<compile_context>
chip_gen: v7x
topology: tpu7x:2x2x1
jax: 0.10.0
libtpu: 0.0.40
codegen_flags: <defaults>
</compile_context>

<pallas_src>
import functools

import numpy as np
import jax
import jax.numpy as jnp
from jax.experimental import pallas as pl
from jax.experimental.pallas import tpu as pltpu


# ----------------------------- in-kernel helpers -----------------------------

_SQRT_HALF = 0.7071067811865476


def _erf(x):
    # Abramowitz & Stegun 7.1.26 rational approximation, |err| <= 1.5e-7.
    # Divide goes to the EUP (pl.reciprocal, approx) -> off the VALU slot.
    p = 0.3275911
    a1, a2, a3, a4, a5 = (0.254829592, -0.284496736, 1.421413741,
                          -1.453152027, 1.061405429)
    ax = jnp.abs(x)
    t = pl.reciprocal(1.0 + p * ax, approx=True)
    poly = ((((a5 * t + a4) * t + a3) * t + a2) * t + a1) * t
    y = 1.0 - poly * jnp.exp(-ax * ax)
    return jnp.where(x < 0.0, -y, y)


def _gelu_exact(x):
    return 0.5 * x * (1.0 + _erf(x * _SQRT_HALF))


# -------------------------------- fused kernel --------------------------------

def _patch_embed_kernel(xw_ref, w1_ref, b1_ref, w2_ref, b2_ref, mask_ref,
                        o_ref, *, W):
    THW = xw_ref.shape[1]
    cout = w2_ref.shape[2]

    # ---- proj1: Conv3d k=(3,1,1) + folded BN1, 3 temporal taps fused -> 1 matmul
    y = jnp.dot(xw_ref[0], w1_ref[...], preferred_element_type=jnp.float32)
    y = y + b1_ref[...]                                    # (THW, mid) + (1, mid)

    # ---- exact-erf GELU (f32 VPU/EUP math) ----
    y = _gelu_exact(y)

    # ---- proj2: Conv3d k=(1,3,3) + folded BN2 as 9 roll+mask+matmul taps ----
    # Flat row index i = t*H*W + h*W + w ; tap (dh,dw) reads row i + dh*W + dw.
    acc = jnp.zeros((THW, cout), jnp.float32)
    for kh in range(3):
        for kw in range(3):
            dh, dw = kh - 1, kw - 1
            d = dh * W + dw
            win = y if d == 0 else pltpu.roll(y, (-d) % THW, 0)   # XLU slot
            if d != 0:
                win = win * mask_ref[3 * kh + kw]                 # (THW,1) bcast
            acc = acc + jnp.dot(win.astype(jnp.bfloat16),         # bf16 MXU ops
                                w2_ref[3 * kh + kw],
                                preferred_element_type=jnp.float32)

    o_ref[0] = (acc + b2_ref[...]).astype(o_ref.dtype)            # lane-dense store


# ------------------------------ forward wrapper -------------------------------

def patch_embed_forward(x, kp):
    """x: (B, Cin, T, H, W) float32 (PyTorch NCDHW).  Returns (B, embed_dim, T, H, W)."""
    B, Cin, T, H, W = x.shape
    assert W % 8 == 0, "W must be a multiple of 8 (sublane-aligned shifts/reshapes)"
    w1, b1, w2, b2 = kp["w1"], kp["b1"], kp["w2"], kp["b2"]
    mid, cout = w1.shape[1], w2.shape[2]
    THW = T * H * W

    # ---- layout plumbing done ONCE outside the kernel ----
    # NCDHW -> channels-last, build the 3-tap temporal window by channel concat
    # (zero-padded in time), flatten to one lane-dense (T*H*W, 3*Cin) slab.
    xcl = jnp.transpose(x, (0, 2, 3, 4, 1))                          # (B,T,H,W,Cin)
    xp = jnp.pad(xcl, ((0, 0), (1, 1), (0, 0), (0, 0), (0, 0)))      # (B,T+2,...)
    xw = jnp.concatenate([xp[:, :-2], xp[:, 1:-1], xp[:, 2:]], axis=-1)
    xw = xw.reshape(B, THW, 3 * Cin)

    # Static per-tap validity masks for the rolled proj2 windows (trace-time).
    idx = np.arange(THW)
    hpos, wpos = (idx // W) % H, idx % W
    masks = np.empty((9, THW, 1), np.float32)
    for kh in range(3):
        for kw in range(3):
            ok = ((hpos + kh - 1 >= 0) & (hpos + kh - 1 < H) &
                  (wpos + kw - 1 >= 0) & (wpos + kw - 1 < W))
            masks[3 * kh + kw, :, 0] = ok
    masks = jnp.asarray(masks)

    out = pl.pallas_call(
        functools.partial(_patch_embed_kernel, W=W),
        out_shape=jax.ShapeDtypeStruct((B, THW, cout), x.dtype),
        grid=(B,),
        in_specs=[pl.BlockSpec((1, THW, 3 * Cin), lambda b: (b, 0, 0)),
                  pl.BlockSpec((3 * Cin, mid), lambda b: (0, 0)),     # resident f32
                  pl.BlockSpec((1, mid), lambda b: (0, 0)),
                  pl.BlockSpec((9, mid, cout), lambda b: (0, 0, 0)),  # resident bf16
                  pl.BlockSpec((1, cout), lambda b: (0, 0)),
                  pl.BlockSpec((9, THW, 1), lambda b: (0, 0, 0))],    # masks
        out_specs=pl.BlockSpec((1, THW, cout), lambda b: (b, 0, 0)),
        compiler_params=pltpu.CompilerParams(
            dimension_semantics=("parallel",)),   # B>=2 -> both v7x TCs busy
    )(xw, w1, b1, w2, b2, masks)

    return out.reshape(B, T, H, W, cout).transpose(0, 4, 1, 2, 3)


# --------------------------------- parameters ---------------------------------

def init_params(key, in_chans=3, embed_dim=256):
    """Random PyTorch-layout conv weights + eval-mode BatchNorm stats, folded and
    pre-packed ONCE into the layouts the kernel consumes (no .T in the hot path).
    w2 is pre-packed in bf16 (MXU-native operand type)."""
    mid = embed_dim // 2
    eps = 1e-5
    ks = jax.random.split(key, 12)

    def rnd(k, shape, scale=0.1):
        return scale * jax.random.normal(k, shape, jnp.float32)

    # proj1 / norm1
    w1 = rnd(ks[0], (mid, in_chans, 3, 1, 1))            # Conv3d (O, I, kT, kH, kW)
    b1 = rnd(ks[1], (mid,))
    g1, be1 = 1.0 + rnd(ks[2], (mid,)), rnd(ks[3], (mid,))
    rm1, rv1 = rnd(ks[4], (mid,)), 1.0 + jnp.abs(rnd(ks[5], (mid,)))
    # proj2 / norm2
    w2 = rnd(ks[6], (embed_dim, mid, 1, 3, 3))
    b2 = rnd(ks[7], (embed_dim,))
    g2, be2 = 1.0 + rnd(ks[8], (embed_dim,)), rnd(ks[9], (embed_dim,))
    rm2, rv2 = rnd(ks[10], (embed_dim,)), 1.0 + jnp.abs(rnd(ks[11], (embed_dim,)))

    # Fold eval-mode BN into the convs:  BN(Wx + b) = (W*s)x + (b - rm)*s + beta
    s1 = g1 / jnp.sqrt(rv1 + eps)
    w1f = w1[:, :, :, 0, 0] * s1[:, None, None]          # (mid, Cin, kT)
    b1f = (b1 - rm1) * s1 + be1
    s2 = g2 / jnp.sqrt(rv2 + eps)
    w2f = w2[:, :, 0, :, :] * s2[:, None, None, None]    # (Cout, mid, kH, kW)
    b2f = (b2 - rm2) * s2 + be2

    # Pre-pack:
    #   w1 as (3*Cin, mid)  -- row index = kT*Cin + c, matches the channel-concat
    #                          temporal window built in the wrapper.
    #   w2 as (9, mid, Cout) bf16 -- tap index 3*kH + kW.
    w1_pack = jnp.transpose(w1f, (2, 1, 0)).reshape(3 * in_chans, mid)
    w2_pack = jnp.transpose(w2f, (2, 3, 1, 0)).reshape(9, mid, embed_dim)
    return dict(w1=w1_pack, b1=b1f.reshape(1, mid),
                w2=w2_pack.astype(jnp.bfloat16), b2=b2f.reshape(1, embed_dim))


# ------------------------------ pure-JAX reference -----------------------------

def patch_embed_reference(x, kp):
    B, Cin, T, H, W = x.shape
    w1 = kp["w1"].astype(jnp.float32).reshape(3, Cin, -1)   # (3, Cin, mid)
    b1 = kp["b1"][0]
    w2 = kp["w2"].astype(jnp.float32)                       # (9, mid, Cout)
    b2 = kp["b2"][0]
    cout = w2.shape[-1]
    hi = jax.lax.Precision.HIGHEST
    xcl = jnp.transpose(x, (0, 2, 3, 4, 1))                              # (B,T,H,W,Cin)
    xp = jnp.pad(xcl, ((0, 0), (1, 1), (0, 0), (0, 0), (0, 0)))
    y = (jnp.einsum("bthwc,cm->bthwm", xp[:, :-2], w1[0], precision=hi)
         + jnp.einsum("bthwc,cm->bthwm", xp[:, 1:-1], w1[1], precision=hi)
         + jnp.einsum("bthwc,cm->bthwm", xp[:, 2:], w1[2], precision=hi)
         + b1)
    y = jax.nn.gelu(y, approximate=False)                                # exact GELU
    yp = jnp.pad(y, ((0, 0), (0, 0), (1, 1), (1, 1), (0, 0)))
    out = jnp.zeros((B, T, H, W, cout), jnp.float32)
    for kh in range(3):
        for kw in range(3):
            out = out + jnp.einsum("bthwm,mo->bthwo",
                                   yp[:, :, kh:kh + H, kw:kw + W],
                                   w2[3 * kh + kw], precision=hi)
    out = out + b2
    return jnp.transpose(out, (0, 4, 1, 2, 3))


# ------------------------------------ main -------------------------------------

if __name__ == "__main__":
    in_chans, embed_dim = 3, 256       # mid = 128, out = 256 -> lane-dense (x128)
    B, T, H, W = 2, 4, 8, 8            # M = T*H*W = 256 per grid step, grid=(B,)

    key = jax.random.PRNGKey(0)
    kx, kparam = jax.random.split(key)
    x = jax.random.normal(kx, (B, in_chans, T, H, W), jnp.float32)
    params = init_params(kparam, in_chans=in_chans, embed_dim=embed_dim)

    fwd = jax.jit(patch_embed_forward)
    out = fwd(x, params)
    jax.block_until_ready(out)

    assert out.shape == (B, embed_dim, T, H, W), out.shape
    assert bool(jnp.all(jnp.isfinite(out)))

    # bf16 conv2 operands (f32 accumulation) give ~1e-2-level divergence from the
    # f32 reference; 5e-2 tolerance documents that choice.
    ref = patch_embed_reference(x, params)
    assert bool(jnp.allclose(out, ref, atol=5e-2, rtol=5e-2)), \
        float(jnp.max(jnp.abs(out - ref)))

    print("KERNEL_OK")
</pallas_src>

<mosaic_0001>
module attributes {stable_mosaic.version = 11 : i64} {
  func.func @_patch_embed_kernel(%arg0: i32, %arg1: memref<1x256x9xf32, #tpu.memory_space<vmem>>, %arg2: memref<9x128xf32, #tpu.memory_space<vmem>>, %arg3: memref<1x128xf32, #tpu.memory_space<vmem>>, %arg4: memref<9x128x256xbf16, #tpu.memory_space<vmem>>, %arg5: memref<1x256xf32, #tpu.memory_space<vmem>>, %arg6: memref<9x256x1xf32, #tpu.memory_space<vmem>>, %arg7: memref<1x256x256xf32, #tpu.memory_space<vmem>>) attributes {dimension_semantics = [#tpu.dimension_semantics<parallel>], iteration_bounds = array<i64: 2>, scalar_prefetch = 0 : i64, scratch_operands = 0 : i64, tpu.core_type = #tpu.core_type<tc>, window_params = [{transform_indices = @transform_0, window_bounds = array<i64: 1, 256, 9>}, {pipeline_mode = #tpu.pipeline_mode<synchronous>, transform_indices = @transform_1, window_bounds = array<i64: 9, 128>}, {pipeline_mode = #tpu.pipeline_mode<synchronous>, transform_indices = @transform_2, window_bounds = array<i64: 1, 128>}, {pipeline_mode = #tpu.pipeline_mode<synchronous>, transform_indices = @transform_3, window_bounds = array<i64: 9, 128, 256>}, {pipeline_mode = #tpu.pipeline_mode<synchronous>, transform_indices = @transform_4, window_bounds = array<i64: 1, 256>}, {pipeline_mode = #tpu.pipeline_mode<synchronous>, transform_indices = @transform_5, window_bounds = array<i64: 9, 256, 1>}, {transform_indices = @transform_6, window_bounds = array<i64: 1, 256, 256>}]} {
    %c0 = arith.constant 0 : index
    %c0_0 = arith.constant 0 : index
    %c0_1 = arith.constant 0 : index
    %0 = vector.load %arg1[%c0, %c0_0, %c0_1] : memref<1x256x9xf32, #tpu.memory_space<vmem>>, vector<1x256x9xf32>
    %1 = vector.shape_cast %0 : vector<1x256x9xf32> to vector<256x9xf32>
    %c0_2 = arith.constant 0 : index
    %c0_3 = arith.constant 0 : index
    %2 = vector.load %arg2[%c0_2, %c0_3] : memref<9x128xf32, #tpu.memory_space<vmem>>, vector<9x128xf32>
    %cst = arith.constant dense<0.000000e+00> : vector<256x128xf32>
    %3 = tpu.matmul %1, %2, %cst {dimension_numbers = #tpu.dot_dimension_numbers<[1], [0], [0], [1], [0, 0, 1, 1], [], []>} : vector<256x9xf32>, vector<9x128xf32>, vector<256x128xf32> -> vector<256x128xf32>
    %c0_4 = arith.constant 0 : index
    %c0_5 = arith.constant 0 : index
    %4 = vector.load %arg3[%c0_4, %c0_5] : memref<1x128xf32, #tpu.memory_space<vmem>>, vector<1x128xf32>
    %5 = vector.broadcast %4 : vector<1x128xf32> to vector<256x128xf32>
    %6 = arith.addf %3, %5 : vector<256x128xf32>
    %cst_6 = arith.constant 5.000000e-01 : f32
    %7 = vector.broadcast %cst_6 : f32 to vector<256x128xf32>
    %8 = arith.mulf %7, %6 : vector<256x128xf32>
    %cst_7 = arith.constant 0.707106769 : f32
    %9 = vector.broadcast %cst_7 : f32 to vector<256x128xf32>
    %10 = arith.mulf %6, %9 : vector<256x128xf32>
    %11 = math.absf %10 : vector<256x128xf32>
    %cst_8 = arith.constant 0.327591091 : f32
    %12 = vector.broadcast %cst_8 : f32 to vector<256x128xf32>
    %13 = arith.mulf %12, %11 : vector<256x128xf32>
    %cst_9 = arith.constant 1.000000e+00 : f32
    %14 = vector.broadcast %cst_9 : f32 to vector<256x128xf32>
    %15 = arith.addf %14, %13 : vector<256x128xf32>
    %16 = tpu.reciprocal %15 {approx = true} : vector<256x128xf32> -> vector<256x128xf32>
    %cst_10 = arith.constant 1.06140542 : f32
    %17 = vector.broadcast %cst_10 : f32 to vector<256x128xf32>
    %18 = arith.mulf %17, %16 : vector<256x128xf32>
    %cst_11 = arith.constant -1.45315206 : f32
    %19 = vector.broadcast %cst_11 : f32 to vector<256x128xf32>
    %20 = arith.addf %18, %19 : vector<256x128xf32>
    %21 = arith.mulf %20, %16 : vector<256x128xf32>
    %cst_12 = arith.constant 1.42141378 : f32
    %22 = vector.broadcast %cst_12 : f32 to vector<256x128xf32>
    %23 = arith.addf %21, %22 : vector<256x128xf32>
    %24 = arith.mulf %23, %16 : vector<256x128xf32>
    %cst_13 = arith.constant -0.284496725 : f32
    %25 = vector.broadcast %cst_13 : f32 to vector<256x128xf32>
    %26 = arith.addf %24, %25 : vector<256x128xf32>
    %27 = arith.mulf %26, %16 : vector<256x128xf32>
    %cst_14 = arith.constant 0.254829586 : f32
    %28 = vector.broadcast %cst_14 : f32 to vector<256x128xf32>
    %29 = arith.addf %27, %28 : vector<256x128xf32>
    %30 = arith.mulf %29, %16 : vector<256x128xf32>
    %cst_15 = arith.constant 0.000000e+00 : f32
    %31 = vector.broadcast %cst_15 : f32 to vector<256x128xf32>
    %32 = arith.subf %31, %11 : vector<256x128xf32>
    %33 = arith.mulf %32, %11 : vector<256x128xf32>
    %34 = math.exp %33 : vector<256x128xf32>
    %35 = arith.mulf %30, %34 : vector<256x128xf32>
    %cst_16 = arith.constant 1.000000e+00 : f32
    %36 = vector.broadcast %cst_16 : f32 to vector<256x128xf32>
    %37 = arith.subf %36, %35 : vector<256x128xf32>
    %cst_17 = arith.constant 0.000000e+00 : f32
    %38 = vector.broadcast %cst_17 : f32 to vector<256x128xf32>
    %39 = arith.cmpf olt, %10, %38 : vector<256x128xf32>
    %cst_18 = arith.constant 0.000000e+00 : f32
    %40 = vector.broadcast %cst_18 : f32 to vector<256x128xf32>
    %41 = arith.subf %40, %37 : vector<256x128xf32>
    %42 = arith.select %39, %41, %37 : vector<256x128xi1>, vector<256x128xf32>
    %cst_19 = arith.constant 1.000000e+00 : f32
    %43 = vector.broadcast %cst_19 : f32 to vector<256x128xf32>
    %44 = arith.addf %43, %42 : vector<256x128xf32>
    %45 = arith.mulf %8, %44 : vector<256x128xf32>
    %cst_20 = arith.constant 0.000000e+00 : f32
    %46 = vector.broadcast %cst_20 : f32 to vector<256x256xf32>
    %c9_i32 = arith.constant 9 : i32
    %47 = tpu.dynamic_rotate %45 by %c9_i32 dim 0 : vector<256x128xf32>, i32 -> vector<256x128xf32>
    %c0_21 = arith.constant 0 : index
    %c0_22 = arith.constant 0 : index
    %c0_23 = arith.constant 0 : index
    %48 = vector.load %arg6[%c0_21, %c0_22, %c0_23] : memref<9x256x1xf32, #tpu.memory_space<vmem>>, vector<1x256x1xf32>
    %49 = vector.shape_cast %48 : vector<1x256x1xf32> to vector<256x1xf32>
    %50 = vector.broadcast %49 : vector<256x1xf32> to vector<256x128xf32>
    %51 = arith.mulf %47, %50 : vector<256x128xf32>
    %52 = arith.truncf %51 : vector<256x128xf32> to vector<256x128xbf16>
    %c0_24 = arith.constant 0 : index
    %c0_25 = arith.constant 0 : index
    %c0_26 = arith.constant 0 : index
    %53 = vector.load %arg4[%c0_24, %c0_25, %c0_26] : memref<9x128x256xbf16, #tpu.memory_space<vmem>>, vector<1x128x256xbf16>
    %54 = vector.shape_cast %53 : vector<1x128x256xbf16> to vector<128x256xbf16>
    %cst_27 = arith.constant dense<0.000000e+00> : vector<256x256xf32>
    %55 = tpu.matmul %52, %54, %cst_27 {dimension_numbers = #tpu.dot_dimension_numbers<[1], [0], [0], [1], [0, 0, 1, 1], [], []>} : vector<256x128xbf16>, vector<128x256xbf16>, vector<256x256xf32> -> vector<256x256xf32>
    %56 = arith.addf %46, %55 : vector<256x256xf32>
    %c8_i32 = arith.constant 8 : i32
    %57 = tpu.dynamic_rotate %45 by %c8_i32 dim 0 : vector<256x128xf32>, i32 -> vector<256x128xf32>
    %c1 = arith.constant 1 : index
    %c0_28 = arith.constant 0 : index
    %c0_29 = arith.constant 0 : index
    %58 = vector.load %arg6[%c1, %c0_28, %c0_29] : memref<9x256x1xf32, #tpu.memory_space<vmem>>, vector<1x256x1xf32>
    %59 = vector.shape_cast %58 : vector<1x256x1xf32> to vector<256x1xf32>
    %60 = vector.broadcast %59 : vector<256x1xf32> to vector<256x128xf32>
    %61 = arith.mulf %57, %60 : vector<256x128xf32>
    %62 = arith.truncf %61 : vector<256x128xf32> to vector<256x128xbf16>
    %c1_30 = arith.constant 1 : index
    %c0_31 = arith.constant 0 : index
    %c0_32 = arith.constant 0 : index
    %63 = vector.load %arg4[%c1_30, %c0_31, %c0_32] : memref<9x128x256xbf16, #tpu.memory_space<vmem>>, vector<1x128x256xbf16>
    %64 = vector.shape_cast %63 : vector<1x128x256xbf16> to vector<128x256xbf16>
    %cst_33 = arith.constant dense<0.000000e+00> : vector<256x256xf32>
    %65 = tpu.matmul %62, %64, %cst_33 {dimension_numbers = #tpu.dot_dimension_numbers<[1], [0], [0], [1], [0, 0, 1, 1], [], []>} : vector<256x128xbf16>, vector<128x256xbf16>, vector<256x256xf32> -> vector<256x256xf32>
    %66 = arith.addf %56, %65 : vector<256x256xf32>
    %c7_i32 = arith.constant 7 : i32
    %67 = tpu.dynamic_rotate %45 by %c7_i32 dim 0 : vector<256x128xf32>, i32 -> vector<256x128xf32>
    %c2 = arith.constant 2 : index
    %c0_34 = arith.constant 0 : index
    %c0_35 = arith.constant 0 : index
    %68 = vector.load %arg6[%c2, %c0_34, %c0_35] : memref<9x256x1xf32, #tpu.memory_space<vmem>>, vector<1x256x1xf32>
    %69 = vector.shape_cast %68 : vector<1x256x1xf32> to vector<256x1xf32>
    %70 = vector.broadcast %69 : vector<256x1xf32> to vector<256x128xf32>
    %71 = arith.mulf %67, %70 : vector<256x128xf32>
    %72 = arith.truncf %71 : vector<256x128xf32> to vector<256x128xbf16>
    %c2_36 = arith.constant 2 : index
    %c0_37 = arith.constant 0 : index
    %c0_38 = arith.constant 0 : index
    %73 = vector.load %arg4[%c2_36, %c0_37, %c0_38] : memref<9x128x256xbf16, #tpu.memory_space<vmem>>, vector<1x128x256xbf16>
    %74 = vector.shape_cast %73 : vector<1x128x256xbf16> to vector<128x256xbf16>
    %cst_39 = arith.constant dense<0.000000e+00> : vector<256x256xf32>
    %75 = tpu.matmul %72, %74, %cst_39 {dimension_numbers = #tpu.dot_dimension_numbers<[1], [0], [0], [1], [0, 0, 1, 1], [], []>} : vector<256x128xbf16>, vector<128x256xbf16>, vector<256x256xf32> -> vector<256x256xf32>
    %76 = arith.addf %66, %75 : vector<256x256xf32>
    %c1_i32 = arith.constant 1 : i32
    %77 = tpu.dynamic_rotate %45 by %c1_i32 dim 0 : vector<256x128xf32>, i32 -> vector<256x128xf32>
    %c3 = arith.constant 3 : index
    %c0_40 = arith.constant 0 : index
    %c0_41 = arith.constant 0 : index
    %78 = vector.load %arg6[%c3, %c0_40, %c0_41] : memref<9x256x1xf32, #tpu.memory_space<vmem>>, vector<1x256x1xf32>
    %79 = vector.shape_cast %78 : vector<1x256x1xf32> to vector<256x1xf32>
    %80 = vector.broadcast %79 : vector<256x1xf32> to vector<256x128xf32>
    %81 = arith.mulf %77, %80 : vector<256x128xf32>
    %82 = arith.truncf %81 : vector<256x128xf32> to vector<256x128xbf16>
    %c3_42 = arith.constant 3 : index
    %c0_43 = arith.constant 0 : index
    %c0_44 = arith.constant 0 : index
    %83 = vector.load %arg4[%c3_42, %c0_43, %c0_44] : memref<9x128x256xbf16, #tpu.memory_space<vmem>>, vector<1x128x256xbf16>
    %84 = vector.shape_cast %83 : vector<1x128x256xbf16> to vector<128x256xbf16>
    %cst_45 = arith.constant dense<0.000000e+00> : vector<256x256xf32>
    %85 = tpu.matmul %82, %84, %cst_45 {dimension_numbers = #tpu.dot_dimension_numbers<[1], [0], [0], [1], [0, 0, 1, 1], [], []>} : vector<256x128xbf16>, vector<128x256xbf16>, vector<256x256xf32> -> vector<256x256xf32>
    %86 = arith.addf %76, %85 : vector<256x256xf32>
    %87 = arith.truncf %45 : vector<256x128xf32> to vector<256x128xbf16>
    %c4 = arith.constant 4 : index
    %c0_46 = arith.constant 0 : index
    %c0_47 = arith.constant 0 : index
    %88 = vector.load %arg4[%c4, %c0_46, %c0_47] : memref<9x128x256xbf16, #tpu.memory_space<vmem>>, vector<1x128x256xbf16>
    %89 = vector.shape_cast %88 : vector<1x128x256xbf16> to vector<128x256xbf16>
    %cst_48 = arith.constant dense<0.000000e+00> : vector<256x256xf32>
    %90 = tpu.matmul %87, %89, %cst_48 {dimension_numbers = #tpu.dot_dimension_numbers<[1], [0], [0], [1], [0, 0, 1, 1], [], []>} : vector<256x128xbf16>, vector<128x256xbf16>, vector<256x256xf32> -> vector<256x256xf32>
    %91 = arith.addf %86, %90 : vector<256x256xf32>
    %c255_i32 = arith.constant 255 : i32
    %92 = tpu.dynamic_rotate %45 by %c255_i32 dim 0 : vector<256x128xf32>, i32 -> vector<256x128xf32>
    %c5 = arith.constant 5 : index
    %c0_49 = arith.constant 0 : index
    %c0_50 = arith.constant 0 : index
    %93 = vector.load %arg6[%c5, %c0_49, %c0_50] : memref<9x256x1xf32, #tpu.memory_space<vmem>>, vector<1x256x1xf32>
    %94 = vector.shape_cast %93 : vector<1x256x1xf32> to vector<256x1xf32>
    %95 = vector.broadcast %94 : vector<256x1xf32> to vector<256x128xf32>
    %96 = arith.mulf %92, %95 : vector<256x128xf32>
    %97 = arith.truncf %96 : vector<256x128xf32> to vector<256x128xbf16>
    %c5_51 = arith.constant 5 : index
    %c0_52 = arith.constant 0 : index
    %c0_53 = arith.constant 0 : index
    %98 = vector.load %arg4[%c5_51, %c0_52, %c0_53] : memref<9x128x256xbf16, #tpu.memory_space<vmem>>, vector<1x128x256xbf16>
    %99 = vector.shape_cast %98 : vector<1x128x256xbf16> to vector<128x256xbf16>
    %cst_54 = arith.constant dense<0.000000e+00> : vector<256x256xf32>
    %100 = tpu.matmul %97, %99, %cst_54 {dimension_numbers = #tpu.dot_dimension_numbers<[1], [0], [0], [1], [0, 0, 1, 1], [], []>} : vector<256x128xbf16>, vector<128x256xbf16>, vector<256x256xf32> -> vector<256x256xf32>
    %101 = arith.addf %91, %100 : vector<256x256xf32>
    %c249_i32 = arith.constant 249 : i32
    %102 = tpu.dynamic_rotate %45 by %c249_i32 dim 0 : vector<256x128xf32>, i32 -> vector<256x128xf32>
    %c6 = arith.constant 6 : index
    %c0_55 = arith.constant 0 : index
    %c0_56 = arith.constant 0 : index
    %103 = vector.load %arg6[%c6, %c0_55, %c0_56] : memref<9x256x1xf32, #tpu.memory_space<vmem>>, vector<1x256x1xf32>
    %104 = vector.shape_cast %103 : vector<1x256x1xf32> to vector<256x1xf32>
    %105 = vector.broadcast %104 : vector<256x1xf32> to vector<256x128xf32>
    %106 = arith.mulf %102, %105 : vector<256x128xf32>
    %107 = arith.truncf %106 : vector<256x128xf32> to vector<256x128xbf16>
    %c6_57 = arith.constant 6 : index
    %c0_58 = arith.constant 0 : index
    %c0_59 = arith.constant 0 : index
    %108 = vector.load %arg4[%c6_57, %c0_58, %c0_59] : memref<9x128x256xbf16, #tpu.memory_space<vmem>>, vector<1x128x256xbf16>
    %109 = vector.shape_cast %108 : vector<1x128x256xbf16> to vector<128x256xbf16>
    %cst_60 = arith.constant dense<0.000000e+00> : vector<256x256xf32>
    %110 = tpu.matmul %107, %109, %cst_60 {dimension_numbers = #tpu.dot_dimension_numbers<[1], [0], [0], [1], [0, 0, 1, 1], [], []>} : vector<256x128xbf16>, vector<128x256xbf16>, vector<256x256xf32> -> vector<256x256xf32>
    %111 = arith.addf %101, %110 : vector<256x256xf32>
    %c248_i32 = arith.constant 248 : i32
    %112 = tpu.dynamic_rotate %45 by %c248_i32 dim 0 : vector<256x128xf32>, i32 -> vector<256x128xf32>
    %c7 = arith.constant 7 : index
    %c0_61 = arith.constant 0 : index
    %c0_62 = arith.constant 0 : index
    %113 = vector.load %arg6[%c7, %c0_61, %c0_62] : memref<9x256x1xf32, #tpu.memory_space<vmem>>, vector<1x256x1xf32>
    %114 = vector.shape_cast %113 : vector<1x256x1xf32> to vector<256x1xf32>
    %115 = vector.broadcast %114 : vector<256x1xf32> to vector<256x128xf32>
    %116 = arith.mulf %112, %115 : vector<256x128xf32>
    %117 = arith.truncf %116 : vector<256x128xf32> to vector<256x128xbf16>
    %c7_63 = arith.constant 7 : index
    %c0_64 = arith.constant 0 : index
    %c0_65 = arith.constant 0 : index
    %118 = vector.load %arg4[%c7_63, %c0_64, %c0_65] : memref<9x128x256xbf16, #tpu.memory_space<vmem>>, vector<1x128x256xbf16>
    %119 = vector.shape_cast %118 : vector<1x128x256xbf16> to vector<128x256xbf16>
    %cst_66 = arith.constant dense<0.000000e+00> : vector<256x256xf32>
    %120 = tpu.matmul %117, %119, %cst_66 {dimension_numbers = #tpu.dot_dimension_numbers<[1], [0], [0], [1], [0, 0, 1, 1], [], []>} : vector<256x128xbf16>, vector<128x256xbf16>, vector<256x256xf32> -> vector<256x256xf32>
    %121 = arith.addf %111, %120 : vector<256x256xf32>
    %c247_i32 = arith.constant 247 : i32
    %122 = tpu.dynamic_rotate %45 by %c247_i32 dim 0 : vector<256x128xf32>, i32 -> vector<256x128xf32>
    %c8 = arith.constant 8 : index
    %c0_67 = arith.constant 0 : index
    %c0_68 = arith.constant 0 : index
    %123 = vector.load %arg6[%c8, %c0_67, %c0_68] : memref<9x256x1xf32, #tpu.memory_space<vmem>>, vector<1x256x1xf32>
    %124 = vector.shape_cast %123 : vector<1x256x1xf32> to vector<256x1xf32>
    %125 = vector.broadcast %124 : vector<256x1xf32> to vector<256x128xf32>
    %126 = arith.mulf %122, %125 : vector<256x128xf32>
    %127 = arith.truncf %126 : vector<256x128xf32> to vector<256x128xbf16>
    %c8_69 = arith.constant 8 : index
    %c0_70 = arith.constant 0 : index
    %c0_71 = arith.constant 0 : index
    %128 = vector.load %arg4[%c8_69, %c0_70, %c0_71] : memref<9x128x256xbf16, #tpu.memory_space<vmem>>, vector<1x128x256xbf16>
    %129 = vector.shape_cast %128 : vector<1x128x256xbf16> to vector<128x256xbf16>
    %cst_72 = arith.constant dense<0.000000e+00> : vector<256x256xf32>
    %130 = tpu.matmul %127, %129, %cst_72 {dimension_numbers = #tpu.dot_dimension_numbers<[1], [0], [0], [1], [0, 0, 1, 1], [], []>} : vector<256x128xbf16>, vector<128x256xbf16>, vector<256x256xf32> -> vector<256x256xf32>
    %131 = arith.addf %121, %130 : vector<256x256xf32>
    %c0_73 = arith.constant 0 : index
    %c0_74 = arith.constant 0 : index
    %132 = vector.load %arg5[%c0_73, %c0_74] : memref<1x256xf32, #tpu.memory_space<vmem>>, vector<1x256xf32>
    %133 = vector.broadcast %132 : vector<1x256xf32> to vector<256x256xf32>
    %134 = arith.addf %131, %133 : vector<256x256xf32>
    %c0_75 = arith.constant 0 : index
    %c0_76 = arith.constant 0 : index
    %c0_77 = arith.constant 0 : index
    %135 = vector.load %arg7[%c0_75, %c0_76, %c0_77] : memref<1x256x256xf32, #tpu.memory_space<vmem>>, vector<1x256x256xf32>
    %136 = vector.shape_cast %135 : vector<1x256x256xf32> to vector<256x256xf32>
    %137 = vector.shape_cast %134 : vector<256x256xf32> to vector<1x256x256xf32>
    tpu.vector_store %arg7[%c0_75, %c0_76, %c0_77], %137 {strides = array<i32>} : memref<1x256x256xf32, #tpu.memory_space<vmem>>, vector<1x256x256xf32>,
    return
  }
  func.func @transform_0(%arg0: i32) -> (i32, i32, i32) {
    %c0_i32 = arith.constant 0 : i32
    %c0_i32_0 = arith.constant 0 : i32
    %c0_i32_1 = arith.constant 0 : i32
    return %arg0, %c0_i32, %c0_i32_0 : i32, i32, i32
  }
  func.func @transform_1(%arg0: i32) -> (i32, i32) {
    %c0_i32 = arith.constant 0 : i32
    %c0_i32_0 = arith.constant 0 : i32
    %c0_i32_1 = arith.constant 0 : i32
    return %c0_i32, %c0_i32_0 : i32, i32
  }
  func.func @transform_2(%arg0: i32) -> (i32, i32) {
    %c0_i32 = arith.constant 0 : i32
    %c0_i32_0 = arith.constant 0 : i32
    %c0_i32_1 = arith.constant 0 : i32
    return %c0_i32, %c0_i32_0 : i32, i32
  }
  func.func @transform_3(%arg0: i32) -> (i32, i32, i32) {
    %c0_i32 = arith.constant 0 : i32
    %c0_i32_0 = arith.constant 0 : i32
    %c0_i32_1 = arith.constant 0 : i32
    %c0_i32_2 = arith.constant 0 : i32
    return %c0_i32, %c0_i32_0, %c0_i32_1 : i32, i32, i32
  }
  func.func @transform_4(%arg0: i32) -> (i32, i32) {
    %c0_i32 = arith.constant 0 : i32
    %c0_i32_0 = arith.constant 0 : i32
    %c0_i32_1 = arith.constant 0 : i32
    return %c0_i32, %c0_i32_0 : i32, i32
  }
  func.func @transform_5(%arg0: i32) -> (i32, i32, i32) {
    %c0_i32 = arith.constant 0 : i32
    %c0_i32_0 = arith.constant 0 : i32
    %c0_i32_1 = arith.constant 0 : i32
    %c0_i32_2 = arith.constant 0 : i32
    return %c0_i32, %c0_i32_0, %c0_i32_1 : i32, i32, i32
  }
  func.func @transform_6(%arg0: i32) -> (i32, i32, i32) {
    %c0_i32 = arith.constant 0 : i32
    %c0_i32_0 = arith.constant 0 : i32
    %c0_i32_1 = arith.constant 0 : i32
    return %arg0, %c0_i32, %c0_i32_0 : i32, i32, i32
  }
}

</mosaic_0001>

<bundles_post_ra>
// kernel: patch_embed_forward.1
= control target key start
LH: loop header
LB: loop body
LE: loop exit
PB: predicated region body
PF: predicated region fallthrough
CT: control target
= control target key end

     0   :  { %11 = vsyncpa [#allocation3], 0  ;;  %s12288_s0 = inlined_call_operand.vmem [shape: f32[2,256,9], index: 0, kind: input, shape index: {}]   ;;  %s12289_s1 = inlined_call_operand.vmem [shape: f32[9,128], index: 1, kind: input, shape index: {}]   ;;  %s12290_s2 = inlined_call_operand.vmem [shape: f32[1,128], index: 2, kind: input, shape index: {}]   ;;  %s12291_s3 = inlined_call_operand.hbm [shape: bf16[9,128,256], index: 3, kind: input, shape index: {}]   ;;  %s12292_s4 = inlined_call_operand.vmem [shape: f32[1,256], index: 4, kind: input, shape index: {}]   ;;  %s12293_s5 = inlined_call_operand.vmem [shape: f32[9,256,1], index: 5, kind: input, shape index: {}]   ;;  %s12294_s6 = inlined_call_operand.hbm [shape: f32[2,256,256], index: 6, kind: output, shape index: {}]  }
   0x1   :  { %12 = vsyncpa [#allocation4], 0 }
   0x2   :  { %14 = vsyncpa [#allocation4 + $0x1], 0  ;;  %s8421_s21 = smov 0   ;;  %s8423_s22 = smov 0  }
   0x3   :  { %s8425_s23 = smov 0   ;;  %s8427_s24 = smov 0  }
   0x4 LB: > { %s8442_s25 = sadd.s32 4294967295, %s8376_s24   ;;  %s6825_s26 = sadd.s32 4294967294, %s8376_s24   ;;  %s8376_s24 = sphi %s8427_s24, %s13126_s24   ;;  %s8372_s23 = sphi %s8425_s23, %s13125_s23   ;;  %s8368_s22 = sphi %s8423_s22, %s13124_s22   ;;  %s8364_s21 = sphi %s8421_s21, %s13123_s21  }
   0x5   : > { %s8446_s27 = sadd.s32 1, %s8376_s24   ;;  %s158_s28 = sadd.s32 1, %s8372_s23 }
   0x6   : > { %s155_s29 = ssub.s32 %s8376_s24, %s8446_s27  ;;  %p168_p0 = scmp.ne.s32.totalorder %s8372_s23, %s8368_s22 }
   0x7   : > { %p156_p1 = scmp.eq.s32.totalorder %s155_s29, 0  ;;  %p169_p2 = scmp.eq.s32.totalorder %s8442_s25, 1 }
   0x8   : > { %p174_p3 = scmp.ne.s32.totalorder %s8368_s22, %s8364_s21  ;;  %p175_p4 = scmp.eq.s32.totalorder %s6825_s26, 1 }
   0x9   : > { %s8457_s30 = scalar_select %p156_p1, %s8372_s23, %s158_s28  }
   0xa   : > { %p8459_p5 = por %p169_p2, %p168_p0  ;;  %p8463_p6 = por %p175_p4, %p174_p3 }
   0xb   : > { %p6826_p7 = scmp.ge.s32.totalorder %s8376_s24, 1  ;;  %p182_p8 = scmp.lt.s32.totalorder %s8376_s24, 3 }
   0xc   : > { %s12470_s7 = scalar_select %p8459_p5, 1, 0 }
   0xd   : > { %s12471_s8 = scalar_select %p8463_p6, 1, 0 }
   0xe   : > { %p12295_p9 = scmp.eq.s32.totalorder %s8442_s25, 0  ;;  %p8470_p10 = pnand %p6826_p7, %p182_p8 }
   0xf   : > { %s8378_s10 = smov [#allocation2]   ;;  %s8282_s15 = scalar_lea.hbm %s12291_s3, 18432 }
  0x10   : > { %s12472_s9 = scalar_select %p8470_p10, 1, 0 }
  0x11   : > { %s200_s11 = sshll.u32 %s8378_s10, 4  ;;  %p7869_p11 = pneg %p8470_p10  ;;  %s201_s11 = int_to_ptr.vmem [resolvable:$true] %s200_s11 }
  0x12   : > { %p8283_p13 = scmp.ne.s32.totalorder %s12291_s3, %s8282_s15  ;;  %p8289_p3 = scmp.lt.u32.totalorder %s8282_s15, %s12291_s3 }
  0x13   : > { %p8478_p12 = pnand %p12295_p9, %p7869_p11 }
  0x15   : > { %p8284_p0 = pneg %p8478_p12 }
  0x17   : > { %p8285_p1 = pnand %p8284_p0, %p8283_p13 }
  0x19   : > { %p8286_p2 = pneg %p8285_p1 }
  0x1b   : > { %p8291_p4 = pnand %p8289_p3, %p8286_p2 }
  0x1d   : > { %8294 = shalt.err (!%p8291_p4)
}
  0x1e   : > { %s8295_s20 = scalar_lea.vmem %s201_s11, 18432  ;;  %p8303_p9 = scmp.lt.s32.totalorder %s201_s11, %s201_s11 }
  0x1f   : > { %p8296_p7 = scmp.ne.s32.totalorder %s201_s11, %s8295_s20  ;;  %p8304_p6 = scmp.lt.s32.totalorder %s8295_s20, %s8295_s20 }
  0x21   : > { %p8298_p8 = pnand %p8296_p7, %p8284_p0  ;;  %p8305_p5 = por %p8304_p6, %p8303_p9 }
  0x23   : > { %p8299_p11 = pneg %p8298_p8 }
  0x25   : > { %p8306_p10 = pnand %p8305_p5, %p8299_p11 }
  0x27   : > { %8309 = shalt.err (!%p8306_p10)
}
  0x28   : > { %s8379_s26 = smov 128   ;;  %s8380_s28 = smov 8  }
  0x29   : > { %7872 = dma.hbm_to_vmem [thread:$0]  (!%p8478_p12), %s12291_s3, 18432, %s201_s11, [#allocation3], %s8379_s26, %s8379_s26, %s8380_s28  }
  0x2a   : > { %p12474_p13 = scmp.ne.s32.totalorder %s12472_s9, 0 }
  0x2c   : > { %230 = sbr.rel (%p12474_p13) target bundleno = 1315 (0x523), region = 44 }
  0x33   : > { %p12475_p1 = scmp.eq.s32.totalorder %s8442_s25, 0 }
  0x35   : > { %8355 = dma.done.wait (%p12475_p1), [#allocation3], 18432   ;;  %p12476_p0 = pmov %p12475_p1 }
  0x36   : > { %p260_p5 = scmp.lt.s32.totalorder %s8442_s25, 1  ;;  %v12298_v0 = vmov 0   ;;  %vm404_vm0 = vcmask 1040384   ;;  %v1534_v1 = vld [vmem:[%s12293_s5 + $0x10] sm:$0xff]  ;;  %v1532_v2 = vld [vmem:[%s12293_s5] sm:$0xff]  ;;  %vm307_vm1 = vcmask 72704  }
  0x37   : > { %8357 = vsyncadd (%p12476_p0), [#allocation3], 4294948864  ;;  %7920 = vset.pattern.permute.xlu1 %v12298_v0  ;;  %7919 = vset.pattern.permute.xlu0 %v12298_v0  ;;  %v298_v3 = vld [vmem:[%s12289_s1] sm:$0xff]  ;;  %v299_v4 = vld [vmem:[%s12289_s1 + $0x8] sm:$0x1]  ;;  %vm8382_vm2 = vmmov 1  }
  0x38   : > { %s261_s12 = scalar_select %p260_p5, %s8442_s25, 1  ;;  %4042 = vmatprep.mubr.bf16.mxu1 %v12298_v0  ;;  %1576 = vperm.xlu1 %7920, %v1534_v1   ;;  %vm7330_vm3 = vmpackc.low %vm404_vm0, %vm8382_vm2  ;;  %v7329_v5 = vpack.c.bf16 %v299_v4, %v298_v3  ;;  %v1535_v6 = vld [vmem:[%s12293_s5 + $0x18] sm:$0xff]  ;;  %v1533_v8 = vld [vmem:[%s12293_s5 + $0x8] sm:$0xff] }
  0x39   : > { %1566 = vperm.xlu0 %7919, %v1532_v2   ;;  %v1537_v10 = vld [vmem:[%s12293_s5 + $0x28] sm:$0xff]  ;;  %v1536_v12 = vld [vmem:[%s12293_s5 + $0x20] sm:$0xff]  ;;  %v1539_v14 = vld [vmem:[%s12293_s5 + $0x38] sm:$0xff]  ;;  %s257_s17 = sand.u32 1, %s8368_s22   ;;  %s7242_s20 = sshll.u32 %s8442_s25, 13 }
  0x3a   : > { %s7241_s11 = sshll.u32 %s261_s12, 8  ;;  %7331 = vmatprep.subr.msk.bf16.mxu0 %vm7330_vm3, %v7329_v5  ;;  %v1538_v16 = vld [vmem:[%s12293_s5 + $0x30] sm:$0xff]  ;;  %v1541_v18 = vld [vmem:[%s12293_s5 + $0x48] sm:$0xff]  ;;  %v1540_v20 = vld [vmem:[%s12293_s5 + $0x40] sm:$0xff]  ;;  %s6831_s18 = sshll.u32 %s257_s17, 9 }
  0x3b   : > { %s8512_s14 = scalar_lea.vmem %s12288_s0, %s7241_s11  ;;  %7334 = vmatpush3.bf16.msk.msra.mxu0 %vm7330_vm3, %v7329_v5  ;;  %v1543_v22 = vld [vmem:[%s12293_s5 + $0x58] sm:$0xff]  ;;  %v1542_v24 = vld [vmem:[%s12293_s5 + $0x50] sm:$0xff]  ;;  %v1545_v26 = vld [vmem:[%s12293_s5 + $0x68] sm:$0xff]  ;;  %s12024_s19 = scalar_lea.vmem [#allocation5], %s6831_s18 }
  0x3c   : > { %v266_v7 = vld [vmem:[%s8512_s14] sm:$0xff]  ;;  %1581 = vperm.xlu1 %7920, %v1535_v6   ;;  %v267_v9 = vld [vmem:[%s8512_s14 + $0x8] sm:$0xff]  ;;  %v268_v11 = vld [vmem:[%s8512_s14 + $0x10] sm:$0xff]  ;;  %s6751_s26 = sshll.u32 %s12024_s19, 4  ;;  %s12237_s29 = scalar_lea.hbm %s12294_s6, %s7242_s20  ;;  %s12239_s26 = int_to_ptr.vmem [resolvable:$true] %s6751_s26 }
  0x3d   : > { %7281 = vmatprep.mubr.msk.f32.mxu0 %vm307_vm1, %v266_v7  ;;  %1571 = vperm.xlu0 %7919, %v1533_v8   ;;  %v269_v13 = vld [vmem:[%s8512_s14 + $0x18] sm:$0xff]  ;;  %v270_v15 = vld [vmem:[%s8512_s14 + $0x20] sm:$0xff]  ;;  %v271_v17 = vld [vmem:[%s8512_s14 + $0x28] sm:$0xff]  ;;  %s12247_s25 = scalar_lea.sflag [#allocation4], %s257_s17  ;;  %s8310_s10 = scalar_lea.vmem %s12239_s26, 8192 }
  0x3e   : > { %7282 = vmatmul.mubr.msk.f32.vlgmr.msra.gmra.mrb[0].mxu0 %vm307_vm1, %v267_v9  ;;  %v272_v19 = vld [vmem:[%s8512_s14 + $0x30] sm:$0xff]  ;;  %v273_v21 = vld [vmem:[%s8512_s14 + $0x38] sm:$0xff]  ;;  %v274_v23 = vld [vmem:[%s8512_s14 + $0x40] sm:$0xff]  ;;  %p8311_p6 = scmp.ne.s32.totalorder %s12239_s26, %s8310_s10  ;;  %p13121_p9 = scmp.ne.s32.totalorder %s12470_s7, 0 }
  0x3f   : > { %7284 = vmatprep.mubr.msk.f32.mxu0 %vm307_vm1, %v268_v11  ;;  %v275_v25 = vld [vmem:[%s8512_s14 + $0x48] sm:$0xff]  ;;  %v276_v27 = vld [vmem:[%s8512_s14 + $0x50] sm:$0xff]  ;;  %v1544_v28 = vld [vmem:[%s12293_s5 + $0x60] sm:$0xff]  ;;  %s8383_s12 = smov [#allocation5]  }
  0x40   : > { %1591 = vperm.xlu1 %7920, %v1537_v10   ;;  %v277_v29 = vld [vmem:[%s8512_s14 + $0x58] sm:$0xff]  ;;  %v278_v31 = vld [vmem:[%s8512_s14 + $0x60] sm:$0xff]  ;;  %v1546_v32 = vld [vmem:[%s12293_s5 + $0x70] sm:$0xff]  ;;  %p8312_p10 = pnand %p8311_p6, %p13121_p9  ;;  %s8314_s11 = sshll.u32 %s8383_s12, 4  ;;  %s8315_s11 = int_to_ptr.vmem [resolvable:$false] %s8314_s11 }
  0x41   : > { %1586 = vperm.xlu0 %7919, %v1536_v12   ;;  %v1547_v30 = vld [vmem:[%s12293_s5 + $0x78] sm:$0xff]  ;;  %v279_v33 = vld [vmem:[%s8512_s14 + $0x68] sm:$0xff]  ;;  %v280_v35 = vld [vmem:[%s8512_s14 + $0x70] sm:$0xff]  ;;  %s8316_s9 = scalar_lea.vmem %s8315_s11, 16384  ;;  %p8317_p2 = scmp.lt.s32.totalorder %s12239_s26, %s8315_s11 }
  0x42   : > { %7285 = vmatmul.mubr.msk.f32.gmra.mrb[2].mxu0 %vm307_vm1, %v269_v13  ;;  %v1549_v34 = vld [vmem:[%s12293_s5 + $0x88] sm:$0xff]  ;;  %v1548_v36 = vld [vmem:[%s12293_s5 + $0x80] sm:$0xff]  ;;  %v281_v37 = vld [vmem:[%s8512_s14 + $0x78] sm:$0xff]  ;;  %p8313_p12 = pneg %p8312_p10  ;;  %p8318_p3 = scmp.lt.s32.totalorder %s8316_s9, %s8310_s10 }
  0x43   : > { %7287 = vmatprep.mubr.msk.f32.mxu0 %vm307_vm1, %v270_v15  ;;  %v1551_v38 = vld [vmem:[%s12293_s5 + $0x98] sm:$0xff]  ;;  %v282_v39 = vld [vmem:[%s8512_s14 + $0x80] sm:$0xff]  ;;  %v1550_v40 = vld [vmem:[%s12293_s5 + $0x90] sm:$0xff] }
  0x44   : > { %1601 = vperm.xlu1 %7920, %v1539_v14   ;;  %v283_v41 = vld [vmem:[%s8512_s14 + $0x88] sm:$0xff]  ;;  %v1552_v43 = vld [vmem:[%s12293_s5 + $0xa0] sm:$0xff]  ;;  %v284_v44 = vld [vmem:[%s8512_s14 + $0x90] sm:$0xff]  ;;  %p8319_p4 = por %p8318_p3, %p8317_p2 }
  0x45   : > { %1596 = vperm.xlu0 %7919, %v1538_v16   ;;  %v1553_v42 = vld [vmem:[%s12293_s5 + $0xa8] sm:$0xff]  ;;  %v285_v45 = vld [vmem:[%s8512_s14 + $0x98] sm:$0xff]  ;;  %v1554_v47 = vld [vmem:[%s12293_s5 + $0xb0] sm:$0xff] }
  0x46   : > { %7288 = vmatmul.mubr.msk.f32.gmra.mrb[4].mxu0 %vm307_vm1, %v271_v17  ;;  %v1555_v46 = vld [vmem:[%s12293_s5 + $0xb8] sm:$0xff]  ;;  %v286_v48 = vld [vmem:[%s8512_s14 + $0xa0] sm:$0xff]  ;;  %v287_v49 = vld [vmem:[%s8512_s14 + $0xa8] sm:$0xff]  ;;  %p8320_p7 = pnand %p8319_p4, %p8313_p12 }
  0x47   : > { %7290 = vmatprep.mubr.msk.f32.mxu0 %vm307_vm1, %v272_v19  ;;  %v1557_v50 = vld [vmem:[%s12293_s5 + $0xc8] sm:$0xff]  ;;  %v1556_v51 = vld [vmem:[%s12293_s5 + $0xc0] sm:$0xff]  ;;  %v288_v52 = vld [vmem:[%s8512_s14 + $0xb0] sm:$0xff] }
  0x48   : > { %1611 = vperm.xlu1 %7920, %v1541_v18   ;;  %v289_v53 = vld [vmem:[%s8512_s14 + $0xb8] sm:$0xff]  ;;  %v1558_v55 = vld [vmem:[%s12293_s5 + $0xd0] sm:$0xff]  ;;  %v290_v56 = vld [vmem:[%s8512_s14 + $0xc0] sm:$0xff] }
  0x49   : > { %1606 = vperm.xlu0 %7919, %v1540_v20   ;;  %v1559_v54 = vld [vmem:[%s12293_s5 + $0xd8] sm:$0xff]  ;;  %v291_v57 = vld [vmem:[%s8512_s14 + $0xc8] sm:$0xff]  ;;  %v1560_v59 = vld [vmem:[%s12293_s5 + $0xe0] sm:$0xff] }
  0x4a   : > { %7291 = vmatmul.mubr.msk.f32.gmra.mrb[6].mxu0 %vm307_vm1, %v273_v21  ;;  %v1561_v58 = vld [vmem:[%s12293_s5 + $0xe8] sm:$0xff]  ;;  %v292_v60 = vld [vmem:[%s8512_s14 + $0xd0] sm:$0xff]  ;;  %v293_v61 = vld [vmem:[%s8512_s14 + $0xd8] sm:$0xff] }
  0x4b   : > { %7293 = vmatprep.mubr.msk.f32.mxu0 %vm307_vm1, %v274_v23  ;;  %v1563_v62 = vld [vmem:[%s12293_s5 + $0xf8] sm:$0xff]  ;;  %v1562_v63 = vld [vmem:[%s12293_s5 + $0xf0] sm:$0xff]  ;;  %v294_v1 = vld [vmem:[%s8512_s14 + $0xe0] sm:$0xff] }
  0x4c   : > { %1621 = vperm.xlu1 %7920, %v1543_v22   ;;  %v295_v2 = vld [vmem:[%s8512_s14 + $0xe8] sm:$0xff]  ;;  %v6868_v4 = vld [vmem:[%s12293_s5 + $0x100] sm:$0xff]  ;;  %v296_v5 = vld [vmem:[%s8512_s14 + $0xf0] sm:$0xff] }
  0x4d   : > { %1616 = vperm.xlu0 %7919, %v1542_v24   ;;  %v6869_v3 = vld [vmem:[%s12293_s5 + $0x108] sm:$0xff]  ;;  %v297_v6 = vld [vmem:[%s8512_s14 + $0xf8] sm:$0xff]  ;;  %v6870_v8 = vld [vmem:[%s12293_s5 + $0x110] sm:$0xff] }
  0x4e   : > { %7294 = vmatmul.mubr.msk.f32.gmra.mrb[8].mxu0 %vm307_vm1, %v275_v25  ;;  %v6871_v7 = vld [vmem:[%s12293_s5 + $0x118] sm:$0xff]  ;;  %v6873_v9 = vld [vmem:[%s12293_s5 + $0x128] sm:$0xff]  ;;  %v6872_v10 = vld [vmem:[%s12293_s5 + $0x120] sm:$0xff] }
  0x4f   : > { %7296 = vmatprep.mubr.msk.f32.mxu0 %vm307_vm1, %v276_v27  ;;  %v6875_v11 = vld [vmem:[%s12293_s5 + $0x138] sm:$0xff]  ;;  %v6874_v12 = vld [vmem:[%s12293_s5 + $0x130] sm:$0xff]  ;;  %v6877_v13 = vld [vmem:[%s12293_s5 + $0x148] sm:$0xff] }
  0x50   : > { %1631 = vperm.xlu1 %7920, %v1545_v26   ;;  %v6876_v14 = vld [vmem:[%s12293_s5 + $0x140] sm:$0xff]  ;;  %v6879_v15 = vld [vmem:[%s12293_s5 + $0x158] sm:$0xff]  ;;  %v6878_v16 = vld [vmem:[%s12293_s5 + $0x150] sm:$0xff] }
  0x51   : > { %1626 = vperm.xlu0 %7919, %v1544_v28   ;;  %v6881_v17 = vld [vmem:[%s12293_s5 + $0x168] sm:$0xff]  ;;  %v6880_v18 = vld [vmem:[%s12293_s5 + $0x160] sm:$0xff]  ;;  %v6883_v19 = vld [vmem:[%s12293_s5 + $0x178] sm:$0xff] }
  0x52   : > { %7297 = vmatmul.mubr.msk.f32.gmra.mrb[10].mxu0 %vm307_vm1, %v277_v29  ;;  %v6882_v20 = vld [vmem:[%s12293_s5 + $0x170] sm:$0xff]  ;;  %v6885_v21 = vld [vmem:[%s12293_s5 + $0x188] sm:$0xff]  ;;  %v6884_v22 = vld [vmem:[%s12293_s5 + $0x180] sm:$0xff] }
  0x53   : > { %7299 = vmatprep.mubr.msk.f32.mxu0 %vm307_vm1, %v278_v31  ;;  %v6887_v23 = vld [vmem:[%s12293_s5 + $0x198] sm:$0xff]  ;;  %v6886_v24 = vld [vmem:[%s12293_s5 + $0x190] sm:$0xff]  ;;  %v6889_v25 = vld [vmem:[%s12293_s5 + $0x1a8] sm:$0xff] }
  0x54   : > { %1641 = vperm.xlu1 %7920, %v1547_v30   ;;  %v6888_v26 = vld [vmem:[%s12293_s5 + $0x1a0] sm:$0xff]  ;;  %v6891_v27 = vld [vmem:[%s12293_s5 + $0x1b8] sm:$0xff]  ;;  %v6890_v28 = vld [vmem:[%s12293_s5 + $0x1b0] sm:$0xff] }
  0x55   : > { %1636 = vperm.xlu0 %7919, %v1546_v32   ;;  %v6893_v29 = vld [vmem:[%s12293_s5 + $0x1c8] sm:$0xff]  ;;  %v6892_v30 = vld [vmem:[%s12293_s5 + $0x1c0] sm:$0xff] }
  0x56   : > { %7300 = vmatmul.mubr.msk.f32.gmra.mrb[12].mxu0 %vm307_vm1, %v279_v33  ;;  %v7045_v31 = vld [vmem:[%s12293_s5 + $0x508] sm:$0xff]  ;;  %v7044_v32 = vld [vmem:[%s12293_s5 + $0x500] sm:$0xff]  ;;  %v7047_v33 = vld [vmem:[%s12293_s5 + $0x518] sm:$0xff] }
  0x57   : > { %7302 = vmatprep.mubr.msk.f32.mxu0 %vm307_vm1, %v280_v35  ;;  %v7049_v35 = vld [vmem:[%s12293_s5 + $0x528] sm:$0xff] }
  0x58   : > { %1651 = vperm.xlu1 %7920, %v1549_v34   ;;  %v7046_v34 = vld [vmem:[%s12293_s5 + $0x510] sm:$0xff] }
  0x59   : > { %1646 = vperm.xlu0 %7919, %v1548_v36   ;;  %v7048_v36 = vld [vmem:[%s12293_s5 + $0x520] sm:$0xff] }
  0x5a   : > { %7303 = vmatmul.mubr.msk.f32.gmra.mrb[14].mxu0 %vm307_vm1, %v281_v37  ;;  %v7051_v37 = vld [vmem:[%s12293_s5 + $0x538] sm:$0xff] }
  0x5b   : > { %7305 = vmatprep.mubr.msk.f32.mxu0 %vm307_vm1, %v282_v39 }
  0x5c   : > { %1661 = vperm.xlu1 %7920, %v1551_v38   ;;  %v7050_v38 = vld [vmem:[%s12293_s5 + $0x530] sm:$0xff] }
  0x5d   : > { %1656 = vperm.xlu0 %7919, %v1550_v40  }
  0x5e   : > { %7306 = vmatmul.mubr.msk.f32.gmra.mrb[16].mxu0 %vm307_vm1, %v283_v41  ;;  %v7053_v41 = vld [vmem:[%s12293_s5 + $0x548] sm:$0xff] }
  0x5f   : > { %7308 = vmatprep.mubr.msk.f32.mxu0 %vm307_vm1, %v284_v44 }
  0x60   : > { %1671 = vperm.xlu1 %7920, %v1553_v42   ;;  %v7052_v42 = vld [vmem:[%s12293_s5 + $0x540] sm:$0xff] }
  0x61   : > { %1666 = vperm.xlu0 %7919, %v1552_v43  }
  0x62   : > { %7309 = vmatmul.mubr.msk.f32.gmra.mrb[18].mxu0 %vm307_vm1, %v285_v45  ;;  %v7055_v45 = vld [vmem:[%s12293_s5 + $0x558] sm:$0xff] }
  0x63   : > { %7311 = vmatprep.mubr.msk.f32.mxu0 %vm307_vm1, %v286_v48 }
  0x64   : > { %1681 = vperm.xlu1 %7920, %v1555_v46   ;;  %v7054_v46 = vld [vmem:[%s12293_s5 + $0x550] sm:$0xff] }
  0x65   : > { %1676 = vperm.xlu0 %7919, %v1554_v47  }
  0x66   : > { %7312 = vmatmul.mubr.msk.f32.gmra.mrb[20].mxu0 %vm307_vm1, %v287_v49  ;;  %v7057_v49 = vld [vmem:[%s12293_s5 + $0x568] sm:$0xff] }
  0x67   : > { %7314 = vmatprep.mubr.msk.f32.mxu0 %vm307_vm1, %v288_v52 }
  0x68   : > { %1691 = vperm.xlu1 %7920, %v1557_v50   ;;  %v7056_v50 = vld [vmem:[%s12293_s5 + $0x560] sm:$0xff] }
  0x69   : > { %1686 = vperm.xlu0 %7919, %v1556_v51  }
  0x6a   : > { %7315 = vmatmul.mubr.msk.f32.gmra.mrb[22].mxu0 %vm307_vm1, %v289_v53  ;;  %v7059_v53 = vld [vmem:[%s12293_s5 + $0x578] sm:$0xff] }
  0x6b   : > { %7317 = vmatprep.mubr.msk.f32.mxu0 %vm307_vm1, %v290_v56 }
  0x6c   : > { %1701 = vperm.xlu1 %7920, %v1559_v54   ;;  %v7058_v54 = vld [vmem:[%s12293_s5 + $0x570] sm:$0xff] }
  0x6d   : > { %1696 = vperm.xlu0 %7919, %v1558_v55  }
  0x6e   : > { %7318 = vmatmul.mubr.msk.f32.gmra.mrb[24].mxu0 %vm307_vm1, %v291_v57  ;;  %v6895_v57 = vld [vmem:[%s12293_s5 + $0x1d8] sm:$0xff] }
  0x6f   : > { %7320 = vmatprep.mubr.msk.f32.mxu0 %vm307_vm1, %v292_v60 }
  0x70   : > { %1711 = vperm.xlu1 %7920, %v1561_v58   ;;  %v6894_v58 = vld [vmem:[%s12293_s5 + $0x1d0] sm:$0xff] }
  0x71   : > { %1706 = vperm.xlu0 %7919, %v1560_v59  }
  0x72   : > { %7321 = vmatmul.mubr.msk.f32.gmra.mrb[26].mxu0 %vm307_vm1, %v293_v61  ;;  %v7061_v61 = vld [vmem:[%s12293_s5 + $0x588] sm:$0xff] }
  0x73   : > { %7323 = vmatprep.mubr.msk.f32.mxu0 %vm307_vm1, %v294_v1 }
  0x74   : > { %1721 = vperm.xlu1 %7920, %v1563_v62   ;;  %v7060_v62 = vld [vmem:[%s12293_s5 + $0x580] sm:$0xff] }
  0x75   : > { %1716 = vperm.xlu0 %7919, %v1562_v63  }
  0x76   : > { %7324 = vmatmul.mubr.msk.f32.gmra.mrb[28].mxu0 %vm307_vm1, %v295_v2  ;;  %v6897_v2 = vld [vmem:[%s12293_s5 + $0x1e8] sm:$0xff] }
  0x77   : > { %7326 = vmatprep.mubr.msk.f32.mxu0 %vm307_vm1, %v296_v5 }
  0x78   : > { %1828 = vperm.xlu1 %7920, %v6869_v3   ;;  %v6896_v3 = vld [vmem:[%s12293_s5 + $0x1e0] sm:$0xff] }
  0x79   : > { %1823 = vperm.xlu0 %7919, %v6868_v4  }
  0x7a   : > { %7327 = vmatmul.mubr.msk.f32.gmra.mrb[30].mxu0 %vm307_vm1, %v297_v6  ;;  %v7063_v6 = vld [vmem:[%s12293_s5 + $0x598] sm:$0xff] }
  0x7b   : > { %2158 = vmatprep.mubr.bf16.mxu0 %v12298_v0 }
  0x7c   : > { %1838 = vperm.xlu1 %7920, %v6871_v7   ;;  %v7062_v7 = vld [vmem:[%s12293_s5 + $0x590] sm:$0xff] }
  0x7d   : > { %1833 = vperm.xlu0 %7919, %v6870_v8  }
  0x80   : > { %1848 = vperm.xlu1 %7920, %v6873_v9  }
  0x81   : > { %1843 = vperm.xlu0 %7919, %v6872_v10   ;;  %v6899_v10 = vld [vmem:[%s12293_s5 + $0x1f8] sm:$0xff] }
  0x84   : > { %1858 = vperm.xlu1 %7920, %v6875_v11   ;;  %v6898_v11 = vld [vmem:[%s12293_s5 + $0x1f0] sm:$0xff] }
  0x85   : > { %1853 = vperm.xlu0 %7919, %v6874_v12  }
  0x88   : > { %1868 = vperm.xlu1 %7920, %v6877_v13  }
  0x89   : > { %1863 = vperm.xlu0 %7919, %v6876_v14   ;;  %v7065_v14 = vld [vmem:[%s12293_s5 + $0x5a8] sm:$0xff] }
  0x8c   : > { %1878 = vperm.xlu1 %7920, %v6879_v15   ;;  %v7064_v15 = vld [vmem:[%s12293_s5 + $0x5a0] sm:$0xff] }
  0x8d   : > { %1873 = vperm.xlu0 %7919, %v6878_v16  }
  0x90   : > { %1888 = vperm.xlu1 %7920, %v6881_v17  }
  0x91   : > { %1883 = vperm.xlu0 %7919, %v6880_v18   ;;  %v7067_v18 = vld [vmem:[%s12293_s5 + $0x5b8] sm:$0xff] }
  0x94   : > { %1898 = vperm.xlu1 %7920, %v6883_v19   ;;  %v7066_v19 = vld [vmem:[%s12293_s5 + $0x5b0] sm:$0xff] }
  0x95   : > { %1893 = vperm.xlu0 %7919, %v6882_v20  }
  0x98   : > { %1908 = vperm.xlu1 %7920, %v6885_v21  }
  0x99   : > { %1903 = vperm.xlu0 %7919, %v6884_v22   ;;  %v7069_v22 = vld [vmem:[%s12293_s5 + $0x5c8] sm:$0xff] }
  0x9c   : > { %1918 = vperm.xlu1 %7920, %v6887_v23   ;;  %v7068_v23 = vld [vmem:[%s12293_s5 + $0x5c0] sm:$0xff] }
  0x9d   : > { %1913 = vperm.xlu0 %7919, %v6886_v24  }
  0xa0   : > { %1928 = vperm.xlu1 %7920, %v6889_v25  }
  0xa1   : > { %1923 = vperm.xlu0 %7919, %v6888_v26   ;;  %v7071_v26 = vld [vmem:[%s12293_s5 + $0x5d8] sm:$0xff] }
  0xa4   : > { %1938 = vperm.xlu1 %7920, %v6891_v27   ;;  %v7070_v27 = vld [vmem:[%s12293_s5 + $0x5d0] sm:$0xff] }
  0xa5   : > { %1933 = vperm.xlu0 %7919, %v6890_v28  }
  0xa8   : > { %1948 = vperm.xlu1 %7920, %v6893_v29  }
  0xa9   : > { %1943 = vperm.xlu0 %7919, %v6892_v30   ;;  %v7073_v30 = vld [vmem:[%s12293_s5 + $0x5e8] sm:$0xff] }
  0xac   : > { %4257 = vperm.xlu1 %7920, %v7045_v31   ;;  %v7072_v31 = vld [vmem:[%s12293_s5 + $0x5e0] sm:$0xff] }
  0xad   : > { %4252 = vperm.xlu0 %7919, %v7044_v32  }
  0xb0   : > { %4267 = vperm.xlu1 %7920, %v7047_v33  }
  0xb1   : > { %4262 = vperm.xlu0 %7919, %v7046_v34   ;;  %v7075_v34 = vld [vmem:[%s12293_s5 + $0x5f8] sm:$0xff] }
  0xb4   : > { %4277 = vperm.xlu1 %7920, %v7049_v35   ;;  %v7074_v35 = vld [vmem:[%s12293_s5 + $0x5f0] sm:$0xff] }
  0xb5   : > { %4272 = vperm.xlu0 %7919, %v7048_v36  }
  0xb7   : > { %v8783_v39 = vpop.permute.xlu1 %1576 }
  0xb8   : > { %12477 = vst [vmem:[#allocation8_spill] sm:$0xff] %v8783_v39  ;;  %v8785_v40 = vpop.permute.xlu0 %1566  ;;  %4287 = vperm.xlu1 %7920, %v7051_v37  }
  0xb9   : > { %12478 = vst [vmem:[#allocation9_spill] sm:$0xff] %v8785_v40  ;;  %4282 = vperm.xlu0 %7919, %v7050_v38   ;;  %v7093_v38 = vld [vmem:[%s12293_s5 + $0x608] sm:$0xff]  ;;  %v7930_v40 = vld [vmem:[#allocation2 + $0x234] ss:$8 sps:$4 sm:$0xff]  }
  0xbb   : > { %v8793_v43 = vpop.permute.xlu1 %1581 }
  0xbc   : > { %12479 = vst [vmem:[#allocation10_spill] sm:$0xff] %v8793_v43  ;;  %v8795_v44 = vpop.permute.xlu0 %1571  ;;  %4297 = vperm.xlu1 %7920, %v7053_v41   ;;  %v7092_v41 = vld [vmem:[%s12293_s5 + $0x600] sm:$0xff] }
  0xbd   : > { %12480 = vst [vmem:[#allocation11_spill] sm:$0xff] %v8795_v44  ;;  %4292 = vperm.xlu0 %7919, %v7052_v42  }
  0xbf   : > { %v8803_v47 = vpop.permute.xlu1 %1591 }
  0xc0   : > { %12481 = vst [vmem:[#allocation12_spill] sm:$0xff] %v8803_v47  ;;  %v8805_v48 = vpop.permute.xlu0 %1586  ;;  %4307 = vperm.xlu1 %7920, %v7055_v45  }
  0xc1   : > { %12482 = vst [vmem:[#allocation13_spill] sm:$0xff] %v8805_v48  ;;  %4302 = vperm.xlu0 %7919, %v7054_v46   ;;  %v7095_v46 = vld [vmem:[%s12293_s5 + $0x618] sm:$0xff] }
  0xc3   : > { %v8813_v51 = vpop.permute.xlu1 %1601 }
  0xc4   : > { %12483 = vst [vmem:[#allocation14_spill] sm:$0xff] %v8813_v51  ;;  %v8815_v52 = vpop.permute.xlu0 %1596  ;;  %4317 = vperm.xlu1 %7920, %v7057_v49   ;;  %v7094_v49 = vld [vmem:[%s12293_s5 + $0x610] sm:$0xff] }
  0xc5   : > { %12484 = vst [vmem:[#allocation15_spill] sm:$0xff] %v8815_v52  ;;  %4312 = vperm.xlu0 %7919, %v7056_v50   ;;  %v7097_v50 = vld [vmem:[%s12293_s5 + $0x628] sm:$0xff] }
  0xc7   : > { %v8823_v55 = vpop.permute.xlu1 %1611 }
  0xc8   : > { %12485 = vst [vmem:[#allocation16_spill] sm:$0xff] %v8823_v55  ;;  %v8825_v56 = vpop.permute.xlu0 %1606  ;;  %4327 = vperm.xlu1 %7920, %v7059_v53  }
  0xc9   : > { %12486 = vst [vmem:[#allocation17_spill] sm:$0xff] %v8825_v56  ;;  %4322 = vperm.xlu0 %7919, %v7058_v54   ;;  %v7096_v54 = vld [vmem:[%s12293_s5 + $0x620] sm:$0xff] }
  0xcb   : > { %v8833_v59 = vpop.permute.xlu1 %1621 }
  0xcc   : > { %12487 = vst [vmem:[#allocation18_spill] sm:$0xff] %v8833_v59  ;;  %v8835_v60 = vpop.permute.xlu0 %1616  ;;  %1958 = vperm.xlu1 %7920, %v6895_v57  }
  0xcd   : > { %12488 = vst [vmem:[#allocation19_spill] sm:$0xff] %v8835_v60  ;;  %1953 = vperm.xlu0 %7919, %v6894_v58   ;;  %v7099_v58 = vld [vmem:[%s12293_s5 + $0x638] sm:$0xff] }
  0xcf   : > { %v8843_v63 = vpop.permute.xlu1 %1631 }
  0xd0   : > { %12489 = vst [vmem:[#allocation20_spill] sm:$0xff] %v8843_v63  ;;  %v8845_v1 = vpop.permute.xlu0 %1626  ;;  %4337 = vperm.xlu1 %7920, %v7061_v61   ;;  %v7098_v61 = vld [vmem:[%s12293_s5 + $0x630] sm:$0xff] }
  0xd1   : > { %12490 = vst [vmem:[#allocation21_spill] sm:$0xff] %v8845_v1  ;;  %4332 = vperm.xlu0 %7919, %v7060_v62  }
  0xd3   : > { %v8853_v4 = vpop.permute.xlu1 %1641 }
  0xd4   : > { %12491 = vst [vmem:[#allocation22_spill] sm:$0xff] %v8853_v4  ;;  %v8855_v5 = vpop.permute.xlu0 %1636  ;;  %1968 = vperm.xlu1 %7920, %v6897_v2  }
  0xd5   : > { %12492 = vst [vmem:[#allocation23_spill] sm:$0xff] %v8855_v5  ;;  %1963 = vperm.xlu0 %7919, %v6896_v3   ;;  %v7101_v3 = vld [vmem:[%s12293_s5 + $0x648] sm:$0xff] }
  0xd6   : > { %v7929_v5 = vld [vmem:[#allocation2 + $0x220] ss:$8 sps:$4 sm:$0xff]  }
  0xd7   : > { %v8863_v8 = vpop.permute.xlu1 %1651 }
  0xd8   : > { %12493 = vst [vmem:[#allocation24_spill] sm:$0xff] %v8863_v8  ;;  %v8865_v9 = vpop.permute.xlu0 %1646  ;;  %4347 = vperm.xlu1 %7920, %v7063_v6   ;;  %v7100_v6 = vld [vmem:[%s12293_s5 + $0x640] sm:$0xff]  ;;  %v6939_v8 = vld [vmem:[%s12293_s5 + $0x238] sm:$0xff] }
  0xd9   : > { %12494 = vst [vmem:[#allocation25_spill] sm:$0xff] %v8865_v9  ;;  %4342 = vperm.xlu0 %7919, %v7062_v7   ;;  %v7103_v7 = vld [vmem:[%s12293_s5 + $0x658] sm:$0xff] }
  0xdb   : > { %v8873_v12 = vpop.permute.xlu1 %1661 }
  0xdc   : > { %12495 = vst [vmem:[#allocation26_spill] sm:$0xff] %v8873_v12  ;;  %v8875_v13 = vpop.permute.xlu0 %1656  ;;  %1978 = vperm.xlu1 %7920, %v6899_v10  }
  0xdd   : > { %12496 = vst [vmem:[#allocation27_spill] sm:$0xff] %v8875_v13  ;;  %1973 = vperm.xlu0 %7919, %v6898_v11   ;;  %v7102_v11 = vld [vmem:[%s12293_s5 + $0x650] sm:$0xff] }
  0xde   : > { %v7118_v13 = vld [vmem:[%s12293_s5 + $0x6d0] sm:$0xff] }
  0xdf   : > { %v8883_v16 = vpop.permute.xlu1 %1671 }
  0xe0   : > { %12497 = vst [vmem:[#allocation28_spill] sm:$0xff] %v8883_v16  ;;  %v8885_v17 = vpop.permute.xlu0 %1666  ;;  %4357 = vperm.xlu1 %7920, %v7065_v14  }
  0xe1   : > { %12498 = vst [vmem:[#allocation29_spill] sm:$0xff] %v8885_v17  ;;  %4352 = vperm.xlu0 %7919, %v7064_v15   ;;  %v7105_v15 = vld [vmem:[%s12293_s5 + $0x668] sm:$0xff] }
  0xe3   : > { %v8893_v20 = vpop.permute.xlu1 %1681 }
  0xe4   : > { %12499 = vst [vmem:[#allocation30_spill] sm:$0xff] %v8893_v20  ;;  %v8895_v21 = vpop.permute.xlu0 %1676  ;;  %4367 = vperm.xlu1 %7920, %v7067_v18   ;;  %v7104_v18 = vld [vmem:[%s12293_s5 + $0x660] sm:$0xff] }
  0xe5   : > { %12500 = vst [vmem:[#allocation31_spill] sm:$0xff] %v8895_v21  ;;  %4362 = vperm.xlu0 %7919, %v7066_v19   ;;  %v6936_v20 = vld [vmem:[%s12293_s5 + $0x220] sm:$0xff] }
  0xe7   : > { %v8903_v24 = vpop.permute.xlu1 %1691 }
  0xe8   : > { %12501 = vst [vmem:[#allocation32_spill] sm:$0xff] %v8903_v24  ;;  %v8905_v25 = vpop.permute.xlu0 %1686  ;;  %4377 = vperm.xlu1 %7920, %v7069_v22  }
  0xe9   : > { %12502 = vst [vmem:[#allocation33_spill] sm:$0xff] %v8905_v25  ;;  %4372 = vperm.xlu0 %7919, %v7068_v23   ;;  %v7107_v23 = vld [vmem:[%s12293_s5 + $0x678] sm:$0xff]  ;;  %v7116_v25 = vld [vmem:[%s12293_s5 + $0x6c0] sm:$0xff] }
  0xeb   : > { %v8913_v28 = vpop.permute.xlu1 %1701 }
  0xec   : > { %12503 = vst [vmem:[#allocation34_spill] sm:$0xff] %v8913_v28  ;;  %v8915_v29 = vpop.permute.xlu0 %1696  ;;  %4387 = vperm.xlu1 %7920, %v7071_v26   ;;  %v7926_v28 = vld [vmem:[#allocation2 + $0x210] ss:$8 sps:$4 sm:$0xff]  }
  0xed   : > { %12504 = vst [vmem:[#allocation35_spill] sm:$0xff] %v8915_v29  ;;  %4382 = vperm.xlu0 %7919, %v7070_v27   ;;  %v7106_v27 = vld [vmem:[%s12293_s5 + $0x670] sm:$0xff] }
  0xee   : > { %v7924_v29 = vld [vmem:[#allocation2 + $0x214] ss:$8 sps:$4 sm:$0xff]  }
  0xef   : > { %v8923_v32 = vpop.permute.xlu1 %1711 }
  0xf0   : > { %12505 = vst [vmem:[#allocation36_spill] sm:$0xff] %v8923_v32  ;;  %v8925_v33 = vpop.permute.xlu0 %1706  ;;  %4397 = vperm.xlu1 %7920, %v7073_v30  }
  0xf1   : > { %12506 = vst [vmem:[#allocation37_spill] sm:$0xff] %v8925_v33  ;;  %4392 = vperm.xlu0 %7919, %v7072_v31   ;;  %v7109_v31 = vld [vmem:[%s12293_s5 + $0x688] sm:$0xff]  ;;  %v6934_v33 = vld [vmem:[%s12293_s5 + $0x210] sm:$0xff] }
  0xf3   : > { %v8933_v36 = vpop.permute.xlu1 %1721 }
  0xf4   : > { %12507 = vst [vmem:[#allocation38_spill] sm:$0xff] %v8933_v36  ;;  %v8935_v37 = vpop.permute.xlu0 %1716  ;;  %4407 = vperm.xlu1 %7920, %v7075_v34   ;;  %v7921_v34 = vld [vmem:[#allocation2 + $0x204] ss:$8 sps:$4 sm:$0xff]  }
  0xf5   : > { %12508 = vst [vmem:[#allocation39_spill] sm:$0xff] %v8935_v37  ;;  %4402 = vperm.xlu0 %7919, %v7074_v35   ;;  %7335 = vmatprep.subr.bf16.mxu1 %v7921_v34 }
  0xf7   : > { %v8943_v42 = vpop.permute.xlu1 %1828 }
  0xf8   : > { %12509 = vst [vmem:[#allocation40_spill] sm:$0xff] %v8943_v42  ;;  %4852 = vperm.xlu1 %7920, %v7093_v38   ;;  %v8945_v45 = vpop.permute.xlu0 %1823  ;;  %v7939_v42 = vld [vmem:[#allocation2 + $0x254] ss:$8 sps:$4 sm:$0xff]  }
  0xf9   : > { %12510 = vst [vmem:[#allocation41_spill] sm:$0xff] %v8945_v45  ;;  %4847 = vperm.xlu0 %7919, %v7092_v41   ;;  %v7108_v41 = vld [vmem:[%s12293_s5 + $0x680] sm:$0xff] }
  0xfb   : > { %v8956_v53 = vpop.permute.xlu1 %1838 }
  0xfc   : > { %4862 = vperm.xlu1 %7920, %v7095_v46   ;;  %12511 = vst [vmem:[#allocation42_spill] sm:$0xff] %v8956_v53  ;;  %v8961_v57 = vpop.permute.xlu0 %1833  ;;  %v7923_v46 = vld [vmem:[#allocation2 + $0x200] ss:$8 sps:$4 sm:$0xff]  }
  0xfd   : > { %4857 = vperm.xlu0 %7919, %v7094_v49   ;;  %12512 = vst [vmem:[#allocation43_spill] sm:$0xff] %v8961_v57  ;;  %7343 = vmatpush1.bf16.msra.mxu1 %v7923_v46 }
  0xfe   : > { %7336 = vmatprep.subr.bf16.mxu1 %v7924_v29 }
  0xff   : > { %v8969_v62 = vpop.permute.xlu1 %1848 }
 0x100   : > { %4872 = vperm.xlu1 %7920, %v7097_v50   ;;  %12513 = vst [vmem:[#allocation44_spill] sm:$0xff] %v8969_v62  ;;  %v8971_v2 = vpop.permute.xlu0 %1843 }
 0x101   : > { %4867 = vperm.xlu0 %7919, %v7096_v54   ;;  %12514 = vst [vmem:[#allocation45_spill] sm:$0xff] %v8971_v2  ;;  %v7111_v54 = vld [vmem:[%s12293_s5 + $0x698] sm:$0xff]  ;;  %7344 = vmatpush1.bf16.msra.mxu1 %v7926_v28 }
 0x103   : > { %v8982_v10 = vpop.permute.xlu1 %1858 }
 0x104   : > { %4882 = vperm.xlu1 %7920, %v7099_v58   ;;  %12515 = vst [vmem:[#allocation46_spill] sm:$0xff] %v8982_v10  ;;  %v8987_v14 = vpop.permute.xlu0 %1853  ;;  %v7110_v58 = vld [vmem:[%s12293_s5 + $0x690] sm:$0xff] }
 0x105   : > { %4877 = vperm.xlu0 %7919, %v7098_v61   ;;  %12516 = vst [vmem:[#allocation47_spill] sm:$0xff] %v8987_v14 }
 0x107   : > { %v8995_v19 = vpop.permute.xlu1 %1868 }
 0x108   : > { %4892 = vperm.xlu1 %7920, %v7101_v3   ;;  %12517 = vst [vmem:[#allocation48_spill] sm:$0xff] %v8995_v19  ;;  %v8997_v22 = vpop.permute.xlu0 %1863 }
 0x109   : > { %4887 = vperm.xlu0 %7919, %v7100_v6   ;;  %12518 = vst [vmem:[#allocation49_spill] sm:$0xff] %v8997_v22 }
 0x10b   : > { %v9012_v35 = vpop.permute.xlu1 %1878 }
 0x10c   : > { %4902 = vperm.xlu1 %7920, %v7103_v7   ;;  %12519 = vst [vmem:[#allocation50_spill] sm:$0xff] %v9012_v35  ;;  %v9019_v49 = vpop.permute.xlu0 %1873 }
 0x10d   : > { %4897 = vperm.xlu0 %7919, %v7102_v11   ;;  %12520 = vst [vmem:[#allocation51_spill] sm:$0xff] %v9019_v49  ;;  %v7113_v11 = vld [vmem:[%s12293_s5 + $0x6a8] sm:$0xff] }
 0x10f   : > { %v9031_v3 = vpop.permute.xlu1 %1888 }
 0x110   : > { %4912 = vperm.xlu1 %7920, %v7105_v15   ;;  %12521 = vst [vmem:[#allocation52_spill] sm:$0xff] %v9031_v3  ;;  %v9035_v7 = vpop.permute.xlu0 %1883 }
 0x111   : > { %4907 = vperm.xlu0 %7919, %v7104_v18   ;;  %v9002_v26 = vpop.f32.mrb[0].mxu0  ;;  %12522 = vst [vmem:[#allocation53_spill] sm:$0xff] %v9035_v7  ;;  %v7112_v18 = vld [vmem:[%s12293_s5 + $0x6a0] sm:$0xff] }
 0x112   : > { %v9007_v30 = vpop.f32.mrb[1].mxu0 }
 0x114   : > { %4922 = vperm.xlu1 %7920, %v7107_v23   ;;  %v9057_v46 = vpop.permute.xlu0 %1893 }
 0x115   : > { %4917 = vperm.xlu0 %7919, %v7106_v27   ;;  %v9014_v38 = vpop.f32.mrb[2].mxu0  ;;  %v6933_v27 = vld [vmem:[%s12293_s5 + $0x208] sm:$0xff]  ;;  %12524 = vst [vmem:[#allocation55_spill] sm:$0xff] %v9057_v46 }
 0x116   : > { %v9021_v50 = vpop.f32.mrb[3].mxu0 }
 0x118   : > { %4932 = vperm.xlu1 %7920, %v7109_v31   ;;  %v9050_v31 = vpop.permute.xlu1 %1898  ;;  %v9073_v36 = vpop.permute.xlu0 %1903 }
 0x119   : > { %4927 = vperm.xlu0 %7919, %v7108_v41   ;;  %v9029_v61 = vpop.f32.mrb[4].mxu0  ;;  %12523 = vst [vmem:[#allocation54_spill] sm:$0xff] %v9050_v31  ;;  %v6932_v41 = vld [vmem:[%s12293_s5 + $0x200] sm:$0xff]  ;;  %12526 = vst [vmem:[#allocation57_spill] sm:$0xff] %v9073_v36 }
 0x11a   : > { %v9033_v6 = vpop.f32.mrb[5].mxu0 }
 0x11c   : > { %4942 = vperm.xlu1 %7920, %v7111_v54   ;;  %v9069_v0 = vpop.permute.xlu1 %1908  ;;  %v9093_v24 = vpop.permute.xlu0 %1913 }
 0x11d   : > { %4937 = vperm.xlu0 %7919, %v7110_v58   ;;  %v9040_v15 = vpop.f32.mrb[6].mxu0  ;;  %v7115_v58 = vld [vmem:[%s12293_s5 + $0x6b8] sm:$0xff]  ;;  %12525 = vst [vmem:[#allocation56_spill] sm:$0xff] %v9069_v0  ;;  %12528 = vst [vmem:[#allocation59_spill] sm:$0xff] %v9093_v24 }
 0x11e   : > { %v9045_v23 = vpop.f32.mrb[7].mxu0 }
 0x120   : > { %4952 = vperm.xlu1 %7920, %v7113_v11   ;;  %v7114_v11 = vld [vmem:[%s12293_s5 + $0x6b0] sm:$0xff]  ;;  %v9109_v16 = vpop.permute.xlu0 %1923 }
 0x121   : > { %4947 = vperm.xlu0 %7919, %v7112_v18   ;;  %v9052_v34 = vpop.f32.mrb[8].mxu0  ;;  %12530 = vst [vmem:[#allocation61_spill] sm:$0xff] %v9109_v16 }
 0x122   : > { %v9059_v54 = vpop.f32.mrb[9].mxu0 }
 0x124   : > { %2697 = vperm.xlu1 %7920, %v6933_v27   ;;  %v6935_v27 = vld [vmem:[%s12293_s5 + $0x218] sm:$0xff] }
 0x125   : > { %2692 = vperm.xlu0 %7919, %v6932_v41   ;;  %v9067_v18 = vpop.f32.mrb[10].mxu0 }
 0x126   : > { %v9071_v37 = vpop.f32.mrb[11].mxu0 }
 0x128   : > { %4962 = vperm.xlu1 %7920, %v7115_v58   ;;  %v7117_v58 = vld [vmem:[%s12293_s5 + $0x6c8] sm:$0xff] }
 0x129   : > { %4957 = vperm.xlu0 %7919, %v7114_v11   ;;  %v9078_v41 = vpop.f32.mrb[12].mxu0  ;;  %v9088_v11 = vpop.permute.xlu1 %1918 }
 0x12a   : > { %v9083_v32 = vpop.f32.mrb[13].mxu0  ;;  %12527 = vst [vmem:[#allocation58_spill] sm:$0xff] %v9088_v11  ;;  %v7122_v11 = vld [vmem:[%s12293_s5 + $0x6f0] sm:$0xff] }
 0x12c   : > { %2707 = vperm.xlu1 %7920, %v6935_v27  }
 0x12d   : > { %2702 = vperm.xlu0 %7919, %v6934_v33   ;;  %v9095_v21 = vpop.f32.mrb[14].mxu0  ;;  %v6937_v33 = vld [vmem:[%s12293_s5 + $0x228] sm:$0xff]  ;;  %v9105_v17 = vpop.permute.xlu1 %1928 }
 0x12e   : > { %v9097_v27 = vpop.f32.mrb[15].mxu0  ;;  %12529 = vst [vmem:[#allocation60_spill] sm:$0xff] %v9105_v17 }
 0x130   : > { %4972 = vperm.xlu1 %7920, %v7117_v58   ;;  %v9119_v58 = vld [vmem:[%s12290_s2] ss:$0 sm:$0xff] }
 0x131   : > { %4967 = vperm.xlu0 %7919, %v7116_v25   ;;  %v9107_v29 = vpop.f32.mrb[16].mxu0  ;;  %v7119_v25 = vld [vmem:[%s12293_s5 + $0x6d8] sm:$0xff]  ;;  %v9137_v4 = vadd.f32 %v9119_v58, %v9007_v30  ;;  %v9139_v1 = vpop.permute.xlu1 %1938  ;;  %v9153_v30 = vadd.f32 %v9014_v38, %v9119_v58  ;;  %v7120_v38 = vld [vmem:[%s12293_s5 + $0x6e0] sm:$0xff]  ;;  %v9200_v43 = vadd.f32 %v9029_v61, %v9119_v58  ;;  %v9221_v17 = vadd.f32 %v9119_v58, %v9033_v6 }
 0x132   : > { %v9111_v28 = vpop.f32.mrb[17].mxu0  ;;  %12531 = vst [vmem:[#allocation62_spill] sm:$0xff] %v9139_v1 }
 0x133   : > { %v9161_v59 = vmul.f32 0.70710677, %v9137_v4  ;;  %v9180_v52 = vmul.f32 0.70710677, %v9153_v30  ;;  %v9231_v36 = vmul.f32 0.70710677, %v9200_v43 }
 0x134   : > { %2717 = vperm.xlu1 %7920, %v6937_v33   ;;  %v7927_v33 = vld [vmem:[#allocation2 + $0x224] ss:$8 sps:$4 sm:$0xff]  }
 0x135   : > { %2712 = vperm.xlu0 %7919, %v6936_v20   ;;  %v9124_v12 = vpop.f32.mrb[18].mxu0  ;;  %v9128_v20 = vadd.f32 %v9002_v26, %v9119_v58  ;;  %7337 = vmatprep.subr.bf16.mxu1 %v7927_v33  ;;  %v9144_v26 = vpop.permute.xlu0 %1933  ;;  %v7121_v33 = vld [vmem:[%s12293_s5 + $0x6e8] sm:$0xff]  ;;  %v9188_v48 = vand.u32 2147483647, %v9161_v59  ;;  %vm1305_vm5 = vcmp.lt.f32.partialorder %v9161_v59, 0.0  ;;  %vm1308_vm6 = vcmp.lt.f32.partialorder %v9180_v52, 0.0 }
 0x136   : > { %v9130_v9 = vpop.f32.mrb[19].mxu0  ;;  %12532 = vst [vmem:[#allocation63_spill] sm:$0xff] %v9144_v26  ;;  %7345 = vmatpush1.bf16.msra.mxu1 %v7929_v5  ;;  %v9165_v5 = vadd.f32 %v9119_v58, %v9021_v50  ;;  %v6941_v50 = vld [vmem:[%s12293_s5 + $0x248] sm:$0xff]  ;;  %vm1310_vm8 = vcmp.lt.f32.partialorder %v9231_v36, 0.0 }
 0x137   : > { %v9149_v63 = vmul.f32 0.70710677, %v9128_v20  ;;  %v729_v26 = vmul.f32 0.3275911, %v9188_v48  ;;  %7338 = vmatprep.subr.bf16.mxu1 %v7930_v40 }
 0x138   : > { %4982 = vperm.xlu1 %7920, %v7119_v25   ;;  %v6938_v25 = vld [vmem:[%s12293_s5 + $0x230] sm:$0xff]  ;;  %v9191_v47 = vmul.f32 0.70710677, %v9165_v5 }
 0x139   : > { %4977 = vperm.xlu0 %7919, %v7118_v13   ;;  %v9146_v13 = vpop.f32.mrb[20].mxu0  ;;  %v9177_v55 = vand.u32 2147483647, %v9149_v63  ;;  %v9182_v51 = vpop.permute.xlu0 %1943  ;;  %v761_v46 = vadd.f32 1.0, %v729_v26  ;;  %v9252_v26 = vadd.f32 %v9040_v15, %v9119_v58  ;;  %v6943_v15 = vld [vmem:[%s12293_s5 + $0x258] sm:$0xff]  ;;  %vm1306_vm4 = vcmp.lt.f32.partialorder %v9149_v63, 0.0 }
 0x13a   : > { %v9155_v60 = vpop.f32.mrb[21].mxu0  ;;  %12537 = vst [vmem:[#allocation68_spill] sm:$0xff] %v9182_v51  ;;  %v9206_v51 = vand.u32 2147483647, %v9180_v52  ;;  %v9210_v1 = vand.u32 2147483647, %v9191_v47 }
 0x13b   : > { %12533 = vst [vmem:[#allocation64_spill] sm:$0xff] %v9155_v60  ;;  %v730_v44 = vmul.f32 0.3275911, %v9177_v55  ;;  %12547 = vst [vmem:[#allocation78_spill] sm:$0xff] %v9252_v26  ;;  %vm1307_vm7 = vcmp.lt.f32.partialorder %v9191_v47, 0.0  ;;  %v7149_v63 = vld [vmem:[%s12293_s5 + $0x748] sm:$0xff] }
 0x13c   : > { %2727 = vperm.xlu1 %7920, %v6939_v8   ;;  %v732_v0 = vmul.f32 0.3275911, %v9206_v51  ;;  %v731_v6 = vmul.f32 0.3275911, %v9210_v1 }
 0x13d   : > { %2722 = vperm.xlu0 %7919, %v6938_v25   ;;  %v9167_v8 = vpop.f32.mrb[22].mxu0  ;;  %v9174_v25 = vpop.permute.xlu1 %1948  ;;  %v762_v40 = vadd.f32 1.0, %v730_v44 }
 0x13e   : > { %12534 = vst [vmem:[#allocation65_spill] sm:$0xff] %v9167_v8  ;;  %v9172_v56 = vpop.f32.mrb[23].mxu0  ;;  %12536 = vst [vmem:[#allocation67_spill] sm:$0xff] %v9174_v25  ;;  %v7932_v25 = vld [vmem:[#allocation2 + $0x230] ss:$8 sps:$4 sm:$0xff]   ;;  %v764_v7 = vadd.f32 1.0, %v732_v0 }
 0x13f   : > { %12535 = vst [vmem:[#allocation66_spill] sm:$0xff] %v9172_v56  ;;  %7346 = vmatpush1.bf16.msra.mxu1 %v7932_v25  ;;  %v9241_v25 = vand.u32 2147483647, %v9231_v36  ;;  %8137 = vrcp.f32 %v762_v40  ;;  %v763_v44 = vadd.f32 1.0, %v731_v6  ;;  %v9259_v0 = vmul.f32 0.70710677, %v9252_v26 }
 0x140   : > { %4992 = vperm.xlu1 %7920, %v7121_v33   ;;  %v6940_v33 = vld [vmem:[%s12293_s5 + $0x240] sm:$0xff]  ;;  %8139 = vrcp.f32 %v761_v46  ;;  %v9361_v56 = vadd.f32 %v9052_v34, %v9119_v58 }
 0x141   : > { %4987 = vperm.xlu0 %7919, %v7120_v38   ;;  %v9196_v39 = vpop.f32.mrb[24].mxu0  ;;  %v9212_v16 = vpop.permute.xlu1 %4257  ;;  %v734_v3 = vmul.f32 0.3275911, %v9241_v25  ;;  %8141 = vrcp.f32 %v764_v7  ;;  %12549 = vst [vmem:[#allocation80_spill] sm:$0xff] %v9259_v0  ;;  %v9270_v7 = vadd.f32 %v9119_v58, %v9045_v23  ;;  %v9275_v35 = vand.u32 2147483647, %v9259_v0 }
 0x142   : > { %12538 = vst [vmem:[#allocation69_spill] sm:$0xff] %v9196_v39  ;;  %v9202_v38 = vpop.f32.mrb[25].mxu0  ;;  %12540 = vst [vmem:[#allocation71_spill] sm:$0xff] %v9212_v16  ;;  %8143 = vrcp.f32 %v763_v44  ;;  %v7936_v44 = vld [vmem:[#allocation2 + $0x244] ss:$8 sps:$4 sm:$0xff]  }
 0x143   : > { %12539 = vst [vmem:[#allocation70_spill] sm:$0xff] %v9202_v38  ;;  %v766_v6 = vadd.f32 1.0, %v734_v3  ;;  %v6942_v3 = vld [vmem:[%s12293_s5 + $0x250] sm:$0xff]  ;;  %7339 = vmatprep.subr.bf16.mxu1 %v7936_v44  ;;  %v9290_v14 = vmul.f32 0.70710677, %v9270_v7  ;;  %12562 = vst [vmem:[#allocation93_spill] sm:$0xff] %v9361_v56 }
 0x144   : > { %2737 = vperm.xlu1 %7920, %v6941_v50   ;;  %v7123_v50 = vld [vmem:[%s12293_s5 + $0x6f8] sm:$0xff]  ;;  %v736_v44 = vmul.f32 0.3275911, %v9275_v35 }
 0x145   : > { %2732 = vperm.xlu0 %7919, %v6940_v33   ;;  %v9214_v61 = vpop.f32.mrb[26].mxu0  ;;  %v9223_v33 = vpop.permute.xlu0 %4252  ;;  %8145 = vrcp.f32 %v766_v6  ;;  %12555 = vst [vmem:[#allocation86_spill] sm:$0xff] %v9290_v14 }
 0x146   : > { %12541 = vst [vmem:[#allocation72_spill] sm:$0xff] %v9214_v61  ;;  %12542 = vst [vmem:[#allocation73_spill] sm:$0xff] %v9223_v33  ;;  %v9225_v24 = vpop.f32.mrb[27].mxu0  ;;  %v9238_v33 = vmul.f32 0.70710677, %v9221_v17  ;;  %v9243_v16 = vpop.permute.xlu1 %4267  ;;  %v768_v53 = vadd.f32 1.0, %v736_v44 }
 0x147   : > { %12543 = vst [vmem:[#allocation74_spill] sm:$0xff] %v9225_v24  ;;  %12545 = vst [vmem:[#allocation76_spill] sm:$0xff] %v9243_v16  ;;  %v7941_v44 = vld [vmem:[#allocation2 + $0x250] ss:$8 sps:$4 sm:$0xff]  }
 0x148   : > { %5002 = vperm.xlu1 %7920, %v7123_v50   ;;  %vm1309_vm9 = vcmp.lt.f32.partialorder %v9238_v33, 0.0 }
 0x149   : > { %4997 = vperm.xlu0 %7919, %v7122_v11   ;;  %v9235_v31 = vpop.f32.mrb[28].mxu0  ;;  %v9245_v50 = vpop.permute.xlu0 %4262  ;;  %v9248_v11 = vand.u32 2147483647, %v9238_v33 }
 0x14a   : > { %12544 = vst [vmem:[#allocation75_spill] sm:$0xff] %v9235_v31  ;;  %12546 = vst [vmem:[#allocation77_spill] sm:$0xff] %v9245_v50  ;;  %v9255_v49 = vpop.permute.xlu1 %4277  ;;  %v9263_v50 = vpop.f32.mrb[29].mxu0 }
 0x14b   : > { %12548 = vst [vmem:[#allocation79_spill] sm:$0xff] %v9255_v49  ;;  %v733_v40 = vmul.f32 0.3275911, %v9248_v11  ;;  %12551 = vst [vmem:[#allocation82_spill] sm:$0xff] %v9263_v50  ;;  %v9272_v49 = vpop.eup %8137 }
 0x14c   : > { %2747 = vperm.xlu1 %7920, %v6943_v15   ;;  %v9280_v22 = vpop.eup %8139 }
 0x14d   : > { %v9261_v46 = vpop.permute.xlu0 %4272  ;;  %v765_v16 = vadd.f32 1.0, %v733_v40  ;;  %2742 = vperm.xlu0 %7919, %v6942_v3   ;;  %v9284_v23 = vpop.f32.mrb[30].mxu0  ;;  %v826_v40 = vmul.f32 1.0614054, %v9272_v49  ;;  %v825_v6 = vmul.f32 1.0614054, %v9280_v22 }
 0x14e   : > { %12550 = vst [vmem:[#allocation81_spill] sm:$0xff] %v9261_v46  ;;  %v7938_v46 = vld [vmem:[#allocation2 + $0x240] ss:$8 sps:$4 sm:$0xff]   ;;  %v9282_v19 = vpop.permute.xlu1 %4287  ;;  %12553 = vst [vmem:[#allocation84_spill] sm:$0xff] %v9284_v23  ;;  %v9292_v26 = vpop.f32.mrb[31].mxu0 }
 0x14f   : > { %12552 = vst [vmem:[#allocation83_spill] sm:$0xff] %v9282_v19  ;;  %7347 = vmatpush1.bf16.msra.mxu1 %v7938_v46  ;;  %12556 = vst [vmem:[#allocation87_spill] sm:$0xff] %v9292_v26  ;;  %v9294_v10 = vpop.eup %8141  ;;  %8147 = vrcp.f32 %v765_v16  ;;  %v858_v19 = vadd.f32 -1.4531521, %v826_v40  ;;  %v9302_v46 = vand.u32 2147483647, %v9290_v14 }
 0x150   : > { %v9298_v3 = vpop.eup %8143  ;;  %v857_v62 = vadd.f32 -1.4531521, %v825_v6  ;;  %v1114_v16 = vsub.f32 0.0, %v9177_v55  ;;  %8149 = vrcp.f32 %v768_v53  ;;  %7340 = vmatprep.subr.bf16.mxu1 %v7939_v42  ;;  %v7140_v42 = vld [vmem:[%s12293_s5 + $0x700] sm:$0xff] }
 0x151   : > { %v9286_v15 = vpop.permute.xlu0 %4282  ;;  %v827_v57 = vmul.f32 1.0614054, %v9298_v3  ;;  %v9310_v45 = vpop.eup %8145  ;;  %v890_v40 = vmul.f32 %v9272_v49, %v858_v19  ;;  %v735_v50 = vmul.f32 0.3275911, %v9302_v46  ;;  %v7945_v53 = vld [vmem:[#allocation2 + $0x264] ss:$8 sps:$4 sm:$0xff]   ;;  %5442 = vperm.xlu0 %7919, %v7140_v42  }
 0x152   : > { %12554 = vst [vmem:[#allocation85_spill] sm:$0xff] %v9286_v15  ;;  %v828_v15 = vmul.f32 1.0614054, %v9294_v10  ;;  %v9304_v2 = vpop.permute.xlu1 %4297  ;;  %v889_v14 = vmul.f32 %v9280_v22, %v857_v62  ;;  %v1146_v24 = vmul.f32 %v1114_v16, %v9177_v55  ;;  %v830_v62 = vmul.f32 1.0614054, %v9310_v45 }
 0x153   : > { %12557 = vst [vmem:[#allocation88_spill] sm:$0xff] %v9304_v2  ;;  %v1113_v2 = vsub.f32 0.0, %v9188_v48  ;;  %v859_v6 = vadd.f32 -1.4531521, %v827_v57  ;;  %7348 = vmatpush1.bf16.msra.mxu1 %v7941_v44  ;;  %v922_v31 = vadd.f32 1.4214138, %v890_v40 }
 0x154   : > { %v860_v26 = vadd.f32 -1.4531521, %v828_v15  ;;  %v9325_v15 = vmul.f32 0.5, %v9128_v20  ;;  %v9334_v55 = vmul.f32 0.5, %v9137_v4  ;;  %v7947_v16 = vld [vmem:[#allocation2 + $0x260] ss:$8 sps:$4 sm:$0xff]   ;;  %7341 = vmatprep.subr.bf16.mxu1 %v7945_v53 }
 0x155   : > { %v9307_v0 = vpop.permute.xlu0 %4292  ;;  %v891_v44 = vmul.f32 %v9298_v3, %v859_v6  ;;  %v767_v23 = vadd.f32 1.0, %v735_v50  ;;  %v1179_v38 = vmul.f32 1.442695, %v1146_v24  ;;  %v1116_v40 = vsub.f32 0.0, %v9206_v51 }
 0x156   : > { %12558 = vst [vmem:[#allocation89_spill] sm:$0xff] %v9307_v0  ;;  %v7141_v0 = vld [vmem:[%s12293_s5 + $0x708] sm:$0xff]  ;;  %v9320_v61 = vpop.permute.xlu1 %4307  ;;  %v892_v20 = vmul.f32 %v9294_v10, %v860_v26  ;;  %v1115_v4 = vsub.f32 0.0, %v9210_v1  ;;  %v9353_v50 = vmul.f32 0.5, %v9165_v5  ;;  %v1118_v6 = vsub.f32 0.0, %v9241_v25  ;;  %v7143_v5 = vld [vmem:[%s12293_s5 + $0x718] sm:$0xff] }
 0x157   : > { %12559 = vst [vmem:[#allocation90_spill] sm:$0xff] %v9320_v61  ;;  %5447 = vperm.xlu1 %7920, %v7141_v0   ;;  %v9337_v0 = vmul.f32 0.5, %v9153_v30  ;;  %v921_v61 = vadd.f32 1.4214138, %v889_v14  ;;  %v862_v30 = vadd.f32 -1.4531521, %v830_v62  ;;  %7349 = vmatpush1.bf16.msra.mxu1 %v7947_v16  ;;  %v954_v14 = vmul.f32 %v9272_v49, %v922_v31 }
 0x158   : > { %v6945_v26 = vld [vmem:[%s12293_s5 + $0x268] sm:$0xff]  ;;  %v924_v24 = vadd.f32 1.4214138, %v892_v20  ;;  %v7950_v62 = vld [vmem:[#allocation2 + $0x270] ss:$8 sps:$4 sm:$0xff]   ;;  %8151 = vrcp.f32 %v767_v23  ;;  %v1147_v23 = vmul.f32 %v1115_v4, %v9210_v1 }
 0x159   : > { %v9322_v19 = vpop.eup %8147  ;;  %v9328_v57 = vpop.permute.xlu0 %4302  ;;  %v953_v53 = vmul.f32 %v9280_v22, %v921_v61  ;;  %v923_v16 = vadd.f32 1.4214138, %v891_v44  ;;  %v7142_v20 = vld [vmem:[%s12293_s5 + $0x710] sm:$0xff]  ;;  %v1148_v61 = vmul.f32 %v1116_v40, %v9206_v51  ;;  %v1117_v44 = vsub.f32 0.0, %v9248_v11 }
 0x15a   : > { %12560 = vst [vmem:[#allocation91_spill] sm:$0xff] %v9328_v57  ;;  %v1145_v57 = vmul.f32 %v1113_v2, %v9188_v48  ;;  %v829_v39 = vmul.f32 1.0614054, %v9322_v19  ;;  %v6944_v48 = vld [vmem:[%s12293_s5 + $0x260] sm:$0xff]  ;;  %v7948_v2 = vld [vmem:[#allocation2 + $0x274] ss:$8 sps:$4 sm:$0xff]   ;;  %v9356_v42 = vpop.permute.xlu1 %4317  ;;  %v9374_v34 = vpop.eup %8149  ;;  %8153 = vpow2.f32 %v1179_v38  ;;  %v956_v60 = vmul.f32 %v9294_v10, %v924_v24 }
 0x15b   : > { %12561 = vst [vmem:[#allocation92_spill] sm:$0xff] %v9356_v42  ;;  %2757 = vperm.xlu1 %7920, %v6945_v26   ;;  %2752 = vperm.xlu0 %7919, %v6944_v48   ;;  %v894_v48 = vmul.f32 %v9310_v45, %v862_v30  ;;  %v7935_v42 = vld [vmem:[#allocation2 + $0x84] ss:$8 sps:$4 sm:$0xff]   ;;  %v986_v8 = vadd.f32 -0.28449672, %v954_v14  ;;  %v1120_v51 = vsub.f32 0.0, %v9275_v35  ;;  %v955_v40 = vmul.f32 %v9298_v3, %v923_v16 }
 0x15c   : > { %7342 = vmatprep.subr.bf16.mxu1 %v7948_v2  ;;  %v1177_v26 = vmul.f32 1.442695, %v1145_v57  ;;  %v861_v2 = vadd.f32 -1.4531521, %v829_v39  ;;  %v1150_v57 = vmul.f32 %v1118_v6, %v9241_v25  ;;  %v985_v1 = vadd.f32 -0.28449672, %v953_v53  ;;  %2126 = vmatprep.subr.bf16.mxu0 %v7935_v42 }
 0x15d   : > { %v9363_v31 = vpop.permute.xlu0 %4312  ;;  %7350 = vmatpush1.bf16.msra.mxu1 %v7950_v62  ;;  %v9382_v38 = vmul.f32 0.70710677, %v9361_v56  ;;  %v9386_v39 = vadd.f32 %v9067_v18, %v9119_v58  ;;  %v1183_v4 = vmul.f32 1.442695, %v1148_v61  ;;  %v1181_v30 = vmul.f32 1.442695, %v1147_v23 }
 0x15e   : > { %12563 = vst [vmem:[#allocation94_spill] sm:$0xff] %v9363_v31  ;;  %v7933_v31 = vld [vmem:[#allocation2 + $0x80] ss:$8 sps:$4 sm:$0xff]   ;;  %v832_v14 = vmul.f32 1.0614054, %v9374_v34  ;;  %v9391_v25 = vadd.f32 %v9119_v58, %v9071_v37  ;;  %v9393_v24 = vpop.permute.xlu1 %4327  ;;  %v893_v62 = vmul.f32 %v9322_v19, %v861_v2  ;;  %v1149_v53 = vmul.f32 %v1117_v44, %v9248_v11 }
 0x15f   : > { %5457 = vperm.xlu1 %7920, %v7143_v5   ;;  %5452 = vperm.xlu0 %7919, %v7142_v20   ;;  %12564 = vst [vmem:[#allocation95_spill] sm:$0xff] %v9382_v38  ;;  %12565 = vst [vmem:[#allocation96_spill] sm:$0xff] %v9393_v24  ;;  %v926_v6 = vadd.f32 1.4214138, %v894_v48  ;;  %v9399_v18 = vadd.f32 %v9078_v41, %v9119_v58  ;;  %v1018_v16 = vmul.f32 %v9272_v49, %v986_v8 }
 0x160   : > { %2127 = vmatpush1.bf16.msra.mxu0 %v7933_v31  ;;  %v988_v5 = vadd.f32 -0.28449672, %v956_v60  ;;  %v9404_v20 = vmul.f32 1.442695, %v1150_v57  ;;  %v1152_v37 = vmul.f32 %v1120_v51, %v9275_v35  ;;  %v1017_v31 = vmul.f32 %v9280_v22, %v985_v1  ;;  %v6947_v60 = vld [vmem:[%s12293_s5 + $0x278] sm:$0xff]  ;;  %v6946_v35 = vld [vmem:[%s12293_s5 + $0x270] sm:$0xff] }
 0x161   : > { %12566 = vst [vmem:[#allocation97_spill] sm:$0xff] %v9399_v18  ;;  %v9401_v42 = vpop.permute.xlu0 %4322  ;;  %v987_v61 = vadd.f32 -0.28449672, %v955_v40  ;;  %v9409_v23 = vand.u32 2147483647, %v9382_v38  ;;  %8155 = vpow2.f32 %v1177_v26  ;;  %v958_v48 = vmul.f32 %v9310_v45, %v926_v6 }
 0x162   : > { %12567 = vst [vmem:[#allocation98_spill] sm:$0xff] %v9401_v42  ;;  %v9412_v11 = vmul.f32 0.70710677, %v9386_v39  ;;  %v864_v41 = vadd.f32 -1.4531521, %v832_v14  ;;  %v9423_v8 = vpop.eup %8151  ;;  %v1020_v1 = vmul.f32 %v9294_v10, %v988_v5  ;;  %v9436_v14 = vadd.f32 %v9119_v58, %v9083_v32  ;;  %v9438_v42 = vpop.permute.xlu1 %1958 }
 0x163   : > { %v9415_v44 = vmul.f32 0.70710677, %v9391_v25  ;;  %v925_v2 = vadd.f32 1.4214138, %v893_v62  ;;  %v9426_v57 = vmul.f32 1.442695, %v1149_v53  ;;  %2767 = vperm.xlu1 %7920, %v6947_v60   ;;  %2762 = vperm.xlu0 %7919, %v6946_v35   ;;  %v1019_v53 = vmul.f32 %v9298_v3, %v987_v61 }
 0x164   : > { %12568 = vst [vmem:[#allocation99_spill] sm:$0xff] %v9412_v11  ;;  %v9429_v26 = vmul.f32 0.70710677, %v9399_v18  ;;  %v1050_v51 = vadd.f32 0.2548296, %v1018_v16  ;;  %12571 = vst [vmem:[#allocation102_spill] sm:$0xff] %v9436_v14  ;;  %v8154_v6 = vpop.eup %8153  ;;  %8157 = vpow2.f32 %v1183_v4  ;;  %v896_v5 = vmul.f32 %v9374_v34, %v864_v41 }
 0x165   : > { %12569 = vst [vmem:[#allocation100_spill] sm:$0xff] %v9415_v44  ;;  %v9432_v40 = vmul.f32 1.442695, %v1152_v37  ;;  %12572 = vst [vmem:[#allocation103_spill] sm:$0xff] %v9438_v42  ;;  %v1049_v62 = vadd.f32 0.2548296, %v1017_v31  ;;  %v9447_v16 = vpop.permute.xlu0 %1953  ;;  %v957_v42 = vmul.f32 %v9322_v19, %v925_v2  ;;  %v9466_v41 = vadd.f32 %v9095_v21, %v9119_v58 }
 0x166   : > { %12570 = vst [vmem:[#allocation101_spill] sm:$0xff] %v9429_v26  ;;  %v9442_v24 = vmul.f32 0.3275911, %v9409_v23  ;;  %v9445_v60 = vand.u32 2147483647, %v9412_v11  ;;  %12573 = vst [vmem:[#allocation104_spill] sm:$0xff] %v9447_v16  ;;  %8159 = vpow2.f32 %v1181_v30  ;;  %v9473_v38 = vadd.f32 %v9119_v58, %v9097_v27 }
 0x167   : > { %v831_v32 = vmul.f32 1.0614054, %v9423_v8  ;;  %v9452_v37 = vand.u32 2147483647, %v9415_v44  ;;  %v7145_v31 = vld [vmem:[%s12293_s5 + $0x728] sm:$0xff]  ;;  %v7144_v61 = vld [vmem:[%s12293_s5 + $0x720] sm:$0xff]  ;;  %v1082_v2 = vmul.f32 %v9272_v49, %v1050_v51  ;;  %v9478_v44 = vadd.f32 %v9119_v58, %v9059_v54 }
 0x168   : > { %v990_v35 = vadd.f32 -0.28449672, %v958_v48  ;;  %v9462_v4 = vand.u32 2147483647, %v9429_v26  ;;  %12574 = vst [vmem:[#allocation105_spill] sm:$0xff] %v9466_v41  ;;  %5467 = vperm.xlu1 %7920, %v7145_v31   ;;  %5462 = vperm.xlu0 %7919, %v7144_v61   ;;  %12576 = vst [vmem:[#allocation107_spill] sm:$0xff] %v9473_v38  ;;  %8161 = vpow2.f32 %v9404_v20 }
 0x169   : > { %v1052_v16 = vadd.f32 0.2548296, %v1020_v1  ;;  %v9469_v56 = vmul.f32 0.70710677, %v9436_v14  ;;  %v7944_v48 = vld [vmem:[#allocation2 + $0x94] ss:$8 sps:$4 sm:$0xff]   ;;  %v9482_v14 = vpop.permute.xlu1 %4337  ;;  %v9489_v54 = vpop.permute.xlu0 %4332  ;;  %8163 = vpow2.f32 %v9426_v57 }
 0x16a   : > { %v1051_v26 = vadd.f32 0.2548296, %v1019_v53  ;;  %v740_v21 = vmul.f32 0.3275911, %v9445_v60  ;;  %v7942_v31 = vld [vmem:[#allocation2 + $0x90] ss:$8 sps:$4 sm:$0xff]   ;;  %2128 = vmatprep.subr.bf16.mxu0 %v7944_v48  ;;  %v1022_v27 = vmul.f32 %v9310_v45, %v990_v35  ;;  %v9499_v35 = vmul.f32 %v8154_v6, %v1082_v2 }
 0x16b   : > { %12575 = vst [vmem:[#allocation106_spill] sm:$0xff] %v9469_v56  ;;  %v928_v1 = vadd.f32 1.4214138, %v896_v5  ;;  %v863_v30 = vadd.f32 -1.4531521, %v831_v32  ;;  %12577 = vst [vmem:[#allocation108_spill] sm:$0xff] %v9482_v14  ;;  %2129 = vmatpush1.bf16.msra.mxu0 %v7942_v31  ;;  %v8156_v53 = vpop.eup %8155  ;;  %v1081_v5 = vmul.f32 %v9280_v22, %v1049_v62  ;;  %v1084_v14 = vmul.f32 %v9294_v10, %v1052_v16 }
 0x16c   : > { %v739_v61 = vmul.f32 0.3275911, %v9452_v37  ;;  %v989_v11 = vadd.f32 -0.28449672, %v957_v42  ;;  %v742_v49 = vmul.f32 0.3275911, %v9462_v4  ;;  %v1083_v22 = vmul.f32 %v9298_v3, %v1051_v26 }
 0x16d   : > { %v9487_v51 = vmul.f32 0.70710677, %v9466_v41  ;;  %12578 = vst [vmem:[#allocation109_spill] sm:$0xff] %v9489_v54  ;;  %v9494_v32 = vand.u32 2147483647, %v9469_v56  ;;  %v772_v31 = vadd.f32 1.0, %v740_v21  ;;  %v960_v20 = vmul.f32 %v9374_v34, %v928_v1  ;;  %v9517_v26 = vpop.permute.xlu1 %1968 }
 0x16e   : > { %v9497_v48 = vmul.f32 0.70710677, %v9473_v38  ;;  %v7953_v42 = vld [vmem:[#allocation2 + $0xa4] ss:$8 sps:$4 sm:$0xff]   ;;  %v9503_v41 = vmul.f32 0.70710677, %v9478_v44  ;;  %v895_v62 = vmul.f32 %v9423_v8, %v863_v30  ;;  %v1021_v18 = vmul.f32 %v9322_v19, %v989_v11  ;;  %v8158_v10 = vpop.eup %8157 }
 0x16f   : > { %v7951_v54 = vld [vmem:[#allocation2 + $0xa0] ss:$8 sps:$4 sm:$0xff]   ;;  %v771_v56 = vadd.f32 1.0, %v739_v61  ;;  %2130 = vmatprep.subr.bf16.mxu0 %v7953_v42  ;;  %v1054_v38 = vadd.f32 0.2548296, %v1022_v27  ;;  %v774_v6 = vadd.f32 1.0, %v742_v49  ;;  %v9526_v30 = vmul.f32 %v8156_v53, %v1081_v5  ;;  %v9531_v61 = vpop.permute.xlu0 %1963 }
 0x170   : > { %12579 = vst [vmem:[#allocation110_spill] sm:$0xff] %v9503_v41  ;;  %v9510_v2 = vand.u32 2147483647, %v9487_v51  ;;  %2131 = vmatpush1.bf16.msra.mxu0 %v7951_v54  ;;  %v741_v16 = vmul.f32 0.3275911, %v9494_v32  ;;  %12580 = vst [vmem:[#allocation111_spill] sm:$0xff] %v9517_v26  ;;  %8165 = vrcp.f32 %v772_v31  ;;  %v8160_v27 = vpop.eup %8159  ;;  %v9533_v49 = vmul.f32 %v8158_v10, %v1084_v14 }
 0x171   : > { %v9515_v3 = vand.u32 2147483647, %v9497_v48  ;;  %v6949_v21 = vld [vmem:[%s12293_s5 + $0x288] sm:$0xff]  ;;  %v6948_v11 = vld [vmem:[%s12293_s5 + $0x280] sm:$0xff]  ;;  %v9529_v57 = vand.u32 2147483647, %v9503_v41  ;;  %8167 = vrcp.f32 %v771_v56  ;;  %v9537_v1 = vmul.f32 %v8160_v27, %v1083_v22  ;;  %v9556_v10 = vpop.permute.xlu1 %4347 }
 0x172   : > { %12581 = vst [vmem:[#allocation112_spill] sm:$0xff] %v9531_v61  ;;  %2777 = vperm.xlu1 %7920, %v6949_v21   ;;  %2772 = vperm.xlu0 %7919, %v6948_v11   ;;  %v992_v54 = vadd.f32 -0.28449672, %v960_v20  ;;  %v770_v42 = vadd.f32 1.0, %v9442_v24  ;;  %v1053_v53 = vadd.f32 0.2548296, %v1021_v18  ;;  %v1086_v31 = vmul.f32 %v9310_v45, %v1054_v38  ;;  %v8162_v20 = vpop.eup %8161 }
 0x173   : > { %v927_v5 = vadd.f32 1.4214138, %v895_v62  ;;  %v744_v26 = vmul.f32 0.3275911, %v9510_v2  ;;  %8169 = vrcp.f32 %v774_v6  ;;  %v773_v21 = vadd.f32 1.0, %v741_v16  ;;  %v7147_v56 = vld [vmem:[%s12293_s5 + $0x738] sm:$0xff]  ;;  %v9562_v61 = vpop.permute.xlu0 %4342 }
 0x174   : > { %v743_v14 = vmul.f32 0.3275911, %v9515_v3  ;;  %v7146_v24 = vld [vmem:[%s12293_s5 + $0x730] sm:$0xff]  ;;  %v1273_v18 = vsub.f32 1.0, %v9526_v30  ;;  %8171 = vpow2.f32 %v9432_v40  ;;  %v1119_v22 = vsub.f32 0.0, %v9302_v46  ;;  %12582 = vst [vmem:[#allocation113_spill] sm:$0xff] %v9556_v10 }
 0x175   : > { %v737_v45 = vmul.f32 0.3275911, %v9529_v57  ;;  %v7959_v38 = vld [vmem:[#allocation2 + $0xb4] ss:$8 sps:$4 sm:$0xff]   ;;  %v1276_v62 = vsub.f32 1.0, %v9533_v49  ;;  %v1024_v6 = vmul.f32 %v9374_v34, %v992_v54  ;;  %8173 = vrcp.f32 %v770_v42  ;;  %12584 = vst [vmem:[#allocation114_spill] sm:$0xff] %v9562_v61 }
 0x176   : > { %5477 = vperm.xlu1 %7920, %v7147_v56   ;;  %v7957_v16 = vld [vmem:[#allocation2 + $0xb0] ss:$8 sps:$4 sm:$0xff]   ;;  %5472 = vperm.xlu0 %7919, %v7146_v24   ;;  %v12583_v40 = vsub.f32 1.0, %v9499_v35  ;;  %v1275_v30 = vsub.f32 1.0, %v9537_v1  ;;  %v1085_v27 = vmul.f32 %v9322_v19, %v1053_v53  ;;  %v776_v56 = vadd.f32 1.0, %v744_v26  ;;  %v8164_v1 = vpop.eup %8163 }
 0x177   : > { %2132 = vmatprep.subr.bf16.mxu0 %v7959_v38  ;;  %v9564_v49 = vmul.f32 %v8162_v20, %v1086_v31  ;;  %v959_v54 = vmul.f32 %v9423_v8, %v927_v5  ;;  %8175 = vrcp.f32 %v773_v21  ;;  %v775_v42 = vadd.f32 1.0, %v743_v14  ;;  %v6951_v19 = vld [vmem:[%s12293_s5 + $0x298] sm:$0xff]  ;;  %v6950_v26 = vld [vmem:[%s12293_s5 + $0x290] sm:$0xff] }
 0x178   : > { %v1338_v11 = vsub.f32 0.0, %v12583_v40  ;;  %2133 = vmatpush1.bf16.msra.mxu0 %v7957_v16  ;;  %v1337_v10 = vsub.f32 0.0, %v1273_v18  ;;  %v1151_v24 = vmul.f32 %v1119_v22, %v9302_v46  ;;  %v769_v40 = vadd.f32 1.0, %v737_v45  ;;  %v9596_v16 = vpop.permute.xlu1 %1978 }
 0x179   : > { %v1340_v53 = vsub.f32 0.0, %v1276_v62  ;;  %v9576_v5 = vmul.f32 0.5, %v9200_v43  ;;  %v9579_v31 = vmul.f32 0.5, %v9221_v17  ;;  %v1056_v21 = vadd.f32 0.2548296, %v1024_v6  ;;  %12588 = vst [vmem:[#allocation117_spill] sm:$0xff] %v9596_v16 }
 0x17a   : > { %2787 = vperm.xlu1 %7920, %v6951_v19   ;;  %2782 = vperm.xlu0 %7919, %v6950_v26   ;;  %v9581_v46 = vpop.eup %8165  ;;  %v1339_v14 = vsub.f32 0.0, %v1275_v30  ;;  %v9584_v22 = vmul.f32 %v8164_v1, %v1085_v27  ;;  %v9587_v45 = vmul.f32 0.5, %v9270_v7  ;;  %8177 = vrcp.f32 %v776_v56  ;;  %v9604_v56 = vpop.permute.xlu0 %1973 }
 0x17b   : > { %12585 = vst [vmem:[#allocation115_spill] sm:$0xff] %v9576_v5  ;;  %v9589_v38 = vpop.eup %8167  ;;  %v12587_v43 = vsub.f32 1.0, %v9499_v35  ;;  %v1278_v20 = vsub.f32 1.0, %v9564_v49  ;;  %v991_v6 = vadd.f32 -0.28449672, %v959_v54  ;;  %8179 = vrcp.f32 %v775_v42  ;;  %12589 = vst [vmem:[#allocation118_spill] sm:$0xff] %v9604_v56 }
 0x17c   : > { %12586 = vst [vmem:[#allocation116_spill] sm:$0xff] %v9587_v45  ;;  %v1369_v27 = vsel %vm1305_vm5, %v1337_v10, %v1273_v18  ;;  %v1189_v19 = vmul.f32 1.442695, %v1151_v24  ;;  %8181 = vrcp.f32 %v769_v40  ;;  %v9602_v7 = vadd.f32 %v9107_v29, %v9119_v58  ;;  %v7148_v35 = vld [vmem:[%s12293_s5 + $0x740] sm:$0xff]  ;;  %v9646_v61 = vpop.permute.xlu1 %4357 }
 0x17d   : > { %v1370_v17 = vsel %vm1306_vm4, %v1338_v11, %v12587_v43  ;;  %v9612_v11 = vpop.eup %8169  ;;  %v1372_v59 = vsel %vm1308_vm6, %v1340_v53, %v1276_v62  ;;  %v1088_v18 = vmul.f32 %v9374_v34, %v1056_v21  ;;  %v1122_v29 = vsub.f32 0.0, %v9409_v23  ;;  %v7965_v62 = vld [vmem:[#allocation2 + $0xc4] ss:$8 sps:$4 sm:$0xff]   ;;  %v7963_v21 = vld [vmem:[#allocation2 + $0xc0] ss:$8 sps:$4 sm:$0xff]   ;;  %12592 = vst [vmem:[#allocation121_spill] sm:$0xff] %v9646_v61 }
 0x17e   : > { %v836_v10 = vmul.f32 1.0614054, %v9581_v46  ;;  %5487 = vperm.xlu1 %7920, %v7149_v63   ;;  %5482 = vperm.xlu0 %7919, %v7148_v35   ;;  %v8172_v49 = vpop.eup %8171  ;;  %v9619_v54 = vadd.f32 1.0, %v1370_v17  ;;  %v1371_v42 = vsel %vm1307_vm7, %v1339_v14, %v1275_v30  ;;  %v1277_v24 = vsub.f32 1.0, %v9584_v22  ;;  %v6953_v22 = vld [vmem:[%s12293_s5 + $0x2a8] sm:$0xff] }
 0x17f   : > { %v835_v52 = vmul.f32 1.0614054, %v9589_v38  ;;  %v9626_v34 = vpop.eup %8173  ;;  %v1401_v40 = vadd.f32 1.0, %v1369_v27  ;;  %v1342_v26 = vsub.f32 0.0, %v1278_v20  ;;  %v1023_v1 = vmul.f32 %v9423_v8, %v991_v6  ;;  %2134 = vmatprep.subr.bf16.mxu0 %v7965_v62  ;;  %v6952_v62 = vld [vmem:[%s12293_s5 + $0x2a0] sm:$0xff] }
 0x180   : > { %12590 = vst [vmem:[#allocation119_spill] sm:$0xff] %v9626_v34  ;;  %v1124_v53 = vsub.f32 0.0, %v9445_v60  ;;  %v9630_v43 = vadd.f32 1.0, %v1372_v59  ;;  %v838_v47 = vmul.f32 1.0614054, %v9612_v11  ;;  %v9641_v27 = vadd.f32 1.0, %v1371_v42  ;;  %2135 = vmatpush1.bf16.msra.mxu0 %v7963_v21 }
 0x181   : > { %v9634_v14 = vmul.f32 0.70710677, %v9602_v7  ;;  %v9639_v17 = vpop.eup %8175  ;;  %v9643_v6 = vmul.f32 %v8172_v49, %v1088_v18  ;;  %v1154_v63 = vmul.f32 %v1122_v29, %v9409_v23  ;;  %v868_v35 = vadd.f32 -1.4531521, %v836_v10  ;;  %v7956_v59 = vld [vmem:[#allocation2 + $0x284] ss:$8 sps:$4 sm:$0xff]   ;;  %v9655_v49 = vpop.permute.xlu0 %4352 }
 0x182   : > { %2797 = vperm.xlu1 %7920, %v6953_v22   ;;  %v1341_v30 = vsub.f32 0.0, %v1277_v24  ;;  %v834_v56 = vmul.f32 1.0614054, %v9626_v34  ;;  %v9653_v42 = vmul.f32 0.5, %v9478_v44  ;;  %v867_v18 = vadd.f32 -1.4531521, %v835_v52  ;;  %2792 = vperm.xlu0 %7919, %v6952_v62  }
 0x183   : > { %12591 = vst [vmem:[#allocation120_spill] sm:$0xff] %v9643_v6  ;;  %12594 = vst [vmem:[#allocation123_spill] sm:$0xff] %v9655_v49  ;;  %v1374_v23 = vsel %vm1310_vm8, %v1342_v26, %v1278_v20  ;;  %v1055_v29 = vadd.f32 0.2548296, %v1023_v1  ;;  %v1156_v10 = vmul.f32 %v1124_v53, %v9445_v60  ;;  %v9662_v21 = vadd.f32 %v9119_v58, %v9111_v28 }
 0x184   : > { %12593 = vst [vmem:[#allocation122_spill] sm:$0xff] %v9653_v42  ;;  %4555 = vmatprep.subr.bf16.mxu1 %v7956_v59  ;;  %v9664_v22 = vpop.eup %8177  ;;  %8183 = vpow2.f32 %v1189_v19  ;;  %v870_v44 = vadd.f32 -1.4531521, %v838_v47  ;;  %v837_v52 = vmul.f32 1.0614054, %v9639_v17  ;;  %v9676_v60 = vmul.f32 0.5, %v9386_v39 }
 0x185   : > { %v9668_v49 = vand.u32 2147483647, %v9634_v14  ;;  %v9670_v62 = vpop.eup %8179  ;;  %v9673_v20 = vmul.f32 1.442695, %v1154_v63  ;;  %v900_v28 = vmul.f32 %v9581_v46, %v868_v35  ;;  %v9681_v19 = vadd.f32 1.0, %v1374_v23  ;;  %v9693_v35 = vpop.permute.xlu1 %4367 }
 0x186   : > { %v9679_v26 = vpop.eup %8181  ;;  %v866_v1 = vadd.f32 -1.4531521, %v834_v56  ;;  %v899_v53 = vmul.f32 %v9589_v38, %v867_v18  ;;  %v1123_v47 = vsub.f32 0.0, %v9452_v37  ;;  %v1373_v59 = vsel %vm1309_vm9, %v1341_v30, %v1277_v24  ;;  %12596 = vst [vmem:[#allocation125_spill] sm:$0xff] %v9693_v35  ;;  %v9698_v16 = vpop.permute.xlu0 %4362  ;;  %v7969_v35 = vld [vmem:[#allocation2 + $0xd0] ss:$8 sps:$4 sm:$0xff]  }
 0x187   : > { %12595 = vst [vmem:[#allocation124_spill] sm:$0xff] %v9681_v19  ;;  %v9687_v36 = vmul.f32 1.442695, %v1156_v10  ;;  %v840_v63 = vmul.f32 1.0614054, %v9664_v22  ;;  %v902_v23 = vmul.f32 %v9612_v11, %v870_v44  ;;  %12597 = vst [vmem:[#allocation126_spill] sm:$0xff] %v9698_v16  ;;  %v9702_v33 = vmul.f32 %v9619_v54, %v9325_v15 }
 0x188   : > { %v9691_v39 = vmul.f32 0.70710677, %v9662_v21  ;;  %v869_v61 = vadd.f32 -1.4531521, %v837_v52  ;;  %v839_v56 = vmul.f32 1.0614054, %v9670_v62  ;;  %v9705_v24 = vmul.f32 %v1401_v40, %v9334_v55 }
 0x189   : > { %v746_v18 = vmul.f32 0.3275911, %v9668_v49  ;;  %12598 = vst [vmem:[#allocation127_spill] sm:$0xff] %v9702_v33  ;;  %v833_v30 = vmul.f32 1.0614054, %v9679_v26  ;;  %v9708_v42 = vadd.f32 1.0, %v1373_v59  ;;  %v898_v44 = vmul.f32 %v9626_v34, %v866_v1 }
 0x18a   : > { %12599 = vst [vmem:[#allocation128_spill] sm:$0xff] %v9705_v24  ;;  %v932_v10 = vadd.f32 1.4214138, %v900_v28  ;;  %v931_v52 = vadd.f32 1.4214138, %v899_v53  ;;  %v9713_v45 = vadd.f32 %v9124_v12, %v9119_v58  ;;  %v7151_v15 = vld [vmem:[%s12293_s5 + $0x758] sm:$0xff]  ;;  %v1155_v40 = vmul.f32 %v1123_v47, %v9452_v37 }
 0x18b   : > { %v7971_v16 = vld [vmem:[#allocation2 + $0xd4] ss:$8 sps:$4 sm:$0xff]   ;;  %v12600_v55 = vsub.f32 1.0, %v9643_v6  ;;  %v872_v28 = vadd.f32 -1.4531521, %v840_v63  ;;  %5497 = vperm.xlu1 %7920, %v7151_v15   ;;  %v901_v53 = vmul.f32 %v9639_v17, %v869_v61  ;;  %v778_v5 = vadd.f32 1.0, %v746_v18 }
 0x18c   : > { %v9724_v59 = vand.u32 2147483647, %v9691_v39  ;;  %v7150_v12 = vld [vmem:[%s12293_s5 + $0x750] sm:$0xff]  ;;  %v934_v1 = vadd.f32 1.4214138, %v902_v23  ;;  %2136 = vmatprep.subr.bf16.mxu0 %v7971_v16  ;;  %v6955_v37 = vld [vmem:[%s12293_s5 + $0x2b8] sm:$0xff]  ;;  %v9735_v47 = vmul.f32 %v9630_v43, %v9337_v0  ;;  %v9739_v63 = vmul.f32 %v9641_v27, %v9353_v50 }
 0x18d   : > { %v9720_v54 = vsub.f32 0.0, %v12600_v55  ;;  %v871_v19 = vadd.f32 -1.4531521, %v839_v56  ;;  %5492 = vperm.xlu0 %7919, %v7150_v12   ;;  %v9742_v23 = vmul.f32 %v9423_v8, %v1055_v29  ;;  %v1126_v61 = vsub.f32 0.0, %v9462_v4  ;;  %v9745_v56 = vpop.permute.xlu1 %4377  ;;  %2137 = vmatpush1.bf16.msra.mxu0 %v7969_v35  ;;  %v7972_v16 = vld [vmem:[#allocation2 + $0xe0] ss:$8 sps:$4 sm:$0xff]   ;;  %v9758_v29 = vpop.permute.xlu0 %4372 }
 0x18e   : > { %12602 = vst [vmem:[#allocation130_spill] sm:$0xff] %v9735_v47  ;;  %12603 = vst [vmem:[#allocation131_spill] sm:$0xff] %v9739_v63  ;;  %v7974_v18 = vld [vmem:[#allocation2 + $0xe4] ss:$8 sps:$4 sm:$0xff]   ;;  %v6954_v15 = vld [vmem:[%s12293_s5 + $0x2b0] sm:$0xff]  ;;  %v9750_v0 = vpop.eup %8183  ;;  %v964_v27 = vmul.f32 %v9581_v46, %v932_v10  ;;  %v963_v35 = vmul.f32 %v9589_v38, %v931_v52  ;;  %v904_v12 = vmul.f32 %v9664_v22, %v872_v28  ;;  %8185 = vrcp.f32 %v778_v5 }
 0x18f   : > { %12601 = vst [vmem:[#allocation129_spill] sm:$0xff] %v9720_v54  ;;  %12604 = vst [vmem:[#allocation132_spill] sm:$0xff] %v9745_v56  ;;  %v9752_v43 = vadd.f32 1.4214138, %v898_v44  ;;  %v865_v50 = vadd.f32 -1.4531521, %v833_v30  ;;  %2138 = vmatprep.subr.bf16.mxu0 %v7974_v18  ;;  %2807 = vperm.xlu1 %7920, %v6955_v37   ;;  %v903_v44 = vmul.f32 %v9670_v62, %v871_v19  ;;  %8187 = vpow2.f32 %v9673_v20 }
 0x190   : > { %v9756_v8 = vmul.f32 0.70710677, %v9713_v45  ;;  %12605 = vst [vmem:[#allocation133_spill] sm:$0xff] %v9758_v29  ;;  %v1197_v55 = vmul.f32 1.442695, %v1155_v40  ;;  %v9766_v30 = vadd.f32 %v9119_v58, %v9130_v9  ;;  %v7153_v10 = vld [vmem:[%s12293_s5 + $0x768] sm:$0xff]  ;;  %v966_v52 = vmul.f32 %v9612_v11, %v934_v1 }
 0x191   : > { %v745_v56 = vmul.f32 0.3275911, %v9724_v59  ;;  %v933_v47 = vadd.f32 1.4214138, %v901_v53  ;;  %2802 = vperm.xlu0 %7919, %v6954_v15   ;;  %v1158_v40 = vmul.f32 %v1126_v61, %v9462_v4  ;;  %v1125_v28 = vsub.f32 0.0, %v9494_v32  ;;  %2139 = vmatpush1.bf16.msra.mxu0 %v7972_v16  ;;  %v7152_v5 = vld [vmem:[%s12293_s5 + $0x760] sm:$0xff]  ;;  %v9784_v16 = vpop.permute.xlu1 %4387 }
 0x192   : > { %v1128_v53 = vsub.f32 0.0, %v9510_v2  ;;  %v7978_v9 = vld [vmem:[#allocation2 + $0xf0] ss:$8 sps:$4 sm:$0xff]   ;;  %v897_v58 = vmul.f32 %v9679_v26, %v865_v50  ;;  %v996_v19 = vadd.f32 -0.28449672, %v964_v27  ;;  %v1127_v18 = vsub.f32 0.0, %v9515_v3  ;;  %v9791_v27 = vpop.permute.xlu0 %4382 }
 0x193   : > { %v9781_v37 = vand.u32 2147483647, %v9756_v8  ;;  %v7980_v1 = vld [vmem:[#allocation2 + $0xf4] ss:$8 sps:$4 sm:$0xff]   ;;  %v995_v4 = vadd.f32 -0.28449672, %v963_v35  ;;  %5507 = vperm.xlu1 %7920, %v7153_v10   ;;  %v965_v54 = vmul.f32 %v9639_v17, %v933_v47  ;;  %8189 = vpow2.f32 %v9687_v36 }
 0x194   : > { %v936_v61 = vadd.f32 1.4214138, %v904_v12  ;;  %v777_v15 = vadd.f32 1.0, %v745_v56  ;;  %12606 = vst [vmem:[#allocation134_spill] sm:$0xff] %v9784_v16  ;;  %v1121_v29 = vsub.f32 0.0, %v9529_v57  ;;  %12607 = vst [vmem:[#allocation135_spill] sm:$0xff] %v9791_v27  ;;  %2140 = vmatprep.subr.bf16.mxu0 %v7980_v1  ;;  %v1157_v10 = vmul.f32 %v1125_v28, %v9494_v32 }
 0x195   : > { %v935_v20 = vadd.f32 1.4214138, %v903_v44  ;;  %v9789_v50 = vmul.f32 0.70710677, %v9766_v30  ;;  %5502 = vperm.xlu0 %7919, %v7152_v5   ;;  %v6957_v35 = vld [vmem:[%s12293_s5 + $0x2c8] sm:$0xff]  ;;  %2141 = vmatpush1.bf16.msra.mxu0 %v7978_v9  ;;  %v6956_v47 = vld [vmem:[%s12293_s5 + $0x2c0] sm:$0xff]  ;;  %v1028_v27 = vmul.f32 %v9581_v46, %v996_v19  ;;  %v1160_v5 = vmul.f32 %v1128_v53, %v9510_v2 }
 0x196   : > { %v998_v56 = vadd.f32 -0.28449672, %v966_v52  ;;  %v1203_v12 = vmul.f32 1.442695, %v1158_v40  ;;  %v929_v44 = vadd.f32 1.4214138, %v897_v58  ;;  %v1027_v16 = vmul.f32 %v9589_v38, %v995_v4 }
 0x197   : > { %v748_v1 = vmul.f32 0.3275911, %v9781_v37  ;;  %v968_v36 = vmul.f32 %v9664_v22, %v936_v61  ;;  %v1159_v52 = vmul.f32 %v1127_v18, %v9515_v3  ;;  %8191 = vrcp.f32 %v777_v15  ;;  %2817 = vperm.xlu1 %7920, %v6957_v35   ;;  %v7155_v2 = vld [vmem:[%s12293_s5 + $0x778] sm:$0xff]  ;;  %v7986_v58 = vld [vmem:[#allocation2 + $0x4] ss:$8 sps:$4 sm:$0xff]   ;;  %v9835_v15 = vpop.permute.xlu0 %4392 }
 0x198   : > { %8193 = vpow2.f32 %v1197_v55  ;;  %v997_v32 = vadd.f32 -0.28449672, %v965_v54  ;;  %v967_v40 = vmul.f32 %v9670_v62, %v935_v20  ;;  %v9809_v28 = vand.u32 2147483647, %v9789_v50  ;;  %v9819_v55 = vpop.permute.xlu1 %4397  ;;  %v7154_v54 = vld [vmem:[%s12293_s5 + $0x770] sm:$0xff]  ;;  %v9824_v19 = vpop.eup %8185  ;;  %12610 = vst [vmem:[#allocation138_spill] sm:$0xff] %v9835_v15  ;;  %2399 = vmatprep.subr.bf16.mxu0 %v7986_v58 }
 0x199   : > { %2812 = vperm.xlu0 %7919, %v6956_v47   ;;  %v9816_v53 = vmul.f32 %v9750_v0, %v9742_v23  ;;  %v1030_v3 = vmul.f32 %v9612_v11, %v998_v56  ;;  %8195 = vpow2.f32 %v1203_v12  ;;  %v1201_v9 = vmul.f32 1.442695, %v1157_v10  ;;  %12609 = vst [vmem:[#allocation137_spill] sm:$0xff] %v9819_v55  ;;  %v9829_v23 = vld [vmem:[%s12290_s2] ss:$0 sm:$0xff]  ;;  %v12624_v55 = vld [vmem:[#allocation101_spill] sm:$0xff] }
 0x19a   : > { %v1060_v4 = vadd.f32 0.2548296, %v1028_v27  ;;  %v1207_v61 = vmul.f32 1.442695, %v1160_v5  ;;  %v780_v18 = vadd.f32 1.0, %v748_v1  ;;  %v9833_v0 = vadd.f32 %v9829_v23, %v9146_v13  ;;  %v9838_v27 = vpop.eup %8187 }
 0x19b   : > { %12608 = vst [vmem:[#allocation136_spill] sm:$0xff] %v9816_v53  ;;  %v961_v20 = vmul.f32 %v9679_v26, %v929_v44  ;;  %v1059_v35 = vadd.f32 0.2548296, %v1027_v16  ;;  %v1000_v56 = vadd.f32 -0.28449672, %v968_v36  ;;  %5517 = vperm.xlu1 %7920, %v7155_v2   ;;  %12611 = vst [vmem:[#allocation139_spill] sm:$0xff] %v9838_v27  ;;  %v1029_v47 = vmul.f32 %v9639_v17, %v997_v32 }
 0x19c   : > { %v1205_v12 = vmul.f32 1.442695, %v1159_v52  ;;  %v9841_v10 = vmul.f32 0.5, %v9391_v25  ;;  %v999_v5 = vadd.f32 -0.28449672, %v967_v40  ;;  %v6959_v44 = vld [vmem:[%s12293_s5 + $0x2d8] sm:$0xff]  ;;  %v1153_v16 = vmul.f32 %v1121_v29, %v9529_v57 }
 0x19d   : > { %v747_v13 = vmul.f32 0.3275911, %v9809_v28  ;;  %5512 = vperm.xlu0 %7919, %v7154_v54   ;;  %v1062_v1 = vadd.f32 0.2548296, %v1030_v3  ;;  %8197 = vpow2.f32 %v1201_v9  ;;  %v842_v36 = vmul.f32 1.0614054, %v9824_v19  ;;  %v8190_v2 = vpop.eup %8189  ;;  %v9862_v9 = vpop.permute.xlu1 %4407 }
 0x19e   : > { %v6958_v25 = vld [vmem:[%s12293_s5 + $0x2d0] sm:$0xff]  ;;  %v962_v32 = vmul.f32 %v9626_v34, %v9752_v43  ;;  %8199 = vrcp.f32 %v780_v18  ;;  %v9857_v40 = vmul.f32 0.70710677, %v9833_v0  ;;  %v993_v54 = vadd.f32 -0.28449672, %v961_v20  ;;  %12612 = vst [vmem:[#allocation140_spill] sm:$0xff] %v9862_v9  ;;  %v9865_v18 = vpop.permute.xlu0 %4402 }
 0x19f   : > { %v1092_v57 = vmul.f32 %v9581_v46, %v1060_v4  ;;  %v1091_v29 = vmul.f32 %v9589_v38, %v1059_v35  ;;  %v1032_v3 = vmul.f32 %v9664_v22, %v1000_v56  ;;  %2827 = vperm.xlu1 %7920, %v6959_v44   ;;  %v1061_v58 = vadd.f32 0.2548296, %v1029_v47  ;;  %12613 = vst [vmem:[#allocation141_spill] sm:$0xff] %v9865_v18  ;;  %v7157_v20 = vld [vmem:[%s12293_s5 + $0x788] sm:$0xff]  ;;  %v12614_v35 = vld [vmem:[#allocation64_spill] sm:$0xff] }
 0x1a0   : > { %8201 = vpow2.f32 %v1207_v61  ;;  %v1031_v52 = vmul.f32 %v9670_v62, %v999_v5  ;;  %v779_v43 = vadd.f32 1.0, %v747_v13  ;;  %v1094_v38 = vmul.f32 %v9612_v11, %v1062_v1  ;;  %v7156_v61 = vld [vmem:[%s12293_s5 + $0x780] sm:$0xff] }
 0x1a1   : > { %2822 = vperm.xlu0 %7919, %v6958_v25   ;;  %v9870_v46 = vpop.eup %8191  ;;  %8203 = vpow2.f32 %v1205_v12  ;;  %v874_v4 = vadd.f32 -1.4531521, %v842_v36  ;;  %v9875_v56 = vadd.f32 %v9829_v23, %v12614_v35  ;;  %v9882_v5 = vmul.f32 %v9708_v42, %v9579_v31  ;;  %v6961_v42 = vld [vmem:[%s12293_s5 + $0x2e8] sm:$0xff] }
 0x1a2   : > { %v8194_v47 = vpop.eup %8193  ;;  %v994_v13 = vadd.f32 -0.28449672, %v962_v32  ;;  %v1193_v44 = vmul.f32 1.442695, %v1153_v16  ;;  %v9885_v25 = vand.u32 2147483647, %v9857_v40  ;;  %v1025_v12 = vmul.f32 %v9679_v26, %v993_v54 }
 0x1a3   : > { %12615 = vst [vmem:[#allocation64_spill] sm:$0xff] %v9882_v5  ;;  %v8196_v11 = vpop.eup %8195  ;;  %v9888_v1 = vmul.f32 %v8190_v2, %v1092_v57  ;;  %v9890_v36 = vmul.f32 %v8194_v47, %v1091_v29  ;;  %v1064_v35 = vadd.f32 0.2548296, %v1032_v3  ;;  %5527 = vperm.xlu1 %7920, %v7157_v20   ;;  %v1093_v18 = vmul.f32 %v9639_v17, %v1061_v58  ;;  %v12616_v16 = vld [vmem:[#allocation97_spill] sm:$0xff]  ;;  %v9906_v17 = vpop.permute.xlu1 %4852  ;;  %v12621_v20 = vld [vmem:[#allocation100_spill] sm:$0xff] }
 0x1a4   : > { %v1063_v9 = vadd.f32 0.2548296, %v1031_v52  ;;  %v841_v31 = vmul.f32 1.0614054, %v9870_v46  ;;  %8205 = vrcp.f32 %v779_v43  ;;  %v9898_v32 = vmul.f32 0.5, %v12616_v16  ;;  %12617 = vst [vmem:[#allocation97_spill] sm:$0xff] %v9906_v17 }
 0x1a5   : > { %5522 = vperm.xlu0 %7919, %v7156_v61   ;;  %v9900_v2 = vmul.f32 %v8196_v11, %v1094_v38  ;;  %v906_v54 = vmul.f32 %v9824_v19, %v874_v4  ;;  %v9904_v57 = vmul.f32 0.70710677, %v9875_v56  ;;  %v6960_v52 = vld [vmem:[%s12293_s5 + $0x2e0] sm:$0xff]  ;;  %v12618_v29 = vsub.f32 1.0, %v9816_v53  ;;  %v12620_v43 = vld [vmem:[#allocation99_spill] sm:$0xff]  ;;  %v9919_v4 = vpop.permute.xlu0 %4847  ;;  %v12623_v16 = vld [vmem:[#allocation102_spill] sm:$0xff] }
 0x1a6   : > { %v1026_v58 = vmul.f32 %v9626_v34, %v994_v13  ;;  %vm1316_vm10 = vcmp.lt.f32.partialorder %v12620_v43, 0.0  ;;  %vm1315_vm11 = vcmp.lt.f32.partialorder %v12621_v20, 0.0  ;;  %v750_v38 = vmul.f32 0.3275911, %v9885_v25  ;;  %12622 = vst [vmem:[#allocation99_spill] sm:$0xff] %v9919_v4  ;;  %v7161_v43 = vld [vmem:[%s12293_s5 + $0x7a8] sm:$0xff] }
 0x1a7   : > { %v9913_v3 = vsub.f32 0.0, %v12618_v29  ;;  %v8198_v61 = vpop.eup %8197  ;;  %v1284_v47 = vsub.f32 1.0, %v9888_v1  ;;  %v1283_v11 = vsub.f32 1.0, %v9890_v36  ;;  %v9924_v17 = vmul.f32 0.5, %v12623_v16  ;;  %2837 = vperm.xlu1 %7920, %v6961_v42   ;;  %v7159_v1 = vld [vmem:[%s12293_s5 + $0x798] sm:$0xff]  ;;  %v9953_v34 = vpop.permute.xlu1 %4862 }
 0x1a8   : > { %v1096_v29 = vmul.f32 %v9664_v22, %v1064_v35  ;;  %v9927_v13 = vpop.eup %8199  ;;  %v1057_v15 = vadd.f32 0.2548296, %v1025_v12  ;;  %vm1318_vm12 = vcmp.lt.f32.partialorder %v12624_v55, 0.0  ;;  %v9930_v27 = vmul.f32 %v8198_v61, %v1093_v18  ;;  %v7158_v18 = vld [vmem:[%s12293_s5 + $0x790] sm:$0xff]  ;;  %12628 = vst [vmem:[#allocation102_spill] sm:$0xff] %v9953_v34 }
 0x1a9   : > { %12619 = vst [vmem:[#allocation142_spill] sm:$0xff] %v9913_v3  ;;  %v1095_v4 = vmul.f32 %v9670_v62, %v1063_v9  ;;  %v873_v6 = vadd.f32 -1.4531521, %v841_v31  ;;  %2832 = vperm.xlu0 %7919, %v6960_v52   ;;  %8207 = vpow2.f32 %v1193_v44  ;;  %v1286_v36 = vsub.f32 1.0, %v9900_v2  ;;  %v12626_v62 = vld [vmem:[#allocation105_spill] sm:$0xff]  ;;  %v9962_v41 = vpop.permute.xlu0 %4857 }
 0x1aa   : > { %v938_v22 = vadd.f32 1.4214138, %v906_v54  ;;  %v9938_v35 = vand.u32 2147483647, %v9904_v57  ;;  %v8202_v12 = vpop.eup %8201  ;;  %v9943_v42 = vadd.f32 0.2548296, %v1026_v58 }
 0x1ab   : > { %v9946_v9 = vmul.f32 0.5, %v12626_v62  ;;  %v1130_v31 = vsub.f32 0.0, %v9668_v49  ;;  %v782_v52 = vadd.f32 1.0, %v750_v38  ;;  %v8204_v44 = vpop.eup %8203  ;;  %v1348_v61 = vsub.f32 0.0, %v1284_v47  ;;  %v12627_v54 = vld [vmem:[#allocation106_spill] sm:$0xff]  ;;  %5537 = vperm.xlu1 %7920, %v7159_v1   ;;  %12630 = vst [vmem:[#allocation101_spill] sm:$0xff] %v9962_v41 }
 0x1ac   : > { %12625 = vst [vmem:[#allocation100_spill] sm:$0xff] %v9943_v42  ;;  %v1347_v2 = vsub.f32 0.0, %v1283_v11  ;;  %vm1317_vm13 = vcmp.lt.f32.partialorder %v12627_v54, 0.0  ;;  %v9950_v16 = vmul.f32 %v8202_v12, %v1096_v29  ;;  %v844_v5 = vmul.f32 1.0614054, %v9927_v13  ;;  %v12629_v42 = vld [vmem:[#allocation107_spill] sm:$0xff] }
 0x1ad   : > { %v1285_v58 = vsub.f32 1.0, %v9930_v27  ;;  %v9957_v62 = vmul.f32 0.5, %v12629_v42  ;;  %v9959_v33 = vmul.f32 %v8204_v44, %v1095_v4  ;;  %v905_v38 = vmul.f32 %v9870_v46, %v873_v6  ;;  %5532 = vperm.xlu0 %7919, %v7158_v18   ;;  %v6963_v29 = vld [vmem:[%s12293_s5 + $0x2f8] sm:$0xff]  ;;  %v6962_v4 = vld [vmem:[%s12293_s5 + $0x2f0] sm:$0xff]  ;;  %v10012_v55 = vpop.permute.xlu0 %4867 }
 0x1ae   : > { %v9968_v12 = vmul.f32 %v9679_v26, %v1057_v15  ;;  %v1350_v1 = vsub.f32 0.0, %v1286_v36  ;;  %v970_v27 = vmul.f32 %v9824_v19, %v938_v22  ;;  %v749_v42 = vmul.f32 0.3275911, %v9938_v35  ;;  %v9975_v6 = vpop.eup %8205  ;;  %v12632_v26 = vld [vmem:[#allocation65_spill] sm:$0xff]  ;;  %12638 = vst [vmem:[#allocation143_spill] sm:$0xff] %v10012_v55 }
 0x1af   : > { %vm1320_vm14 = vcmp.lt.f32.partialorder %v9487_v51, 0.0  ;;  %v9979_v18 = vmul.f32 0.5, %v9602_v7  ;;  %v1162_v44 = vmul.f32 %v1130_v31, %v9668_v49  ;;  %8209 = vrcp.f32 %v782_v52  ;;  %2847 = vperm.xlu1 %7920, %v6963_v29   ;;  %v10000_v52 = vpop.permute.xlu1 %4872  ;;  %v6981_v55 = vld [vmem:[%s12293_s5 + $0x308] sm:$0xff] }
 0x1b0   : > { %12631 = vst [vmem:[#allocation105_spill] sm:$0xff] %v9968_v12  ;;  %v9984_v15 = vadd.f32 %v9829_v23, %v12632_v26  ;;  %v1380_v22 = vsel %vm1316_vm10, %v1348_v61, %v1284_v47  ;;  %v1379_v41 = vsel %vm1315_vm11, %v1347_v2, %v1283_v11  ;;  %v1288_v34 = vsub.f32 1.0, %v9950_v16  ;;  %12634 = vst [vmem:[#allocation107_spill] sm:$0xff] %v10000_v52 }
 0x1b1   : > { %v876_v63 = vadd.f32 -1.4531521, %v844_v5  ;;  %v1349_v12 = vsub.f32 0.0, %v1285_v58  ;;  %v1287_v7 = vsub.f32 1.0, %v9959_v33  ;;  %vm1319_vm15 = vcmp.lt.f32.partialorder %v9497_v48, 0.0  ;;  %2842 = vperm.xlu0 %7919, %v6962_v4   ;;  %v7160_v33 = vld [vmem:[%s12293_s5 + $0x7a0] sm:$0xff] }
 0x1b2   : > { %12633 = vst [vmem:[#allocation106_spill] sm:$0xff] %v9984_v15  ;;  %v937_v49 = vadd.f32 1.4214138, %v905_v38  ;;  %v1129_v31 = vsub.f32 0.0, %v9724_v59  ;;  %v1382_v20 = vsel %vm1318_vm12, %v1350_v1, %v1286_v36  ;;  %v1002_v47 = vadd.f32 -0.28449672, %v970_v27 }
 0x1b3   : > { %v843_v5 = vmul.f32 1.0614054, %v9975_v6  ;;  %v781_v11 = vadd.f32 1.0, %v749_v42  ;;  %v1412_v61 = vadd.f32 1.0, %v1380_v22  ;;  %v1211_v2 = vmul.f32 1.442695, %v1162_v44  ;;  %v10014_v36 = vpop.eup %8207  ;;  %5547 = vperm.xlu1 %7920, %v7161_v43  }
 0x1b4   : > { %v10006_v16 = vmul.f32 0.70710677, %v9984_v15  ;;  %v12636_v38 = vld [vmem:[#allocation66_spill] sm:$0xff]  ;;  %12639 = vst [vmem:[#allocation144_spill] sm:$0xff] %v10014_v36  ;;  %v1411_v1 = vadd.f32 1.0, %v1379_v41  ;;  %v1352_v27 = vsub.f32 0.0, %v1288_v34  ;;  %v908_v42 = vmul.f32 %v9927_v13, %v876_v63 }
 0x1b5   : > { %v10010_v29 = vadd.f32 %v9829_v23, %v12636_v38  ;;  %v1132_v4 = vsub.f32 0.0, %v9781_v37  ;;  %v1414_v26 = vadd.f32 1.0, %v1382_v20  ;;  %v1381_v44 = vsel %vm1317_vm13, %v1349_v12, %v1285_v58  ;;  %5542 = vperm.xlu0 %7919, %v7160_v33   ;;  %v6980_v43 = vld [vmem:[%s12293_s5 + $0x300] sm:$0xff]  ;;  %v7975_v36 = vld [vmem:[#allocation2 + $0x2b0] ss:$8 sps:$4 sm:$0xff]  }
 0x1b6   : > { %12635 = vst [vmem:[#allocation65_spill] sm:$0xff] %v10006_v16  ;;  %v969_v22 = vmul.f32 %v9870_v46, %v937_v49  ;;  %v1161_v38 = vmul.f32 %v1129_v31, %v9724_v59  ;;  %v1351_v41 = vsub.f32 0.0, %v1287_v7  ;;  %v1034_v52 = vmul.f32 %v9824_v19, %v1002_v47  ;;  %v10044_v47 = vpop.permute.xlu1 %4882 }
 0x1b7   : > { %12637 = vst [vmem:[#allocation66_spill] sm:$0xff] %v10010_v29  ;;  %v875_v63 = vadd.f32 -1.4531521, %v843_v5  ;;  %8211 = vrcp.f32 %v781_v11  ;;  %v10030_v54 = vmul.f32 %v1412_v61, %v9676_v60  ;;  %v10033_v59 = vand.u32 2147483647, %v10006_v16  ;;  %12642 = vst [vmem:[#allocation147_spill] sm:$0xff] %v10044_v47  ;;  %3292 = vperm.xlu1 %7920, %v6981_v55  }
 0x1b8   : > { %8213 = vpow2.f32 %v1211_v2  ;;  %v10036_v58 = vmul.f32 0.70710677, %v10010_v29  ;;  %v1384_v12 = vsel %vm1320_vm14, %v1352_v27, %v1288_v34  ;;  %v10041_v49 = vmul.f32 0.5, %v9662_v21  ;;  %v10054_v34 = vpop.permute.xlu0 %4877  ;;  %v7163_v21 = vld [vmem:[%s12293_s5 + $0x7b8] sm:$0xff] }
 0x1b9   : > { %12640 = vst [vmem:[#allocation145_spill] sm:$0xff] %v10030_v54  ;;  %v940_v31 = vadd.f32 1.4214138, %v908_v42  ;;  %v1164_v20 = vmul.f32 %v1132_v4, %v9781_v37  ;;  %v10046_v60 = vpop.eup %8209  ;;  %v10049_v5 = vmul.f32 %v1411_v1, %v9841_v10  ;;  %v10052_v11 = vmul.f32 %v1414_v26, %v9898_v32  ;;  %12645 = vst [vmem:[#allocation150_spill] sm:$0xff] %v10054_v34  ;;  %v7162_v32 = vld [vmem:[%s12293_s5 + $0x7b0] sm:$0xff]  ;;  %v12646_v4 = vld [vmem:[#allocation69_spill] sm:$0xff] }
 0x1ba   : > { %12641 = vst [vmem:[#allocation146_spill] sm:$0xff] %v10036_v58  ;;  %v1413_v33 = vadd.f32 1.0, %v1381_v44  ;;  %v1001_v51 = vadd.f32 -0.28449672, %v969_v22  ;;  %3287 = vperm.xlu0 %7919, %v6980_v43   ;;  %v1383_v37 = vsel %vm1319_vm15, %v1351_v41, %v1287_v7  ;;  %v1066_v61 = vadd.f32 0.2548296, %v1034_v52 }
 0x1bb   : > { %12643 = vst [vmem:[#allocation148_spill] sm:$0xff] %v10049_v5  ;;  %12644 = vst [vmem:[#allocation149_spill] sm:$0xff] %v10052_v11  ;;  %v1209_v2 = vmul.f32 1.442695, %v1161_v38  ;;  %v907_v10 = vmul.f32 %v9975_v6, %v875_v63  ;;  %v1416_v55 = vadd.f32 1.0, %v1384_v12  ;;  %v10066_v1 = vmul.f32 0.5, %v9713_v45  ;;  %5557 = vperm.xlu1 %7920, %v7163_v21  }
 0x1bc   : > { %v752_v27 = vmul.f32 0.3275911, %v10033_v59  ;;  %v10070_v42 = vand.u32 2147483647, %v10036_v58  ;;  %v972_v48 = vmul.f32 %v9927_v13, %v940_v31  ;;  %v1215_v7 = vmul.f32 1.442695, %v1164_v20  ;;  %v10091_v20 = vpop.permute.xlu1 %4892 }
 0x1bd   : > { %v846_v52 = vmul.f32 1.0614054, %v10046_v60  ;;  %v10076_v26 = vadd.f32 %v9829_v23, %v12646_v4  ;;  %v1415_v44 = vadd.f32 1.0, %v1383_v37  ;;  %v1033_v22 = vmul.f32 %v9870_v46, %v1001_v51  ;;  %v12648_v38 = vld [vmem:[#allocation70_spill] sm:$0xff]  ;;  %v6983_v63 = vld [vmem:[%s12293_s5 + $0x318] sm:$0xff]  ;;  %12650 = vst [vmem:[#allocation151_spill] sm:$0xff] %v10091_v20 }
 0x1be   : > { %v1131_v45 = vsub.f32 0.0, %v9809_v28  ;;  %v10082_v41 = vadd.f32 %v9829_v23, %v12648_v38  ;;  %5552 = vperm.xlu0 %7919, %v7162_v32   ;;  %v10088_v43 = vmul.f32 %v1413_v33, %v9924_v17  ;;  %v1098_v12 = vmul.f32 %v9824_v19, %v1066_v61  ;;  %v6982_v51 = vld [vmem:[%s12293_s5 + $0x310] sm:$0xff]  ;;  %v10103_v33 = vpop.permute.xlu0 %4887 }
 0x1bf   : > { %12647 = vst [vmem:[#allocation69_spill] sm:$0xff] %v10076_v26  ;;  %8215 = vpow2.f32 %v1209_v2  ;;  %v939_v31 = vadd.f32 1.4214138, %v907_v10  ;;  %v10097_v21 = vmul.f32 %v1416_v55, %v9946_v9  ;;  %v10100_v37 = vmul.f32 0.5, %v9766_v30  ;;  %12651 = vst [vmem:[#allocation152_spill] sm:$0xff] %v10103_v33  ;;  %3302 = vperm.xlu1 %7920, %v6983_v63   ;;  %v12654_v63 = vld [vmem:[#allocation84_spill] sm:$0xff] }
 0x1c0   : > { %12649 = vst [vmem:[#allocation70_spill] sm:$0xff] %v10082_v41  ;;  %v784_v32 = vadd.f32 1.0, %v752_v27  ;;  %v751_v17 = vmul.f32 0.3275911, %v10070_v42  ;;  %v1004_v61 = vadd.f32 -0.28449672, %v972_v48  ;;  %8217 = vpow2.f32 %v1215_v7  ;;  %v10142_v33 = vpop.permute.xlu1 %4902 }
 0x1c1   : > { %v10105_v19 = vpop.eup %8211  ;;  %v878_v2 = vadd.f32 -1.4531521, %v846_v52  ;;  %v10108_v10 = vmul.f32 0.70710677, %v10076_v26  ;;  %v10111_v9 = vmul.f32 %v1415_v44, %v9957_v62  ;;  %v1065_v30 = vadd.f32 0.2548296, %v1033_v22 }
 0x1c2   : > { %v8214_v4 = vpop.eup %8213  ;;  %v1163_v55 = vmul.f32 %v1131_v45, %v9809_v28  ;;  %v10115_v27 = vmul.f32 0.70710677, %v10082_v41  ;;  %3297 = vperm.xlu0 %7919, %v6982_v51   ;;  %v7165_v48 = vld [vmem:[%s12293_s5 + $0x7c8] sm:$0xff]  ;;  %v971_v52 = vmul.f32 %v9975_v6, %v939_v31  ;;  %v1134_v38 = vsub.f32 0.0, %v9885_v25  ;;  %v7164_v28 = vld [vmem:[%s12293_s5 + $0x7c0] sm:$0xff]  ;;  %v12655_v45 = vld [vmem:[#allocation75_spill] sm:$0xff] }
 0x1c3   : > { %12652 = vst [vmem:[#allocation153_spill] sm:$0xff] %v10108_v10  ;;  %v10120_v7 = vmul.f32 %v8214_v4, %v1098_v12  ;;  %v10126_v62 = vadd.f32 %v9829_v23, %v12654_v63  ;;  %v845_v44 = vmul.f32 1.0614054, %v10105_v19  ;;  %8219 = vrcp.f32 %v784_v32  ;;  %12657 = vst [vmem:[#allocation75_spill] sm:$0xff] %v10142_v33  ;;  %5567 = vperm.xlu1 %7920, %v7165_v48  }
 0x1c4   : > { %12653 = vst [vmem:[#allocation154_spill] sm:$0xff] %v10115_v27  ;;  %v783_v22 = vadd.f32 1.0, %v751_v17  ;;  %v10134_v12 = vadd.f32 %v9829_v23, %v12655_v45  ;;  %v1036_v31 = vmul.f32 %v9927_v13, %v1004_v61  ;;  %v910_v51 = vmul.f32 %v10046_v60, %v878_v2  ;;  %v12658_v45 = vld [vmem:[#allocation72_spill] sm:$0xff]  ;;  %v10152_v61 = vpop.permute.xlu0 %4897  ;;  %v6985_v2 = vld [vmem:[%s12293_s5 + $0x328] sm:$0xff] }
 0x1c5   : > { %v1133_v4 = vsub.f32 0.0, %v9938_v35  ;;  %v10140_v63 = vand.u32 2147483647, %v10108_v10  ;;  %v1097_v20 = vmul.f32 %v9870_v46, %v1065_v30  ;;  %v1213_v32 = vmul.f32 1.442695, %v1163_v55  ;;  %12660 = vst [vmem:[#allocation155_spill] sm:$0xff] %v10152_v61 }
 0x1c6   : > { %12656 = vst [vmem:[#allocation84_spill] sm:$0xff] %v10134_v12  ;;  %v10146_v17 = vand.u32 2147483647, %v10115_v27  ;;  %v10150_v34 = vadd.f32 %v9829_v23, %v12658_v45  ;;  %5562 = vperm.xlu0 %7919, %v7164_v28   ;;  %v1166_v48 = vmul.f32 %v1134_v38, %v9885_v25  ;;  %v12661_v46 = vld [vmem:[#allocation74_spill] sm:$0xff]  ;;  %v10164_v55 = vmul.f32 0.70710677, %v10126_v62 }
 0x1c7   : > { %v10161_v30 = vadd.f32 %v9829_v23, %v12661_v46  ;;  %v6984_v45 = vld [vmem:[%s12293_s5 + $0x320] sm:$0xff]  ;;  %v1003_v28 = vadd.f32 -0.28449672, %v971_v52  ;;  %v877_v61 = vadd.f32 -1.4531521, %v845_v44  ;;  %8221 = vrcp.f32 %v783_v22  ;;  %3312 = vperm.xlu1 %7920, %v6985_v2   ;;  %v7167_v22 = vld [vmem:[%s12293_s5 + $0x7d8] sm:$0xff] }
 0x1c8   : > { %12659 = vst [vmem:[#allocation72_spill] sm:$0xff] %v10150_v34  ;;  %v10170_v47 = vmul.f32 0.70710677, %v10134_v12  ;;  %v1068_v41 = vadd.f32 0.2548296, %v1036_v31  ;;  %v1165_v38 = vmul.f32 %v1133_v4, %v9938_v35  ;;  %v10177_v27 = vmul.f32 0.5, %v9833_v0 }
 0x1c9   : > { %12662 = vst [vmem:[#allocation74_spill] sm:$0xff] %v10161_v30  ;;  %v8216_v33 = vpop.eup %8215  ;;  %v942_v25 = vadd.f32 1.4214138, %v910_v51  ;;  %v754_v46 = vmul.f32 0.3275911, %v10140_v63  ;;  %8223 = vpow2.f32 %v1213_v32  ;;  %v10187_v35 = vmul.f32 0.5, %v9875_v56 }
 0x1ca   : > { %12663 = vst [vmem:[#allocation156_spill] sm:$0xff] %v10170_v47  ;;  %v10174_v26 = vmul.f32 %v8216_v33, %v1097_v20  ;;  %12664 = vst [vmem:[#allocation157_spill] sm:$0xff] %v10177_v27  ;;  %v753_v52 = vmul.f32 0.3275911, %v10146_v17  ;;  %v10181_v44 = vmul.f32 0.70710677, %v10150_v34  ;;  %3307 = vperm.xlu0 %7919, %v6984_v45   ;;  %v8218_v31 = vpop.eup %8217  ;;  %v10195_v33 = vpop.permute.xlu1 %4912  ;;  %v1035_v4 = vmul.f32 %v9975_v6, %v1003_v28 }
 0x1cb   : > { %12666 = vst [vmem:[#allocation159_spill] sm:$0xff] %v10187_v35  ;;  %v10190_v20 = vmul.f32 0.70710677, %v10161_v30  ;;  %v10193_v0 = vand.u32 2147483647, %v10164_v55  ;;  %12668 = vst [vmem:[#allocation161_spill] sm:$0xff] %v10195_v33  ;;  %v909_v32 = vmul.f32 %v10105_v19, %v877_v61  ;;  %v10205_v45 = vpop.permute.xlu0 %4907  ;;  %5577 = vperm.xlu1 %7920, %v7167_v22   ;;  %v974_v61 = vmul.f32 %v10046_v60, %v942_v25 }
 0x1cc   : > { %12665 = vst [vmem:[#allocation158_spill] sm:$0xff] %v10181_v44  ;;  %v7166_v51 = vld [vmem:[%s12293_s5 + $0x7d0] sm:$0xff]  ;;  %v1219_v2 = vmul.f32 1.442695, %v1166_v48  ;;  %v10203_v56 = vand.u32 2147483647, %v10170_v47 }
 0x1cd   : > { %12667 = vst [vmem:[#allocation160_spill] sm:$0xff] %v10190_v20  ;;  %12669 = vst [vmem:[#allocation162_spill] sm:$0xff] %v10205_v45  ;;  %v12670_v30 = vsub.f32 1.0, %v10120_v7  ;;  %v1217_v12 = vmul.f32 1.442695, %v1165_v38  ;;  %v1136_v33 = vsub.f32 0.0, %v10033_v59  ;;  %v10212_v29 = vpop.eup %8219  ;;  %v1100_v38 = vmul.f32 %v9927_v13, %v1068_v41 }
 0x1ce   : > { %v786_v10 = vadd.f32 1.0, %v754_v46  ;;  %v785_v28 = vadd.f32 1.0, %v753_v52  ;;  %v10217_v47 = vand.u32 2147483647, %v10181_v44  ;;  %5572 = vperm.xlu0 %7919, %v7166_v51   ;;  %v10224_v46 = vand.u32 2147483647, %v10190_v20  ;;  %v10238_v44 = vpop.permute.xlu1 %4922 }
 0x1cf   : > { %v10209_v34 = vsub.f32 0.0, %v12670_v30  ;;  %v6987_v30 = vld [vmem:[%s12293_s5 + $0x338] sm:$0xff]  ;;  %v12671_v22 = vld [vmem:[#allocation82_spill] sm:$0xff]  ;;  %v760_v25 = vmul.f32 0.3275911, %v10193_v0  ;;  %vm1322_vm0 = vcmp.lt.f32.partialorder %v9634_v14, 0.0  ;;  %8225 = vpow2.f32 %v1219_v2  ;;  %v10248_v16 = vpop.permute.xlu0 %4917 }
 0x1d0   : > { %v10228_v45 = vadd.f32 %v9829_v23, %v12671_v22  ;;  %v6986_v52 = vld [vmem:[%s12293_s5 + $0x330] sm:$0xff]  ;;  %v1067_v51 = vadd.f32 0.2548296, %v1035_v4  ;;  %v941_v48 = vadd.f32 1.4214138, %v909_v32  ;;  %v1135_v20 = vsub.f32 0.0, %v10070_v42  ;;  %3322 = vperm.xlu1 %7920, %v6987_v30  }
 0x1d1   : > { %v758_v13 = vmul.f32 0.3275911, %v10203_v56  ;;  %v848_v41 = vmul.f32 1.0614054, %v10212_v29  ;;  %8227 = vrcp.f32 %v786_v10  ;;  %v792_v22 = vadd.f32 1.0, %v760_v25  ;;  %12673 = vst [vmem:[#allocation163_spill] sm:$0xff] %v10238_v44  ;;  %v10240_v15 = vpop.eup %8221 }
 0x1d2   : > { %12672 = vst [vmem:[#allocation82_spill] sm:$0xff] %v10228_v45  ;;  %vm1321_vm1 = vcmp.lt.f32.partialorder %v9691_v39, 0.0  ;;  %v1006_v58 = vadd.f32 -0.28449672, %v974_v61  ;;  %8229 = vrcp.f32 %v785_v28  ;;  %v756_v4 = vmul.f32 0.3275911, %v10217_v47  ;;  %3317 = vperm.xlu0 %7919, %v6986_v52  }
 0x1d3   : > { %v12674_v2 = vld [vmem:[#allocation87_spill] sm:$0xff]  ;;  %12676 = vst [vmem:[#allocation164_spill] sm:$0xff] %v10248_v16  ;;  %v7169_v10 = vld [vmem:[%s12293_s5 + $0x7e8] sm:$0xff]  ;;  %v10253_v30 = vmul.f32 %v8218_v31, %v1100_v38  ;;  %v755_v25 = vmul.f32 0.3275911, %v10224_v46  ;;  %8231 = vrcp.f32 %v792_v22  ;;  %v1099_v28 = vmul.f32 %v9975_v6, %v1067_v51  ;;  %v8224_v31 = vpop.eup %8223 }
 0x1d4   : > { %v10246_v32 = vadd.f32 %v9829_v23, %v12674_v2  ;;  %v10257_v61 = vmul.f32 0.70710677, %v10228_v45  ;;  %v7168_v23 = vld [vmem:[%s12293_s5 + $0x7e0] sm:$0xff]  ;;  %v973_v52 = vmul.f32 %v10105_v19, %v941_v48  ;;  %v790_v2 = vadd.f32 1.0, %v758_v13  ;;  %5587 = vperm.xlu1 %7920, %v7169_v10  }
 0x1d5   : > { %8233 = vpow2.f32 %v1217_v12  ;;  %v880_v38 = vadd.f32 -1.4531521, %v848_v41  ;;  %v1168_v44 = vmul.f32 %v1136_v33, %v10033_v59  ;;  %v847_v45 = vmul.f32 1.0614054, %v10240_v15  ;;  %v6989_v12 = vld [vmem:[%s12293_s5 + $0x348] sm:$0xff]  ;;  %v6988_v41 = vld [vmem:[%s12293_s5 + $0x340] sm:$0xff] }
 0x1d6   : > { %12675 = vst [vmem:[#allocation87_spill] sm:$0xff] %v10246_v32  ;;  %12677 = vst [vmem:[#allocation165_spill] sm:$0xff] %v10257_v61  ;;  %v10265_v16 = vmul.f32 0.70710677, %v10246_v32  ;;  %v12679_v22 = vsub.f32 1.0, %v10174_v26  ;;  %v1038_v27 = vmul.f32 %v10046_v60, %v1006_v58  ;;  %v788_v6 = vadd.f32 1.0, %v756_v4  ;;  %5582 = vperm.xlu0 %7919, %v7168_v23   ;;  %v10284_v58 = vpop.permute.xlu1 %4932  ;;  %v10292_v23 = vpop.permute.xlu0 %4927 }
 0x1d7   : > { %v1292_v51 = vsub.f32 1.0, %v10253_v30  ;;  %vm1324_vm2 = vcmp.lt.f32.partialorder %v9756_v8, 0.0  ;;  %v1167_v59 = vmul.f32 %v1135_v20, %v10070_v42  ;;  %v787_v33 = vadd.f32 1.0, %v755_v25  ;;  %12680 = vst [vmem:[#allocation167_spill] sm:$0xff] %v10284_v58  ;;  %12681 = vst [vmem:[#allocation168_spill] sm:$0xff] %v10292_v23 }
 0x1d8   : > { %12678 = vst [vmem:[#allocation166_spill] sm:$0xff] %v10265_v16  ;;  %v1353_v35 = vsub.f32 0.0, %v12679_v22  ;;  %v10273_v48 = vand.u32 2147483647, %v10265_v16  ;;  %v10282_v13 = vand.u32 2147483647, %v10257_v61  ;;  %v10289_v4 = vmul.f32 %v8224_v31, %v1099_v28  ;;  %3332 = vperm.xlu1 %7920, %v6989_v12  }
 0x1d9   : > { %v1005_v10 = vadd.f32 -0.28449672, %v973_v52  ;;  %8235 = vrcp.f32 %v790_v2  ;;  %v12682_v42 = vsub.f32 1.0, %v10120_v7  ;;  %v912_v25 = vmul.f32 %v10212_v29, %v880_v38  ;;  %v8226_v28 = vpop.eup %8225  ;;  %v7171_v7 = vld [vmem:[%s12293_s5 + $0x7f8] sm:$0xff] }
 0x1da   : > { %v759_v30 = vmul.f32 0.3275911, %v10273_v48  ;;  %v879_v22 = vadd.f32 -1.4531521, %v847_v45  ;;  %v1144_v58 = vsub.f32 0.0, %v10193_v0  ;;  %8237 = vrcp.f32 %v788_v6  ;;  %3327 = vperm.xlu0 %7919, %v6988_v41  }
 0x1db   : > { %v1386_v20 = vsel %vm1322_vm0, %v10209_v34, %v12682_v42  ;;  %v1070_v31 = vadd.f32 0.2548296, %v1038_v27  ;;  %v1223_v52 = vmul.f32 1.442695, %v1168_v44  ;;  %v10304_v23 = vpop.eup %8227  ;;  %v12683_v14 = vsub.f32 1.0, %v10174_v26  ;;  %v7170_v44 = vld [vmem:[%s12293_s5 + $0x7f0] sm:$0xff] }
 0x1dc   : > { %v791_v2 = vadd.f32 1.0, %v759_v30  ;;  %vm1323_vm3 = vcmp.lt.f32.partialorder %v9789_v50, 0.0  ;;  %v1221_v45 = vmul.f32 1.442695, %v1167_v59  ;;  %8239 = vrcp.f32 %v787_v33  ;;  %v10315_v38 = vpop.eup %8229  ;;  %v10323_v30 = vpop.permute.xlu1 %4942  ;;  %5597 = vperm.xlu1 %7920, %v7171_v7   ;;  %v7968_v50 = vld [vmem:[#allocation2 + $0x2a4] ss:$8 sps:$4 sm:$0xff]  }
 0x1dd   : > { %v1385_v34 = vsel %vm1321_vm1, %v1353_v35, %v12683_v14  ;;  %v757_v27 = vmul.f32 0.3275911, %v10282_v13  ;;  %v1356_v6 = vsub.f32 0.0, %v1292_v51  ;;  %v1291_v12 = vsub.f32 1.0, %v10289_v4  ;;  %v10319_v39 = vpop.eup %8231  ;;  %12684 = vst [vmem:[#allocation169_spill] sm:$0xff] %v10323_v30 }
 0x1de   : > { %v1037_v26 = vmul.f32 %v10105_v19, %v1005_v10  ;;  %8241 = vrcp.f32 %v791_v2  ;;  %v1418_v35 = vadd.f32 1.0, %v1386_v20  ;;  %v944_v41 = vadd.f32 1.4214138, %v912_v25  ;;  %v7954_v10 = vld [vmem:[#allocation2 + $0x280] ss:$8 sps:$4 sm:$0xff]   ;;  %v10328_v2 = vpop.permute.xlu0 %4937  ;;  %5592 = vperm.xlu0 %7919, %v7170_v44   ;;  %v6991_v20 = vld [vmem:[%s12293_s5 + $0x358] sm:$0xff] }
 0x1df   : > { %v911_v59 = vmul.f32 %v10240_v15, %v879_v22  ;;  %v1176_v33 = vmul.f32 %v1144_v58, %v10193_v0  ;;  %v1102_v42 = vmul.f32 %v10046_v60, %v1070_v31  ;;  %8243 = vpow2.f32 %v1223_v52  ;;  %12685 = vst [vmem:[#allocation170_spill] sm:$0xff] %v10328_v2  ;;  %v8234_v25 = vpop.eup %8233  ;;  %v6990_v60 = vld [vmem:[%s12293_s5 + $0x350] sm:$0xff] }
 0x1e0   : > { %v850_v14 = vmul.f32 1.0614054, %v10304_v23  ;;  %v856_v4 = vmul.f32 1.0614054, %v10319_v39  ;;  %v1417_v0 = vadd.f32 1.0, %v1385_v34  ;;  %8245 = vpow2.f32 %v1221_v45  ;;  %3342 = vperm.xlu1 %7920, %v6991_v20  }
 0x1e1   : > { %v849_v58 = vmul.f32 1.0614054, %v10315_v38  ;;  %v789_v22 = vadd.f32 1.0, %v757_v27  ;;  %v1388_v31 = vsel %vm1324_vm2, %v1356_v6, %v1292_v51  ;;  %v1355_v52 = vsub.f32 0.0, %v1291_v12  ;;  %v7962_v45 = vld [vmem:[#allocation2 + $0x294] ss:$8 sps:$4 sm:$0xff]  }
 0x1e2   : > { %v1069_v7 = vadd.f32 0.2548296, %v1037_v26  ;;  %v888_v44 = vadd.f32 -1.4531521, %v856_v4  ;;  %v976_v2 = vmul.f32 %v10212_v29, %v944_v41  ;;  %v943_v30 = vadd.f32 1.4214138, %v911_v59  ;;  %3337 = vperm.xlu0 %7919, %v6990_v60   ;;  %v10354_v59 = vpop.permute.xlu1 %4952 }
 0x1e3   : > { %v1239_v61 = vmul.f32 1.442695, %v1176_v33  ;;  %v3852_v34 = vpack.c.bf16 %v10030_v54, %v10049_v5  ;;  %v10342_v27 = vpop.eup %8235  ;;  %v10344_v32 = vmul.f32 %v8226_v28, %v1102_v42  ;;  %v882_v16 = vadd.f32 -1.4531521, %v850_v14  ;;  %12687 = vst [vmem:[#allocation172_spill] sm:$0xff] %v10354_v59  ;;  %v7189_v28 = vld [vmem:[%s12293_s5 + $0x808] sm:$0xff] }
 0x1e4   : > { %v1138_v8 = vsub.f32 0.0, %v10140_v63  ;;  %v920_v51 = vmul.f32 %v10319_v39, %v888_v44  ;;  %v10349_v6 = vmul.f32 %v1418_v35, %v9979_v18  ;;  %v10352_v26 = vmul.f32 %v1417_v0, %v10041_v49  ;;  %v7188_v33 = vld [vmem:[%s12293_s5 + $0x800] sm:$0xff]  ;;  %v10362_v42 = vpop.eup %8237  ;;  %v7960_v20 = vld [vmem:[#allocation2 + $0x290] ss:$8 sps:$4 sm:$0xff]   ;;  %v10368_v0 = vpop.permute.xlu0 %4947  ;;  %6042 = vperm.xlu1 %7920, %v7189_v28  }
 0x1e5   : > { %v881_v41 = vadd.f32 -1.4531521, %v849_v58  ;;  %8247 = vrcp.f32 %v789_v22  ;;  %4043 = vmatmul.mubr.bf16.vlgmr.msra.gmra.mrb[0].mxu1 %v3852_v34  ;;  %v1420_v18 = vadd.f32 1.0, %v1388_v31  ;;  %v1387_v49 = vsel %vm1323_vm3, %v1355_v52, %v1291_v12  ;;  %12689 = vst [vmem:[#allocation173_spill] sm:$0xff] %v10368_v0 }
 0x1e6   : > { %12686 = vst [vmem:[#allocation171_spill] sm:$0xff] %v10349_v6  ;;  %v1101_v35 = vmul.f32 %v10105_v19, %v1069_v7  ;;  %v952_v14 = vadd.f32 1.4214138, %v920_v51  ;;  %4556 = vmatpush1.bf16.msra.mxu1 %v7954_v10  ;;  %v12688_v4 = vmov 0   ;;  %v10370_v58 = vpop.eup %8239  ;;  %v1008_v22 = vadd.f32 -0.28449672, %v976_v2  ;;  %6037 = vperm.xlu0 %7919, %v7188_v33  }
 0x1e7   : > { %4052 = vmatprep.mubr.bf16.mxu1 %v12688_v4  ;;  %v975_v60 = vmul.f32 %v10240_v15, %v943_v30  ;;  %v854_v44 = vmul.f32 1.0614054, %v10342_v27  ;;  %8249 = vpow2.f32 %v1239_v61  ;;  %4557 = vmatprep.subr.bf16.mxu1 %v7962_v45  ;;  %v914_v10 = vmul.f32 %v10304_v23, %v882_v16  ;;  %v7966_v7 = vld [vmem:[#allocation2 + $0x2a0] ss:$8 sps:$4 sm:$0xff]   ;;  %v7977_v45 = vld [vmem:[#allocation2 + $0x2b4] ss:$8 sps:$4 sm:$0xff]  }
 0x1e8   : > { %v10374_v12 = vpop.eup %8241  ;;  %v1170_v31 = vmul.f32 %v1138_v8, %v10140_v63  ;;  %v984_v52 = vmul.f32 %v10319_v39, %v952_v14  ;;  %v913_v30 = vmul.f32 %v10315_v38, %v881_v41  ;;  %v1137_v2 = vsub.f32 0.0, %v10146_v17  ;;  %v6993_v16 = vld [vmem:[%s12293_s5 + $0x368] sm:$0xff]  ;;  %v6992_v33 = vld [vmem:[%s12293_s5 + $0x360] sm:$0xff]  ;;  %v10407_v3 = vpop.permute.xlu0 %2692 }
 0x1e9   : > { %v852_v61 = vmul.f32 1.0614054, %v10362_v42  ;;  %v855_v34 = vmul.f32 1.0614054, %v10374_v12  ;;  %v10387_v51 = vpop.eup %8243  ;;  %v10389_v63 = vadd.f32 1.0, %v1387_v49  ;;  %v10391_v8 = vmul.f32 %v8234_v25, %v1101_v35  ;;  %v10400_v49 = vpop.permute.xlu1 %2697  ;;  %12692 = vst [vmem:[#allocation175_spill] sm:$0xff] %v10407_v3  ;;  %3352 = vperm.xlu1 %7920, %v6993_v16  }
 0x1ea   : > { %v851_v28 = vmul.f32 1.0614054, %v10370_v58  ;;  %v1016_v41 = vadd.f32 -0.28449672, %v984_v52  ;;  %4558 = vmatpush1.bf16.msra.mxu1 %v7960_v20  ;;  %v10397_v14 = vpop.eup %8245  ;;  %v1040_v19 = vmul.f32 %v10212_v29, %v1008_v22  ;;  %v1007_v0 = vadd.f32 -0.28449672, %v975_v60  ;;  %3347 = vperm.xlu0 %7919, %v6992_v33  }
 0x1eb   : > { %v886_v59 = vadd.f32 -1.4531521, %v854_v44  ;;  %v887_v54 = vadd.f32 -1.4531521, %v855_v34  ;;  %4559 = vmatprep.subr.bf16.mxu1 %v7968_v50  ;;  %12690 = vst [vmem:[#allocation174_spill] sm:$0xff] %v10400_v49  ;;  %v12691_v25 = vsub.f32 1.0, %v10344_v32  ;;  %v1169_v22 = vmul.f32 %v1137_v2, %v10146_v17 }
 0x1ec   : > { %v946_v52 = vadd.f32 1.4214138, %v914_v10  ;;  %v1227_v20 = vmul.f32 1.442695, %v1170_v31  ;;  %v1048_v5 = vmul.f32 %v10319_v39, %v1016_v41  ;;  %v945_v53 = vadd.f32 1.4214138, %v913_v30 }
 0x1ed   : > { %v10404_v35 = vsub.f32 0.0, %v12691_v25  ;;  %v884_v60 = vadd.f32 -1.4531521, %v852_v61  ;;  %v3853_v44 = vpack.c.bf16 %v10052_v11, %v10088_v43  ;;  %v7191_v50 = vld [vmem:[%s12293_s5 + $0x818] sm:$0xff]  ;;  %v10416_v10 = vmul.f32 %v1420_v18, %v10066_v1  ;;  %v7190_v17 = vld [vmem:[%s12293_s5 + $0x810] sm:$0xff]  ;;  %v10434_v25 = vpop.permute.xlu1 %4962 }
 0x1ee   : > { %v883_v34 = vadd.f32 -1.4531521, %v851_v28  ;;  %v1080_v41 = vadd.f32 0.2548296, %v1048_v5  ;;  %4560 = vmatpush1.bf16.msra.mxu1 %v7966_v7  ;;  %v1072_v2 = vadd.f32 0.2548296, %v1040_v19  ;;  %v1039_v61 = vmul.f32 %v10240_v15, %v1007_v0  ;;  %6052 = vperm.xlu1 %7920, %v7191_v50  }
 0x1ef   : > { %v10422_v30 = vpop.eup %8247  ;;  %v918_v16 = vmul.f32 %v10342_v27, %v886_v59  ;;  %v919_v33 = vmul.f32 %v10374_v12, %v887_v54  ;;  %4053 = vmatmul.mubr.bf16.gmra.mrb[4].mxu1 %v3853_v44  ;;  %4561 = vmatprep.subr.bf16.mxu1 %v7977_v45  ;;  %v7983_v1 = vld [vmem:[#allocation2 + $0x2c4] ss:$8 sps:$4 sm:$0xff]   ;;  %v978_v18 = vmul.f32 %v10304_v23, %v946_v52  ;;  %8251 = vpow2.f32 %v1227_v20  ;;  %v7981_v45 = vld [vmem:[#allocation2 + $0x2c0] ss:$8 sps:$4 sm:$0xff]   ;;  %v6995_v52 = vld [vmem:[%s12293_s5 + $0x378] sm:$0xff] }
 0x1f0   : > { %v1140_v5 = vsub.f32 0.0, %v10217_v47  ;;  %v1112_v7 = vmul.f32 %v10319_v39, %v1080_v41  ;;  %4062 = vmatprep.mubr.bf16.mxu1 %v12688_v4  ;;  %v977_v0 = vmul.f32 %v10315_v38, %v945_v53  ;;  %v1225_v28 = vmul.f32 1.442695, %v1169_v22  ;;  %12693 = vst [vmem:[#allocation176_spill] sm:$0xff] %v10434_v25  ;;  %6047 = vperm.xlu0 %7919, %v7190_v17   ;;  %v7989_v22 = vld [vmem:[#allocation2 + $0x2d4] ss:$8 sps:$4 sm:$0xff]  }
 0x1f1   : > { %v8250_v19 = vpop.eup %8249  ;;  %v916_v59 = vmul.f32 %v10362_v42, %v884_v60  ;;  %v1139_v54 = vsub.f32 0.0, %v10224_v46  ;;  %v915_v39 = vmul.f32 %v10370_v58, %v883_v34  ;;  %v1142_v20 = vsub.f32 0.0, %v10203_v56  ;;  %v10442_v60 = vpop.permute.xlu0 %4957  ;;  %v6994_v50 = vld [vmem:[%s12293_s5 + $0x370] sm:$0xff] }
 0x1f2   : > { %v853_v44 = vmul.f32 1.0614054, %v10422_v30  ;;  %v1272_v53 = vmul.f32 %v8250_v19, %v1112_v7  ;;  %4562 = vmatpush1.bf16.msra.mxu1 %v7975_v36  ;;  %12694 = vst [vmem:[#allocation177_spill] sm:$0xff] %v10442_v60  ;;  %v1104_v41 = vmul.f32 %v10212_v29, %v1072_v2  ;;  %v1071_v17 = vadd.f32 0.2548296, %v1039_v61  ;;  %3362 = vperm.xlu1 %7920, %v6995_v52   ;;  %v7193_v2 = vld [vmem:[%s12293_s5 + $0x828] sm:$0xff] }
 0x1f3   : > { %v950_v31 = vadd.f32 1.4214138, %v918_v16  ;;  %v951_v25 = vadd.f32 1.4214138, %v919_v33  ;;  %4563 = vmatprep.subr.bf16.mxu1 %v7983_v1  ;;  %v1010_v34 = vadd.f32 -0.28449672, %v978_v18  ;;  %v1172_v3 = vmul.f32 %v1140_v5, %v10217_v47 }
 0x1f4   : > { %v1304_v49 = vsub.f32 1.0, %v1272_v53  ;;  %v1143_v7 = vsub.f32 0.0, %v10273_v48  ;;  %v7987_v36 = vld [vmem:[#allocation2 + $0x2d0] ss:$8 sps:$4 sm:$0xff]   ;;  %vm1326_vm4 = vcmp.lt.f32.partialorder %v9857_v40, 0.0  ;;  %v1171_v11 = vmul.f32 %v1139_v54, %v10224_v46  ;;  %3357 = vperm.xlu0 %7919, %v6994_v50   ;;  %v7192_v1 = vld [vmem:[%s12293_s5 + $0x820] sm:$0xff] }
 0x1f5   : > { %v1009_v19 = vadd.f32 -0.28449672, %v977_v0  ;;  %v948_v60 = vadd.f32 1.4214138, %v916_v59  ;;  %v3854_v29 = vpack.c.bf16 %v10097_v21, %v10111_v9  ;;  %v947_v47 = vadd.f32 1.4214138, %v915_v39  ;;  %v10466_v0 = vpop.permute.xlu1 %2707 }
 0x1f6   : > { %v1174_v61 = vmul.f32 %v1142_v20, %v10203_v56  ;;  %v885_v16 = vadd.f32 -1.4531521, %v853_v44  ;;  %v1368_v33 = vsub.f32 0.0, %v1304_v49  ;;  %4564 = vmatpush1.bf16.msra.mxu1 %v7981_v45  ;;  %vm1325_vm5 = vcmp.lt.f32.partialorder %v9904_v57, 0.0  ;;  %v7995_v56 = vld [vmem:[#allocation2 + $0x2e4] ss:$8 sps:$4 sm:$0xff]   ;;  %6062 = vperm.xlu1 %7920, %v7193_v2  }
 0x1f7   : > { %v1103_v46 = vmul.f32 %v10240_v15, %v1071_v17  ;;  %v982_v18 = vmul.f32 %v10342_v27, %v950_v31  ;;  %vm1336_vm6 = vcmp.lt.f32.partialorder %v10164_v55, 0.0  ;;  %v983_v5 = vmul.f32 %v10374_v12, %v951_v25  ;;  %4063 = vmatmul.mubr.bf16.gmra.mrb[8].mxu1 %v3854_v29  ;;  %4565 = vmatprep.subr.bf16.mxu1 %v7989_v22  ;;  %v7993_v15 = vld [vmem:[#allocation2 + $0x2e0] ss:$8 sps:$4 sm:$0xff]   ;;  %v10473_v31 = vpop.permute.xlu0 %2702  ;;  %v7998_v44 = vld [vmem:[#allocation2 + $0x2f4] ss:$8 sps:$4 sm:$0xff]  }
 0x1f8   : > { %v12695_v59 = vsub.f32 1.0, %v10391_v8  ;;  %v1042_v45 = vmul.f32 %v10304_v23, %v1010_v34  ;;  %v1400_v52 = vsel %vm1336_vm6, %v1368_v33, %v1304_v49  ;;  %v1175_v39 = vmul.f32 %v1143_v7, %v10273_v48  ;;  %4072 = vmatprep.mubr.bf16.mxu1 %v12688_v4  ;;  %6057 = vperm.xlu0 %7919, %v7192_v1   ;;  %v6997_v49 = vld [vmem:[%s12293_s5 + $0x388] sm:$0xff] }
 0x1f9   : > { %v1041_v55 = vmul.f32 %v10315_v38, %v1009_v19  ;;  %8253 = vpow2.f32 %v1225_v28  ;;  %v980_v25 = vmul.f32 %v10362_v42, %v948_v60  ;;  %v1231_v20 = vmul.f32 1.442695, %v1172_v3  ;;  %v10480_v53 = vpop.eup %8251  ;;  %v6996_v28 = vld [vmem:[%s12293_s5 + $0x380] sm:$0xff]  ;;  %v10498_v33 = vpop.permute.xlu1 %4972 }
 0x1fa   : > { %v1357_v54 = vsub.f32 0.0, %v12695_v59  ;;  %v979_v48 = vmul.f32 %v10370_v58, %v947_v47  ;;  %v1229_v22 = vmul.f32 1.442695, %v1171_v11  ;;  %v1235_v50 = vmul.f32 1.442695, %v1174_v61  ;;  %4566 = vmatpush1.bf16.msra.mxu1 %v7987_v36  ;;  %3372 = vperm.xlu1 %7920, %v6997_v49   ;;  %v12696_v36 = vld [vmem:[#allocation86_spill] sm:$0xff] }
 0x1fb   : > { %v917_v17 = vmul.f32 %v10422_v30, %v885_v16  ;;  %v10488_v3 = vmul.f32 %v10387_v51, %v1104_v41  ;;  %v1014_v60 = vadd.f32 -0.28449672, %v982_v18  ;;  %v1432_v34 = vadd.f32 1.0, %v1400_v52  ;;  %4567 = vmatprep.subr.bf16.mxu1 %v7995_v56  ;;  %v7996_v47 = vld [vmem:[#allocation2 + $0x2f0] ss:$8 sps:$4 sm:$0xff]   ;;  %12697 = vst [vmem:[#allocation86_spill] sm:$0xff] %v10498_v33 }
 0x1fc   : > { %v1015_v7 = vadd.f32 -0.28449672, %v983_v5  ;;  %v10491_v19 = vmul.f32 %v10397_v14, %v1103_v46  ;;  %v1074_v29 = vadd.f32 0.2548296, %v1042_v45  ;;  %v664_v11 = vmul.f32 0.5, %v10126_v62  ;;  %3367 = vperm.xlu0 %7919, %v6996_v28   ;;  %v10509_v5 = vpop.permute.xlu0 %4967  ;;  %v7195_v56 = vld [vmem:[%s12293_s5 + $0x838] sm:$0xff] }
 0x1fd   : > { %v1237_v2 = vmul.f32 1.442695, %v1175_v39  ;;  %vm1311_vm7 = vcmp.lt.f32.partialorder %v12696_v36, 0.0  ;;  %v1073_v61 = vadd.f32 0.2548296, %v1041_v55  ;;  %v1141_v51 = vsub.f32 0.0, %v10282_v13 }
 0x1fe   : > { %v1012_v16 = vadd.f32 -0.28449672, %v980_v25  ;;  %v3855_v41 = vpack.c.bf16 %v10349_v6, %v10352_v26  ;;  %v10502_v14 = vmul.f32 %v10389_v63, %v10100_v37  ;;  %v12699_v62 = vsub.f32 1.0, %v10344_v32  ;;  %4568 = vmatpush1.bf16.msra.mxu1 %v7993_v15  ;;  %12700 = vst [vmem:[#allocation179_spill] sm:$0xff] %v10509_v5  ;;  %v8004_v40 = vld [vmem:[#allocation2 + $0x304] ss:$8 sps:$4 sm:$0xff]   ;;  %6072 = vperm.xlu1 %7920, %v7195_v56  }
 0x1ff   : > { %v1011_v46 = vadd.f32 -0.28449672, %v979_v48  ;;  %v949_v18 = vadd.f32 1.4214138, %v917_v17  ;;  %v1046_v59 = vmul.f32 %v10342_v27, %v1014_v60  ;;  %8255 = vpow2.f32 %v1235_v50  ;;  %4569 = vmatprep.subr.bf16.mxu1 %v7998_v44  ;;  %v7194_v63 = vld [vmem:[%s12293_s5 + $0x830] sm:$0xff]  ;;  %v6999_v44 = vld [vmem:[%s12293_s5 + $0x398] sm:$0xff]  ;;  %v10541_v17 = vpop.permute.xlu1 %2717 }
 0x200   : > { %12698 = vst [vmem:[#allocation178_spill] sm:$0xff] %v10502_v14  ;;  %v1390_v1 = vsel %vm1326_vm4, %v10404_v35, %v12699_v62  ;;  %v10515_v37 = vmul.f32 %v1432_v34, %v664_v11  ;;  %v1047_v32 = vmul.f32 %v10374_v12, %v1015_v7  ;;  %4073 = vmatmul.mubr.bf16.gmra.mrb[12].mxu1 %v3855_v41  ;;  %v12702_v35 = vsub.f32 1.0, %v10391_v8  ;;  %v12704_v50 = vld [vmem:[#allocation40_spill] sm:$0xff]  ;;  %v10546_v7 = vpop.permute.xlu0 %2712  ;;  %v7197_v36 = vld [vmem:[%s12293_s5 + $0x848] sm:$0xff] }
 0x201   : > { %v1296_v52 = vsub.f32 1.0, %v10488_v3  ;;  %v1295_v39 = vsub.f32 1.0, %v10491_v19  ;;  %8257 = vpow2.f32 %v1237_v2  ;;  %4082 = vmatprep.mubr.bf16.mxu1 %v12688_v4  ;;  %v1106_v15 = vmul.f32 %v10304_v23, %v1074_v29  ;;  %6067 = vperm.xlu0 %7919, %v7194_v63   ;;  %v7992_v63 = vld [vmem:[#allocation2 + $0x14] ss:$8 sps:$4 sm:$0xff]  }
 0x202   : > { %12701 = vst [vmem:[#allocation180_spill] sm:$0xff] %v10515_v37  ;;  %v1389_v45 = vsel %vm1325_vm5, %v1357_v54, %v12702_v35  ;;  %v1044_v55 = vmul.f32 %v10362_v42, %v1012_v16  ;;  %8259 = vpow2.f32 %v1231_v20  ;;  %v1173_v25 = vmul.f32 %v1141_v51, %v10282_v13  ;;  %4570 = vmatpush1.bf16.msra.mxu1 %v7996_v47  ;;  %v12703_v20 = vld [vmem:[#allocation41_spill] sm:$0xff]  ;;  %v12705_v47 = vld [vmem:[#allocation136_spill] sm:$0xff]  ;;  %v12707_v16 = vld [vmem:[#allocation142_spill] sm:$0xff] }
 0x203   : > { %v1105_v8 = vmul.f32 %v10315_v38, %v1073_v61  ;;  %v1043_v57 = vmul.f32 %v10370_v58, %v1011_v46  ;;  %8261 = vpow2.f32 %v1229_v22  ;;  %v981_v54 = vmul.f32 %v10422_v30, %v949_v18  ;;  %v8254_v23 = vpop.eup %8253  ;;  %5150 = vmatprep.subr.bf16.mxu1 %v8004_v40  ;;  %v6998_v22 = vld [vmem:[%s12293_s5 + $0x390] sm:$0xff]  ;;  %3382 = vperm.xlu1 %7920, %v6999_v44   ;;  %v7984_v46 = vld [vmem:[#allocation2] ss:$8 sps:$4 sm:$0xff]  }
 0x204   : > { %v1078_v49 = vadd.f32 0.2548296, %v1046_v59  ;;  %v1079_v48 = vadd.f32 0.2548296, %v1047_v32  ;;  %v1981_v13 = vmul.f32 %v12703_v20, %v10515_v37  ;;  %v1982_v38 = vmul.f32 %v12704_v50, %v9705_v24  ;;  %v12709_v18 = vld [vmem:[#allocation144_spill] sm:$0xff]  ;;  %v12710_v35 = vld [vmem:[#allocation157_spill] sm:$0xff] }
 0x205   : > { %v1422_v28 = vadd.f32 1.0, %v1390_v1  ;;  %v1421_v3 = vadd.f32 1.0, %v1389_v45  ;;  %v1360_v60 = vsub.f32 0.0, %v1296_v52  ;;  %v1359_v34 = vsub.f32 0.0, %v1295_v39  ;;  %3377 = vperm.xlu0 %7919, %v6998_v22   ;;  %v12715_v20 = vld [vmem:[#allocation80_spill] sm:$0xff] }
 0x206   : > { %v10549_v19 = vmul.f32 %v10480_v53, %v1106_v15  ;;  %v1076_v29 = vadd.f32 0.2548296, %v1044_v55  ;;  %v3856_v11 = vpack.c.bf16 %v10416_v10, %v10502_v14  ;;  %v2013_v2 = vpack.c.bf16 %v1982_v38, %v1981_v13  ;;  %v12708_v53 = vld [vmem:[#allocation105_spill] sm:$0xff]  ;;  %v12711_v15 = vld [vmem:[#allocation159_spill] sm:$0xff] }
 0x207   : > { %v12706_v61 = vsub.f32 1.0, %v12705_v47  ;;  %v10558_v41 = vmul.f32 %v8254_v23, %v1105_v8  ;;  %v1075_v62 = vadd.f32 0.2548296, %v1043_v57  ;;  %v1013_v1 = vadd.f32 -0.28449672, %v981_v54  ;;  %v12712_v8 = vld [vmem:[#allocation65_spill] sm:$0xff]  ;;  %6082 = vperm.xlu1 %7920, %v7197_v36  }
 0x208   : > { %v10562_v56 = vmul.f32 %v12709_v18, %v12708_v53  ;;  %v1110_v59 = vmul.f32 %v10342_v27, %v1078_v49  ;;  %v1233_v32 = vmul.f32 1.442695, %v1173_v25  ;;  %v1111_v40 = vmul.f32 %v10374_v12, %v1079_v48  ;;  %4083 = vmatmul.mubr.bf16.gmra.mrb[16].mxu1 %v3856_v11  ;;  %2159 = vmatmul.mubr.bf16.vlgmr.msra.gmra.mrb[32].mxu0 %v2013_v2  ;;  %v12713_v57 = vld [vmem:[#allocation146_spill] sm:$0xff]  ;;  %v7196_v27 = vld [vmem:[%s12293_s5 + $0x840] sm:$0xff]  ;;  %v10584_v49 = vpop.permute.xlu1 %4982  ;;  %v7001_v2 = vld [vmem:[%s12293_s5 + $0x3a8] sm:$0xff] }
 0x209   : > { %v1375_v51 = vsel %vm1311_vm7, %v12707_v16, %v12706_v61  ;;  %v10570_v45 = vmul.f32 %v1422_v28, %v12710_v35  ;;  %v10573_v55 = vmul.f32 %v1421_v3, %v12711_v15  ;;  %vm1328_vm8 = vcmp.lt.f32.partialorder %v12712_v8, 0.0  ;;  %4092 = vmatprep.mubr.bf16.mxu1 %v12688_v4  ;;  %v8256_v12 = vpop.eup %8255  ;;  %2168 = vmatprep.mubr.bf16.mxu0 %v12688_v4  ;;  %v7990_v28 = vld [vmem:[#allocation2 + $0x10] ss:$8 sps:$4 sm:$0xff]   ;;  %v10592_v3 = vpop.permute.xlu0 %4977 }
 0x20a   : > { %vm1327_vm9 = vcmp.lt.f32.partialorder %v12713_v57, 0.0  ;;  %v1392_v25 = vsel %vm1328_vm8, %v1360_v60, %v1296_v52  ;;  %v1298_v44 = vsub.f32 1.0, %v10549_v19  ;;  %v1108_v23 = vmul.f32 %v10362_v42, %v1076_v29  ;;  %12714 = vst [vmem:[#allocation41_spill] sm:$0xff] %v10584_v49  ;;  %2400 = vmatpush1.bf16.msra.mxu0 %v7984_v46  ;;  %v12716_v52 = vld [vmem:[#allocation131_spill] sm:$0xff]  ;;  %12718 = vst [vmem:[#allocation40_spill] sm:$0xff] %v10592_v3  ;;  %v12719_v60 = vld [vmem:[#allocation110_spill] sm:$0xff] }
 0x20b   : > { %v1391_v54 = vsel %vm1327_vm9, %v1359_v34, %v1295_v39  ;;  %v8258_v48 = vpop.eup %8257  ;;  %vm1312_vm10 = vcmp.lt.f32.partialorder %v12715_v20, 0.0  ;;  %v1297_v13 = vsub.f32 1.0, %v10558_v41  ;;  %v1107_v50 = vmul.f32 %v10370_v58, %v1075_v62  ;;  %v12717_v39 = vld [vmem:[#allocation42_spill] sm:$0xff]  ;;  %v12720_v29 = vld [vmem:[#allocation127_spill] sm:$0xff]  ;;  %2401 = vmatprep.subr.bf16.mxu0 %v7992_v63  ;;  %6077 = vperm.xlu0 %7919, %v7196_v27  }
 0x20c   : > { %v1045_v38 = vmul.f32 %v10422_v30, %v1013_v1  ;;  %v1984_v22 = vmul.f32 %v12717_v39, %v12716_v52  ;;  %v8260_v42 = vpop.eup %8259  ;;  %vm1313_vm11 = vcmp.lt.f32.partialorder %v12719_v60, 0.0  ;;  %v10595_v34 = vmul.f32 %v8256_v12, %v1110_v59  ;;  %v12721_v58 = vld [vmem:[#allocation43_spill] sm:$0xff]  ;;  %v8001_v59 = vld [vmem:[#allocation2 + $0x24] ss:$8 sps:$4 sm:$0xff]   ;;  %3392 = vperm.xlu1 %7920, %v7001_v2   ;;  %v12725_v57 = vld [vmem:[#allocation66_spill] sm:$0xff] }
 0x20d   : > { %8263 = vpow2.f32 %v1233_v32  ;;  %v10597_v19 = vmul.f32 %v8258_v48, %v1111_v40  ;;  %v1983_v11 = vmul.f32 %v12721_v58, %v12720_v29  ;;  %v8262_v47 = vpop.eup %8261  ;;  %v1407_v61 = vadd.f32 1.0, %v1375_v51  ;;  %v12722_v32 = vld [vmem:[#allocation106_spill] sm:$0xff]  ;;  %v7999_v51 = vld [vmem:[#allocation2 + $0x20] ss:$8 sps:$4 sm:$0xff]   ;;  %v12724_v15 = vld [vmem:[#allocation119_spill] sm:$0xff] }
 0x20e   : > { %v1281_v16 = vsub.f32 1.0, %v10562_v56  ;;  %v1424_v41 = vadd.f32 1.0, %v1392_v25  ;;  %v1423_v62 = vadd.f32 1.0, %v1391_v54  ;;  %v1362_v1 = vsub.f32 0.0, %v1298_v44  ;;  %2402 = vmatpush1.bf16.msra.mxu0 %v7990_v28  ;;  %v12723_v56 = vld [vmem:[#allocation100_spill] sm:$0xff]  ;;  %v12728_v39 = vld [vmem:[#allocation154_spill] sm:$0xff] }
 0x20f   : > { %v10605_v46 = vmul.f32 %v8260_v42, %v1108_v23  ;;  %v3857_v53 = vpack.c.bf16 %v10570_v45, %v10573_v55  ;;  %v2014_v18 = vpack.c.bf16 %v1984_v22, %v1983_v11  ;;  %v656_v40 = vmul.f32 0.5, %v12722_v32  ;;  %v8007_v54 = vld [vmem:[#allocation2 + $0x34] ss:$8 sps:$4 sm:$0xff]   ;;  %v10617_v23 = vpop.permute.xlu1 %2727  ;;  %v10625_v22 = vpop.permute.xlu0 %2722  ;;  %v7000_v28 = vld [vmem:[%s12293_s5 + $0x3a0] sm:$0xff]  ;;  %2403 = vmatprep.subr.bf16.mxu0 %v8001_v59 }
 0x210   : > { %v1361_v63 = vsub.f32 0.0, %v1297_v13  ;;  %v10610_v36 = vmul.f32 %v8262_v47, %v1107_v50  ;;  %v1077_v35 = vadd.f32 0.2548296, %v1045_v38  ;;  %v1090_v8 = vmul.f32 %v12724_v15, %v12723_v56  ;;  %12726 = vst [vmem:[#allocation136_spill] sm:$0xff] %v10617_v23  ;;  %v12727_v38 = vld [vmem:[#allocation153_spill] sm:$0xff]  ;;  %12729 = vst [vmem:[#allocation142_spill] sm:$0xff] %v10625_v22  ;;  %3387 = vperm.xlu0 %7919, %v7000_v28  }
 0x211   : > { %v655_v27 = vmul.f32 0.5, %v12725_v57  ;;  %v1302_v12 = vsub.f32 1.0, %v10595_v34  ;;  %v1303_v25 = vsub.f32 1.0, %v10597_v19  ;;  %4093 = vmatmul.mubr.bf16.gmra.mrb[20].mxu1 %v3857_v53  ;;  %2169 = vmatmul.mubr.bf16.gmra.mrb[36].mxu0 %v2014_v18  ;;  %v1345_v48 = vsub.f32 0.0, %v1281_v16  ;;  %v12730_v58 = vld [vmem:[#allocation64_spill] sm:$0xff]  ;;  %v7199_v47 = vld [vmem:[%s12293_s5 + $0x858] sm:$0xff] }
 0x212   : > { %v10619_v50 = vmul.f32 %v1424_v41, %v656_v40  ;;  %vm1330_vm12 = vcmp.lt.f32.partialorder %v12727_v38, 0.0  ;;  %vm1329_vm13 = vcmp.lt.f32.partialorder %v12728_v39, 0.0  ;;  %4102 = vmatprep.mubr.bf16.mxu1 %v12688_v4  ;;  %2178 = vmatprep.mubr.bf16.mxu0 %v12688_v4  ;;  %v1300_v19 = vsub.f32 1.0, %v10605_v46  ;;  %v12731_v11 = vld [vmem:[#allocation44_spill] sm:$0xff]  ;;  %v12732_v41 = vld [vmem:[#allocation115_spill] sm:$0xff]  ;;  %v12737_v56 = vld [vmem:[#allocation129_spill] sm:$0xff] }
 0x213   : > { %v10630_v42 = vmul.f32 %v1423_v62, %v655_v27  ;;  %v1394_v34 = vsel %vm1330_vm12, %v1362_v1, %v1298_v44  ;;  %v1986_v2 = vmul.f32 %v12731_v11, %v12730_v58  ;;  %v12733_v53 = vld [vmem:[#allocation124_spill] sm:$0xff]  ;;  %v1393_v32 = vsel %vm1329_vm13, %v1361_v63, %v1297_v13  ;;  %2404 = vmatpush1.bf16.msra.mxu0 %v7999_v51  ;;  %v8005_v44 = vld [vmem:[#allocation2 + $0x30] ss:$8 sps:$4 sm:$0xff]   ;;  %v12739_v38 = vld [vmem:[#allocation45_spill] sm:$0xff]  ;;  %v10667_v60 = vpop.permute.xlu0 %4987 }
 0x214   : > { %v10640_v18 = vmul.f32 %v12733_v53, %v12732_v41  ;;  %v1299_v40 = vsub.f32 1.0, %v10610_v36  ;;  %v1109_v62 = vmul.f32 %v10422_v30, %v1077_v35  ;;  %v12735_v1 = vld [vmem:[#allocation120_spill] sm:$0xff]  ;;  %v1366_v15 = vsub.f32 0.0, %v1302_v12  ;;  %v12738_v27 = vld [vmem:[#allocation130_spill] sm:$0xff]  ;;  %2405 = vmatprep.subr.bf16.mxu0 %v8007_v54  ;;  %v12742_v36 = vld [vmem:[#allocation139_spill] sm:$0xff]  ;;  %6092 = vperm.xlu1 %7920, %v7199_v47   ;;  %v10661_v54 = vpop.permute.xlu1 %4992  ;;  %12746 = vst [vmem:[#allocation159_spill] sm:$0xff] %v10667_v60 }
 0x215   : > { %v12736_v46 = vsub.f32 1.0, %v12735_v1  ;;  %v1367_v57 = vsub.f32 0.0, %v1303_v25  ;;  %v1985_v39 = vmul.f32 %v12739_v38, %v12738_v27  ;;  %v12740_v13 = vld [vmem:[#allocation116_spill] sm:$0xff]  ;;  %v10655_v30 = vmul.f32 %v12742_v36, %v1090_v8  ;;  %12743 = vst [vmem:[#allocation157_spill] sm:$0xff] %v10661_v54  ;;  %v12748_v47 = vld [vmem:[#allocation70_spill] sm:$0xff] }
 0x216   : > { %12734 = vst [vmem:[#allocation105_spill] sm:$0xff] %v10640_v18  ;;  %v10652_v63 = vmul.f32 %v1407_v61, %v12740_v13  ;;  %v1377_v35 = vsel %vm1313_vm11, %v1345_v48, %v1281_v16  ;;  %v1426_v51 = vadd.f32 1.0, %v1394_v34  ;;  %v1425_v11 = vadd.f32 1.0, %v1393_v32  ;;  %v8013_v28 = vld [vmem:[#allocation2 + $0x44] ss:$8 sps:$4 sm:$0xff]   ;;  %v12768_v60 = vld [vmem:[#allocation74_spill] sm:$0xff] }
 0x217   : > { %v1376_v59 = vsel %vm1312_vm10, %v12737_v56, %v12736_v46  ;;  %v8264_v20 = vpop.eup %8263  ;;  %v1364_v41 = vsub.f32 0.0, %v1300_v19  ;;  %v3858_v53 = vpack.c.bf16 %v10619_v50, %v10630_v42  ;;  %v2015_v1 = vpack.c.bf16 %v1986_v2, %v1985_v39  ;;  %v12744_v46 = vld [vmem:[#allocation156_spill] sm:$0xff]  ;;  %v12745_v56 = vld [vmem:[#allocation166_spill] sm:$0xff]  ;;  %2406 = vmatpush1.bf16.msra.mxu0 %v8005_v44  ;;  %v12747_v48 = vld [vmem:[#allocation69_spill] sm:$0xff] }
 0x218   : > { %12741 = vst [vmem:[#allocation144_spill] sm:$0xff] %v10652_v63  ;;  %v1363_v61 = vsub.f32 0.0, %v1299_v40  ;;  %vm1334_vm14 = vcmp.lt.f32.partialorder %v12744_v46, 0.0  ;;  %v10664_v8 = vmul.f32 %v8264_v20, %v1109_v62  ;;  %vm1335_vm15 = vcmp.lt.f32.partialorder %v12745_v56, 0.0  ;;  %v8011_v16 = vld [vmem:[#allocation2 + $0x40] ss:$8 sps:$4 sm:$0xff]   ;;  %2407 = vmatprep.subr.bf16.mxu0 %v8013_v28 }
 0x219   : > { %v658_v34 = vmul.f32 0.5, %v12747_v48  ;;  %v657_v32 = vmul.f32 0.5, %v12748_v47  ;;  %v1398_v38 = vsel %vm1334_vm14, %v1366_v15, %v1302_v12  ;;  %v1399_v2 = vsel %vm1335_vm15, %v1367_v57, %v1303_v25  ;;  %4103 = vmatmul.mubr.bf16.gmra.mrb[24].mxu1 %v3858_v53  ;;  %2179 = vmatmul.mubr.bf16.gmra.mrb[40].mxu0 %v2015_v1  ;;  %v8019_v39 = vld [vmem:[#allocation2 + $0x54] ss:$8 sps:$4 sm:$0xff]   ;;  %v12750_v20 = vld [vmem:[#allocation160_spill] sm:$0xff]  ;;  %v10692_v47 = vpop.permute.xlu1 %2737 }
 0x21a   : > { %v1282_v13 = vsub.f32 1.0, %v10655_v30  ;;  %v1409_v36 = vadd.f32 1.0, %v1377_v35  ;;  %v12749_v62 = vld [vmem:[#allocation158_spill] sm:$0xff]  ;;  %vm1331_vm1 = vcmp.lt.f32.partialorder %v12750_v20, 0.0  ;;  %4112 = vmatprep.mubr.bf16.mxu1 %v12688_v4  ;;  %2188 = vmatprep.mubr.bf16.mxu0 %v12688_v4  ;;  %v7003_v35 = vld [vmem:[%s12293_s5 + $0x3b8] sm:$0xff]  ;;  %v1430_v1 = vadd.f32 1.0, %v1398_v38 }
 0x21b   : > { %vm1332_vm0 = vcmp.lt.f32.partialorder %v12749_v62, 0.0  ;;  %v7198_v44 = vld [vmem:[%s12293_s5 + $0x850] sm:$0xff]  ;;  %v10679_v12 = vmul.f32 %v1426_v51, %v658_v34  ;;  %v10681_v25 = vmul.f32 %v1425_v11, %v657_v32  ;;  %v1395_v53 = vsel %vm1331_vm1, %v1363_v61, %v1299_v40  ;;  %2408 = vmatpush1.bf16.msra.mxu0 %v8011_v16  ;;  %12755 = vst [vmem:[#allocation146_spill] sm:$0xff] %v10692_v47  ;;  %v12758_v40 = vld [vmem:[#allocation84_spill] sm:$0xff]  ;;  %v10699_v16 = vpop.permute.xlu0 %2732 }
 0x21c   : > { %v1396_v15 = vsel %vm1332_vm0, %v1364_v41, %v1300_v19  ;;  %v12752_v57 = vld [vmem:[#allocation46_spill] sm:$0xff]  ;;  %v1301_v46 = vsub.f32 1.0, %v10664_v8  ;;  %v1431_v56 = vadd.f32 1.0, %v1399_v2  ;;  %v1408_v11 = vadd.f32 1.0, %v1376_v59  ;;  %v12754_v19 = vld [vmem:[#allocation47_spill] sm:$0xff]  ;;  %2409 = vmatprep.subr.bf16.mxu0 %v8019_v39  ;;  %6087 = vperm.xlu0 %7919, %v7198_v44   ;;  %12760 = vst [vmem:[#allocation42_spill] sm:$0xff] %v10699_v16 }
 0x21d   : > { %12751 = vst [vmem:[#allocation65_spill] sm:$0xff] %v10679_v12  ;;  %v1988_v30 = vmul.f32 %v12752_v57, %v10652_v63  ;;  %v8017_v48 = vld [vmem:[#allocation2 + $0x50] ss:$8 sps:$4 sm:$0xff]   ;;  %v1987_v41 = vmul.f32 %v12754_v19, %v10640_v18  ;;  %v1346_v28 = vsub.f32 0.0, %v1282_v13  ;;  %v662_v61 = vmul.f32 0.5, %v12758_v40  ;;  %3402 = vperm.xlu1 %7920, %v7003_v35  }
 0x21e   : > { %v12753_v51 = vld [vmem:[#allocation78_spill] sm:$0xff]  ;;  %v12759_v8 = vld [vmem:[#allocation87_spill] sm:$0xff]  ;;  %v1428_v2 = vadd.f32 1.0, %v1396_v15  ;;  %v1427_v59 = vadd.f32 1.0, %v1395_v53  ;;  %v3859_v20 = vpack.c.bf16 %v10679_v12, %v10681_v25  ;;  %v12761_v39 = vlaneseq  ;;  %v8023_v40 = vld [vmem:[#allocation2 + $0x60] ss:$8 sps:$4 sm:$0xff]  }
 0x21f   : > { %v640_v34 = vmul.f32 0.5, %v12753_v51  ;;  %v12756_v32 = vld [vmem:[#allocation122_spill] sm:$0xff]  ;;  %v663_v38 = vmul.f32 0.5, %v12759_v8  ;;  %v2016_v57 = vpack.c.bf16 %v1988_v30, %v1987_v41  ;;  %v8025_v51 = vld [vmem:[#allocation2 + $0x64] ss:$8 sps:$4 sm:$0xff]   ;;  %v10706_v19 = vmul.f32 %v1430_v1, %v662_v61  ;;  %2410 = vmatpush1.bf16.msra.mxu0 %v8017_v48  ;;  %v12766_v35 = vld [vmem:[#allocation95_spill] sm:$0xff]  ;;  %v10727_v61 = vpop.permute.xlu1 %5002 }
 0x220   : > { %v10695_v62 = vmul.f32 %v1409_v36, %v12756_v32  ;;  %v10704_v44 = vshrl.u32 %v12761_v39, 7  ;;  %v1365_v36 = vsub.f32 0.0, %v1301_v46  ;;  %vm1314_vm2 = vcmp.lt.f32.partialorder %v12766_v35, 0.0  ;;  %v12767_v15 = vld [vmem:[#allocation72_spill] sm:$0xff]  ;;  %v8031_v30 = vld [vmem:[#allocation2 + $0x74] ss:$8 sps:$4 sm:$0xff]   ;;  %2411 = vmatprep.subr.bf16.mxu0 %v8025_v51 }
 0x221   : > { %12763 = vst [vmem:[#allocation43_spill] sm:$0xff] %v10706_v19  ;;  %v10708_v32 = vmul.f32 %v1431_v56, %v663_v38  ;;  %v10710_v8 = vmul.f32 %v1408_v11, %v640_v34  ;;  %v660_v53 = vmul.f32 0.5, %v12767_v15  ;;  %v659_v54 = vmul.f32 0.5, %v12768_v60  ;;  %4113 = vmatmul.mubr.bf16.gmra.mrb[28].mxu1 %v3859_v20  ;;  %2189 = vmatmul.mubr.bf16.gmra.mrb[44].mxu0 %v2016_v57  ;;  %v7002_v1 = vld [vmem:[%s12293_s5 + $0x3b0] sm:$0xff]  ;;  %v12771_v34 = vld [vmem:[#allocation165_spill] sm:$0xff]  ;;  %v12772_v60 = vld [vmem:[#allocation48_spill] sm:$0xff]  ;;  %v10734_v20 = vpop.permute.xlu0 %4997 }
 0x222   : > { %12757 = vst [vmem:[#allocation80_spill] sm:$0xff] %v10695_v62  ;;  %12762 = vst [vmem:[#allocation110_spill] sm:$0xff] %v10704_v44  ;;  %v1378_v41 = vsel %vm1314_vm2, %v1346_v28, %v1282_v13  ;;  %4122 = vmatprep.mubr.bf16.mxu1 %v12688_v4  ;;  %2198 = vmatprep.mubr.bf16.mxu0 %v12688_v4  ;;  %vm1333_vm3 = vcmp.lt.f32.partialorder %v12771_v34, 0.0  ;;  %v1990_v11 = vmul.f32 %v12772_v60, %v10695_v62  ;;  %v7201_v13 = vld [vmem:[%s12293_s5 + $0x868] sm:$0xff]  ;;  %v8022_v22 = vld [vmem:[#allocation2 + $0x334] ss:$8 sps:$4 sm:$0xff]  }
 0x223   : > { %12764 = vst [vmem:[#allocation106_spill] sm:$0xff] %v10708_v32  ;;  %12765 = vst [vmem:[#allocation100_spill] sm:$0xff] %v10710_v8  ;;  %v10720_v56 = vmul.f32 %v1428_v2, %v660_v53  ;;  %v10722_v48 = vmul.f32 %v1427_v59, %v659_v54  ;;  %v1397_v28 = vsel %vm1333_vm3, %v1365_v36, %v1301_v46  ;;  %v12352_v38 = vrot.slane %v10706_v19, 7  ;;  %v8029_v54 = vld [vmem:[#allocation2 + $0x70] ss:$8 sps:$4 sm:$0xff]   ;;  %v12775_v57 = vld [vmem:[#allocation49_spill] sm:$0xff]  ;;  %v10756_v34 = vpop.permute.xlu1 %2747 }
 0x224   : > { %12773 = vst [vmem:[#allocation153_spill] sm:$0xff] %v10727_v61  ;;  %v12353_v2 = vrot.slane %v10708_v32, 7  ;;  %12774 = vst [vmem:[#allocation154_spill] sm:$0xff] %v10734_v20  ;;  %2412 = vmatpush1.bf16.msra.mxu0 %v8023_v40  ;;  %3397 = vperm.xlu0 %7919, %v7002_v1   ;;  %v1410_v59 = vadd.f32 1.0, %v1378_v41  ;;  %vm1499_vm4 = vcmp.lt.s32.totalorder %v10704_v44, 1  ;;  %v1989_v51 = vmul.f32 %v12775_v57, %v10710_v8  ;;  %v12777_v39 = vld [vmem:[#allocation93_spill] sm:$0xff] }
 0x225   : > { %12769 = vst [vmem:[#allocation119_spill] sm:$0xff] %v10720_v56  ;;  %12770 = vst [vmem:[#allocation66_spill] sm:$0xff] %v10722_v48  ;;  %2413 = vmatprep.subr.bf16.mxu0 %v8031_v30  ;;  %6102 = vperm.xlu1 %7920, %v7201_v13   ;;  %v642_v36 = vmul.f32 0.5, %v12777_v39  ;;  %v1429_v40 = vadd.f32 1.0, %v1397_v28  ;;  %v3860_v35 = vpack.c.bf16 %v10720_v56, %v10722_v48  ;;  %v7200_v53 = vld [vmem:[%s12293_s5 + $0x860] sm:$0xff]  ;;  %v12778_v1 = vld [vmem:[#allocation82_spill] sm:$0xff] }
 0x226   : > { %v10745_v46 = vsel %vm1499_vm4, %v12352_v38, %v12353_v2  ;;  %v2017_v15 = vpack.c.bf16 %v1990_v11, %v1989_v51  ;;  %v661_v41 = vmul.f32 0.5, %v12778_v1  ;;  %12779 = vst [vmem:[#allocation115_spill] sm:$0xff] %v10756_v34  ;;  %v7005_v60 = vld [vmem:[%s12293_s5 + $0x3c8] sm:$0xff]  ;;  %v10763_v11 = vpop.permute.xlu0 %2742  ;;  %v7004_v51 = vld [vmem:[%s12293_s5 + $0x3c0] sm:$0xff]  ;;  %v12784_v39 = vld [vmem:[#allocation51_spill] sm:$0xff]  ;;  %v2593_v38 = vrot.slane %v12720_v29, 1 }
 0x227   : > { %12776 = vst [vmem:[#allocation44_spill] sm:$0xff] %v10745_v46  ;;  %v10753_v30 = vmul.f32 %v1410_v59, %v642_v36  ;;  %v8037_v13 = vld [vmem:[#allocation2 + $0x104] ss:$8 sps:$4 sm:$0xff]   ;;  %12780 = vst [vmem:[#allocation124_spill] sm:$0xff] %v10763_v11  ;;  %v12783_v59 = vld [vmem:[#allocation50_spill] sm:$0xff]  ;;  %v10779_v1 = vpop.permute.xlu1 %5447  ;;  %vm2624_vm5 = vcmp.lt.s32.totalorder %v10704_v44, 7 }
 0x228   : > { %2414 = vmatpush1.bf16.msra.mxu0 %v8029_v54  ;;  %v10765_v28 = vmul.f32 %v1429_v40, %v661_v41  ;;  %v12782_v54 = vld [vmem:[#allocation148_spill] sm:$0xff]  ;;  %6097 = vperm.xlu0 %7919, %v7200_v53   ;;  %12785 = vst [vmem:[#allocation129_spill] sm:$0xff] %v10779_v1  ;;  %v7202_v41 = vld [vmem:[%s12293_s5 + $0x870] sm:$0xff]  ;;  %v12793_v1 = vrot.slane %v9705_v24, 1  ;;  %v12800_v61 = vld [vmem:[#allocation149_spill] sm:$0xff]  ;;  %v2598_v47 = vrot.slane %v10652_v63, 1 }
 0x229   : > { %4123 = vmatmul.mubr.bf16.gmra.mrb[32].mxu1 %v3860_v35  ;;  %2199 = vmatmul.mubr.bf16.gmra.mrb[48].mxu0 %v2017_v15  ;;  %v1992_v57 = vmul.f32 %v12783_v59, %v12782_v54  ;;  %v1991_v36 = vmul.f32 %v12784_v39, %v10753_v30  ;;  %v7203_v35 = vld [vmem:[%s12293_s5 + $0x878] sm:$0xff]  ;;  %v12788_v39 = vld [vmem:[#allocation145_spill] sm:$0xff] }
 0x22a   : > { %4132 = vmatprep.mubr.bf16.mxu1 %v12688_v4  ;;  %2208 = vmatprep.mubr.bf16.mxu0 %v12688_v4  ;;  %12781 = vst [vmem:[#allocation120_spill] sm:$0xff] %v10765_v28  ;;  %v3861_v40 = vpack.c.bf16 %v10706_v19, %v10765_v28  ;;  %v10781_v53 = vpop.permute.xlu0 %5442 }
 0x22b   : > { %3412 = vperm.xlu1 %7920, %v7005_v60   ;;  %2995 = vmatprep.subr.bf16.mxu0 %v8037_v13  ;;  %v2018_v15 = vpack.c.bf16 %v1992_v57, %v1991_v36  ;;  %12786 = vst [vmem:[#allocation45_spill] sm:$0xff] %v10781_v53  ;;  %v7007_v60 = vld [vmem:[%s12293_s5 + $0x3d8] sm:$0xff]  ;;  %v12787_v13 = vld [vmem:[#allocation52_spill] sm:$0xff]  ;;  %v2594_v57 = vrot.slane %v12716_v52, 1  ;;  %v12789_v36 = vld [vmem:[#allocation53_spill] sm:$0xff] }
 0x22c   : > { %3407 = vperm.xlu0 %7919, %v7004_v51   ;;  %v1994_v59 = vmul.f32 %v12787_v13, %v10088_v43  ;;  %v7006_v51 = vld [vmem:[%s12293_s5 + $0x3d0] sm:$0xff]  ;;  %v7204_v53 = vld [vmem:[%s12293_s5 + $0x880] sm:$0xff] }
 0x22e   : > { %v10806_v13 = vpop.permute.xlu0 %2752 }
 0x22f   : > { %6112 = vperm.xlu1 %7920, %v7203_v35   ;;  %v1993_v35 = vmul.f32 %v12789_v36, %v12788_v39  ;;  %12791 = vst [vmem:[#allocation139_spill] sm:$0xff] %v10806_v13  ;;  %v10813_v36 = vsel %vm2624_vm5, %v2593_v38, %v2594_v57  ;;  %v2596_v13 = vrot.slane %v12730_v58, 1 }
 0x230   : > { %6107 = vperm.xlu0 %7919, %v7202_v41   ;;  %12792 = vst [vmem:[#allocation156_spill] sm:$0xff] %v10813_v36  ;;  %v7009_v41 = vld [vmem:[%s12293_s5 + $0x3e8] sm:$0xff] }
 0x231   : > { %4133 = vmatmul.mubr.bf16.gmra.mrb[36].mxu1 %v3861_v40  ;;  %2209 = vmatmul.mubr.bf16.gmra.mrb[52].mxu0 %v2018_v15  ;;  %v10799_v40 = vpop.permute.xlu1 %2757  ;;  %v7205_v15 = vld [vmem:[%s12293_s5 + $0x888] sm:$0xff]  ;;  %v2019_v2 = vpack.c.bf16 %v1994_v59, %v1993_v35  ;;  %v10825_v59 = vsel %vm2624_vm5, %v12793_v1, %v2593_v38  ;;  %v7008_v38 = vld [vmem:[%s12293_s5 + $0x3e0] sm:$0xff] }
 0x232   : > { %4142 = vmatprep.mubr.bf16.mxu1 %v12688_v4  ;;  %2218 = vmatprep.mubr.bf16.mxu0 %v12688_v4  ;;  %12790 = vst [vmem:[#allocation116_spill] sm:$0xff] %v10799_v40  ;;  %12794 = vst [vmem:[#allocation166_spill] sm:$0xff] %v10825_v59  ;;  %v10836_v40 = vpop.permute.xlu0 %5452  ;;  %v12799_v1 = vld [vmem:[#allocation73_spill] sm:$0xff] }
 0x233   : > { %3422 = vperm.xlu1 %7920, %v7007_v60   ;;  %v3862_v60 = vpack.c.bf16 %v10515_v37, %v10708_v32  ;;  %12798 = vst [vmem:[#allocation70_spill] sm:$0xff] %v10836_v40  ;;  %v4410_v20 = vmul.f32 %v12799_v1, %v10825_v59 }
 0x234   : > { %3417 = vperm.xlu0 %7919, %v7006_v51   ;;  %v12795_v51 = vld [vmem:[#allocation71_spill] sm:$0xff] }
 0x235   : > { %v4411_v35 = vmul.f32 %v12795_v51, %v10813_v36  ;;  %v12801_v51 = vld [vmem:[#allocation55_spill] sm:$0xff] }
 0x236   : > { %v1995_v11 = vmul.f32 %v12801_v51, %v12800_v61  ;;  %v7206_v51 = vld [vmem:[%s12293_s5 + $0x890] sm:$0xff] }
 0x237   : > { %6122 = vperm.xlu1 %7920, %v7205_v15   ;;  %v12796_v15 = vld [vmem:[#allocation54_spill] sm:$0xff]  ;;  %v4442_v34 = vpack.c.bf16 %v4411_v35, %v4410_v20  ;;  %v7011_v20 = vld [vmem:[%s12293_s5 + $0x3f8] sm:$0xff] }
 0x238   : > { %6117 = vperm.xlu0 %7919, %v7204_v53   ;;  %v2595_v53 = vrot.slane %v12738_v27, 1  ;;  %v8008_v35 = vld [vmem:[#allocation2 + $0x310] ss:$8 sps:$4 sm:$0xff]  }
 0x239   : > { %4143 = vmatmul.mubr.bf16.gmra.mrb[40].mxu1 %v3862_v60  ;;  %2219 = vmatmul.mubr.bf16.gmra.mrb[56].mxu0 %v2019_v2  ;;  %v1996_v2 = vmul.f32 %v12796_v15, %v10111_v9  ;;  %v10833_v60 = vpop.permute.xlu1 %5457  ;;  %v7207_v15 = vld [vmem:[%s12293_s5 + $0x898] sm:$0xff] }
 0x23a   : > { %4587 = vmatprep.mubr.bf16.mxu1 %v12688_v4  ;;  %2228 = vmatprep.mubr.bf16.mxu0 %v12688_v4  ;;  %12797 = vst [vmem:[#allocation69_spill] sm:$0xff] %v10833_v60  ;;  %v8002_v60 = vld [vmem:[#allocation2 + $0x300] ss:$8 sps:$4 sm:$0xff]   ;;  %v10851_v16 = vsel %vm2624_vm5, %v2595_v53, %v2596_v13 }
 0x23b   : > { %3432 = vperm.xlu1 %7920, %v7009_v41   ;;  %v2020_v40 = vpack.c.bf16 %v1996_v2, %v1995_v11  ;;  %v8010_v41 = vld [vmem:[#allocation2 + $0x314] ss:$8 sps:$4 sm:$0xff]   ;;  %12802 = vst [vmem:[#allocation158_spill] sm:$0xff] %v10851_v16  ;;  %v10863_v11 = vsel %vm2624_vm5, %v2594_v57, %v2595_v53  ;;  %v12808_v57 = vld [vmem:[#allocation77_spill] sm:$0xff] }
 0x23c   : > { %3427 = vperm.xlu0 %7919, %v7008_v38   ;;  %12804 = vst [vmem:[#allocation46_spill] sm:$0xff] %v10863_v11  ;;  %v12807_v38 = vld [vmem:[#allocation56_spill] sm:$0xff]  ;;  %v12809_v53 = vld [vmem:[#allocation57_spill] sm:$0xff] }
 0x23d   : > { %v10853_v1 = vpop.permute.xlu1 %2767 }
 0x23e   : > { %12803 = vst [vmem:[#allocation160_spill] sm:$0xff] %v10853_v1  ;;  %v8016_v1 = vld [vmem:[#allocation2 + $0x324] ss:$8 sps:$4 sm:$0xff]  }
 0x23f   : > { %6132 = vperm.xlu1 %7920, %v7207_v15   ;;  %v1998_v15 = vmul.f32 %v12807_v38, %v10352_v26  ;;  %v2597_v38 = vrot.slane %v10640_v18, 1 }
 0x240   : > { %6127 = vperm.xlu0 %7919, %v7206_v51  }
 0x241   : > { %4588 = vmatmul.mubr.bf16.vlgmr.msra.gmra.mrb[44].mxu1 %v4442_v34  ;;  %2229 = vmatmul.mubr.bf16.gmra.mrb[60].mxu0 %v2020_v40  ;;  %v10866_v34 = vpop.permute.xlu0 %2762  ;;  %v12806_v40 = vld [vmem:[#allocation76_spill] sm:$0xff]  ;;  %v10885_v49 = vpop.permute.xlu1 %5467 }
 0x242   : > { %5151 = vmatpush1.bf16.msra.mxu1 %v8002_v60  ;;  %4597 = vmatprep.mubr.bf16.mxu1 %v12688_v4  ;;  %12805 = vst [vmem:[#allocation78_spill] sm:$0xff] %v10866_v34  ;;  %v4413_v2 = vmul.f32 %v12806_v40, %v10851_v16  ;;  %v4412_v60 = vmul.f32 %v12808_v57, %v10863_v11  ;;  %v7209_v40 = vld [vmem:[%s12293_s5 + $0x8a8] sm:$0xff]  ;;  %12810 = vst [vmem:[#allocation47_spill] sm:$0xff] %v10885_v49 }
 0x243   : > { %5152 = vmatprep.subr.bf16.mxu1 %v8010_v41  ;;  %2238 = vmatprep.mubr.bf16.mxu0 %v12688_v4  ;;  %v1997_v34 = vmul.f32 %v12809_v53, %v10097_v21  ;;  %v7010_v41 = vld [vmem:[%s12293_s5 + $0x3f0] sm:$0xff]  ;;  %v10889_v57 = vsel %vm2624_vm5, %v2597_v38, %v2598_v47 }
 0x244   : > { %3442 = vperm.xlu1 %7920, %v7011_v20   ;;  %v4443_v3 = vpack.c.bf16 %v4413_v2, %v4412_v60  ;;  %v8014_v20 = vld [vmem:[#allocation2 + $0x320] ss:$8 sps:$4 sm:$0xff]   ;;  %12811 = vst [vmem:[#allocation122_spill] sm:$0xff] %v10889_v57  ;;  %3437 = vperm.xlu0 %7919, %v7010_v41   ;;  %v12814_v2 = vld [vmem:[#allocation79_spill] sm:$0xff] }
 0x245   : > { %v2021_v51 = vpack.c.bf16 %v1998_v15, %v1997_v34  ;;  %v10891_v53 = vpop.permute.xlu0 %5462  ;;  %v7211_v34 = vld [vmem:[%s12293_s5 + $0x8b8] sm:$0xff]  ;;  %v12815_v15 = vld [vmem:[#allocation58_spill] sm:$0xff]  ;;  %v10914_v23 = vpop.permute.xlu1 %2777 }
 0x246   : > { %5153 = vmatpush1.bf16.msra.mxu1 %v8008_v35  ;;  %12812 = vst [vmem:[#allocation84_spill] sm:$0xff] %v10891_v53  ;;  %v7208_v35 = vld [vmem:[%s12293_s5 + $0x8a0] sm:$0xff]  ;;  %v2000_v60 = vmul.f32 %v12815_v15, %v10502_v14  ;;  %v8020_v41 = vld [vmem:[#allocation2 + $0x330] ss:$8 sps:$4 sm:$0xff]   ;;  %12818 = vst [vmem:[#allocation95_spill] sm:$0xff] %v10914_v23 }
 0x247   : > { %5154 = vmatprep.subr.bf16.mxu1 %v8016_v1  ;;  %v10898_v1 = vsel %vm2624_vm5, %v2596_v13, %v2597_v38  ;;  %v8028_v13 = vld [vmem:[#allocation2 + $0x344] ss:$8 sps:$4 sm:$0xff]   ;;  %v12817_v53 = vld [vmem:[#allocation59_spill] sm:$0xff] }
 0x248   : > { %6142 = vperm.xlu1 %7920, %v7209_v40   ;;  %12813 = vst [vmem:[#allocation87_spill] sm:$0xff] %v10898_v1  ;;  %v2600_v40 = vrot.slane %v10695_v62, 1  ;;  %6137 = vperm.xlu0 %7919, %v7208_v35   ;;  %v12816_v38 = vld [vmem:[#allocation81_spill] sm:$0xff]  ;;  %v1999_v49 = vmul.f32 %v12817_v53, %v10349_v6  ;;  %v8034_v53 = vld [vmem:[#allocation2 + $0x354] ss:$8 sps:$4 sm:$0xff]  }
 0x249   : > { %4598 = vmatmul.mubr.bf16.gmra.mrb[48].mxu1 %v4443_v3  ;;  %2239 = vmatmul.mubr.bf16.gmra.mrb[64].mxu0 %v2021_v51  ;;  %v4415_v3 = vmul.f32 %v12814_v2, %v10889_v57  ;;  %v4414_v51 = vmul.f32 %v12816_v38, %v10898_v1  ;;  %v7210_v2 = vld [vmem:[%s12293_s5 + $0x8b0] sm:$0xff]  ;;  %v10920_v15 = vpop.permute.xlu0 %2772  ;;  %v8026_v35 = vld [vmem:[#allocation2 + $0x340] ss:$8 sps:$4 sm:$0xff]  }
 0x24a   : > { %4607 = vmatprep.mubr.bf16.mxu1 %v12688_v4  ;;  %2248 = vmatprep.mubr.bf16.mxu0 %v12688_v4  ;;  %12819 = vst [vmem:[#allocation72_spill] sm:$0xff] %v10920_v15  ;;  %v2022_v57 = vpack.c.bf16 %v2000_v60, %v1999_v49  ;;  %v12822_v60 = vld [vmem:[#allocation83_spill] sm:$0xff] }
 0x24b   : > { %5155 = vmatpush1.bf16.msra.mxu1 %v8014_v20  ;;  %v2599_v20 = vrot.slane %v10710_v8, 1 }
 0x24c   : > { %5156 = vmatprep.subr.bf16.mxu1 %v8022_v22  ;;  %6152 = vperm.xlu1 %7920, %v7211_v34   ;;  %v4444_v22 = vpack.c.bf16 %v4415_v3, %v4414_v51  ;;  %v7213_v34 = vld [vmem:[%s12293_s5 + $0x8c8] sm:$0xff]  ;;  %v7212_v3 = vld [vmem:[%s12293_s5 + $0x8c0] sm:$0xff] }
 0x24d   : > { %v10924_v38 = vsel %vm2624_vm5, %v2599_v20, %v2600_v40  ;;  %6147 = vperm.xlu0 %7919, %v7210_v2   ;;  %v10934_v49 = vsel %vm2624_vm5, %v2598_v47, %v2599_v20  ;;  %v10942_v2 = vpop.permute.xlu1 %5477  ;;  %v10945_v15 = vpop.permute.xlu0 %5472  ;;  %v8040_v47 = vld [vmem:[#allocation2 + $0x364] ss:$8 sps:$4 sm:$0xff]   ;;  %v7215_v20 = vld [vmem:[%s12293_s5 + $0x8d8] sm:$0xff] }
 0x24e   : > { %12820 = vst [vmem:[#allocation74_spill] sm:$0xff] %v10924_v38  ;;  %12821 = vst [vmem:[#allocation165_spill] sm:$0xff] %v10934_v49 }
 0x24f   : > { %5157 = vmatpush1.bf16.msra.mxu1 %v8020_v41  ;;  %v4417_v41 = vmul.f32 %v12822_v60, %v10924_v38  ;;  %12824 = vst [vmem:[#allocation48_spill] sm:$0xff] %v10942_v2  ;;  %12825 = vst [vmem:[#allocation49_spill] sm:$0xff] %v10945_v15  ;;  %v12826_v60 = vld [vmem:[#allocation85_spill] sm:$0xff] }
 0x250   : > { %5158 = vmatprep.subr.bf16.mxu1 %v8028_v13  ;;  %v12823_v13 = vld [vmem:[#allocation60_spill] sm:$0xff]  ;;  %6162 = vperm.xlu1 %7920, %v7213_v34   ;;  %v4416_v23 = vmul.f32 %v12826_v60, %v10934_v49  ;;  %v2601_v34 = vrot.slane %v10753_v30, 1  ;;  %v8046_v60 = vld [vmem:[#allocation2 + $0x374] ss:$8 sps:$4 sm:$0xff]  }
 0x251   : > { %4608 = vmatmul.mubr.bf16.gmra.mrb[52].mxu1 %v4444_v22  ;;  %2249 = vmatmul.mubr.bf16.gmra.mrb[68].mxu0 %v2022_v57  ;;  %v2002_v51 = vmul.f32 %v12823_v13, %v10573_v55  ;;  %v8032_v57 = vld [vmem:[#allocation2 + $0x350] ss:$8 sps:$4 sm:$0xff]   ;;  %v2602_v22 = vrot.slane %v12782_v54, 1  ;;  %v12827_v13 = vld [vmem:[#allocation61_spill] sm:$0xff]  ;;  %v10965_v49 = vpop.permute.xlu1 %2787 }
 0x252   : > { %4617 = vmatprep.mubr.bf16.mxu1 %v12688_v4  ;;  %2258 = vmatprep.mubr.bf16.mxu0 %v12688_v4  ;;  %v2001_v2 = vmul.f32 %v12827_v13, %v10416_v10  ;;  %v4445_v15 = vpack.c.bf16 %v4417_v41, %v4416_v23  ;;  %v7217_v13 = vld [vmem:[%s12293_s5 + $0x8e8] sm:$0xff]  ;;  %12829 = vst [vmem:[#allocation82_spill] sm:$0xff] %v10965_v49  ;;  %v7216_v23 = vld [vmem:[%s12293_s5 + $0x8e0] sm:$0xff] }
 0x253   : > { %5159 = vmatpush1.bf16.msra.mxu1 %v8026_v35  ;;  %6157 = vperm.xlu0 %7919, %v7212_v3   ;;  %v7214_v35 = vld [vmem:[%s12293_s5 + $0x8d0] sm:$0xff]  ;;  %v8038_v3 = vld [vmem:[#allocation2 + $0x360] ss:$8 sps:$4 sm:$0xff]   ;;  %v10960_v38 = vsel %vm2624_vm5, %v2601_v34, %v2602_v22  ;;  %v10972_v41 = vsel %vm2624_vm5, %v2600_v40, %v2601_v34  ;;  %v8052_v40 = vld [vmem:[#allocation2 + $0x384] ss:$8 sps:$4 sm:$0xff]  }
 0x254   : > { %5160 = vmatprep.subr.bf16.mxu1 %v8034_v53  ;;  %v2023_v53 = vpack.c.bf16 %v2002_v51, %v2001_v2  ;;  %6172 = vperm.xlu1 %7920, %v7215_v20   ;;  %12828 = vst [vmem:[#allocation93_spill] sm:$0xff] %v10960_v38  ;;  %12830 = vst [vmem:[#allocation148_spill] sm:$0xff] %v10972_v41  ;;  %v10976_v51 = vpop.permute.xlu0 %2782  ;;  %v12832_v2 = vld [vmem:[#allocation88_spill] sm:$0xff]  ;;  %v8044_v20 = vld [vmem:[#allocation2 + $0x370] ss:$8 sps:$4 sm:$0xff]  }
 0x255   : > { %12831 = vst [vmem:[#allocation50_spill] sm:$0xff] %v10976_v51  ;;  %v7219_v34 = vld [vmem:[%s12293_s5 + $0x8f8] sm:$0xff] }
 0x257   : > { %5161 = vmatpush1.bf16.msra.mxu1 %v8032_v57  ;;  %6167 = vperm.xlu0 %7919, %v7214_v35   ;;  %v12833_v57 = vld [vmem:[#allocation62_spill] sm:$0xff]  ;;  %v2604_v35 = vrot.slane %v10088_v43, 1 }
 0x258   : > { %5162 = vmatprep.subr.bf16.mxu1 %v8040_v47  ;;  %v2004_v47 = vmul.f32 %v12833_v57, %v10630_v42  ;;  %6182 = vperm.xlu1 %7920, %v7217_v13   ;;  %v2603_v13 = vrot.slane %v12788_v39, 1 }
 0x259   : > { %4618 = vmatmul.mubr.bf16.gmra.mrb[56].mxu1 %v4445_v15  ;;  %2259 = vmatmul.mubr.bf16.gmra.mrb[72].mxu0 %v2023_v53  ;;  %v4419_v15 = vmul.f32 %v12832_v2, %v10960_v38  ;;  %v12834_v53 = vld [vmem:[#allocation89_spill] sm:$0xff]  ;;  %v12835_v2 = vld [vmem:[#allocation63_spill] sm:$0xff] }
 0x25a   : > { %4627 = vmatprep.mubr.bf16.mxu1 %v12688_v4  ;;  %2268 = vmatprep.mubr.bf16.mxu0 %v12688_v4  ;;  %v4418_v51 = vmul.f32 %v12834_v53, %v10972_v41  ;;  %v2003_v49 = vmul.f32 %v12835_v2, %v10570_v45  ;;  %v10998_v38 = vsel %vm2624_vm5, %v2603_v13, %v2604_v35  ;;  %v11000_v53 = vpop.permute.xlu0 %5482  ;;  %v1466_v41 = vrot.slane %v12720_v29, 7  ;;  %v12878_v29 = vld [vmem:[#allocation8_spill] sm:$0xff] }
 0x25b   : > { %5163 = vmatpush1.bf16.msra.mxu1 %v8038_v3  ;;  %6177 = vperm.xlu0 %7919, %v7216_v23   ;;  %v7218_v3 = vld [vmem:[%s12293_s5 + $0x8f0] sm:$0xff]  ;;  %v10994_v23 = vpop.permute.xlu1 %5487  ;;  %12837 = vst [vmem:[#allocation52_spill] sm:$0xff] %v10998_v38  ;;  %12838 = vst [vmem:[#allocation145_spill] sm:$0xff] %v11000_v53  ;;  %v11004_v2 = vsel %vm2624_vm5, %v2602_v22, %v2603_v13  ;;  %v2605_v22 = vrot.slane %v12800_v61, 1 }
 0x25c   : > { %5164 = vmatprep.subr.bf16.mxu1 %v8046_v60  ;;  %v4446_v57 = vpack.c.bf16 %v4419_v15, %v4418_v51  ;;  %v2024_v60 = vpack.c.bf16 %v2004_v47, %v2003_v49  ;;  %12836 = vst [vmem:[#allocation51_spill] sm:$0xff] %v10994_v23  ;;  %6192 = vperm.xlu1 %7920, %v7219_v34   ;;  %12839 = vst [vmem:[#allocation53_spill] sm:$0xff] %v11004_v2  ;;  %v12840_v49 = vld [vmem:[#allocation90_spill] sm:$0xff]  ;;  %v12841_v15 = vld [vmem:[#allocation67_spill] sm:$0xff] }
 0x25d   : > { %v4421_v51 = vmul.f32 %v12840_v49, %v10998_v38  ;;  %v2006_v47 = vmul.f32 %v12841_v15, %v10681_v25  ;;  %v11024_v49 = vsel %vm2624_vm5, %v2604_v35, %v2605_v22  ;;  %v12846_v15 = vld [vmem:[#allocation92_spill] sm:$0xff]  ;;  %v2607_v35 = vrot.slane %v10097_v21, 1 }
 0x25e   : > { %12845 = vst [vmem:[#allocation54_spill] sm:$0xff] %v11024_v49 }
 0x25f   : > { %5165 = vmatpush1.bf16.msra.mxu1 %v8044_v20  ;;  %6187 = vperm.xlu0 %7919, %v7218_v3   ;;  %v2606_v20 = vrot.slane %v10111_v9, 1  ;;  %v12843_v3 = vld [vmem:[#allocation68_spill] sm:$0xff] }
 0x260   : > { %5745 = vmatprep.subr.bf16.mxu1 %v8052_v40  ;;  %v12842_v40 = vld [vmem:[#allocation91_spill] sm:$0xff] }
 0x261   : > { %4628 = vmatmul.mubr.bf16.gmra.mrb[60].mxu1 %v4446_v57  ;;  %2269 = vmatmul.mubr.bf16.gmra.mrb[76].mxu0 %v2024_v60  ;;  %v4420_v34 = vmul.f32 %v12842_v40, %v11004_v2  ;;  %v2005_v57 = vmul.f32 %v12843_v3, %v10619_v50  ;;  %v11020_v53 = vsel %vm2624_vm5, %v2605_v22, %v2606_v20  ;;  %v12848_v3 = vld [vmem:[#allocation94_spill] sm:$0xff] }
 0x262   : > { %4637 = vmatprep.mubr.bf16.mxu1 %v12688_v4  ;;  %2278 = vmatprep.mubr.bf16.mxu0 %v12688_v4  ;;  %12844 = vst [vmem:[#allocation71_spill] sm:$0xff] %v11020_v53  ;;  %v4423_v40 = vmul.f32 %v12846_v15, %v11020_v53  ;;  %v11044_v15 = vsel %vm2624_vm5, %v2606_v20, %v2607_v35  ;;  %v2609_v20 = vrot.slane %v10349_v6, 1 }
 0x263   : > { %v4447_v13 = vpack.c.bf16 %v4421_v51, %v4420_v34  ;;  %v2025_v60 = vpack.c.bf16 %v2006_v47, %v2005_v57  ;;  %v12847_v51 = vld [vmem:[#allocation103_spill] sm:$0xff]  ;;  %v2608_v34 = vrot.slane %v10352_v26, 1  ;;  %v4422_v57 = vmul.f32 %v12848_v3, %v11024_v49  ;;  %12851 = vst [vmem:[#allocation149_spill] sm:$0xff] %v11044_v15 }
 0x264   : > { %v2008_v47 = vmul.f32 %v12847_v51, %v10722_v48  ;;  %v12852_v51 = vld [vmem:[#allocation96_spill] sm:$0xff] }
 0x265   : > { %v4448_v22 = vpack.c.bf16 %v4423_v40, %v4422_v57  ;;  %v11040_v38 = vsel %vm2624_vm5, %v2607_v35, %v2608_v34  ;;  %v12853_v40 = vld [vmem:[#allocation111_spill] sm:$0xff]  ;;  %v2610_v57 = vrot.slane %v10502_v14, 1 }
 0x266   : > { %12850 = vst [vmem:[#allocation73_spill] sm:$0xff] %v11040_v38  ;;  %v4425_v3 = vmul.f32 %v12852_v51, %v11040_v38  ;;  %v11064_v51 = vsel %vm2624_vm5, %v2608_v34, %v2609_v20  ;;  %v12861_v34 = vld [vmem:[#allocation118_spill] sm:$0xff]  ;;  %v1465_v38 = vrot.slane %v9705_v24, 7 }
 0x267   : > { %v11060_v49 = vsel %vm2624_vm5, %v2609_v20, %v2610_v57  ;;  %12857 = vst [vmem:[#allocation76_spill] sm:$0xff] %v11064_v51  ;;  %v2011_v20 = vmul.f32 %v12861_v34, %v10706_v19  ;;  %v12868_v34 = vld [vmem:[#allocation11_spill] sm:$0xff] }
 0x268   : > { %12856 = vst [vmem:[#allocation55_spill] sm:$0xff] %v11060_v49 }
 0x269   : > { %4638 = vmatmul.mubr.bf16.gmra.mrb[0].mxu1 %v4447_v13  ;;  %2279 = vmatmul.mubr.bf16.gmra.mrb[80].mxu0 %v2025_v60  ;;  %v12849_v13 = vld [vmem:[#allocation104_spill] sm:$0xff] }
 0x26a   : > { %4647 = vmatprep.mubr.bf16.mxu1 %v12688_v4  ;;  %2288 = vmatprep.mubr.bf16.mxu0 %v12688_v4  ;;  %v2007_v60 = vmul.f32 %v12849_v13, %v10679_v12  ;;  %v12854_v13 = vld [vmem:[#allocation98_spill] sm:$0xff] }
 0x26c   : > { %v2026_v23 = vpack.c.bf16 %v2008_v47, %v2007_v60  ;;  %v2010_v47 = vmul.f32 %v12853_v40, %v10765_v28  ;;  %v4424_v60 = vmul.f32 %v12854_v13, %v11044_v15  ;;  %v12858_v40 = vld [vmem:[#allocation108_spill] sm:$0xff] }
 0x26d   : > { %v4427_v13 = vmul.f32 %v12858_v40, %v11060_v49  ;;  %v12864_v49 = vrot.slane %v10708_v32, 7 }
 0x26e   : > { %v4449_v35 = vpack.c.bf16 %v4425_v3, %v4424_v60  ;;  %v12859_v3 = vld [vmem:[#allocation117_spill] sm:$0xff]  ;;  %v2612_v60 = vrot.slane %v10573_v55, 1 }
 0x271   : > { %4648 = vmatmul.mubr.bf16.gmra.mrb[4].mxu1 %v4448_v22  ;;  %2289 = vmatmul.mubr.bf16.gmra.mrb[84].mxu0 %v2026_v23  ;;  %v12855_v23 = vld [vmem:[#allocation112_spill] sm:$0xff] }
 0x272   : > { %4657 = vmatprep.mubr.bf16.mxu1 %v12688_v4  ;;  %2298 = vmatprep.mubr.bf16.mxu0 %v12688_v4  ;;  %v2009_v22 = vmul.f32 %v12855_v23, %v10720_v56  ;;  %v1496_v23 = vrot.slane %v10515_v37, 7 }
 0x274   : > { %v2027_v53 = vpack.c.bf16 %v2010_v47, %v2009_v22  ;;  %v2012_v47 = vmul.f32 %v12859_v3, %v10708_v32  ;;  %v11086_v3 = vsel %vm1499_vm4, %v1496_v23, %v1465_v38 }
 0x275   : > { %12863 = vst [vmem:[#allocation77_spill] sm:$0xff] %v11086_v3 }
 0x276   : > { %v2028_v2 = vpack.c.bf16 %v2012_v47, %v2011_v20  ;;  %v12867_v47 = vld [vmem:[#allocation113_spill] sm:$0xff]  ;;  %v1725_v20 = vmul.f32 %v12868_v34, %v11086_v3 }
 0x279   : > { %4658 = vmatmul.mubr.bf16.gmra.mrb[8].mxu1 %v4449_v35  ;;  %2299 = vmatmul.mubr.bf16.gmra.mrb[88].mxu0 %v2027_v53  ;;  %v12860_v53 = vld [vmem:[#allocation109_spill] sm:$0xff]  ;;  %v2611_v35 = vrot.slane %v10416_v10, 1 }
 0x27a   : > { %4667 = vmatprep.mubr.bf16.mxu1 %v12688_v4  ;;  %2308 = vmatprep.mubr.bf16.mxu0 %v12688_v4  ;;  %v4426_v22 = vmul.f32 %v12860_v53, %v11064_v51  ;;  %v11092_v53 = vsel %vm1499_vm4, %v12864_v49, %v1496_v23  ;;  %v12869_v51 = vld [vmem:[#allocation9_spill] sm:$0xff] }
 0x27b   : > { %v11082_v40 = vsel %vm2624_vm5, %v2611_v35, %v2612_v60  ;;  %12865 = vst [vmem:[#allocation57_spill] sm:$0xff] %v11092_v53  ;;  %v1724_v49 = vmul.f32 %v12869_v51, %v11092_v53  ;;  %v2615_v53 = vrot.slane %v10619_v50, 1 }
 0x27c   : > { %v4450_v15 = vpack.c.bf16 %v4427_v13, %v4426_v22  ;;  %12862 = vst [vmem:[#allocation56_spill] sm:$0xff] %v11082_v40  ;;  %v11096_v13 = vsel %vm2624_vm5, %v2610_v57, %v2611_v35  ;;  %v4429_v22 = vmul.f32 %v12867_v47, %v11082_v40  ;;  %v12870_v57 = vld [vmem:[#allocation114_spill] sm:$0xff]  ;;  %v2613_v35 = vrot.slane %v10570_v45, 1  ;;  %v8035_v47 = vld [vmem:[#allocation2 + $0x100] ss:$8 sps:$4 sm:$0xff]  }
 0x27d   : > { %12866 = vst [vmem:[#allocation79_spill] sm:$0xff] %v11096_v13  ;;  %v4428_v23 = vmul.f32 %v12870_v57, %v11096_v13  ;;  %v1756_v33 = vpack.c.bf16 %v1725_v20, %v1724_v49  ;;  %v8043_v40 = vld [vmem:[#allocation2 + $0x114] ss:$8 sps:$4 sm:$0xff]   ;;  %v12875_v20 = vld [vmem:[#allocation121_spill] sm:$0xff]  ;;  %v2616_v13 = vrot.slane %v10681_v25, 1 }
 0x27e   : > { %v11122_v57 = vsel %vm2624_vm5, %v2612_v60, %v2613_v35  ;;  %v1469_v60 = vrot.slane %v12730_v58, 7 }
 0x27f   : > { %v4451_v5 = vpack.c.bf16 %v4429_v22, %v4428_v23  ;;  %12873 = vst [vmem:[#allocation59_spill] sm:$0xff] %v11122_v57  ;;  %v11126_v22 = vsel %vm1499_vm4, %v1465_v38, %v1466_v41  ;;  %v12876_v23 = vld [vmem:[#allocation10_spill] sm:$0xff]  ;;  %v12877_v38 = vld [vmem:[#allocation123_spill] sm:$0xff]  ;;  %v11144_v3 = vsel %vm2624_vm5, %v2615_v53, %v2616_v13 }
 0x280   : > { %12874 = vst [vmem:[#allocation83_spill] sm:$0xff] %v11126_v22  ;;  %12879 = vst [vmem:[#allocation60_spill] sm:$0xff] %v11144_v3 }
 0x281   : > { %4668 = vmatmul.mubr.bf16.gmra.mrb[12].mxu1 %v4450_v15  ;;  %2309 = vmatmul.mubr.bf16.gmra.mrb[92].mxu0 %v2028_v2  ;;  %v2614_v15 = vrot.slane %v10630_v42, 1  ;;  %v1467_v2 = vrot.slane %v12716_v52, 7  ;;  %v1726_v52 = vmul.f32 %v12878_v29, %v11126_v22 }
 0x282   : > { %4677 = vmatprep.mubr.bf16.mxu1 %v12688_v4  ;;  %2431 = vmatprep.mubr.bf16.mxu0 %v12688_v4 }
 0x283   : > { %v11114_v34 = vsel %vm2624_vm5, %v2613_v35, %v2614_v15  ;;  %v11118_v51 = vsel %vm1499_vm4, %v1466_v41, %v1467_v2  ;;  %v8049_v35 = vld [vmem:[#allocation2 + $0x124] ss:$8 sps:$4 sm:$0xff]   ;;  %v4430_v41 = vmul.f32 %v12877_v38, %v11122_v57  ;;  %v8055_v38 = vld [vmem:[#allocation2 + $0x134] ss:$8 sps:$4 sm:$0xff]   ;;  %v11152_v29 = vsel %vm2624_vm5, %v2614_v15, %v2615_v53 }
 0x284   : > { %12871 = vst [vmem:[#allocation58_spill] sm:$0xff] %v11114_v34  ;;  %12872 = vst [vmem:[#allocation81_spill] sm:$0xff] %v11118_v51  ;;  %v4431_v49 = vmul.f32 %v12875_v20, %v11114_v34  ;;  %v1471_v53 = vrot.slane %v10652_v63, 7  ;;  %v8061_v15 = vld [vmem:[#allocation2 + $0x144] ss:$8 sps:$4 sm:$0xff]  }
 0x285   : > { %12881 = vst [vmem:[#allocation61_spill] sm:$0xff] %v11152_v29 }
 0x286   : > { %v4452_v20 = vpack.c.bf16 %v4431_v49, %v4430_v41  ;;  %v12883_v49 = vld [vmem:[#allocation125_spill] sm:$0xff]  ;;  %v2618_v41 = vrot.slane %v10722_v48, 1 }
 0x289   : > { %4678 = vmatmul.mubr.bf16.gmra.mrb[16].mxu1 %v4451_v5  ;;  %2432 = vmatmul.mubr.bf16.vlgmr.msra.gmra.mrb[32].mxu0 %v1756_v33  ;;  %v1727_v5 = vmul.f32 %v12876_v23, %v11118_v51  ;;  %v8041_v33 = vld [vmem:[#allocation2 + $0x110] ss:$8 sps:$4 sm:$0xff]   ;;  %v8047_v23 = vld [vmem:[#allocation2 + $0x120] ss:$8 sps:$4 sm:$0xff]  }
 0x28a   : > { %4687 = vmatprep.mubr.bf16.mxu1 %v12688_v4  ;;  %2441 = vmatprep.mubr.bf16.mxu0 %v12688_v4 }
 0x28b   : > { %2996 = vmatpush1.bf16.msra.mxu0 %v8035_v47  ;;  %v1468_v47 = vrot.slane %v12738_v27, 7  ;;  %v1757_v34 = vpack.c.bf16 %v1727_v5, %v1726_v52  ;;  %v4433_v5 = vmul.f32 %v12883_v49, %v11144_v3  ;;  %v2617_v27 = vrot.slane %v10679_v12, 1 }
 0x28c   : > { %2997 = vmatprep.subr.bf16.mxu0 %v8043_v40  ;;  %v1470_v49 = vrot.slane %v10640_v18, 7  ;;  %v2619_v18 = vrot.slane %v10720_v56, 1 }
 0x28d   : > { %v11148_v40 = vsel %vm1499_vm4, %v1468_v47, %v1469_v60  ;;  %v11156_v52 = vsel %vm1499_vm4, %v1467_v2, %v1468_v47  ;;  %v12885_v2 = vld [vmem:[#allocation126_spill] sm:$0xff]  ;;  %v11174_v58 = vsel %vm2624_vm5, %v2617_v27, %v2618_v41 }
 0x28e   : > { %12880 = vst [vmem:[#allocation85_spill] sm:$0xff] %v11148_v40  ;;  %12882 = vst [vmem:[#allocation88_spill] sm:$0xff] %v11156_v52  ;;  %v4432_v47 = vmul.f32 %v12885_v2, %v11152_v29  ;;  %v8067_v2 = vld [vmem:[#allocation2 + $0x154] ss:$8 sps:$4 sm:$0xff]  }
 0x28f   : > { %2998 = vmatpush1.bf16.msra.mxu0 %v8041_v33  ;;  %v12884_v33 = vld [vmem:[#allocation12_spill] sm:$0xff]  ;;  %12887 = vst [vmem:[#allocation62_spill] sm:$0xff] %v11174_v58 }
 0x290   : > { %2999 = vmatprep.subr.bf16.mxu0 %v8049_v35  ;;  %v1729_v35 = vmul.f32 %v12884_v33, %v11148_v40  ;;  %v4453_v3 = vpack.c.bf16 %v4433_v5, %v4432_v47  ;;  %v12891_v5 = vld [vmem:[#allocation132_spill] sm:$0xff]  ;;  %v2620_v47 = vrot.slane %v10765_v28, 1 }
 0x291   : > { %4688 = vmatmul.mubr.bf16.gmra.mrb[20].mxu1 %v4452_v20  ;;  %2442 = vmatmul.mubr.bf16.gmra.mrb[36].mxu0 %v1757_v34  ;;  %v8053_v34 = vld [vmem:[#allocation2 + $0x130] ss:$8 sps:$4 sm:$0xff]   ;;  %v12886_v20 = vld [vmem:[#allocation13_spill] sm:$0xff] }
 0x292   : > { %4697 = vmatprep.mubr.bf16.mxu1 %v12688_v4  ;;  %2451 = vmatprep.mubr.bf16.mxu0 %v12688_v4  ;;  %v1728_v57 = vmul.f32 %v12886_v20, %v11156_v52  ;;  %v11182_v20 = vsel %vm2624_vm5, %v2616_v13, %v2617_v27  ;;  %v1473_v27 = vrot.slane %v10695_v62, 7  ;;  %v8073_v13 = vld [vmem:[#allocation2 + $0x164] ss:$8 sps:$4 sm:$0xff]   ;;  %v11204_v63 = vsel %vm2624_vm5, %v2619_v18, %v2620_v47 }
 0x293   : > { %3000 = vmatpush1.bf16.msra.mxu0 %v8047_v23  ;;  %v8059_v23 = vld [vmem:[#allocation2 + $0x140] ss:$8 sps:$4 sm:$0xff]   ;;  %12889 = vst [vmem:[#allocation63_spill] sm:$0xff] %v11182_v20  ;;  %12895 = vst [vmem:[#allocation67_spill] sm:$0xff] %v11204_v63 }
 0x294   : > { %3001 = vmatprep.subr.bf16.mxu0 %v8055_v38  ;;  %v1758_v33 = vpack.c.bf16 %v1729_v35, %v1728_v57  ;;  %v11178_v38 = vsel %vm1499_vm4, %v1470_v49, %v1471_v53  ;;  %v11186_v57 = vsel %vm1499_vm4, %v1469_v60, %v1470_v49  ;;  %v4435_v35 = vmul.f32 %v12891_v5, %v11174_v58  ;;  %v12893_v60 = vld [vmem:[#allocation133_spill] sm:$0xff] }
 0x295   : > { %12888 = vst [vmem:[#allocation89_spill] sm:$0xff] %v11178_v38  ;;  %12890 = vst [vmem:[#allocation90_spill] sm:$0xff] %v11186_v57  ;;  %v4434_v49 = vmul.f32 %v12893_v60, %v11182_v20  ;;  %v1472_v5 = vrot.slane %v10710_v8, 7  ;;  %v8079_v60 = vld [vmem:[#allocation2 + $0x174] ss:$8 sps:$4 sm:$0xff]   ;;  %v2621_v8 = vrot.slane %v10706_v19, 1 }
 0x297   : > { %3002 = vmatpush1.bf16.msra.mxu0 %v8053_v34  ;;  %v12892_v34 = vld [vmem:[#allocation14_spill] sm:$0xff]  ;;  %v4454_v58 = vpack.c.bf16 %v4435_v35, %v4434_v49  ;;  %v2622_v49 = vrot.slane %v10708_v32, 1 }
 0x298   : > { %3003 = vmatprep.subr.bf16.mxu0 %v8061_v15  ;;  %v1731_v15 = vmul.f32 %v12892_v34, %v11178_v38  ;;  %v12899_v35 = vld [vmem:[#allocation134_spill] sm:$0xff] }
 0x299   : > { %4698 = vmatmul.mubr.bf16.gmra.mrb[24].mxu1 %v4453_v3  ;;  %2452 = vmatmul.mubr.bf16.gmra.mrb[40].mxu0 %v1758_v33  ;;  %v8065_v3 = vld [vmem:[#allocation2 + $0x150] ss:$8 sps:$4 sm:$0xff]  }
 0x29a   : > { %4707 = vmatprep.mubr.bf16.mxu1 %v12688_v4  ;;  %2461 = vmatprep.mubr.bf16.mxu0 %v12688_v4  ;;  %v12894_v33 = vld [vmem:[#allocation15_spill] sm:$0xff] }
 0x29b   : > { %3004 = vmatpush1.bf16.msra.mxu0 %v8059_v23  ;;  %v1730_v29 = vmul.f32 %v12894_v33, %v11186_v57  ;;  %v8071_v23 = vld [vmem:[#allocation2 + $0x160] ss:$8 sps:$4 sm:$0xff]   ;;  %v11212_v33 = vsel %vm2624_vm5, %v2618_v41, %v2619_v18  ;;  %v1475_v18 = vrot.slane %v12782_v54, 7  ;;  %v8085_v41 = vld [vmem:[#allocation2 + $0x184] ss:$8 sps:$4 sm:$0xff]  }
 0x29c   : > { %3005 = vmatprep.subr.bf16.mxu0 %v8067_v2  ;;  %v11208_v2 = vsel %vm1499_vm4, %v1472_v5, %v1473_v27  ;;  %12897 = vst [vmem:[#allocation68_spill] sm:$0xff] %v11212_v33 }
 0x29d   : > { %v1759_v34 = vpack.c.bf16 %v1731_v15, %v1730_v29  ;;  %12896 = vst [vmem:[#allocation91_spill] sm:$0xff] %v11208_v2  ;;  %v11216_v29 = vsel %vm1499_vm4, %v1471_v53, %v1472_v5  ;;  %v4437_v15 = vmul.f32 %v12899_v35, %v11204_v63  ;;  %v12901_v53 = vld [vmem:[#allocation135_spill] sm:$0xff]  ;;  %v1474_v35 = vrot.slane %v10753_v30, 7 }
 0x29e   : > { %12898 = vst [vmem:[#allocation92_spill] sm:$0xff] %v11216_v29  ;;  %v4436_v5 = vmul.f32 %v12901_v53, %v11212_v33  ;;  %v11242_v53 = vsel %vm2624_vm5, %v2620_v47, %v2621_v8  ;;  %v12911_v33 = vrot.slane %v9705_v24, 1 }
 0x29f   : > { %3006 = vmatpush1.bf16.msra.mxu0 %v8065_v3  ;;  %v12900_v3 = vld [vmem:[#allocation16_spill] sm:$0xff]  ;;  %12905 = vst [vmem:[#allocation104_spill] sm:$0xff] %v11242_v53 }
 0x2a0   : > { %3007 = vmatprep.subr.bf16.mxu0 %v8073_v13  ;;  %v1733_v13 = vmul.f32 %v12900_v3, %v11208_v2  ;;  %v4455_v63 = vpack.c.bf16 %v4437_v15, %v4436_v5  ;;  %v11246_v15 = vsel %vm1499_vm4, %v1473_v27, %v1474_v35  ;;  %v1477_v5 = vrot.slane %v10088_v43, 7  ;;  %v12910_v27 = vld [vmem:[#allocation19_spill] sm:$0xff] }
 0x2a1   : > { %4708 = vmatmul.mubr.bf16.gmra.mrb[28].mxu1 %v4454_v58  ;;  %2462 = vmatmul.mubr.bf16.gmra.mrb[44].mxu0 %v1759_v34  ;;  %v8077_v58 = vld [vmem:[#allocation2 + $0x170] ss:$8 sps:$4 sm:$0xff]   ;;  %v12902_v34 = vld [vmem:[#allocation17_spill] sm:$0xff]  ;;  %12906 = vst [vmem:[#allocation96_spill] sm:$0xff] %v11246_v15 }
 0x2a2   : > { %4717 = vmatprep.mubr.bf16.mxu1 %v12688_v4  ;;  %2471 = vmatprep.mubr.bf16.mxu0 %v12688_v4  ;;  %v1732_v20 = vmul.f32 %v12902_v34, %v11216_v29  ;;  %v1734_v34 = vmul.f32 %v12910_v27, %v11246_v15 }
 0x2a3   : > { %3008 = vmatpush1.bf16.msra.mxu0 %v8071_v23  ;;  %v11234_v23 = vsel %vm2624_vm5, %v2621_v8, %v2622_v49  ;;  %v12909_v8 = vld [vmem:[#allocation138_spill] sm:$0xff] }
 0x2a4   : > { %3009 = vmatprep.subr.bf16.mxu0 %v8079_v60  ;;  %v1760_v3 = vpack.c.bf16 %v1733_v13, %v1732_v20  ;;  %12903 = vst [vmem:[#allocation103_spill] sm:$0xff] %v11234_v23  ;;  %v11238_v60 = vsel %vm1499_vm4, %v1474_v35, %v1475_v18  ;;  %v12907_v20 = vld [vmem:[#allocation137_spill] sm:$0xff]  ;;  %v4438_v47 = vmul.f32 %v12909_v8, %v11242_v53  ;;  %v1476_v35 = vrot.slane %v12788_v39, 7  ;;  %v8058_v53 = vld [vmem:[#allocation2 + $0x394] ss:$8 sps:$4 sm:$0xff]  }
 0x2a5   : > { %12904 = vst [vmem:[#allocation94_spill] sm:$0xff] %v11238_v60  ;;  %v4439_v13 = vmul.f32 %v12907_v20, %v11234_v23 }
 0x2a6   : > { %v11273_v8 = vsel %vm1499_vm4, %v1476_v35, %v1477_v5 }
 0x2a7   : > { %3010 = vmatpush1.bf16.msra.mxu0 %v8077_v58  ;;  %v12908_v58 = vld [vmem:[#allocation18_spill] sm:$0xff]  ;;  %12914 = vst [vmem:[#allocation112_spill] sm:$0xff] %v11273_v8 }
 0x2a8   : > { %3590 = vmatprep.subr.bf16.mxu0 %v8085_v41  ;;  %v1735_v41 = vmul.f32 %v12908_v58, %v11238_v60 }
 0x2a9   : > { %4718 = vmatmul.mubr.bf16.gmra.mrb[32].mxu1 %v4455_v63  ;;  %2472 = vmatmul.mubr.bf16.gmra.mrb[48].mxu0 %v1760_v3  ;;  %v2623_v63 = vrot.slane %v10515_v37, 1  ;;  %v4456_v3 = vpack.c.bf16 %v4439_v13, %v4438_v47  ;;  %v11277_v13 = vsel %vm1499_vm4, %v1475_v18, %v1476_v35  ;;  %v12918_v47 = vld [vmem:[#allocation20_spill] sm:$0xff]  ;;  %v1478_v18 = vrot.slane %v12800_v61, 7 }
 0x2aa   : > { %4727 = vmatprep.mubr.bf16.mxu1 %v12688_v4  ;;  %2481 = vmatprep.mubr.bf16.mxu0 %v12688_v4  ;;  %v1761_v32 = vpack.c.bf16 %v1735_v41, %v1734_v34  ;;  %12915 = vst [vmem:[#allocation108_spill] sm:$0xff] %v11277_v13  ;;  %v1737_v27 = vmul.f32 %v12918_v47, %v11273_v8  ;;  %v1479_v34 = vrot.slane %v10111_v9, 7 }
 0x2ab   : > { %v11265_v20 = vsel %vm2624_vm5, %v2623_v63, %v12911_v33  ;;  %v11269_v58 = vsel %vm2624_vm5, %v2622_v49, %v2623_v63  ;;  %v12916_v33 = vld [vmem:[#allocation140_spill] sm:$0xff]  ;;  %v12917_v49 = vld [vmem:[#allocation141_spill] sm:$0xff] }
 0x2ac   : > { %12912 = vst [vmem:[#allocation111_spill] sm:$0xff] %v11265_v20  ;;  %12913 = vst [vmem:[#allocation98_spill] sm:$0xff] %v11269_v58  ;;  %v4441_v41 = vmul.f32 %v12916_v33, %v11265_v20  ;;  %v4440_v63 = vmul.f32 %v12917_v49, %v11269_v58  ;;  %v11293_v24 = vsel %vm1499_vm4, %v1478_v18, %v1479_v34  ;;  %v12922_v49 = vld [vmem:[#allocation97_spill] sm:$0xff] }
 0x2ad   : > { %12920 = vst [vmem:[#allocation117_spill] sm:$0xff] %v11293_v24  ;;  %v11297_v33 = vsel %vm1499_vm4, %v1477_v5, %v1478_v18  ;;  %v5006_v47 = vmul.f32 %v12922_v49, %v11118_v51  ;;  %v1480_v5 = vrot.slane %v10097_v21, 7  ;;  %v8050_v18 = vld [vmem:[#allocation2 + $0x380] ss:$8 sps:$4 sm:$0xff]  }
 0x2ae   : > { %v4457_v35 = vpack.c.bf16 %v4441_v41, %v4440_v63  ;;  %12921 = vst [vmem:[#allocation109_spill] sm:$0xff] %v11297_v33  ;;  %v12923_v41 = vld [vmem:[#allocation99_spill] sm:$0xff] }
 0x2af   : > { %v5005_v63 = vmul.f32 %v12923_v41, %v11126_v22  ;;  %v11317_v41 = vsel %vm1499_vm4, %v1479_v34, %v1480_v5  ;;  %v1483_v34 = vrot.slane %v10502_v14, 7 }
 0x2b0   : > { %12927 = vst [vmem:[#allocation113_spill] sm:$0xff] %v11317_v41 }
 0x2b1   : > { %4728 = vmatmul.mubr.bf16.gmra.mrb[36].mxu1 %v4456_v3  ;;  %2482 = vmatmul.mubr.bf16.gmra.mrb[52].mxu0 %v1761_v32  ;;  %v12919_v32 = vld [vmem:[#allocation21_spill] sm:$0xff]  ;;  %v5037_v23 = vpack.c.bf16 %v5006_v47, %v5005_v63 }
 0x2b2   : > { %4737 = vmatprep.mubr.bf16.mxu1 %v12688_v4  ;;  %2491 = vmatprep.mubr.bf16.mxu0 %v12688_v4  ;;  %v1736_v3 = vmul.f32 %v12919_v32, %v11277_v13  ;;  %v12929_v47 = vld [vmem:[#allocation101_spill] sm:$0xff] }
 0x2b3   : > { %v5007_v63 = vmul.f32 %v12929_v47, %v11156_v52  ;;  %v8070_v47 = vld [vmem:[#allocation2 + $0x3b4] ss:$8 sps:$4 sm:$0xff]   ;;  %v1484_v52 = vrot.slane %v10416_v10, 7 }
 0x2b4   : > { %v1762_v37 = vpack.c.bf16 %v1737_v27, %v1736_v3  ;;  %v12924_v27 = vld [vmem:[#allocation22_spill] sm:$0xff]  ;;  %v1481_v3 = vrot.slane %v10352_v26, 7 }
 0x2b5   : > { %v1739_v32 = vmul.f32 %v12924_v27, %v11293_v24  ;;  %v8056_v27 = vld [vmem:[#allocation2 + $0x390] ss:$8 sps:$4 sm:$0xff]  }
 0x2b6   : > { %v11313_v49 = vsel %vm1499_vm4, %v1480_v5, %v1481_v3 }
 0x2b7   : > { %12926 = vst [vmem:[#allocation118_spill] sm:$0xff] %v11313_v49 }
 0x2b9   : > { %4738 = vmatmul.mubr.bf16.gmra.mrb[40].mxu1 %v4457_v35  ;;  %2492 = vmatmul.mubr.bf16.gmra.mrb[56].mxu0 %v1762_v37  ;;  %v12925_v37 = vld [vmem:[#allocation23_spill] sm:$0xff] }
 0x2ba   : > { %5182 = vmatprep.mubr.bf16.mxu1 %v12688_v4  ;;  %2501 = vmatprep.mubr.bf16.mxu0 %v12688_v4  ;;  %v1738_v35 = vmul.f32 %v12925_v37, %v11297_v33  ;;  %v12928_v37 = vld [vmem:[#allocation102_spill] sm:$0xff] }
 0x2bb   : > { %v5008_v51 = vmul.f32 %v12928_v37, %v11148_v40  ;;  %v8062_v40 = vld [vmem:[#allocation2 + $0x3a0] ss:$8 sps:$4 sm:$0xff]  }
 0x2bc   : > { %v1763_v58 = vpack.c.bf16 %v1739_v32, %v1738_v35  ;;  %v8064_v32 = vld [vmem:[#allocation2 + $0x3a4] ss:$8 sps:$4 sm:$0xff]  }
 0x2bd   : > { %v12931_v35 = vld [vmem:[#allocation25_spill] sm:$0xff]  ;;  %v5038_v22 = vpack.c.bf16 %v5008_v51, %v5007_v63  ;;  %v12934_v51 = vld [vmem:[#allocation107_spill] sm:$0xff] }
 0x2be   : > { %v1740_v5 = vmul.f32 %v12931_v35, %v11317_v41  ;;  %v12935_v63 = vld [vmem:[#allocation143_spill] sm:$0xff] }
 0x2c1   : > { %5183 = vmatmul.mubr.bf16.vlgmr.msra.gmra.mrb[44].mxu1 %v5037_v23  ;;  %2502 = vmatmul.mubr.bf16.gmra.mrb[60].mxu0 %v1763_v58  ;;  %v12930_v23 = vld [vmem:[#allocation24_spill] sm:$0xff] }
 0x2c2   : > { %5746 = vmatpush1.bf16.msra.mxu1 %v8050_v18  ;;  %5192 = vmatprep.mubr.bf16.mxu1 %v12688_v4  ;;  %v1741_v58 = vmul.f32 %v12930_v23, %v11313_v49  ;;  %v1482_v18 = vrot.slane %v10349_v6, 7 }
 0x2c3   : > { %5747 = vmatprep.subr.bf16.mxu1 %v8058_v53  ;;  %2511 = vmatprep.mubr.bf16.mxu0 %v12688_v4 }
 0x2c4   : > { %v1764_v37 = vpack.c.bf16 %v1741_v58, %v1740_v5  ;;  %v11333_v53 = vsel %vm1499_vm4, %v1482_v18, %v1483_v34  ;;  %v11337_v23 = vsel %vm1499_vm4, %v1481_v3, %v1482_v18  ;;  %v5009_v58 = vmul.f32 %v12935_v63, %v11186_v57  ;;  %v8076_v3 = vld [vmem:[#allocation2 + $0x3c4] ss:$8 sps:$4 sm:$0xff]   ;;  %v12937_v18 = vld [vmem:[#allocation27_spill] sm:$0xff] }
 0x2c5   : > { %12932 = vst [vmem:[#allocation11_spill] sm:$0xff] %v11333_v53  ;;  %12933 = vst [vmem:[#allocation9_spill] sm:$0xff] %v11337_v23  ;;  %v1485_v5 = vrot.slane %v10573_v55, 7 }
 0x2c6   : > { %5748 = vmatpush1.bf16.msra.mxu1 %v8056_v27  ;;  %v5010_v27 = vmul.f32 %v12934_v51, %v11178_v38  ;;  %v8074_v51 = vld [vmem:[#allocation2 + $0x3c0] ss:$8 sps:$4 sm:$0xff]  }
 0x2c7   : > { %5749 = vmatprep.subr.bf16.mxu1 %v8064_v32  ;;  %v12936_v32 = vld [vmem:[#allocation26_spill] sm:$0xff]  ;;  %v11353_v63 = vsel %vm1499_vm4, %v1484_v52, %v1485_v5 }
 0x2c8   : > { %v1743_v35 = vmul.f32 %v12936_v32, %v11333_v53  ;;  %v5039_v6 = vpack.c.bf16 %v5010_v27, %v5009_v58  ;;  %12938 = vst [vmem:[#allocation114_spill] sm:$0xff] %v11353_v63  ;;  %v12940_v27 = vld [vmem:[#allocation147_spill] sm:$0xff]  ;;  %v12941_v32 = vld [vmem:[#allocation150_spill] sm:$0xff] }
 0x2c9   : > { %5193 = vmatmul.mubr.bf16.gmra.mrb[48].mxu1 %v5038_v22  ;;  %2512 = vmatmul.mubr.bf16.gmra.mrb[64].mxu0 %v1764_v37  ;;  %v8068_v22 = vld [vmem:[#allocation2 + $0x3b0] ss:$8 sps:$4 sm:$0xff]   ;;  %v1742_v37 = vmul.f32 %v12937_v18, %v11337_v23  ;;  %v5012_v58 = vmul.f32 %v12940_v27, %v11208_v2  ;;  %v8086_v27 = vld [vmem:[#allocation2 + $0x3e0] ss:$8 sps:$4 sm:$0xff]  }
 0x2ca   : > { %5202 = vmatprep.mubr.bf16.mxu1 %v12688_v4  ;;  %2521 = vmatprep.mubr.bf16.mxu0 %v12688_v4 }
 0x2cb   : > { %5750 = vmatpush1.bf16.msra.mxu1 %v8062_v40  ;;  %v1765_v14 = vpack.c.bf16 %v1743_v35, %v1742_v37  ;;  %v8082_v40 = vld [vmem:[#allocation2 + $0x3d4] ss:$8 sps:$4 sm:$0xff]   ;;  %v5011_v35 = vmul.f32 %v12941_v32, %v11216_v29  ;;  %v1486_v37 = vrot.slane %v10570_v45, 7 }
 0x2cc   : > { %5751 = vmatprep.subr.bf16.mxu1 %v8070_v47  ;;  %v11357_v47 = vsel %vm1499_vm4, %v1483_v34, %v1484_v52  ;;  %v8088_v52 = vld [vmem:[#allocation2 + $0x3e4] ss:$8 sps:$4 sm:$0xff]  }
 0x2cd   : > { %12939 = vst [vmem:[#allocation121_spill] sm:$0xff] %v11357_v47  ;;  %v12943_v34 = vld [vmem:[#allocation29_spill] sm:$0xff]  ;;  %v5040_v38 = vpack.c.bf16 %v5012_v58, %v5011_v35  ;;  %v12946_v58 = vld [vmem:[#allocation151_spill] sm:$0xff] }
 0x2ce   : > { %v1744_v18 = vmul.f32 %v12943_v34, %v11357_v47  ;;  %v5014_v35 = vmul.f32 %v12946_v58, %v11238_v60  ;;  %v12949_v34 = vld [vmem:[#allocation31_spill] sm:$0xff] }
 0x2cf   : > { %5752 = vmatpush1.bf16.msra.mxu1 %v8068_v22  ;;  %v12942_v22 = vld [vmem:[#allocation28_spill] sm:$0xff]  ;;  %v8106_v60 = vld [vmem:[#allocation2 + $0x414] ss:$8 sps:$4 sm:$0xff]  }
 0x2d0   : > { %5753 = vmatprep.subr.bf16.mxu1 %v8076_v3  ;;  %v1745_v3 = vmul.f32 %v12942_v22, %v11353_v63  ;;  %v12947_v22 = vld [vmem:[#allocation152_spill] sm:$0xff] }
 0x2d1   : > { %5203 = vmatmul.mubr.bf16.gmra.mrb[52].mxu1 %v5039_v6  ;;  %2522 = vmatmul.mubr.bf16.gmra.mrb[68].mxu0 %v1765_v14  ;;  %v8080_v6 = vld [vmem:[#allocation2 + $0x3d0] ss:$8 sps:$4 sm:$0xff]   ;;  %v1487_v14 = vrot.slane %v10630_v42, 7 }
 0x2d2   : > { %5212 = vmatprep.mubr.bf16.mxu1 %v12688_v4  ;;  %2531 = vmatprep.mubr.bf16.mxu0 %v12688_v4  ;;  %v1766_v57 = vpack.c.bf16 %v1745_v3, %v1744_v18  ;;  %v5013_v3 = vmul.f32 %v12947_v22, %v11246_v15  ;;  %v12953_v22 = vld [vmem:[#allocation155_spill] sm:$0xff]  ;;  %v13022_v15 = vld [vmem:[#allocation73_spill] sm:$0xff] }
 0x2d3   : > { %5754 = vmatpush1.bf16.msra.mxu1 %v8074_v51  ;;  %v11373_v32 = vsel %vm1499_vm4, %v1486_v37, %v1487_v14  ;;  %v8094_v51 = vld [vmem:[#allocation2 + $0x3f4] ss:$8 sps:$4 sm:$0xff]  }
 0x2d4   : > { %5755 = vmatprep.subr.bf16.mxu1 %v8082_v40  ;;  %12944 = vst [vmem:[#allocation10_spill] sm:$0xff] %v11373_v32  ;;  %v11377_v40 = vsel %vm1499_vm4, %v1485_v5, %v1486_v37  ;;  %v8100_v5 = vld [vmem:[#allocation2 + $0x404] ss:$8 sps:$4 sm:$0xff]   ;;  %v1488_v37 = vrot.slane %v10619_v50, 7  ;;  %v5041_v2 = vpack.c.bf16 %v5014_v35, %v5013_v3  ;;  %v5015_v3 = vmul.f32 %v12953_v22, %v11277_v13 }
 0x2d5   : > { %12945 = vst [vmem:[#allocation123_spill] sm:$0xff] %v11377_v40  ;;  %v1746_v18 = vmul.f32 %v12949_v34, %v11377_v40 }
 0x2d7   : > { %5756 = vmatpush1.bf16.msra.mxu1 %v8080_v6  ;;  %v12948_v6 = vld [vmem:[#allocation30_spill] sm:$0xff] }
 0x2d8   : > { %5757 = vmatprep.subr.bf16.mxu1 %v8088_v52  ;;  %v1747_v52 = vmul.f32 %v12948_v6, %v11373_v32  ;;  %v12954_v6 = vld [vmem:[#allocation32_spill] sm:$0xff] }
 0x2d9   : > { %5213 = vmatmul.mubr.bf16.gmra.mrb[56].mxu1 %v5040_v38  ;;  %2532 = vmatmul.mubr.bf16.gmra.mrb[72].mxu0 %v1766_v57  ;;  %v8092_v38 = vld [vmem:[#allocation2 + $0x3f0] ss:$8 sps:$4 sm:$0xff]   ;;  %v1489_v57 = vrot.slane %v10681_v25, 7 }
 0x2da   : > { %5222 = vmatprep.mubr.bf16.mxu1 %v12688_v4  ;;  %2541 = vmatprep.mubr.bf16.mxu0 %v12688_v4  ;;  %v1767_v29 = vpack.c.bf16 %v1747_v52, %v1746_v18 }
 0x2db   : > { %5758 = vmatpush1.bf16.msra.mxu1 %v8086_v27  ;;  %v11393_v58 = vsel %vm1499_vm4, %v1488_v37, %v1489_v57  ;;  %v11397_v27 = vsel %vm1499_vm4, %v1487_v14, %v1488_v37  ;;  %v1490_v14 = vrot.slane %v10679_v12, 7 }
 0x2dc   : > { %5759 = vmatprep.subr.bf16.mxu1 %v8094_v51  ;;  %12950 = vst [vmem:[#allocation8_spill] sm:$0xff] %v11393_v58  ;;  %12951 = vst [vmem:[#allocation125_spill] sm:$0xff] %v11397_v27  ;;  %v12952_v51 = vld [vmem:[#allocation75_spill] sm:$0xff]  ;;  %v1749_v52 = vmul.f32 %v12954_v6, %v11393_v58  ;;  %v12960_v6 = vld [vmem:[#allocation34_spill] sm:$0xff] }
 0x2dd   : > { %v5016_v35 = vmul.f32 %v12952_v51, %v11273_v8  ;;  %v11417_v37 = vsel %vm1499_vm4, %v1489_v57, %v1490_v14  ;;  %v12958_v51 = vld [vmem:[#allocation161_spill] sm:$0xff]  ;;  %v1492_v57 = vrot.slane %v10720_v56, 7  ;;  %v13023_v56 = vld [vmem:[#allocation72_spill] sm:$0xff] }
 0x2de   : > { %12957 = vst [vmem:[#allocation126_spill] sm:$0xff] %v11417_v37  ;;  %v5018_v22 = vmul.f32 %v12958_v51, %v11293_v24 }
 0x2df   : > { %5760 = vmatpush1.bf16.msra.mxu1 %v8092_v38 }
 0x2e0   : > { %6340 = vmatprep.subr.bf16.mxu1 %v8100_v5  ;;  %v5042_v5 = vpack.c.bf16 %v5016_v35, %v5015_v3  ;;  %v12959_v35 = vld [vmem:[#allocation162_spill] sm:$0xff] }
 0x2e1   : > { %5223 = vmatmul.mubr.bf16.gmra.mrb[60].mxu1 %v5041_v2  ;;  %2542 = vmatmul.mubr.bf16.gmra.mrb[76].mxu0 %v1767_v29  ;;  %v1491_v2 = vrot.slane %v10722_v48, 7  ;;  %v12955_v29 = vld [vmem:[#allocation33_spill] sm:$0xff]  ;;  %v5017_v3 = vmul.f32 %v12959_v35, %v11297_v33  ;;  %v12964_v35 = vld [vmem:[#allocation163_spill] sm:$0xff] }
 0x2e2   : > { %5232 = vmatprep.mubr.bf16.mxu1 %v12688_v4  ;;  %2551 = vmatprep.mubr.bf16.mxu0 %v12688_v4  ;;  %v1748_v38 = vmul.f32 %v12955_v29, %v11397_v27  ;;  %v1493_v29 = vrot.slane %v10765_v28, 7  ;;  %v8091_v33 = vld [vmem:[#allocation2 + $0x194] ss:$8 sps:$4 sm:$0xff]   ;;  %v8122_v48 = vld [vmem:[#allocation2 + $0x440] ss:$8 sps:$4 sm:$0xff]  }
 0x2e3   : > { %v11413_v18 = vsel %vm1499_vm4, %v1490_v14, %v1491_v2  ;;  %v5043_v14 = vpack.c.bf16 %v5018_v22, %v5017_v3  ;;  %v11437_v51 = vsel %vm1499_vm4, %v1491_v2, %v1492_v57  ;;  %v12965_v22 = vld [vmem:[#allocation164_spill] sm:$0xff]  ;;  %v12968_v2 = vrot.slane %v10706_v19, 7 }
 0x2e4   : > { %v1768_v34 = vpack.c.bf16 %v1749_v52, %v1748_v38  ;;  %12956 = vst [vmem:[#allocation12_spill] sm:$0xff] %v11413_v18  ;;  %v1751_v52 = vmul.f32 %v12960_v6, %v11413_v18  ;;  %v12961_v38 = vld [vmem:[#allocation35_spill] sm:$0xff]  ;;  %v11433_v8 = vsel %vm1499_vm4, %v1492_v57, %v1493_v29  ;;  %12963 = vst [vmem:[#allocation132_spill] sm:$0xff] %v11437_v51 }
 0x2e5   : > { %12962 = vst [vmem:[#allocation13_spill] sm:$0xff] %v11433_v8  ;;  %v5020_v6 = vmul.f32 %v12964_v35, %v11313_v49  ;;  %v5019_v3 = vmul.f32 %v12965_v22, %v11317_v41  ;;  %v11453_v57 = vsel %vm1499_vm4, %v1493_v29, %v12968_v2  ;;  %v12970_v35 = vld [vmem:[#allocation167_spill] sm:$0xff] }
 0x2e6   : > { %12969 = vst [vmem:[#allocation14_spill] sm:$0xff] %v11453_v57  ;;  %v5022_v22 = vmul.f32 %v12970_v35, %v11333_v53  ;;  %v12973_v29 = vld [vmem:[#allocation39_spill] sm:$0xff]  ;;  %v12975_v53 = vld [vmem:[#allocation170_spill] sm:$0xff] }
 0x2e7   : > { %v5023_v49 = vmul.f32 %v12975_v53, %v11357_v47  ;;  %v12978_v53 = vld [vmem:[#allocation172_spill] sm:$0xff] }
 0x2e9   : > { %5233 = vmatmul.mubr.bf16.gmra.mrb[0].mxu1 %v5042_v5  ;;  %2552 = vmatmul.mubr.bf16.gmra.mrb[80].mxu0 %v1768_v34  ;;  %v1750_v5 = vmul.f32 %v12961_v38, %v11417_v37 }
 0x2ea   : > { %5242 = vmatprep.mubr.bf16.mxu1 %v12688_v4  ;;  %2561 = vmatprep.mubr.bf16.mxu0 %v12688_v4 }
 0x2eb   : > { %v1769_v34 = vpack.c.bf16 %v1751_v52, %v1750_v5  ;;  %v12966_v52 = vld [vmem:[#allocation36_spill] sm:$0xff]  ;;  %v12967_v5 = vld [vmem:[#allocation37_spill] sm:$0xff] }
 0x2ec   : > { %v1753_v38 = vmul.f32 %v12966_v52, %v11433_v8  ;;  %v12971_v52 = vld [vmem:[#allocation168_spill] sm:$0xff] }
 0x2f1   : > { %5243 = vmatmul.mubr.bf16.gmra.mrb[4].mxu1 %v5043_v14  ;;  %2562 = vmatmul.mubr.bf16.gmra.mrb[84].mxu0 %v1769_v34  ;;  %v1752_v14 = vmul.f32 %v12967_v5, %v11437_v51  ;;  %v5044_v34 = vpack.c.bf16 %v5020_v6, %v5019_v3  ;;  %v5021_v5 = vmul.f32 %v12971_v52, %v11337_v23  ;;  %v12972_v6 = vld [vmem:[#allocation38_spill] sm:$0xff]  ;;  %v12974_v52 = vld [vmem:[#allocation169_spill] sm:$0xff] }
 0x2f2   : > { %5252 = vmatprep.mubr.bf16.mxu1 %v12688_v4  ;;  %2571 = vmatprep.mubr.bf16.mxu0 %v12688_v4  ;;  %v1755_v3 = vmul.f32 %v12972_v6, %v10745_v46  ;;  %v5024_v6 = vmul.f32 %v12974_v52, %v11353_v63  ;;  %v5026_v52 = vmul.f32 %v12978_v53, %v11373_v32  ;;  %v8095_v53 = vld [vmem:[#allocation2 + $0x1a0] ss:$8 sps:$4 sm:$0xff]   ;;  %v8121_v32 = vld [vmem:[#allocation2 + $0x1e4] ss:$8 sps:$4 sm:$0xff]  }
 0x2f3   : > { %v1770_v24 = vpack.c.bf16 %v1753_v38, %v1752_v14  ;;  %v11465_v38 = vpop.permute.xlu0 %2792  ;;  %v1754_v14 = vmul.f32 %v12973_v29, %v11453_v57  ;;  %v12976_v29 = vld [vmem:[#allocation174_spill] sm:$0xff] }
 0x2f5   : > { %v1771_v2 = vpack.c.bf16 %v1755_v3, %v1754_v14  ;;  %v5046_v14 = vpack.c.bf16 %v5024_v6, %v5023_v49  ;;  %v2853_v49 = vmul.f32 %v10466_v0, %v10863_v11  ;;  %v2852_v6 = vmul.f32 %v10473_v31, %v10813_v36  ;;  %v12980_v0 = vld [vmem:[#allocation176_spill] sm:$0xff] }
 0x2f6   : > { %v5028_v31 = vmul.f32 %v12980_v0, %v11393_v58  ;;  %v8107_v0 = vld [vmem:[#allocation2 + $0x1c0] ss:$8 sps:$4 sm:$0xff]  }
 0x2f7   : > { %v11471_v35 = vpop.permute.xlu0 %5492 }
 0x2f9   : > { %5253 = vmatmul.mubr.bf16.gmra.mrb[8].mxu1 %v5044_v34  ;;  %2572 = vmatmul.mubr.bf16.gmra.mrb[88].mxu0 %v1770_v24  ;;  %v11463_v24 = vpop.permute.xlu1 %2797  ;;  %v5045_v34 = vpack.c.bf16 %v5022_v22, %v5021_v5  ;;  %v2851_v22 = vmul.f32 %v12976_v29, %v10825_v59  ;;  %v12977_v5 = vld [vmem:[#allocation175_spill] sm:$0xff]  ;;  %v12979_v29 = vld [vmem:[#allocation173_spill] sm:$0xff]  ;;  %v2883_v59 = vpack.c.bf16 %v2853_v49, %v2852_v6 }
 0x2fa   : > { %5262 = vmatprep.mubr.bf16.mxu1 %v12688_v4  ;;  %2581 = vmatprep.mubr.bf16.mxu0 %v12688_v4  ;;  %v2850_v3 = vmul.f32 %v12977_v5, %v11265_v20  ;;  %v5025_v5 = vmul.f32 %v12979_v29, %v11377_v40  ;;  %v8103_v29 = vld [vmem:[#allocation2 + $0x1b4] ss:$8 sps:$4 sm:$0xff]   ;;  %v8101_v49 = vld [vmem:[#allocation2 + $0x1b0] ss:$8 sps:$4 sm:$0xff]   ;;  %v8109_v6 = vld [vmem:[#allocation2 + $0x1c4] ss:$8 sps:$4 sm:$0xff]  }
 0x2fb   : > { %v11485_v41 = vpop.permute.xlu0 %2802  ;;  %v8119_v40 = vld [vmem:[#allocation2 + $0x1e0] ss:$8 sps:$4 sm:$0xff]  }
 0x2fc   : > { %v5047_v20 = vpack.c.bf16 %v5026_v52, %v5025_v5  ;;  %v2855_v52 = vmul.f32 %v10541_v17, %v10898_v1  ;;  %v2854_v5 = vmul.f32 %v10546_v7, %v10851_v16  ;;  %v12982_v7 = vld [vmem:[#allocation86_spill] sm:$0xff]  ;;  %v13010_v16 = vld [vmem:[#allocation127_spill] sm:$0xff]  ;;  %v13012_v1 = vld [vmem:[#allocation149_spill] sm:$0xff] }
 0x2fd   : > { %v11469_v44 = vpop.permute.xlu1 %5497 }
 0x301   : > { %5263 = vmatmul.mubr.bf16.gmra.mrb[12].mxu1 %v5045_v34  ;;  %2582 = vmatmul.mubr.bf16.gmra.mrb[92].mxu0 %v1771_v2  ;;  %v2882_v34 = vpack.c.bf16 %v2851_v22, %v2850_v3  ;;  %v8083_v2 = vld [vmem:[#allocation2 + $0x180] ss:$8 sps:$4 sm:$0xff]   ;;  %v11483_v23 = vpop.permute.xlu1 %2807  ;;  %v8089_v22 = vld [vmem:[#allocation2 + $0x190] ss:$8 sps:$4 sm:$0xff]   ;;  %v8097_v3 = vld [vmem:[#allocation2 + $0x1a4] ss:$8 sps:$4 sm:$0xff]  }
 0x302   : > { %5272 = vmatprep.mubr.bf16.mxu1 %v12688_v4  ;;  %3027 = vmatprep.mubr.bf16.mxu0 %v12688_v4 }
 0x309   : > { %5273 = vmatmul.mubr.bf16.gmra.mrb[16].mxu1 %v5046_v14  ;;  %3028 = vmatmul.mubr.bf16.vlgmr.msra.gmra.mrb[32].mxu0 %v2882_v34  ;;  %v11497_v14 = vpop.permute.xlu1 %5507  ;;  %v11499_v34 = vpop.permute.xlu0 %5502 }
 0x30a   : > { %5282 = vmatprep.mubr.bf16.mxu1 %v12688_v4  ;;  %3037 = vmatprep.mubr.bf16.mxu0 %v12688_v4 }
 0x30b   : > { %3591 = vmatpush1.bf16.msra.mxu0 %v8083_v2 }
 0x30c   : > { %3592 = vmatprep.subr.bf16.mxu0 %v8091_v33  ;;  %v12981_v33 = vld [vmem:[#allocation177_spill] sm:$0xff] }
 0x30d   : > { %v5027_v2 = vmul.f32 %v12981_v33, %v11397_v27  ;;  %v8115_v33 = vld [vmem:[#allocation2 + $0x1d4] ss:$8 sps:$4 sm:$0xff]  }
 0x30f   : > { %3593 = vmatpush1.bf16.msra.mxu0 %v8089_v22  ;;  %v5048_v22 = vpack.c.bf16 %v5028_v31, %v5027_v2  ;;  %v12984_v2 = vld [vmem:[#allocation165_spill] sm:$0xff] }
 0x310   : > { %3594 = vmatprep.subr.bf16.mxu0 %v8097_v3  ;;  %v2884_v3 = vpack.c.bf16 %v2855_v52, %v2854_v5  ;;  %v12985_v52 = vld [vmem:[#allocation136_spill] sm:$0xff] }
 0x311   : > { %5283 = vmatmul.mubr.bf16.gmra.mrb[20].mxu1 %v5047_v20  ;;  %3038 = vmatmul.mubr.bf16.gmra.mrb[36].mxu0 %v2883_v59  ;;  %v11511_v20 = vpop.permute.xlu1 %2817  ;;  %v11513_v59 = vpop.permute.xlu0 %2812  ;;  %v2857_v5 = vmul.f32 %v12985_v52, %v12984_v2  ;;  %v12990_v52 = vld [vmem:[#allocation148_spill] sm:$0xff] }
 0x312   : > { %5292 = vmatprep.mubr.bf16.mxu1 %v12688_v4  ;;  %3047 = vmatprep.mubr.bf16.mxu0 %v12688_v4 }
 0x313   : > { %3595 = vmatpush1.bf16.msra.mxu0 %v8095_v53  ;;  %v5030_v53 = vmul.f32 %v12982_v7, %v11413_v18 }
 0x314   : > { %3596 = vmatprep.subr.bf16.mxu0 %v8103_v29  ;;  %v12983_v29 = vld [vmem:[#allocation179_spill] sm:$0xff] }
 0x315   : > { %v11515_v17 = vpop.permute.xlu1 %5517  ;;  %v11517_v58 = vpop.permute.xlu0 %5512  ;;  %v5029_v31 = vmul.f32 %v12983_v29, %v11417_v37  ;;  %v8127_v29 = vld [vmem:[#allocation2 + $0x1f4] ss:$8 sps:$4 sm:$0xff]  }
 0x317   : > { %3597 = vmatpush1.bf16.msra.mxu0 %v8101_v49  ;;  %v12986_v49 = vld [vmem:[#allocation122_spill] sm:$0xff]  ;;  %v5049_v27 = vpack.c.bf16 %v5030_v53, %v5029_v31  ;;  %v12989_v53 = vld [vmem:[#allocation40_spill] sm:$0xff] }
 0x318   : > { %3598 = vmatprep.subr.bf16.mxu0 %v8109_v6  ;;  %v12987_v6 = vld [vmem:[#allocation142_spill] sm:$0xff]  ;;  %v5031_v31 = vmul.f32 %v12989_v53, %v11437_v51  ;;  %v12994_v53 = vld [vmem:[#allocation157_spill] sm:$0xff] }
 0x319   : > { %5293 = vmatmul.mubr.bf16.gmra.mrb[24].mxu1 %v5048_v22  ;;  %3048 = vmatmul.mubr.bf16.gmra.mrb[40].mxu0 %v2884_v3  ;;  %v2856_v22 = vmul.f32 %v12987_v6, %v12986_v49  ;;  %v8113_v3 = vld [vmem:[#allocation2 + $0x1d0] ss:$8 sps:$4 sm:$0xff]   ;;  %v11529_v47 = vpop.permute.xlu1 %2827  ;;  %v11531_v7 = vpop.permute.xlu0 %2822 }
 0x31a   : > { %5302 = vmatprep.mubr.bf16.mxu1 %v12688_v4  ;;  %3057 = vmatprep.mubr.bf16.mxu0 %v12688_v4 }
 0x31b   : > { %3599 = vmatpush1.bf16.msra.mxu0 %v8107_v0  ;;  %v2885_v63 = vpack.c.bf16 %v2857_v5, %v2856_v22  ;;  %v12988_v0 = vld [vmem:[#allocation41_spill] sm:$0xff]  ;;  %v12991_v5 = vld [vmem:[#allocation146_spill] sm:$0xff] }
 0x31c   : > { %3600 = vmatprep.subr.bf16.mxu0 %v8115_v33  ;;  %v5032_v33 = vmul.f32 %v12988_v0, %v11433_v8  ;;  %v2859_v6 = vmul.f32 %v12991_v5, %v12990_v52  ;;  %v12992_v22 = vld [vmem:[#allocation74_spill] sm:$0xff]  ;;  %v8266_v0 = vld [vmem:[#allocation2 + $0x204] ss:$8 sps:$4 sm:$0xff]   ;;  %v12997_v8 = vld [vmem:[#allocation115_spill] sm:$0xff] }
 0x31e   : > { %v5050_v37 = vpack.c.bf16 %v5032_v33, %v5031_v31  ;;  %v12998_v33 = vld [vmem:[#allocation93_spill] sm:$0xff] }
 0x31f   : > { %3601 = vmatpush1.bf16.msra.mxu0 %v8113_v3  ;;  %v12993_v3 = vld [vmem:[#allocation42_spill] sm:$0xff] }
 0x320   : > { %3602 = vmatprep.subr.bf16.mxu0 %v8121_v32  ;;  %v2858_v18 = vmul.f32 %v12993_v3, %v12992_v22  ;;  %v8125_v32 = vld [vmem:[#allocation2 + $0x1f0] ss:$8 sps:$4 sm:$0xff]   ;;  %v12996_v3 = vld [vmem:[#allocation53_spill] sm:$0xff]  ;;  %v13005_v22 = vld [vmem:[#allocation116_spill] sm:$0xff] }
 0x321   : > { %5303 = vmatmul.mubr.bf16.gmra.mrb[28].mxu1 %v5049_v27  ;;  %3058 = vmatmul.mubr.bf16.gmra.mrb[44].mxu0 %v2885_v63  ;;  %v11543_v63 = vpop.permute.xlu1 %5527  ;;  %v11545_v27 = vpop.permute.xlu0 %5522  ;;  %v2861_v51 = vmul.f32 %v12997_v8, %v12996_v3  ;;  %v13000_v8 = vld [vmem:[#allocation77_spill] sm:$0xff]  ;;  %v13004_v3 = vld [vmem:[#allocation54_spill] sm:$0xff] }
 0x322   : > { %5312 = vmatprep.mubr.bf16.mxu1 %v12688_v4  ;;  %3067 = vmatprep.mubr.bf16.mxu0 %v12688_v4  ;;  %v2886_v49 = vpack.c.bf16 %v2859_v6, %v2858_v18  ;;  %v12999_v18 = vld [vmem:[#allocation124_spill] sm:$0xff] }
 0x323   : > { %3603 = vmatpush1.bf16.msra.mxu0 %v8119_v40  ;;  %v5034_v40 = vmul.f32 %v12994_v53, %v10745_v46  ;;  %v2860_v31 = vmul.f32 %v12999_v18, %v12998_v33  ;;  %v13002_v18 = vld [vmem:[#allocation57_spill] sm:$0xff] }
 0x324   : > { %3604 = vmatprep.subr.bf16.mxu0 %v8127_v29  ;;  %v12995_v29 = vld [vmem:[#allocation159_spill] sm:$0xff] }
 0x325   : > { %v5033_v5 = vmul.f32 %v12995_v29, %v11453_v57  ;;  %v11557_v6 = vpop.permute.xlu1 %2837  ;;  %v13001_v29 = vld [vmem:[#allocation153_spill] sm:$0xff]  ;;  %v13003_v57 = vld [vmem:[#allocation154_spill] sm:$0xff] }
 0x326   : > { %v5036_v46 = vmul.f32 %v13001_v29, %v13000_v8  ;;  %v5035_v33 = vmul.f32 %v13003_v57, %v13002_v18  ;;  %v13008_v29 = vld [vmem:[#allocation131_spill] sm:$0xff]  ;;  %v13009_v57 = vld [vmem:[#allocation129_spill] sm:$0xff] }
 0x327   : > { %3605 = vmatpush1.bf16.msra.mxu0 %v8125_v32  ;;  %v2887_v32 = vpack.c.bf16 %v2861_v51, %v2860_v31  ;;  %v13006_v51 = vld [vmem:[#allocation52_spill] sm:$0xff]  ;;  %v5601_v18 = vmul.f32 %v13009_v57, %v13008_v29  ;;  %v13017_v29 = vld [vmem:[#allocation69_spill] sm:$0xff] }
 0x328   : > { %3960 = vmatprep.subr.bf16.mxu0 %v8266_v0  ;;  %v13016_v57 = vld [vmem:[#allocation64_spill] sm:$0xff] }
 0x329   : > { %5313 = vmatmul.mubr.bf16.gmra.mrb[32].mxu1 %v5050_v37  ;;  %3068 = vmatmul.mubr.bf16.gmra.mrb[48].mxu0 %v2886_v49  ;;  %v11559_v37 = vpop.permute.xlu0 %2832  ;;  %v5051_v49 = vpack.c.bf16 %v5034_v40, %v5033_v5  ;;  %v11561_v0 = vpop.permute.xlu1 %5537  ;;  %v2863_v40 = vmul.f32 %v13005_v22, %v13004_v3  ;;  %v13007_v5 = vld [vmem:[#allocation139_spill] sm:$0xff]  ;;  %v13011_v22 = vld [vmem:[#allocation45_spill] sm:$0xff]  ;;  %v5603_v13 = vmul.f32 %v13017_v29, %v13016_v57 }
 0x32a   : > { %5322 = vmatprep.mubr.bf16.mxu1 %v12688_v4  ;;  %3077 = vmatprep.mubr.bf16.mxu0 %v12688_v4  ;;  %v2862_v31 = vmul.f32 %v13007_v5, %v13006_v51  ;;  %v5600_v3 = vmul.f32 %v13011_v22, %v13010_v16  ;;  %v13013_v5 = vld [vmem:[#allocation160_spill] sm:$0xff]  ;;  %v8104_v22 = vld [vmem:[#allocation2 + $0x410] ss:$8 sps:$4 sm:$0xff]  }
 0x32b   : > { %v13019_v16 = vld [vmem:[#allocation70_spill] sm:$0xff] }
 0x32c   : > { %v5632_v36 = vpack.c.bf16 %v5601_v18, %v5600_v3  ;;  %v2866_v3 = vmul.f32 %v13023_v56, %v13022_v15  ;;  %v13025_v56 = vld [vmem:[#allocation144_spill] sm:$0xff]  ;;  %v8116_v15 = vld [vmem:[#allocation2 + $0x430] ss:$8 sps:$4 sm:$0xff]  }
 0x32d   : > { %v11563_v53 = vpop.permute.xlu0 %5532  ;;  %v11575_v52 = vpop.permute.xlu1 %2847 }
 0x331   : > { %5323 = vmatmul.mubr.bf16.gmra.mrb[36].mxu1 %v5051_v49  ;;  %3078 = vmatmul.mubr.bf16.gmra.mrb[52].mxu0 %v2887_v32  ;;  %v5052_v49 = vpack.c.bf16 %v5036_v46, %v5035_v33  ;;  %v2888_v32 = vpack.c.bf16 %v2863_v40, %v2862_v31  ;;  %v11577_v2 = vpop.permute.xlu0 %2842  ;;  %v2865_v46 = vmul.f32 %v13013_v5, %v13012_v1  ;;  %v13014_v33 = vld [vmem:[#allocation71_spill] sm:$0xff]  ;;  %v13015_v40 = vld [vmem:[#allocation78_spill] sm:$0xff]  ;;  %v11589_v51 = vpop.permute.xlu1 %5547 }
 0x332   : > { %5332 = vmatprep.mubr.bf16.mxu1 %v12688_v4  ;;  %3087 = vmatprep.mubr.bf16.mxu0 %v12688_v4  ;;  %v2864_v31 = vmul.f32 %v13015_v40, %v13014_v33  ;;  %v13018_v5 = vld [vmem:[#allocation130_spill] sm:$0xff]  ;;  %v13020_v33 = vld [vmem:[#allocation76_spill] sm:$0xff]  ;;  %v13021_v1 = vld [vmem:[#allocation95_spill] sm:$0xff] }
 0x333   : > { %v5602_v40 = vmul.f32 %v13019_v16, %v13018_v5  ;;  %v2867_v19 = vmul.f32 %v13021_v1, %v13020_v33  ;;  %v8118_v16 = vld [vmem:[#allocation2 + $0x434] ss:$8 sps:$4 sm:$0xff]   ;;  %v13027_v5 = vld [vmem:[#allocation105_spill] sm:$0xff] }
 0x334   : > { %v2889_v11 = vpack.c.bf16 %v2865_v46, %v2864_v31  ;;  %v8110_v31 = vld [vmem:[#allocation2 + $0x420] ss:$8 sps:$4 sm:$0xff]   ;;  %v8124_v33 = vld [vmem:[#allocation2 + $0x444] ss:$8 sps:$4 sm:$0xff]  }
 0x335   : > { %v5633_v29 = vpack.c.bf16 %v5603_v13, %v5602_v40  ;;  %v2890_v46 = vpack.c.bf16 %v2867_v19, %v2866_v3  ;;  %v13029_v19 = vld [vmem:[#allocation79_spill] sm:$0xff]  ;;  %v13030_v40 = vld [vmem:[#allocation82_spill] sm:$0xff] }
 0x336   : > { %v2869_v3 = vmul.f32 %v13030_v40, %v13029_v19  ;;  %v13034_v40 = vld [vmem:[#allocation100_spill] sm:$0xff] }
 0x339   : > { %5333 = vmatmul.mubr.bf16.gmra.mrb[40].mxu1 %v5052_v49  ;;  %3088 = vmatmul.mubr.bf16.gmra.mrb[56].mxu0 %v2888_v32  ;;  %v11591_v49 = vpop.permute.xlu0 %5542  ;;  %v8098_v32 = vld [vmem:[#allocation2 + $0x400] ss:$8 sps:$4 sm:$0xff]  }
 0x33a   : > { %5777 = vmatprep.mubr.bf16.mxu1 %v12688_v4  ;;  %3097 = vmatprep.mubr.bf16.mxu0 %v12688_v4 }
 0x33d   : > { %v11605_v18 = vpop.permute.xlu0 %3287 }
 0x341   : > { %5778 = vmatmul.mubr.bf16.vlgmr.msra.gmra.mrb[44].mxu1 %v5632_v36  ;;  %3098 = vmatmul.mubr.bf16.gmra.mrb[60].mxu0 %v2889_v11  ;;  %v8112_v36 = vld [vmem:[#allocation2 + $0x424] ss:$8 sps:$4 sm:$0xff]   ;;  %v11603_v11 = vpop.permute.xlu1 %3292 }
 0x342   : > { %6341 = vmatpush1.bf16.msra.mxu1 %v8098_v32  ;;  %5787 = vmatprep.mubr.bf16.mxu1 %v12688_v4  ;;  %v11609_v32 = vpop.permute.xlu0 %5552 }
 0x343   : > { %6342 = vmatprep.subr.bf16.mxu1 %v8106_v60  ;;  %3107 = vmatprep.mubr.bf16.mxu0 %v12688_v4  ;;  %13024 = vst [vmem:[#allocation133_spill] sm:$0xff] %v11609_v32  ;;  %v13026_v60 = vld [vmem:[#allocation47_spill] sm:$0xff] }
 0x344   : > { %v5605_v57 = vmul.f32 %v13026_v60, %v13025_v56 }
 0x345   : > { %v11607_v1 = vpop.permute.xlu1 %5557 }
 0x346   : > { %6343 = vmatpush1.bf16.msra.mxu1 %v8104_v22  ;;  %v13028_v22 = vld [vmem:[#allocation84_spill] sm:$0xff]  ;;  %v11623_v60 = vpop.permute.xlu0 %3297 }
 0x347   : > { %6344 = vmatprep.subr.bf16.mxu1 %v8112_v36  ;;  %v5604_v13 = vmul.f32 %v13028_v22, %v13027_v5  ;;  %v13031_v36 = vld [vmem:[#allocation55_spill] sm:$0xff] }
 0x348   : > { %v8130_v22 = vld [vmem:[#allocation2 + $0x454] ss:$8 sps:$4 sm:$0xff]  }
 0x349   : > { %5788 = vmatmul.mubr.bf16.gmra.mrb[48].mxu1 %v5633_v29  ;;  %3108 = vmatmul.mubr.bf16.gmra.mrb[64].mxu0 %v2890_v46  ;;  %v13032_v29 = vld [vmem:[#allocation50_spill] sm:$0xff]  ;;  %v5634_v28 = vpack.c.bf16 %v5605_v57, %v5604_v13  ;;  %v11621_v32 = vpop.permute.xlu1 %3302  ;;  %v13035_v57 = vld [vmem:[#allocation49_spill] sm:$0xff] }
 0x34a   : > { %5797 = vmatprep.mubr.bf16.mxu1 %v12688_v4  ;;  %3117 = vmatprep.mubr.bf16.mxu0 %v12688_v4  ;;  %v2868_v46 = vmul.f32 %v13032_v29, %v13031_v36  ;;  %v5606_v13 = vmul.f32 %v13035_v57, %v13034_v40  ;;  %v13037_v29 = vld [vmem:[#allocation56_spill] sm:$0xff]  ;;  %v11637_v56 = vpop.permute.xlu0 %5562  ;;  %v8136_v57 = vld [vmem:[#allocation2 + $0x474] ss:$8 sps:$4 sm:$0xff]  }
 0x34b   : > { %6345 = vmatpush1.bf16.msra.mxu1 %v8110_v31  ;;  %v13033_v31 = vld [vmem:[#allocation48_spill] sm:$0xff] }
 0x34c   : > { %6346 = vmatprep.subr.bf16.mxu1 %v8118_v16  ;;  %v2891_v12 = vpack.c.bf16 %v2869_v3, %v2868_v46  ;;  %v5607_v16 = vmul.f32 %v13033_v31, %v10695_v62  ;;  %v2870_v46 = vmul.f32 %v11465_v38, %v13037_v29  ;;  %v8131_v31 = vld [vmem:[#allocation2 + $0x460] ss:$8 sps:$4 sm:$0xff]  }
 0x34d   : > { %v13039_v38 = vld [vmem:[#allocation145_spill] sm:$0xff] }
 0x34e   : > { %v5635_v5 = vpack.c.bf16 %v5607_v16, %v5606_v13  ;;  %v13040_v62 = vld [vmem:[#allocation61_spill] sm:$0xff]  ;;  %v13041_v13 = vld [vmem:[#allocation58_spill] sm:$0xff] }
 0x34f   : > { %6347 = vmatpush1.bf16.msra.mxu1 %v8116_v15  ;;  %v13036_v15 = vld [vmem:[#allocation59_spill] sm:$0xff]  ;;  %v2873_v16 = vmul.f32 %v11483_v23, %v13040_v62  ;;  %v5610_v23 = vmul.f32 %v11471_v35, %v12788_v39  ;;  %v13044_v39 = vld [vmem:[#allocation68_spill] sm:$0xff] }
 0x350   : > { %6348 = vmatprep.subr.bf16.mxu1 %v8124_v33  ;;  %v2871_v3 = vmul.f32 %v11463_v24, %v13036_v15  ;;  %v8128_v33 = vld [vmem:[#allocation2 + $0x450] ss:$8 sps:$4 sm:$0xff]   ;;  %v2877_v35 = vmul.f32 %v11529_v47, %v13044_v39  ;;  %v13046_v47 = vld [vmem:[#allocation104_spill] sm:$0xff] }
 0x351   : > { %5798 = vmatmul.mubr.bf16.gmra.mrb[52].mxu1 %v5634_v28  ;;  %3118 = vmatmul.mubr.bf16.gmra.mrb[68].mxu0 %v2891_v12  ;;  %v8133_v12 = vld [vmem:[#allocation2 + $0x464] ss:$8 sps:$4 sm:$0xff]   ;;  %v11635_v28 = vpop.permute.xlu1 %5567 }
 0x352   : > { %5807 = vmatprep.mubr.bf16.mxu1 %v12688_v4  ;;  %3127 = vmatprep.mubr.bf16.mxu0 %v12688_v4  ;;  %v2892_v36 = vpack.c.bf16 %v2871_v3, %v2870_v46  ;;  %v2872_v3 = vmul.f32 %v11485_v41, %v13041_v13  ;;  %v8134_v46 = vld [vmem:[#allocation2 + $0x470] ss:$8 sps:$4 sm:$0xff]   ;;  %v5611_v41 = vmul.f32 %v11469_v44, %v10088_v43 }
 0x353   : > { %6349 = vmatpush1.bf16.msra.mxu1 %v8122_v48  ;;  %v13038_v48 = vld [vmem:[#allocation51_spill] sm:$0xff]  ;;  %v5613_v43 = vmul.f32 %v11497_v14, %v10111_v9  ;;  %v5612_v44 = vmul.f32 %v11499_v34, %v12800_v61  ;;  %v5615_v9 = vmul.f32 %v11515_v17, %v10352_v26  ;;  %v5614_v61 = vmul.f32 %v11517_v58, %v10097_v21  ;;  %v13048_v21 = vld [vmem:[#allocation178_spill] sm:$0xff] }
 0x354   : > { %6350 = vmatprep.subr.bf16.mxu1 %v8130_v22  ;;  %v5609_v24 = vmul.f32 %v13038_v48, %v12782_v54  ;;  %v5608_v22 = vmul.f32 %v13039_v38, %v10753_v30  ;;  %v2879_v14 = vmul.f32 %v11557_v6, %v13046_v47  ;;  %v13047_v34 = vld [vmem:[#allocation67_spill] sm:$0xff]  ;;  %v5617_v58 = vmul.f32 %v11543_v63, %v13048_v21 }
 0x355   : > { %v13049_v17 = vld [vmem:[#allocation171_spill] sm:$0xff]  ;;  %v5619_v63 = vmul.f32 %v11561_v0, %v10573_v55  ;;  %v5620_v55 = vmul.f32 %v11591_v49, %v10570_v45  ;;  %v13053_v0 = vld [vmem:[#allocation88_spill] sm:$0xff] }
 0x356   : > { %v5616_v6 = vmul.f32 %v11545_v27, %v13049_v17  ;;  %v13052_v27 = vld [vmem:[#allocation83_spill] sm:$0xff] }
 0x357   : > { %6351 = vmatpush1.bf16.msra.mxu1 %v8128_v33  ;;  %v5636_v33 = vpack.c.bf16 %v5609_v24, %v5608_v22  ;;  %v13043_v24 = vld [vmem:[#allocation60_spill] sm:$0xff]  ;;  %v5637_v22 = vpack.c.bf16 %v5611_v41, %v5610_v23  ;;  %v5638_v41 = vpack.c.bf16 %v5613_v43, %v5612_v44 }
 0x358   : > { %6352 = vmatprep.subr.bf16.mxu1 %v8133_v12  ;;  %v2893_v12 = vpack.c.bf16 %v2873_v16, %v2872_v3  ;;  %v2874_v38 = vmul.f32 %v11513_v59, %v13043_v24 }
 0x359   : > { %5808 = vmatmul.mubr.bf16.gmra.mrb[56].mxu1 %v5635_v5  ;;  %3128 = vmatmul.mubr.bf16.gmra.mrb[72].mxu0 %v2892_v36  ;;  %v11649_v5 = vpop.permute.xlu1 %3312  ;;  %v11651_v36 = vpop.permute.xlu0 %3307 }
 0x35a   : > { %5817 = vmatprep.mubr.bf16.mxu1 %v12688_v4  ;;  %3137 = vmatprep.mubr.bf16.mxu0 %v12688_v4 }
 0x35b   : > { %6353 = vmatpush1.bf16.msra.mxu1 %v8131_v31  ;;  %v13042_v31 = vld [vmem:[#allocation63_spill] sm:$0xff] }
 0x35c   : > { %6354 = vmatprep.subr.bf16.mxu1 %v8136_v57  ;;  %v2875_v57 = vmul.f32 %v11511_v20, %v13042_v31  ;;  %v13045_v20 = vld [vmem:[#allocation62_spill] sm:$0xff] }
 0x35d   : > { %v11653_v54 = vpop.permute.xlu1 %5577  ;;  %v11655_v48 = vpop.permute.xlu0 %5572  ;;  %v2876_v59 = vmul.f32 %v11531_v7, %v13045_v20  ;;  %v2878_v7 = vmul.f32 %v11559_v37, %v13047_v34  ;;  %v13050_v37 = vld [vmem:[#allocation98_spill] sm:$0xff] }
 0x35e   : > { %v2894_v16 = vpack.c.bf16 %v2875_v57, %v2874_v38  ;;  %v2881_v44 = vmul.f32 %v11575_v52, %v13050_v37  ;;  %v5618_v52 = vmul.f32 %v11563_v53, %v10416_v10  ;;  %v5621_v10 = vmul.f32 %v11589_v51, %v10630_v42  ;;  %v8269_v42 = vld [vmem:[#allocation2 + $0x210] ss:$8 sps:$4 sm:$0xff]   ;;  %v8270_v51 = vld [vmem:[#allocation2 + $0x224] ss:$8 sps:$4 sm:$0xff]  }
 0x35f   : > { %6355 = vmatpush1.bf16.msra.mxu1 %v8134_v46  ;;  %v2895_v23 = vpack.c.bf16 %v2877_v35, %v2876_v59  ;;  %v13051_v35 = vld [vmem:[#allocation103_spill] sm:$0xff]  ;;  %v3448_v53 = vmul.f32 %v11621_v32, %v13053_v0  ;;  %v5623_v32 = vmul.f32 %v11607_v1, %v10681_v25  ;;  %v8274_v1 = vld [vmem:[#allocation2 + $0x244] ss:$8 sps:$4 sm:$0xff]  }
 0x360   : > { %v2880_v59 = vmul.f32 %v11577_v2, %v13051_v35  ;;  %v3446_v2 = vmul.f32 %v11603_v11, %v13052_v27 }
 0x361   : > { %5818 = vmatmul.mubr.bf16.gmra.mrb[60].mxu1 %v5636_v33  ;;  %3138 = vmatmul.mubr.bf16.gmra.mrb[76].mxu0 %v2893_v12  ;;  %v11667_v3 = vpop.permute.xlu1 %3322  ;;  %v11669_v46 = vpop.permute.xlu0 %3317 }
 0x362   : > { %5827 = vmatprep.mubr.bf16.mxu1 %v12688_v4  ;;  %3147 = vmatprep.mubr.bf16.mxu0 %v12688_v4 }
 0x365   : > { %v11681_v33 = vpop.permute.xlu1 %5587  ;;  %v11683_v12 = vpop.permute.xlu0 %5582 }
 0x369   : > { %5828 = vmatmul.mubr.bf16.gmra.mrb[0].mxu1 %v5637_v22  ;;  %3148 = vmatmul.mubr.bf16.gmra.mrb[80].mxu0 %v2894_v16  ;;  %v11695_v57 = vpop.permute.xlu1 %3332  ;;  %v11697_v38 = vpop.permute.xlu0 %3327  ;;  %v5639_v22 = vpack.c.bf16 %v5615_v9, %v5614_v61  ;;  %v2896_v16 = vpack.c.bf16 %v2879_v14, %v2878_v7  ;;  %v3445_v14 = vmul.f32 %v11605_v18, %v13000_v8  ;;  %v13054_v8 = vld [vmem:[#allocation81_spill] sm:$0xff] }
 0x36a   : > { %5837 = vmatprep.mubr.bf16.mxu1 %v12688_v4  ;;  %3157 = vmatprep.mubr.bf16.mxu0 %v12688_v4  ;;  %v3447_v11 = vmul.f32 %v11623_v60, %v13054_v8  ;;  %v8267_v18 = vld [vmem:[#allocation2 + $0x200] ss:$8 sps:$4 sm:$0xff]  }
 0x36b   : > { %v3477_v21 = vpack.c.bf16 %v3446_v2, %v3445_v14  ;;  %v13055_v60 = vld [vmem:[#allocation133_spill] sm:$0xff]  ;;  %v8272_v14 = vld [vmem:[#allocation2 + $0x234] ss:$8 sps:$4 sm:$0xff]  }
 0x36c   : > { %v8271_v2 = vld [vmem:[#allocation2 + $0x220] ss:$8 sps:$4 sm:$0xff]  }
 0x36d   : > { %v11699_v43 = vpop.permute.xlu1 %5597  ;;  %v11701_v26 = vpop.permute.xlu0 %5592 }
 0x371   : > { %5838 = vmatmul.mubr.bf16.gmra.mrb[4].mxu1 %v5638_v41  ;;  %3158 = vmatmul.mubr.bf16.gmra.mrb[84].mxu0 %v2895_v23  ;;  %v5640_v41 = vpack.c.bf16 %v5617_v58, %v5616_v6  ;;  %v2897_v23 = vpack.c.bf16 %v2881_v44, %v2880_v59  ;;  %v11713_v9 = vpop.permute.xlu1 %3342  ;;  %v11715_v61 = vpop.permute.xlu0 %3337  ;;  %v8268_v6 = vld [vmem:[#allocation2 + $0x214] ss:$8 sps:$4 sm:$0xff]   ;;  %v5642_v44 = vpack.c.bf16 %v5621_v10, %v5620_v55  ;;  %v8273_v10 = vld [vmem:[#allocation2 + $0x230] ss:$8 sps:$4 sm:$0xff]  }
 0x372   : > { %5847 = vmatprep.mubr.bf16.mxu1 %v12688_v4  ;;  %3167 = vmatprep.mubr.bf16.mxu0 %v12688_v4  ;;  %v3478_v59 = vpack.c.bf16 %v3448_v53, %v3447_v11  ;;  %v13060_v53 = vld [vmem:[#allocation92_spill] sm:$0xff]  ;;  %v13061_v11 = vld [vmem:[#allocation89_spill] sm:$0xff] }
 0x373   : > { %v3452_v8 = vmul.f32 %v11667_v3, %v13060_v53 }
 0x375   : > { %v11727_v7 = vpop.permute.xlu1 %6042 }
 0x379   : > { %5848 = vmatmul.mubr.bf16.gmra.mrb[8].mxu1 %v5639_v22  ;;  %3168 = vmatmul.mubr.bf16.gmra.mrb[88].mxu0 %v2896_v16  ;;  %v11729_v22 = vpop.permute.xlu0 %6037  ;;  %v5641_v16 = vpack.c.bf16 %v5619_v63, %v5618_v52  ;;  %v11741_v58 = vpop.permute.xlu1 %3352  ;;  %v13057_v52 = vld [vmem:[#allocation85_spill] sm:$0xff] }
 0x37a   : > { %5857 = vmatprep.mubr.bf16.mxu1 %v12688_v4  ;;  %3177 = vmatprep.mubr.bf16.mxu0 %v12688_v4  ;;  %v3449_v27 = vmul.f32 %v11651_v36, %v13057_v52  ;;  %v13059_v36 = vld [vmem:[#allocation65_spill] sm:$0xff]  ;;  %v13065_v52 = vld [vmem:[#allocation91_spill] sm:$0xff] }
 0x37b   : > { %v5624_v0 = vmul.f32 %v11637_v56, %v13059_v36  ;;  %v13062_v56 = vld [vmem:[#allocation120_spill] sm:$0xff] }
 0x37c   : > { %v5627_v3 = vmul.f32 %v11653_v54, %v13062_v56 }
 0x37d   : > { %v11743_v17 = vpop.permute.xlu0 %3347  ;;  %v11745_v45 = vpop.permute.xlu1 %6052 }
 0x381   : > { %5858 = vmatmul.mubr.bf16.gmra.mrb[12].mxu1 %v5640_v41  ;;  %3178 = vmatmul.mubr.bf16.gmra.mrb[92].mxu0 %v2897_v23  ;;  %v11747_v49 = vpop.permute.xlu0 %6047  ;;  %v5622_v41 = vmul.f32 %v13055_v60, %v10619_v50  ;;  %v13056_v23 = vld [vmem:[#allocation90_spill] sm:$0xff]  ;;  %v11759_v55 = vpop.permute.xlu1 %3362  ;;  %v8278_v60 = vld [vmem:[#allocation2 + $0x264] ss:$8 sps:$4 sm:$0xff]  }
 0x382   : > { %5867 = vmatprep.mubr.bf16.mxu1 %v12688_v4  ;;  %3622 = vmatprep.mubr.bf16.mxu0 %v12688_v4  ;;  %v3450_v63 = vmul.f32 %v11649_v5, %v13056_v23  ;;  %v13058_v50 = vld [vmem:[#allocation66_spill] sm:$0xff]  ;;  %v13064_v23 = vld [vmem:[#allocation96_spill] sm:$0xff] }
 0x383   : > { %v5625_v5 = vmul.f32 %v11635_v28, %v13058_v50  ;;  %v8277_v28 = vld [vmem:[#allocation2 + $0x250] ss:$8 sps:$4 sm:$0xff]  }
 0x384   : > { %v8281_v50 = vld [vmem:[#allocation2 + $0x270] ss:$8 sps:$4 sm:$0xff]  }
 0x385   : > { %v11761_v25 = vpop.permute.xlu0 %3357 }
 0x389   : > { %5868 = vmatmul.mubr.bf16.gmra.mrb[16].mxu1 %v5641_v16  ;;  %3623 = vmatmul.mubr.bf16.vlgmr.msra.gmra.mrb[32].mxu0 %v3477_v21  ;;  %v5643_v16 = vpack.c.bf16 %v5623_v32, %v5622_v41  ;;  %v3479_v21 = vpack.c.bf16 %v3450_v63, %v3449_v27  ;;  %v3454_v63 = vmul.f32 %v11695_v57, %v13064_v23  ;;  %v13066_v57 = vld [vmem:[#allocation106_spill] sm:$0xff] }
 0x38a   : > { %5877 = vmatprep.mubr.bf16.mxu1 %v12688_v4  ;;  %3632 = vmatprep.mubr.bf16.mxu0 %v12688_v4  ;;  %v3453_v27 = vmul.f32 %v11697_v38, %v13065_v52  ;;  %v5629_v38 = vmul.f32 %v11681_v33, %v13066_v57  ;;  %v13070_v33 = vld [vmem:[#allocation128_spill] sm:$0xff] }
 0x38b   : > { %3961 = vmatpush1.bf16.msra.mxu0 %v8267_v18  ;;  %v3451_v18 = vmul.f32 %v11669_v46, %v13061_v11  ;;  %v13063_v46 = vld [vmem:[#allocation119_spill] sm:$0xff] }
 0x38c   : > { %3962 = vmatprep.subr.bf16.mxu0 %v8268_v6  ;;  %v8275_v6 = vld [vmem:[#allocation2 + $0x240] ss:$8 sps:$4 sm:$0xff]   ;;  %v5626_v41 = vmul.f32 %v11655_v48, %v13063_v46 }
 0x38d   : > { %v3480_v32 = vpack.c.bf16 %v3452_v8, %v3451_v18  ;;  %v13069_v8 = vld [vmem:[#allocation94_spill] sm:$0xff] }
 0x38e   : > { %v3455_v11 = vmul.f32 %v11715_v61, %v13069_v8  ;;  %v13073_v61 = vld [vmem:[#allocation112_spill] sm:$0xff] }
 0x38f   : > { %3963 = vmatpush1.bf16.msra.mxu0 %v8269_v42  ;;  %v11775_v42 = vpop.permute.xlu0 %6057  ;;  %v3457_v56 = vmul.f32 %v11743_v17, %v13073_v61  ;;  %v13077_v17 = vld [vmem:[#allocation117_spill] sm:$0xff] }
 0x390   : > { %3964 = vmatprep.subr.bf16.mxu0 %v8270_v51  ;;  %v5644_v51 = vpack.c.bf16 %v5625_v5, %v5624_v0  ;;  %v13067_v5 = vld [vmem:[#allocation43_spill] sm:$0xff]  ;;  %v13068_v0 = vld [vmem:[#allocation108_spill] sm:$0xff] }
 0x391   : > { %5878 = vmatmul.mubr.bf16.gmra.mrb[20].mxu1 %v5642_v44  ;;  %3633 = vmatmul.mubr.bf16.gmra.mrb[36].mxu0 %v3478_v59  ;;  %v8276_v44 = vld [vmem:[#allocation2 + $0x254] ss:$8 sps:$4 sm:$0xff]   ;;  %v11773_v59 = vpop.permute.xlu1 %6062  ;;  %v5628_v36 = vmul.f32 %v11683_v12, %v13067_v5  ;;  %v3456_v53 = vmul.f32 %v11713_v9, %v13068_v0  ;;  %v13071_v12 = vld [vmem:[#allocation180_spill] sm:$0xff]  ;;  %v13072_v9 = vld [vmem:[#allocation109_spill] sm:$0xff] }
 0x392   : > { %5887 = vmatprep.mubr.bf16.mxu1 %v12688_v4  ;;  %3642 = vmatprep.mubr.bf16.mxu0 %v12688_v4  ;;  %v13079_v5 = vld [vmem:[#allocation158_spill] sm:$0xff] }
 0x393   : > { %3965 = vmatpush1.bf16.msra.mxu0 %v8271_v2  ;;  %v8279_v2 = vld [vmem:[#allocation2 + $0x260] ss:$8 sps:$4 sm:$0xff]   ;;  %v5646_v18 = vpack.c.bf16 %v5629_v38, %v5628_v36  ;;  %v13081_v0 = vld [vmem:[#allocation118_spill] sm:$0xff] }
 0x394   : > { %3966 = vmatprep.subr.bf16.mxu0 %v8272_v14  ;;  %v13080_v36 = vld [vmem:[#allocation9_spill] sm:$0xff] }
 0x395   : > { %v3373_v14 = vpop.permute.xlu1 %3372 }
 0x397   : > { %3967 = vmatpush1.bf16.msra.mxu0 %v8273_v10  ;;  %v5645_v10 = vpack.c.bf16 %v5627_v3, %v5626_v41 }
 0x398   : > { %3968 = vmatprep.subr.bf16.mxu0 %v8274_v1  ;;  %v3481_v1 = vpack.c.bf16 %v3454_v63, %v3453_v27 }
 0x399   : > { %5888 = vmatmul.mubr.bf16.gmra.mrb[24].mxu1 %v5643_v16  ;;  %3643 = vmatmul.mubr.bf16.gmra.mrb[40].mxu0 %v3479_v21  ;;  %v3368_v16 = vpop.permute.xlu0 %3367  ;;  %v8280_v21 = vld [vmem:[#allocation2 + $0x274] ss:$8 sps:$4 sm:$0xff]   ;;  %v11787_v54 = vpop.permute.xlu1 %6072 }
 0x39a   : > { %5897 = vmatprep.mubr.bf16.mxu1 %v12688_v4  ;;  %3652 = vmatprep.mubr.bf16.mxu0 %v12688_v4 }
 0x39b   : > { %3969 = vmatpush1.bf16.msra.mxu0 %v8275_v6  ;;  %v3482_v6 = vpack.c.bf16 %v3456_v53, %v3455_v11  ;;  %v3461_v53 = vmul.f32 %v3368_v16, %v13081_v0 }
 0x39c   : > { %3970 = vmatprep.subr.bf16.mxu0 %v8276_v44 }
 0x39d   : > { %v11789_v48 = vpop.permute.xlu0 %6067  ;;  %v3383_v44 = vpop.permute.xlu1 %3382 }
 0x39f   : > { %3971 = vmatpush1.bf16.msra.mxu0 %v8277_v28  ;;  %v5630_v28 = vmul.f32 %v11701_v26, %v13071_v12  ;;  %v13075_v26 = vld [vmem:[#allocation156_spill] sm:$0xff]  ;;  %v13083_v12 = vld [vmem:[#allocation122_spill] sm:$0xff] }
 0x3a0   : > { %3972 = vmatprep.subr.bf16.mxu0 %v8278_v60  ;;  %v3458_v60 = vmul.f32 %v11741_v58, %v13072_v9  ;;  %v6195_v52 = vmul.f32 %v11729_v22, %v13075_v26  ;;  %v13076_v58 = vld [vmem:[#allocation113_spill] sm:$0xff]  ;;  %v13085_v9 = vld [vmem:[#allocation11_spill] sm:$0xff]  ;;  %v13089_v26 = vld [vmem:[#allocation114_spill] sm:$0xff] }
 0x3a1   : > { %5898 = vmatmul.mubr.bf16.gmra.mrb[28].mxu1 %v5644_v51  ;;  %3653 = vmatmul.mubr.bf16.gmra.mrb[44].mxu0 %v3480_v32  ;;  %v3378_v51 = vpop.permute.xlu0 %3377  ;;  %v5631_v32 = vmul.f32 %v11699_v43, %v13070_v33  ;;  %v6083_v3 = vpop.permute.xlu1 %6082  ;;  %v13074_v43 = vld [vmem:[#allocation46_spill] sm:$0xff]  ;;  %v3460_v27 = vmul.f32 %v11759_v55, %v13076_v58  ;;  %v6197_v55 = vmul.f32 %v11747_v49, %v13079_v5 }
 0x3a2   : > { %5907 = vmatprep.mubr.bf16.mxu1 %v12688_v4  ;;  %3662 = vmatprep.mubr.bf16.mxu0 %v12688_v4  ;;  %v3483_v23 = vpack.c.bf16 %v3458_v60, %v3457_v56  ;;  %v6196_v63 = vmul.f32 %v11727_v7, %v13074_v43  ;;  %v13078_v7 = vld [vmem:[#allocation87_spill] sm:$0xff]  ;;  %v6199_v49 = vmul.f32 %v11775_v42, %v13083_v12  ;;  %v13087_v43 = vld [vmem:[#allocation74_spill] sm:$0xff] }
 0x3a3   : > { %3973 = vmatpush1.bf16.msra.mxu0 %v8279_v2  ;;  %v5647_v41 = vpack.c.bf16 %v5631_v32, %v5630_v28  ;;  %v3459_v2 = vmul.f32 %v11761_v25, %v13077_v17  ;;  %v6198_v22 = vmul.f32 %v11745_v45, %v13078_v7  ;;  %v3462_v25 = vmul.f32 %v3373_v14, %v13080_v36  ;;  %v13082_v32 = vld [vmem:[#allocation165_spill] sm:$0xff]  ;;  %v13093_v5 = vld [vmem:[#allocation10_spill] sm:$0xff] }
 0x3a4   : > { %3974 = vmatprep.subr.bf16.mxu0 %v8280_v21  ;;  %v6200_v45 = vmul.f32 %v11773_v59, %v13082_v32  ;;  %v13084_v28 = vld [vmem:[#allocation121_spill] sm:$0xff]  ;;  %v3463_v16 = vmul.f32 %v3378_v51, %v13085_v9  ;;  %v6201_v42 = vmul.f32 %v11789_v48, %v13087_v43  ;;  %v13096_v32 = vld [vmem:[#allocation126_spill] sm:$0xff] }
 0x3a5   : > { %v6078_v46 = vpop.permute.xlu0 %6077  ;;  %v3393_v21 = vpop.permute.xlu1 %3392  ;;  %v6228_v8 = vpack.c.bf16 %v6198_v22, %v6197_v55  ;;  %v3485_v11 = vpack.c.bf16 %v3462_v25, %v3461_v53  ;;  %v3464_v14 = vmul.f32 %v3383_v44, %v13084_v28  ;;  %v13091_v7 = vld [vmem:[#allocation93_spill] sm:$0xff]  ;;  %v13094_v53 = vld [vmem:[#allocation54_spill] sm:$0xff] }
 0x3a6   : > { %v6229_v56 = vpack.c.bf16 %v6200_v45, %v6199_v49  ;;  %v6203_v48 = vmul.f32 %v6078_v46, %v13091_v7  ;;  %v13092_v22 = vld [vmem:[#allocation125_spill] sm:$0xff]  ;;  %v13097_v45 = vld [vmem:[#allocation8_spill] sm:$0xff] }
 0x3a7   : > { %3975 = vmatpush1.bf16.msra.mxu0 %v8281_v50  ;;  %v3484_v50 = vpack.c.bf16 %v3460_v27, %v3459_v2 }
 0x3a9   : > { %5908 = vmatmul.mubr.bf16.gmra.mrb[32].mxu1 %v5645_v10  ;;  %3663 = vmatmul.mubr.bf16.gmra.mrb[48].mxu0 %v3481_v1  ;;  %v3388_v10 = vpop.permute.xlu0 %3387  ;;  %v6227_v1 = vpack.c.bf16 %v6196_v63, %v6195_v52  ;;  %v6093_v57 = vpop.permute.xlu1 %6092  ;;  %v13088_v63 = vld [vmem:[#allocation123_spill] sm:$0xff] }
 0x3aa   : > { %5917 = vmatprep.mubr.bf16.mxu1 %v12688_v4  ;;  %3672 = vmatprep.mubr.bf16.mxu0 %v12688_v4  ;;  %v3466_v44 = vmul.f32 %v3393_v21, %v13088_v63  ;;  %v3465_v51 = vmul.f32 %v3388_v10, %v13089_v26 }
 0x3ac   : > { %v3487_v17 = vpack.c.bf16 %v3466_v44, %v3465_v51  ;;  %v13102_v51 = vld [vmem:[#allocation76_spill] sm:$0xff] }
 0x3ad   : > { %v6088_v38 = vpop.permute.xlu0 %6087 }
 0x3b1   : > { %5918 = vmatmul.mubr.bf16.gmra.mrb[36].mxu1 %v5646_v18  ;;  %3673 = vmatmul.mubr.bf16.gmra.mrb[52].mxu0 %v3482_v6  ;;  %v3403_v18 = vpop.permute.xlu1 %3402  ;;  %v3398_v6 = vpop.permute.xlu0 %3397 }
 0x3b2   : > { %5927 = vmatprep.mubr.bf16.mxu1 %v12688_v4  ;;  %3682 = vmatprep.mubr.bf16.mxu0 %v12688_v4  ;;  %v3468_v21 = vmul.f32 %v3403_v18, %v13092_v22  ;;  %v3467_v10 = vmul.f32 %v3398_v6, %v13093_v5  ;;  %v13106_v5 = vld [vmem:[#allocation55_spill] sm:$0xff] }
 0x3b4   : > { %v3488_v36 = vpack.c.bf16 %v3468_v21, %v3467_v10  ;;  %v13107_v10 = vld [vmem:[#allocation57_spill] sm:$0xff] }
 0x3b5   : > { %v6103_v60 = vpop.permute.xlu1 %6102  ;;  %v6098_v61 = vpop.permute.xlu0 %6097 }
 0x3b9   : > { %5928 = vmatmul.mubr.bf16.gmra.mrb[40].mxu1 %v5647_v41  ;;  %3683 = vmatmul.mubr.bf16.gmra.mrb[56].mxu0 %v3483_v23  ;;  %v3486_v41 = vpack.c.bf16 %v3464_v14, %v3463_v16  ;;  %v13086_v23 = vld [vmem:[#allocation148_spill] sm:$0xff]  ;;  %v3413_v52 = vpop.permute.xlu1 %3412  ;;  %v3408_v58 = vpop.permute.xlu0 %3407  ;;  %v13098_v14 = vld [vmem:[#allocation149_spill] sm:$0xff]  ;;  %v13099_v16 = vld [vmem:[#allocation71_spill] sm:$0xff] }
 0x3ba   : > { %6372 = vmatprep.mubr.bf16.mxu1 %v12688_v4  ;;  %3692 = vmatprep.mubr.bf16.mxu0 %v12688_v4  ;;  %v6202_v59 = vmul.f32 %v11787_v54, %v13086_v23  ;;  %v13090_v54 = vld [vmem:[#allocation53_spill] sm:$0xff]  ;;  %v3470_v46 = vmul.f32 %v3413_v52, %v13096_v32  ;;  %v3469_v18 = vmul.f32 %v3408_v58, %v13097_v45  ;;  %v13104_v58 = vld [vmem:[#allocation14_spill] sm:$0xff] }
 0x3bb   : > { %v6208_v9 = vmul.f32 %v6103_v60, %v13098_v14  ;;  %v13103_v52 = vld [vmem:[#allocation73_spill] sm:$0xff] }
 0x3bc   : > { %v6230_v27 = vpack.c.bf16 %v6202_v59, %v6201_v42  ;;  %v3489_v28 = vpack.c.bf16 %v3470_v46, %v3469_v18 }
 0x3bd   : > { %v6113_v2 = vpop.permute.xlu1 %6112 }
 0x3be   : > { %v6210_v60 = vmul.f32 %v6113_v2, %v13102_v51 }
 0x3c1   : > { %6373 = vmatmul.mubr.bf16.vlgmr.msra.gmra.mrb[44].mxu1 %v6227_v1  ;;  %3693 = vmatmul.mubr.bf16.gmra.mrb[60].mxu0 %v3484_v50  ;;  %v6108_v1 = vpop.permute.xlu0 %6107  ;;  %v6204_v50 = vmul.f32 %v6083_v3, %v13090_v54  ;;  %v3423_v25 = vpop.permute.xlu1 %3422 }
 0x3c2   : > { %6382 = vmatprep.mubr.bf16.mxu1 %v12688_v4  ;;  %3702 = vmatprep.mubr.bf16.mxu0 %v12688_v4 }
 0x3c3   : > { %v6231_v55 = vpack.c.bf16 %v6204_v50, %v6203_v48 }
 0x3c5   : > { %v3418_v0 = vpop.permute.xlu0 %3417  ;;  %v6123_v12 = vpop.permute.xlu1 %6122 }
 0x3c6   : > { %v6212_v21 = vmul.f32 %v6123_v12, %v13029_v19  ;;  %v13109_v19 = vld [vmem:[#allocation127_spill] sm:$0xff] }
 0x3c9   : > { %6383 = vmatmul.mubr.bf16.gmra.mrb[48].mxu1 %v6228_v8  ;;  %3703 = vmatmul.mubr.bf16.gmra.mrb[64].mxu0 %v3485_v11  ;;  %v6206_v8 = vmul.f32 %v6093_v57, %v13094_v53  ;;  %v13095_v11 = vld [vmem:[#allocation52_spill] sm:$0xff]  ;;  %v6118_v6 = vpop.permute.xlu0 %6117  ;;  %v6207_v57 = vmul.f32 %v6098_v61, %v13099_v16  ;;  %v3433_v59 = vpop.permute.xlu1 %3432  ;;  %v6209_v61 = vmul.f32 %v6108_v1, %v13103_v52  ;;  %v13113_v16 = vld [vmem:[#allocation105_spill] sm:$0xff] }
 0x3ca   : > { %6392 = vmatprep.mubr.bf16.mxu1 %v12688_v4  ;;  %3712 = vmatprep.mubr.bf16.mxu0 %v12688_v4  ;;  %v6205_v3 = vmul.f32 %v6088_v38, %v13095_v11  ;;  %v6211_v2 = vmul.f32 %v6118_v6, %v13106_v5  ;;  %v13111_v6 = vld [vmem:[#allocation130_spill] sm:$0xff] }
 0x3cb   : > { %v6233_v42 = vpack.c.bf16 %v6208_v9, %v6207_v57  ;;  %v6234_v50 = vpack.c.bf16 %v6210_v60, %v6209_v61 }
 0x3cc   : > { %v6232_v49 = vpack.c.bf16 %v6206_v8, %v6205_v3  ;;  %v3847_v3 = vpack.c.bf16 %v13109_v19, %v13070_v33 }
 0x3cd   : > { %v3428_v43 = vpop.permute.xlu0 %3427  ;;  %v6133_v44 = vpop.permute.xlu1 %6132 }
 0x3ce   : > { %v6214_v53 = vmul.f32 %v6133_v44, %v13036_v15  ;;  %v13110_v15 = vld [vmem:[#allocation131_spill] sm:$0xff] }
 0x3d1   : > { %6393 = vmatmul.mubr.bf16.gmra.mrb[52].mxu1 %v6229_v56  ;;  %3713 = vmatmul.mubr.bf16.gmra.mrb[68].mxu0 %v3486_v41  ;;  %v13100_v56 = vld [vmem:[#allocation132_spill] sm:$0xff]  ;;  %v6128_v26 = vpop.permute.xlu0 %6127  ;;  %v3443_v48 = vpop.permute.xlu1 %3442 }
 0x3d2   : > { %6402 = vmatprep.mubr.bf16.mxu1 %v12688_v4  ;;  %3722 = vmatprep.mubr.bf16.mxu0 %v12688_v4  ;;  %v3472_v38 = vmul.f32 %v3423_v25, %v13100_v56  ;;  %v13101_v41 = vld [vmem:[#allocation12_spill] sm:$0xff]  ;;  %v3476_v1 = vmul.f32 %v3443_v48, %v13107_v10  ;;  %v6235_v25 = vpack.c.bf16 %v6212_v21, %v6211_v2 }
 0x3d3   : > { %v3471_v23 = vmul.f32 %v3418_v0, %v13101_v41  ;;  %v6213_v8 = vmul.f32 %v6128_v26, %v13037_v29  ;;  %v3848_v29 = vpack.c.bf16 %v13111_v6, %v13110_v15 }
 0x3d5   : > { %v3490_v63 = vpack.c.bf16 %v3472_v38, %v3471_v23  ;;  %v3438_v22 = vpop.permute.xlu0 %3437  ;;  %v6236_v11 = vpack.c.bf16 %v6214_v53, %v6213_v8  ;;  %v6143_v32 = vpop.permute.xlu1 %6142 }
 0x3d6   : > { %v6216_v45 = vmul.f32 %v6143_v32, %v13040_v62  ;;  %v13112_v62 = vld [vmem:[#allocation64_spill] sm:$0xff] }
 0x3d9   : > { %6403 = vmatmul.mubr.bf16.gmra.mrb[56].mxu1 %v6230_v27  ;;  %3723 = vmatmul.mubr.bf16.gmra.mrb[72].mxu0 %v3487_v17  ;;  %v3474_v27 = vmul.f32 %v3433_v59, %v13104_v58  ;;  %v13105_v17 = vld [vmem:[#allocation13_spill] sm:$0xff]  ;;  %v6138_v46 = vpop.permute.xlu0 %6137 }
 0x3da   : > { %6412 = vmatprep.mubr.bf16.mxu1 %v12688_v4  ;;  %3732 = vmatprep.mubr.bf16.mxu0 %v12688_v4  ;;  %v3473_v54 = vmul.f32 %v3428_v43, %v13105_v17  ;;  %v6215_v18 = vmul.f32 %v6138_v46, %v13041_v13  ;;  %v3849_v13 = vpack.c.bf16 %v13113_v16, %v13112_v62 }
 0x3dc   : > { %v3491_v7 = vpack.c.bf16 %v3474_v27, %v3473_v54  ;;  %v6237_v12 = vpack.c.bf16 %v6216_v45, %v6215_v18  ;;  %v13117_v27 = vld [vmem:[#allocation111_spill] sm:$0xff] }
 0x3e1   : > { %6413 = vmatmul.mubr.bf16.gmra.mrb[60].mxu1 %v6231_v55  ;;  %3733 = vmatmul.mubr.bf16.gmra.mrb[76].mxu0 %v3488_v36  ;;  %v13108_v55 = vld [vmem:[#allocation44_spill] sm:$0xff] }
 0x3e2   : > { %6422 = vmatprep.mubr.bf16.mxu1 %v12688_v4  ;;  %3742 = vmatprep.mubr.bf16.mxu0 %v12688_v4  ;;  %v3475_v36 = vmul.f32 %v3438_v22, %v13108_v55 }
 0x3e4   : > { %v3492_v0 = vpack.c.bf16 %v3476_v1, %v3475_v36 }
 0x3e9   : > { %6423 = vmatmul.mubr.bf16.gmra.mrb[0].mxu1 %v6232_v49  ;;  %3743 = vmatmul.mubr.bf16.gmra.mrb[80].mxu0 %v3489_v28  ;;  %v6153_v49 = vpop.permute.xlu1 %6152  ;;  %v6148_v28 = vpop.permute.xlu0 %6147 }
 0x3ea   : > { %6432 = vmatprep.mubr.bf16.mxu1 %v12688_v4  ;;  %3752 = vmatprep.mubr.bf16.mxu0 %v12688_v4  ;;  %v6218_v33 = vmul.f32 %v6153_v49, %v13042_v31  ;;  %v6217_v14 = vmul.f32 %v6148_v28, %v13043_v24  ;;  %v13114_v31 = vld [vmem:[#allocation144_spill] sm:$0xff] }
 0x3eb   : > { %v3850_v24 = vpack.c.bf16 %v13034_v40, %v13114_v31 }
 0x3ec   : > { %v6238_v9 = vpack.c.bf16 %v6218_v33, %v6217_v14 }
 0x3ed   : > { %v6163_v57 = vpop.permute.xlu1 %6162  ;;  %v6158_v56 = vpop.permute.xlu0 %6157 }
 0x3ee   : > { %v6220_v38 = vmul.f32 %v6163_v57, %v13044_v39  ;;  %v6219_v41 = vmul.f32 %v6158_v56, %v13045_v20  ;;  %v13115_v39 = vld [vmem:[#allocation80_spill] sm:$0xff] }
 0x3ef   : > { %v3851_v20 = vpack.c.bf16 %v10753_v30, %v13115_v39  ;;  %v6597_v39 = vld [vmem:[%s12292_s4] sm:$0x3] }
 0x3f0   : > { %v6239_v23 = vpack.c.bf16 %v6220_v38, %v6219_v41 }
 0x3f1   : > { %6433 = vmatmul.mubr.bf16.gmra.mrb[4].mxu1 %v6233_v42  ;;  %3753 = vmatmul.mubr.bf16.gmra.mrb[84].mxu0 %v3490_v63  ;;  %v6173_v59 = vpop.permute.xlu1 %6172  ;;  %v6168_v43 = vpop.permute.xlu0 %6167 }
 0x3f2   : > { %6442 = vmatprep.mubr.bf16.mxu1 %v12688_v4  ;;  %3762 = vmatprep.mubr.bf16.mxu0 %v12688_v4  ;;  %v6222_v42 = vmul.f32 %v6173_v59, %v13046_v47  ;;  %v6221_v63 = vmul.f32 %v6168_v43, %v13047_v34  ;;  %v13116_v47 = vld [vmem:[#allocation166_spill] sm:$0xff] }
 0x3f3   : > { %v13118_v43 = vld [vmem:[#allocation110_spill] sm:$0xff] }
 0x3f4   : > { %v6240_v44 = vpack.c.bf16 %v6222_v42, %v6221_v63  ;;  %v6601_v42 = vsub.s32 0, %v13118_v43 }
 0x3f5   : > { %v6183_v26 = vpop.permute.xlu1 %6182  ;;  %v6178_v51 = vpop.permute.xlu0 %6177 }
 0x3f6   : > { %v6224_v40 = vmul.f32 %v6183_v26, %v13050_v37  ;;  %v6223_v60 = vmul.f32 %v6178_v51, %v13051_v35  ;;  %v12007_v26 = vrot.slane %v6597_v39, %v6601_v42 }
 0x3f8   : > { %v6241_v52 = vpack.c.bf16 %v6224_v40, %v6223_v60 }
 0x3f9   : > { %6443 = vmatmul.mubr.bf16.gmra.mrb[8].mxu1 %v6234_v50  ;;  %3763 = vmatmul.mubr.bf16.gmra.mrb[88].mxu0 %v3491_v7  ;;  %v6193_v61 = vpop.permute.xlu1 %6192  ;;  %v6188_v58 = vpop.permute.xlu0 %6187 }
 0x3fa   : > { %6452 = vmatprep.mubr.bf16.mxu1 %v12688_v4  ;;  %3772 = vmatprep.mubr.bf16.mxu0 %v12688_v4  ;;  %v6226_v34 = vmul.f32 %v6193_v61, %v13116_v47  ;;  %v6225_v30 = vmul.f32 %v6188_v58, %v13117_v27 }
 0x3fc   : > { %v6242_v17 = vpack.c.bf16 %v6226_v34, %v6225_v30 }
 0x401   : > { %6453 = vmatmul.mubr.bf16.gmra.mrb[12].mxu1 %v6235_v25  ;;  %3773 = vmatmul.mubr.bf16.gmra.mrb[92].mxu0 %v3492_v0 }
 0x402   : > { %6462 = vmatprep.mubr.bf16.mxu1 %v12688_v4  ;;  %3992 = vmatprep.mubr.bf16.mxu0 %v12688_v4 }
 0x409   : > { %6463 = vmatmul.mubr.bf16.gmra.mrb[16].mxu1 %v6236_v11  ;;  %3993 = vmatmul.mubr.bf16.vlgmr.msra.gmra.mrb[32].mxu0 %v3847_v3 }
 0x40a   : > { %6472 = vmatprep.mubr.bf16.mxu1 %v12688_v4  ;;  %4002 = vmatprep.mubr.bf16.mxu0 %v12688_v4 }
 0x411   : > { %6473 = vmatmul.mubr.bf16.gmra.mrb[20].mxu1 %v6237_v12  ;;  %4003 = vmatmul.mubr.bf16.gmra.mrb[36].mxu0 %v3848_v29 }
 0x412   : > { %6482 = vmatprep.mubr.bf16.mxu1 %v12688_v4  ;;  %4012 = vmatprep.mubr.bf16.mxu0 %v12688_v4 }
 0x419   : > { %6483 = vmatmul.mubr.bf16.gmra.mrb[24].mxu1 %v6238_v9  ;;  %4013 = vmatmul.mubr.bf16.gmra.mrb[40].mxu0 %v3849_v13 }
 0x41a   : > { %6492 = vmatprep.mubr.bf16.mxu1 %v12688_v4  ;;  %4022 = vmatprep.mubr.bf16.mxu0 %v12688_v4 }
 0x421   : > { %6493 = vmatmul.mubr.bf16.gmra.mrb[28].mxu1 %v6239_v23  ;;  %4023 = vmatmul.mubr.bf16.gmra.mrb[44].mxu0 %v3850_v24 }
 0x422   : > { %6502 = vmatprep.mubr.bf16.mxu1 %v12688_v4  ;;  %4032 = vmatprep.mubr.bf16.mxu0 %v12688_v4 }
 0x429   : > { %6503 = vmatmul.mubr.bf16.gmra.mrb[32].mxu1 %v6240_v44  ;;  %4033 = vmatmul.mubr.bf16.gmra.mrb[48].mxu0 %v3851_v20  ;;  %v6605_v20 = vsub.s32 1, %v13118_v43 }
 0x42a   : > { %6512 = vmatprep.mubr.bf16.mxu1 %v12688_v4 }
 0x42b   : > { %v12011_v51 = vrot.slane %v6597_v39, %v6605_v20 }
 0x431   : > { %6513 = vmatmul.mubr.bf16.gmra.mrb[36].mxu1 %v6241_v52 }
 0x432   : > { %6522 = vmatprep.mubr.bf16.mxu1 %v12688_v4 }
 0x439   : > { %6523 = vmatmul.mubr.bf16.gmra.mrb[40].mxu1 %v6242_v17 }
 0x484   : > { %v3674_v54 = vpop.f32.mrb[52].mxu0 }
 0x485   : > { %v3676_v50 = vpop.f32.mrb[53].mxu0 }
 0x486   : > { %v3678_v7 = vpop.f32.mrb[54].mxu0 }
 0x487   : > { %v11911_v48 = vpop.f32.mrb[55].mxu0 }
 0x48c   : > { %v11913_v37 = vpop.f32.mrb[56].mxu0 }
 0x48d   : > { %v11915_v35 = vpop.f32.mrb[57].mxu0 }
 0x48e   : > { %v11917_v22 = vpop.f32.mrb[58].mxu0 }
 0x48f   : > { %v11919_v21 = vpop.f32.mrb[59].mxu0 }
 0x494   : > { %v11921_v4 = vpop.f32.mrb[44].mxu1  ;;  %v11923_v5 = vpop.f32.mrb[60].mxu0 }
 0x495   : > { %v11925_v2 = vpop.f32.mrb[45].mxu1  ;;  %v11927_v10 = vpop.f32.mrb[61].mxu0 }
 0x496   : > { %v11929_v1 = vpop.f32.mrb[46].mxu1  ;;  %v11931_v55 = vpop.f32.mrb[62].mxu0 }
 0x497   : > { %v11933_v36 = vpop.f32.mrb[47].mxu1  ;;  %v11935_v25 = vpop.f32.mrb[63].mxu0 }
 0x49c   : > { %v11937_v0 = vpop.f32.mrb[48].mxu1  ;;  %v11939_v53 = vpop.f32.mrb[64].mxu0 }
 0x49d   : > { %v11941_v8 = vpop.f32.mrb[49].mxu1  ;;  %v11943_v11 = vpop.f32.mrb[65].mxu0 }
 0x49e   : > { %v11945_v19 = vpop.f32.mrb[50].mxu1  ;;  %v11947_v3 = vpop.f32.mrb[66].mxu0 }
 0x49f   : > { %v11949_v32 = vpop.f32.mrb[51].mxu1  ;;  %v11951_v46 = vpop.f32.mrb[67].mxu0 }
 0x4a4   : > { %v11953_v45 = vpop.f32.mrb[52].mxu1  ;;  %v11955_v18 = vpop.f32.mrb[68].mxu0 }
 0x4a5   : > { %v11957_v12 = vpop.f32.mrb[53].mxu1  ;;  %v11959_v15 = vpop.f32.mrb[69].mxu0 }
 0x4a6   : > { %v11961_v6 = vpop.f32.mrb[54].mxu1  ;;  %v11963_v29 = vpop.f32.mrb[70].mxu0 }
 0x4a7   : > { %v11965_v49 = vpop.f32.mrb[55].mxu1  ;;  %v11967_v28 = vpop.f32.mrb[71].mxu0 }
 0x4ac   : > { %v11969_v33 = vpop.f32.mrb[56].mxu1  ;;  %v11971_v14 = vpop.f32.mrb[72].mxu0 }
 0x4ad   : > { %v11973_v9 = vpop.f32.mrb[57].mxu1  ;;  %v11975_v62 = vpop.f32.mrb[73].mxu0 }
 0x4ae   : > { %v11977_v16 = vpop.f32.mrb[58].mxu1  ;;  %v11979_v13 = vpop.f32.mrb[74].mxu0 }
 0x4af   : > { %v11981_v57 = vpop.f32.mrb[59].mxu1  ;;  %v11983_v56 = vpop.f32.mrb[75].mxu0 }
 0x4b4   : > { %v11985_v38 = vpop.f32.mrb[60].mxu1  ;;  %v11987_v41 = vpop.f32.mrb[76].mxu0 }
 0x4b5   : > { %v11989_v23 = vpop.f32.mrb[61].mxu1  ;;  %v11991_v31 = vpop.f32.mrb[77].mxu0 }
 0x4b6   : > { %v11993_v24 = vpop.f32.mrb[62].mxu1  ;;  %v11995_v59 = vpop.f32.mrb[78].mxu0 }
 0x4b7   : > { %v11998_v63 = vpop.f32.mrb[63].mxu1  ;;  %v12000_v44 = vpop.f32.mrb[79].mxu0 }
 0x4bc   : > { %v6424_v40 = vpop.f32.mrb[0].mxu1  ;;  %v12013_v60 = vpop.f32.mrb[80].mxu0 }
 0x4bd   : > { %v7371_v52 = vadd.f32 %v6424_v40, %v3674_v54  ;;  %v6426_v61 = vpop.f32.mrb[1].mxu1  ;;  %v12015_v58 = vpop.f32.mrb[81].mxu0 }
 0x4be   : > { %v7372_v47 = vadd.f32 %v6426_v61, %v3676_v50  ;;  %v6428_v34 = vpop.f32.mrb[2].mxu1  ;;  %v12017_v27 = vpop.f32.mrb[82].mxu0 }
 0x4bf   : > { %v6629_v30 = vadd.f32 %v7371_v52, %v12007_v26  ;;  %v7373_v17 = vadd.f32 %v6428_v34, %v3678_v7  ;;  %v6430_v43 = vpop.f32.mrb[3].mxu1  ;;  %v12020_v42 = vpop.f32.mrb[83].mxu0 }
 0x4c0   : > { %v6630_v39 = vadd.f32 %v7372_v47, %v12011_v51  ;;  %v7374_v20 = vadd.f32 %v6430_v43, %v11911_v48 }
 0x4c1   : > { %6693 = vst [vmem:[%s12024_s19 + $0xa0] sm:$0xff] %v6629_v30  ;;  %v6631_v54 = vadd.f32 %v7373_v17, %v12007_v26 }
 0x4c2   : > { %6694 = vst [vmem:[%s12024_s19 + $0xa8] sm:$0xff] %v6630_v39  ;;  %v6632_v50 = vadd.f32 %v7374_v20, %v12011_v51 }
 0x4c3   : > { %6695 = vst [vmem:[%s12024_s19 + $0xb0] sm:$0xff] %v6631_v54 }
 0x4c4   : > { %6696 = vst [vmem:[%s12024_s19 + $0xb8] sm:$0xff] %v6632_v50  ;;  %v6434_v7 = vpop.f32.mrb[4].mxu1  ;;  %v12032_v40 = vpop.f32.mrb[84].mxu0 }
 0x4c5   : > { %v7375_v48 = vadd.f32 %v6434_v7, %v11913_v37  ;;  %v6436_v52 = vpop.f32.mrb[5].mxu1  ;;  %v12035_v61 = vpop.f32.mrb[85].mxu0 }
 0x4c6   : > { %v7376_v47 = vadd.f32 %v6436_v52, %v11915_v35  ;;  %v6438_v34 = vpop.f32.mrb[6].mxu1  ;;  %v12038_v30 = vpop.f32.mrb[86].mxu0 }
 0x4c7   : > { %v6633_v17 = vadd.f32 %v7375_v48, %v12007_v26  ;;  %v7377_v43 = vadd.f32 %v6438_v34, %v11917_v22  ;;  %v6440_v39 = vpop.f32.mrb[7].mxu1  ;;  %v12042_v20 = vpop.f32.mrb[87].mxu0 }
 0x4c8   : > { %v6634_v54 = vadd.f32 %v7376_v47, %v12011_v51  ;;  %v7378_v37 = vadd.f32 %v6440_v39, %v11919_v21 }
 0x4c9   : > { %6697 = vst [vmem:[%s12024_s19 + $0xc0] sm:$0xff] %v6633_v17  ;;  %v6635_v50 = vadd.f32 %v7377_v43, %v12007_v26 }
 0x4ca   : > { %6698 = vst [vmem:[%s12024_s19 + $0xc8] sm:$0xff] %v6634_v54  ;;  %v6636_v35 = vadd.f32 %v7378_v37, %v12011_v51 }
 0x4cb   : > { %6699 = vst [vmem:[%s12024_s19 + $0xd0] sm:$0xff] %v6635_v50 }
 0x4cc   : > { %6700 = vst [vmem:[%s12024_s19 + $0xd8] sm:$0xff] %v6636_v35  ;;  %v6444_v7 = vpop.f32.mrb[8].mxu1  ;;  %v12052_v48 = vpop.f32.mrb[88].mxu0 }
 0x4cd   : > { %v7379_v22 = vadd.f32 %v6444_v7, %v11923_v5  ;;  %v6446_v52 = vpop.f32.mrb[9].mxu1  ;;  %v12055_v47 = vpop.f32.mrb[89].mxu0 }
 0x4ce   : > { %v7380_v21 = vadd.f32 %v6446_v52, %v11927_v10  ;;  %v6448_v34 = vpop.f32.mrb[10].mxu1  ;;  %v12058_v17 = vpop.f32.mrb[90].mxu0 }
 0x4cf   : > { %v6637_v43 = vadd.f32 %v7379_v22, %v12007_v26  ;;  %v7381_v39 = vadd.f32 %v6448_v34, %v11931_v55  ;;  %v6450_v54 = vpop.f32.mrb[11].mxu1  ;;  %v12062_v37 = vpop.f32.mrb[91].mxu0 }
 0x4d0   : > { %v6638_v50 = vadd.f32 %v7380_v21, %v12011_v51  ;;  %v7382_v5 = vadd.f32 %v6450_v54, %v11935_v25 }
 0x4d1   : > { %6701 = vst [vmem:[%s12024_s19 + $0xe0] sm:$0xff] %v6637_v43  ;;  %v6639_v35 = vadd.f32 %v7381_v39, %v12007_v26 }
 0x4d2   : > { %6702 = vst [vmem:[%s12024_s19 + $0xe8] sm:$0xff] %v6638_v50  ;;  %v6640_v10 = vadd.f32 %v7382_v5, %v12011_v51 }
 0x4d3   : > { %6703 = vst [vmem:[%s12024_s19 + $0xf0] sm:$0xff] %v6639_v35 }
 0x4d4   : > { %6704 = vst [vmem:[%s12024_s19 + $0xf8] sm:$0xff] %v6640_v10  ;;  %v6454_v7 = vpop.f32.mrb[12].mxu1  ;;  %v12072_v22 = vpop.f32.mrb[92].mxu0 }
 0x4d5   : > { %v7383_v55 = vadd.f32 %v6454_v7, %v11939_v53  ;;  %v6456_v52 = vpop.f32.mrb[13].mxu1  ;;  %v12075_v21 = vpop.f32.mrb[93].mxu0 }
 0x4d6   : > { %v7384_v25 = vadd.f32 %v6456_v52, %v11943_v11  ;;  %v6458_v34 = vpop.f32.mrb[14].mxu1  ;;  %v12078_v43 = vpop.f32.mrb[94].mxu0 }
 0x4d7   : > { %v6641_v39 = vadd.f32 %v7383_v55, %v12007_v26  ;;  %v7385_v54 = vadd.f32 %v6458_v34, %v11947_v3  ;;  %v6460_v50 = vpop.f32.mrb[15].mxu1  ;;  %v12082_v5 = vpop.f32.mrb[95].mxu0 }
 0x4d8   : > { %13119 = vst [vmem:[#allocation15_spill] sm:$0xff] %v12082_v5  ;;  %v6642_v35 = vadd.f32 %v7384_v25, %v12011_v51  ;;  %v7386_v53 = vadd.f32 %v6460_v50, %v11951_v46 }
 0x4d9   : > { %6705 = vst [vmem:[%s12024_s19 + $0x100] sm:$0xff] %v6641_v39  ;;  %v6643_v10 = vadd.f32 %v7385_v54, %v12007_v26 }
 0x4da   : > { %6706 = vst [vmem:[%s12024_s19 + $0x108] sm:$0xff] %v6642_v35  ;;  %v6644_v11 = vadd.f32 %v7386_v53, %v12011_v51 }
 0x4db   : > { %6707 = vst [vmem:[%s12024_s19 + $0x110] sm:$0xff] %v6643_v10 }
 0x4dc   : > { %6708 = vst [vmem:[%s12024_s19 + $0x118] sm:$0xff] %v6644_v11  ;;  %v6464_v7 = vpop.f32.mrb[16].mxu1  ;;  %v3994_v52 = vpop.f32.mrb[32].mxu0 }
 0x4dd   : > { %v7387_v55 = vadd.f32 %v6464_v7, %v11955_v18  ;;  %v6466_v3 = vpop.f32.mrb[17].mxu1  ;;  %v7351_v34 = vadd.f32 %v11921_v4, %v3994_v52  ;;  %v3996_v5 = vpop.f32.mrb[33].mxu0 }
 0x4de   : > { %v7388_v25 = vadd.f32 %v6466_v3, %v11959_v15  ;;  %v6468_v46 = vpop.f32.mrb[18].mxu1  ;;  %v7352_v39 = vadd.f32 %v11925_v2, %v3996_v5  ;;  %v3998_v54 = vpop.f32.mrb[34].mxu0 }
 0x4df   : > { %v6645_v50 = vadd.f32 %v7387_v55, %v12007_v26  ;;  %v7389_v35 = vadd.f32 %v6468_v46, %v11963_v29  ;;  %v6470_v53 = vpop.f32.mrb[19].mxu1  ;;  %v6609_v18 = vadd.f32 %v7351_v34, %v12007_v26  ;;  %v7353_v4 = vadd.f32 %v11929_v1, %v3998_v54  ;;  %v4000_v15 = vpop.f32.mrb[35].mxu0 }
 0x4e0   : > { %v6646_v10 = vadd.f32 %v7388_v25, %v12011_v51  ;;  %v7390_v2 = vadd.f32 %v6470_v53, %v11967_v28  ;;  %v6610_v5 = vadd.f32 %v7352_v39, %v12011_v51  ;;  %v7354_v11 = vadd.f32 %v11933_v36, %v4000_v15 }
 0x4e1   : > { %6709 = vst [vmem:[%s12024_s19 + $0x120] sm:$0xff] %v6645_v50  ;;  %v6647_v29 = vadd.f32 %v7389_v35, %v12007_v26  ;;  %6673 = vst [vmem:[%s12024_s19] sm:$0xff] %v6609_v18  ;;  %v6611_v7 = vadd.f32 %v7353_v4, %v12007_v26 }
 0x4e2   : > { %6710 = vst [vmem:[%s12024_s19 + $0x128] sm:$0xff] %v6646_v10  ;;  %v6648_v1 = vadd.f32 %v7390_v2, %v12011_v51  ;;  %6674 = vst [vmem:[%s12024_s19 + $0x8] sm:$0xff] %v6610_v5  ;;  %v6612_v52 = vadd.f32 %v7354_v11, %v12011_v51 }
 0x4e3   : > { %6711 = vst [vmem:[%s12024_s19 + $0x130] sm:$0xff] %v6647_v29  ;;  %6675 = vst [vmem:[%s12024_s19 + $0x10] sm:$0xff] %v6611_v7 }
 0x4e4   : > { %6712 = vst [vmem:[%s12024_s19 + $0x138] sm:$0xff] %v6648_v1  ;;  %v6474_v28 = vpop.f32.mrb[20].mxu1  ;;  %6676 = vst [vmem:[%s12024_s19 + $0x18] sm:$0xff] %v6612_v52  ;;  %v4004_v55 = vpop.f32.mrb[36].mxu0 }
 0x4e5   : > { %v7391_v36 = vadd.f32 %v6474_v28, %v11971_v14  ;;  %v6476_v3 = vpop.f32.mrb[21].mxu1  ;;  %v7355_v34 = vadd.f32 %v11937_v0, %v4004_v55  ;;  %v4006_v25 = vpop.f32.mrb[37].mxu0 }
 0x4e6   : > { %v7392_v46 = vadd.f32 %v6476_v3, %v11975_v62  ;;  %v6478_v39 = vpop.f32.mrb[22].mxu1  ;;  %v7356_v54 = vadd.f32 %v11941_v8, %v4006_v25  ;;  %v4008_v50 = vpop.f32.mrb[38].mxu0 }
 0x4e7   : > { %v6649_v35 = vadd.f32 %v7391_v36, %v12007_v26  ;;  %v7393_v53 = vadd.f32 %v6478_v39, %v11979_v13  ;;  %v6480_v18 = vpop.f32.mrb[23].mxu1  ;;  %v6613_v14 = vadd.f32 %v7355_v34, %v12007_v26  ;;  %v7357_v0 = vadd.f32 %v11945_v19, %v4008_v50  ;;  %v4010_v62 = vpop.f32.mrb[39].mxu0 }
 0x4e8   : > { %v6650_v4 = vadd.f32 %v7392_v46, %v12011_v51  ;;  %v7394_v8 = vadd.f32 %v6480_v18, %v11983_v56  ;;  %v6614_v15 = vadd.f32 %v7356_v54, %v12011_v51  ;;  %v7358_v10 = vadd.f32 %v11949_v32, %v4010_v62 }
 0x4e9   : > { %6713 = vst [vmem:[%s12024_s19 + $0x140] sm:$0xff] %v6649_v35  ;;  %v6651_v13 = vadd.f32 %v7393_v53, %v12007_v26  ;;  %6677 = vst [vmem:[%s12024_s19 + $0x20] sm:$0xff] %v6613_v14  ;;  %v6615_v2 = vadd.f32 %v7357_v0, %v12007_v26 }
 0x4ea   : > { %6714 = vst [vmem:[%s12024_s19 + $0x148] sm:$0xff] %v6650_v4  ;;  %v6652_v19 = vadd.f32 %v7394_v8, %v12011_v51  ;;  %6678 = vst [vmem:[%s12024_s19 + $0x28] sm:$0xff] %v6614_v15  ;;  %v6616_v5 = vadd.f32 %v7358_v10, %v12011_v51 }
 0x4eb   : > { %6715 = vst [vmem:[%s12024_s19 + $0x150] sm:$0xff] %v6651_v13  ;;  %6679 = vst [vmem:[%s12024_s19 + $0x30] sm:$0xff] %v6615_v2 }
 0x4ec   : > { %6716 = vst [vmem:[%s12024_s19 + $0x158] sm:$0xff] %v6652_v19  ;;  %v6484_v56 = vpop.f32.mrb[24].mxu1  ;;  %6680 = vst [vmem:[%s12024_s19 + $0x38] sm:$0xff] %v6616_v5  ;;  %v4014_v11 = vpop.f32.mrb[40].mxu0 }
 0x4ed   : > { %v7395_v32 = vadd.f32 %v6484_v56, %v11987_v41  ;;  %v6486_v29 = vpop.f32.mrb[25].mxu1  ;;  %v7359_v7 = vadd.f32 %v11953_v45, %v4014_v11  ;;  %v4016_v1 = vpop.f32.mrb[41].mxu0 }
 0x4ee   : > { %v7396_v52 = vadd.f32 %v6486_v29, %v11991_v31  ;;  %v6488_v28 = vpop.f32.mrb[26].mxu1  ;;  %v7360_v55 = vadd.f32 %v11957_v12, %v4016_v1  ;;  %v4018_v36 = vpop.f32.mrb[42].mxu0 }
 0x4ef   : > { %v6653_v3 = vadd.f32 %v7395_v32, %v12007_v26  ;;  %v7397_v34 = vadd.f32 %v6488_v28, %v11995_v59  ;;  %v6490_v25 = vpop.f32.mrb[27].mxu1  ;;  %v6617_v41 = vadd.f32 %v7359_v7, %v12007_v26  ;;  %v7361_v45 = vadd.f32 %v11961_v6, %v4018_v36  ;;  %v4020_v31 = vpop.f32.mrb[43].mxu0 }
 0x4f0   : > { %v6654_v46 = vadd.f32 %v7396_v52, %v12011_v51  ;;  %v7398_v12 = vadd.f32 %v6490_v25, %v12000_v44  ;;  %v6618_v39 = vadd.f32 %v7360_v55, %v12011_v51  ;;  %v7362_v54 = vadd.f32 %v11965_v49, %v4020_v31 }
 0x4f1   : > { %6717 = vst [vmem:[%s12024_s19 + $0x160] sm:$0xff] %v6653_v3  ;;  %v6655_v59 = vadd.f32 %v7397_v34, %v12007_v26  ;;  %6681 = vst [vmem:[%s12024_s19 + $0x40] sm:$0xff] %v6617_v41  ;;  %v6619_v50 = vadd.f32 %v7361_v45, %v12007_v26 }
 0x4f2   : > { %6718 = vst [vmem:[%s12024_s19 + $0x168] sm:$0xff] %v6654_v46  ;;  %v6656_v6 = vadd.f32 %v7398_v12, %v12011_v51  ;;  %6682 = vst [vmem:[%s12024_s19 + $0x48] sm:$0xff] %v6618_v39  ;;  %v6620_v35 = vadd.f32 %v7362_v54, %v12011_v51 }
 0x4f3   : > { %6719 = vst [vmem:[%s12024_s19 + $0x170] sm:$0xff] %v6655_v59  ;;  %6683 = vst [vmem:[%s12024_s19 + $0x50] sm:$0xff] %v6619_v50 }
 0x4f4   : > { %6720 = vst [vmem:[%s12024_s19 + $0x178] sm:$0xff] %v6656_v6  ;;  %v6494_v44 = vpop.f32.mrb[28].mxu1  ;;  %6684 = vst [vmem:[%s12024_s19 + $0x58] sm:$0xff] %v6620_v35  ;;  %v4024_v53 = vpop.f32.mrb[44].mxu0 }
 0x4f5   : > { %v7399_v49 = vadd.f32 %v6494_v44, %v12013_v60  ;;  %v6496_v18 = vpop.f32.mrb[29].mxu1  ;;  %v7363_v14 = vadd.f32 %v11969_v33, %v4024_v53  ;;  %v4026_v0 = vpop.f32.mrb[45].mxu0 }
 0x4f6   : > { %v7400_v62 = vadd.f32 %v6496_v18, %v12015_v58  ;;  %v6498_v4 = vpop.f32.mrb[30].mxu1  ;;  %v7364_v8 = vadd.f32 %v11973_v9, %v4026_v0  ;;  %v4028_v15 = vpop.f32.mrb[46].mxu0 }
 0x4f7   : > { %v6657_v10 = vadd.f32 %v7399_v49, %v12007_v26  ;;  %v7401_v13 = vadd.f32 %v6498_v4, %v12017_v27  ;;  %v6500_v2 = vpop.f32.mrb[31].mxu1  ;;  %v6621_v60 = vadd.f32 %v7363_v14, %v12007_v26  ;;  %v7365_v33 = vadd.f32 %v11977_v16, %v4028_v15  ;;  %v4030_v58 = vpop.f32.mrb[47].mxu0 }
 0x4f8   : > { %v6658_v19 = vadd.f32 %v7400_v62, %v12011_v51  ;;  %v7402_v9 = vadd.f32 %v6500_v2, %v12020_v42  ;;  %v6622_v5 = vadd.f32 %v7364_v8, %v12011_v51  ;;  %v7366_v56 = vadd.f32 %v11981_v57, %v4030_v58 }
 0x4f9   : > { %6721 = vst [vmem:[%s12024_s19 + $0x180] sm:$0xff] %v6657_v10  ;;  %v6659_v27 = vadd.f32 %v7401_v13, %v12007_v26  ;;  %6685 = vst [vmem:[%s12024_s19 + $0x60] sm:$0xff] %v6621_v60  ;;  %v6623_v11 = vadd.f32 %v7365_v33, %v12007_v26  ;;  %v13120_v10 = vld [vmem:[#allocation15_spill] sm:$0xff] }
 0x4fa   : > { %6722 = vst [vmem:[%s12024_s19 + $0x188] sm:$0xff] %v6658_v19  ;;  %v6660_v16 = vadd.f32 %v7402_v9, %v12011_v51  ;;  %6686 = vst [vmem:[%s12024_s19 + $0x68] sm:$0xff] %v6622_v5  ;;  %v6624_v32 = vadd.f32 %v7366_v56, %v12011_v51 }
 0x4fb   : > { %6723 = vst [vmem:[%s12024_s19 + $0x190] sm:$0xff] %v6659_v27  ;;  %6687 = vst [vmem:[%s12024_s19 + $0x70] sm:$0xff] %v6623_v11 }
 0x4fc   : > { %6724 = vst [vmem:[%s12024_s19 + $0x198] sm:$0xff] %v6660_v16  ;;  %v6504_v42 = vpop.f32.mrb[32].mxu1  ;;  %6688 = vst [vmem:[%s12024_s19 + $0x78] sm:$0xff] %v6624_v32  ;;  %v4034_v29 = vpop.f32.mrb[48].mxu0 }
 0x4fd   : > { %v7403_v57 = vadd.f32 %v6504_v42, %v12032_v40  ;;  %v6506_v7 = vpop.f32.mrb[33].mxu1  ;;  %v7367_v1 = vadd.f32 %v11985_v38, %v4034_v29  ;;  %v4036_v52 = vpop.f32.mrb[49].mxu0 }
 0x4fe   : > { %v7404_v28 = vadd.f32 %v6506_v7, %v12035_v61  ;;  %v6508_v55 = vpop.f32.mrb[34].mxu1  ;;  %v7368_v36 = vadd.f32 %v11989_v23, %v4036_v52  ;;  %v4038_v3 = vpop.f32.mrb[50].mxu0 }
 0x4ff   : > { %v6661_v34 = vadd.f32 %v7403_v57, %v12007_v26  ;;  %v7405_v25 = vadd.f32 %v6508_v55, %v12038_v30  ;;  %v6510_v41 = vpop.f32.mrb[35].mxu1  ;;  %v6625_v40 = vadd.f32 %v7367_v1, %v12007_v26  ;;  %v7369_v38 = vadd.f32 %v11993_v24, %v4038_v3  ;;  %v4040_v61 = vpop.f32.mrb[51].mxu0 }
 0x500   : > { %v6662_v45 = vadd.f32 %v7404_v28, %v12011_v51  ;;  %v7406_v23 = vadd.f32 %v6510_v41, %v12042_v20  ;;  %v6626_v31 = vadd.f32 %v7368_v36, %v12011_v51  ;;  %v7370_v46 = vadd.f32 %v11998_v63, %v4040_v61 }
 0x501   : > { %6725 = vst [vmem:[%s12024_s19 + $0x1a0] sm:$0xff] %v6661_v34  ;;  %v6663_v30 = vadd.f32 %v7405_v25, %v12007_v26  ;;  %6689 = vst [vmem:[%s12024_s19 + $0x80] sm:$0xff] %v6625_v40  ;;  %v6627_v12 = vadd.f32 %v7369_v38, %v12007_v26 }
 0x502   : > { %6726 = vst [vmem:[%s12024_s19 + $0x1a8] sm:$0xff] %v6662_v45  ;;  %v6664_v24 = vadd.f32 %v7406_v23, %v12011_v51  ;;  %6690 = vst [vmem:[%s12024_s19 + $0x88] sm:$0xff] %v6626_v31  ;;  %v6628_v39 = vadd.f32 %v7370_v46, %v12011_v51 }
 0x503   : > { %6727 = vst [vmem:[%s12024_s19 + $0x1b0] sm:$0xff] %v6663_v30  ;;  %6691 = vst [vmem:[%s12024_s19 + $0x90] sm:$0xff] %v6627_v12 }
 0x504   : > { %6728 = vst [vmem:[%s12024_s19 + $0x1b8] sm:$0xff] %v6664_v24  ;;  %v6514_v20 = vpop.f32.mrb[36].mxu1  ;;  %6692 = vst [vmem:[%s12024_s19 + $0x98] sm:$0xff] %v6628_v39 }
 0x505   : > { %v7407_v63 = vadd.f32 %v6514_v20, %v12052_v48  ;;  %v6516_v54 = vpop.f32.mrb[37].mxu1 }
 0x506   : > { %v7408_v59 = vadd.f32 %v6516_v54, %v12055_v47  ;;  %v6518_v50 = vpop.f32.mrb[38].mxu1 }
 0x507   : > { %v6665_v6 = vadd.f32 %v7407_v63, %v12007_v26  ;;  %v7409_v35 = vadd.f32 %v6518_v50, %v12058_v17  ;;  %v6520_v44 = vpop.f32.mrb[39].mxu1 }
 0x508   : > { %v6666_v53 = vadd.f32 %v7408_v59, %v12011_v51  ;;  %v7410_v49 = vadd.f32 %v6520_v44, %v12062_v37 }
 0x509   : > { %6729 = vst [vmem:[%s12024_s19 + $0x1c0] sm:$0xff] %v6665_v6  ;;  %v6667_v18 = vadd.f32 %v7409_v35, %v12007_v26 }
 0x50a   : > { %6730 = vst [vmem:[%s12024_s19 + $0x1c8] sm:$0xff] %v6666_v53  ;;  %v6668_v48 = vadd.f32 %v7410_v49, %v12011_v51 }
 0x50b   : > { %6731 = vst [vmem:[%s12024_s19 + $0x1d0] sm:$0xff] %v6667_v18 }
 0x50c   : > { %6732 = vst [vmem:[%s12024_s19 + $0x1d8] sm:$0xff] %v6668_v48  ;;  %v6524_v47 = vpop.f32.mrb[40].mxu1 }
 0x50d   : > { %v7411_v14 = vadd.f32 %v6524_v47, %v12072_v22  ;;  %v6526_v17 = vpop.f32.mrb[41].mxu1 }
 0x50e   : > { %v7412_v0 = vadd.f32 %v6526_v17, %v12075_v21  ;;  %v6528_v62 = vpop.f32.mrb[42].mxu1 }
 0x50f   : > { %v6669_v37 = vadd.f32 %v7411_v14, %v12007_v26  ;;  %v7413_v4 = vadd.f32 %v6528_v62, %v12078_v43  ;;  %v6530_v8 = vpop.f32.mrb[43].mxu1 }
 0x510   : > { %v6670_v15 = vadd.f32 %v7412_v0, %v12011_v51  ;;  %v7414_v13 = vadd.f32 %v6530_v8, %v13120_v10 }
 0x511   : > { %6733 = vst [vmem:[%s12024_s19 + $0x1e0] sm:$0xff] %v6669_v37  ;;  %v6671_v22 = vadd.f32 %v7413_v4, %v12007_v26 }
 0x512   : > { %6734 = vst [vmem:[%s12024_s19 + $0x1e8] sm:$0xff] %v6670_v15  ;;  %v6672_v21 = vadd.f32 %v7414_v13, %v12011_v51 }
 0x513   : > { %6735 = vst [vmem:[%s12024_s19 + $0x1f0] sm:$0xff] %v6671_v22 }
 0x514   : > { %6736 = vst [vmem:[%s12024_s19 + $0x1f8] sm:$0xff] %v6672_v21 }
 0x515   : > { %8323 = shalt.err (!%p8320_p7)
}
 0x516   : > { %s8324_s13 = scalar_lea.hbm %s12237_s29, 8192  ;;  %s8328_s17 = scalar_lea.hbm %s12294_s6, 16384 }
 0x517   : > { %p8325_p8 = scmp.ne.s32.totalorder %s12237_s29, %s8324_s13  ;;  %p8329_p1 = scmp.lt.u32.totalorder %s12237_s29, %s12294_s6 }
 0x518   : > { %p8330_p0 = scmp.lt.u32.totalorder %s8328_s17, %s8324_s13  ;;  %p8332_p6 = scmp.lt.u32.totalorder %s8324_s13, %s12237_s29 }
 0x519   : > { %p8326_p11 = pnand %p8325_p8, %p13121_p9 }
 0x51a   : > { %p8331_p5 = por %p8330_p0, %p8329_p1 }
 0x51b   : > { %p8327_p13 = pneg %p8326_p11 }
 0x51c   : > { %p8333_p10 = por %p8332_p6, %p8331_p5 }
 0x51e   : > { %p8334_p12 = pnand %p8333_p10, %p8327_p13 }
 0x520   : > { %8337 = shalt.err (!%p8334_p12)
}
 0x521   : > { %s8384_s20 = smov 256   ;;  %s8385_s28 = smov 16  }
 0x522   : > { %7867 = dma.vmem_to_hbm [thread:$0]  (%p13121_p9), %s12239_s26, 8192, %s12237_s29, %s12247_s25, %s8384_s20, %s8384_s20, %s8385_s28  }
 0x523 PF: > { %p7879_p2 = scmp.ge.s32.totalorder %s8376_s24, 2  ;;  %s6766_s14 = sand.u32 1, %s8364_s21  }
 0x524   : > { %p13122_p3 = scmp.ne.s32.totalorder %s12471_s8, 0  ;;  %s6767_s10 = scalar_lea.sflag [#allocation4], %s6766_s14 }
 0x526   : > { %p7874_p4 = pnand %p7879_p2, %p13122_p3 }
 0x528   : > { %8359 = dma.done.wait (!%p7874_p4), %s6767_s10, 8192  }
 0x529   : > { %8361 = vsyncadd (!%p7874_p4), %s6767_s10, 4294959104  ;;  %p17_p7 = scmp.ge.s32.totalorder %s8446_s27, 4   ;;  %s13123_s21 = smov %s8368_s22 }
 0x52a   : > { %s13124_s22 = smov %s8372_s23  ;;  %s13125_s23 = smov %s8457_s30 }
 0x52b   : > { %s13126_s24 = smov %s8446_s27  ;;  %19 = sbr.rel (!%p17_p7) target bundleno = 4 (0x4), region = 99 }
 0x532   :  { %6772 = vsyncpa [#allocation3], 1 }
 0x533   :  { %6774 = vsyncpa [#allocation3 + $0x1], 1 }
 0x534   :  { %6775 = vsyncpa [#allocation4], 1 }
 0x535   :  { %6777 = vsyncpa [#allocation4 + $0x1], 1 }

</bundles_post_ra>
